<compile_context>
chip_gen: v6e
topology: v6e:2x2x1
jax: 0.10.0
libtpu: 0.0.40
codegen_flags: <defaults>
</compile_context>

<pallas_src>
import jax
import jax.numpy as jnp
from jax.experimental import pallas as pl
from jax.experimental.pallas import tpu as pltpu

LEAK = 0.01      # torch.nn.LeakyReLU default negative_slope
BN_EPS = 1e-5    # torch BatchNorm default eps

# Geometry implied by linear1's 3*46*32 input features.
H_IN, W_IN = 5, 384                 # conv1 input (after NCHW channel squeeze)
W_P1 = W_IN // 2                    # 192 after pool1
H_C2, W_C2 = H_IN - 2, W_P1 - 2     # 3, 190 after conv2 (3x3, no pad)
W_P2 = W_C2 // 2                    # 95 after pool2
W_C3 = W_P2 - 2                     # 93 after conv3 (1x3)
W_P3 = W_C3 // 2                    # 46 after pool3
C1, C2, C3 = 16, 16, 32
FLAT = C3 * H_C2 * W_P3             # 4416
D1, D2, D3 = 64, 128, 88            # MLP widths


# ----------------------------------------------------------------------------
# Fused kernel: conv1->leaky->bn->pool -> conv2->leaky->bn->pool
#               -> conv3(+bn)->leaky->pool -> flatten
#               -> lin1(+bn)->leaky -> lin2(+bn)->leaky -> lin3 -> sigmoid
# (one grid step per sample; everything stays in VMEM / registers)
# ----------------------------------------------------------------------------
def _longnet_kernel(x_ref, w1_ref, cvec_ref, w2_ref, w3_ref, c3_ref,
                    sel1_ref, sel2_ref, sel3_ref,
                    lw1_ref, lw2_ref, lw3_ref, lbias_ref,
                    o_ref, feat_ref):
    def leaky(z):
        return jnp.where(z > 0, z, LEAK * z)

    def pool_w(y, sel):
        # MaxPool2d((1, 2)) over lanes: pairwise max via one shifted slice,
        # then ONE exact 0/1 selection matmul (kept in f32 -> bit-exact).
        m = jnp.maximum(y[:, :-1], y[:, 1:])
        return jnp.dot(m, sel, preferred_element_type=jnp.float32)

    cvec = cvec_ref[...]                                  # (16, 6) packed
    b1, s1, t1 = cvec[:, 0:1], cvec[:, 1:2], cvec[:, 2:3]
    b2, s2, t2 = cvec[:, 3:4], cvec[:, 4:5], cvec[:, 5:6]
    w1 = w1_ref[...]                                      # (16, 9), K = (ki, kj)

    # ---- conv1 (3x3, pad=1, Cin=1) as shifted VPU FMAs; padding handled by
    # statically guarded taps; column shifts built once per input row. -------
    xin = x_ref[0, 0]                                     # (5, 384)
    zero_col = jnp.zeros((1, 1), jnp.float32)
    accs = [None] * H_IN
    for r in range(H_IN):
        x0 = xin[r:r + 1, :]                                          # x[r, w]
        xm = jnp.concatenate([zero_col, x0[:, :W_IN - 1]], axis=1)    # x[r, w-1]
        xp = jnp.concatenate([x0[:, 1:], zero_col], axis=1)           # x[r, w+1]
        for ki in range(3):
            h = r - ki + 1
            if 0 <= h < H_IN:
                contrib = (w1[:, 3 * ki + 0:3 * ki + 1] * xm
                           + w1[:, 3 * ki + 1:3 * ki + 2] * x0
                           + w1[:, 3 * ki + 2:3 * ki + 3] * xp)
                accs[h] = contrib if accs[h] is None else accs[h] + contrib
    # bias -> LeakyReLU -> BN1; all 5 rows stacked, one pooled matmul.
    y1 = jnp.concatenate([leaky(a + b1) * s1 + t1 for a in accs], axis=0)  # (80, 384)
    p1 = pool_w(y1, sel1_ref[...])                                         # (80, 192)

    # ---- conv2 (3x3, no pad): hoisted lane-shifted slices + im2col matmul --
    w2 = w2_ref[...]                                      # (16, 144), K = (ki, kj, ci)
    p1_sl = [[p1[C1 * r:C1 * (r + 1), j:j + W_C2] for j in range(3)]
             for r in range(H_IN)]                        # 15 unique (16, 190) slices
    rows2 = []
    for h in range(H_C2):
        xcat = jnp.concatenate(
            [p1_sl[h + ki][kj] for ki in range(3) for kj in range(3)],
            axis=0)                                       # (144, 190)
        z = jnp.dot(w2, xcat, preferred_element_type=jnp.float32) + b2
        rows2.append(leaky(z) * s2 + t2)                  # bias -> LeakyReLU -> BN2
    y2 = jnp.concatenate(rows2, axis=0)                   # (48, 190)
    p2 = pool_w(y2, sel2_ref[...])                        # (48, 95)

    # ---- conv3 (1x3): conv bias + BN3 folded into w3/c3 (bn-then-act) ------
    w3 = w3_ref[...]                                      # (32, 48)
    c3 = c3_ref[...]                                      # (32, 1)
    rows3 = []
    for h in range(H_C2):
        row = p2[C2 * h:C2 * (h + 1), :]                  # (16, 95)
        xcat = jnp.concatenate([row[:, j:j + W_C3] for j in range(3)], axis=0)  # (48, 93)
        z = jnp.dot(w3, xcat, preferred_element_type=jnp.float32) + c3
        rows3.append(leaky(z))
    y3 = jnp.concatenate(rows3, axis=0)                   # (96, 93)
    p3 = pool_w(y3, sel3_ref[...])                        # (96, 46)

    # ---- flatten (torch NCHW order c*138 + h*46 + w) into VMEM scratch -----
    for h in range(H_C2):
        feat_ref[:, h * W_P3:(h + 1) * W_P3] = p3[C3 * h:C3 * (h + 1), :]

    # ---- MLP head: lin1(+bn)->leaky -> lin2(+bn)->leaky -> lin3 -> sigmoid.
    # lin1 is contracted per conv3 channel against the (32, 138, 64) weight
    # (no sublane->lane flatten relayout); bf16 MXU operands, f32 accumulate.
    lb = lbias_ref[...]                                   # (1, 280) = [lc1 | lc2 | lb3]
    h1 = lb[:, 0:D1]                                      # (1, 64) f32
    for c in range(C3):
        h1 = h1 + jnp.dot(feat_ref[c:c + 1, :].astype(jnp.bfloat16),
                          lw1_ref[c], preferred_element_type=jnp.float32)
    h1 = leaky(h1).astype(jnp.bfloat16)                   # (1, 64)
    h2 = jnp.dot(h1, lw2_ref[...],
                 preferred_element_type=jnp.float32) + lb[:, D1:D1 + D2]
    h2 = leaky(h2).astype(jnp.bfloat16)                   # (1, 128)
    z3 = jnp.dot(h2, lw3_ref[...],
                 preferred_element_type=jnp.float32) + lb[:, D1 + D2:]
    o_ref[0] = jax.nn.sigmoid(z3)                         # (1, 88)


# ----------------------------------------------------------------------------
# Parameters (deterministic synthetic init — shapes from longNet.__init__)
# ----------------------------------------------------------------------------
def init_params(key):
    ks = jax.random.split(key, 40)
    it = iter(ks)

    def nrm(shape, s=0.1):
        return jax.random.normal(next(it), shape, jnp.float32) * s

    def bn(c):
        g = jax.random.uniform(next(it), (c,), jnp.float32, 0.8, 1.2)
        b = nrm((c,), 0.05)
        m = nrm((c,), 0.05)
        v = jax.random.uniform(next(it), (c,), jnp.float32, 0.5, 1.5)
        return (g, b, m, v)

    p = {}
    p["conv1_w"] = nrm((16, 1, 3, 3));   p["conv1_b"] = nrm((16,), 0.05)
    p["bn1"] = bn(16)
    p["conv2_w"] = nrm((16, 16, 3, 3));  p["conv2_b"] = nrm((16,), 0.05)
    p["bn2"] = bn(16)
    p["conv3_w"] = nrm((32, 16, 1, 3));  p["conv3_b"] = nrm((32,), 0.05)
    p["bn3"] = bn(32)
    p["lin1_w"] = nrm((FLAT, D1), 0.02); p["lin1_b"] = nrm((D1,), 0.05)
    p["bn_l1"] = bn(D1)
    p["lin2_w"] = nrm((D1, D2));         p["lin2_b"] = nrm((D2,), 0.05)
    p["bn_l2"] = bn(D2)
    p["lin3_w"] = nrm((D2, D3));         p["lin3_b"] = nrm((D3,), 0.05)
    return p


def prepare_params(p):
    """One-time (outside the hot path) weight re-layout + eval-mode BN folding
    + host construction of the pooling selection matrices."""
    def conv_mat(w):
        # torch (Cout, Cin, kh, kw) -> (Cout, kh*kw*Cin), K ordered (ki, kj, ci)
        co, ci, kh, kw = w.shape
        return jnp.transpose(w, (0, 2, 3, 1)).reshape(co, kh * kw * ci)

    def fold_bn(g, b, m, v):
        s = g / jnp.sqrt(v + BN_EPS)
        return s, b - m * s

    def sel_mat(w_in):
        # (w_in-1, w_in//2) 0/1 matrix: picks even columns of the pairwise max.
        w_out = w_in // 2
        r = jnp.arange(w_in - 1)[:, None]
        c = jnp.arange(w_out)[None, :]
        return (r == 2 * c).astype(jnp.float32)

    col = lambda v: v.reshape(-1, 1).astype(jnp.float32)

    s1, t1 = fold_bn(*p["bn1"])
    s2, t2 = fold_bn(*p["bn2"])
    s3, t3 = fold_bn(*p["bn3"])
    sl1, tl1 = fold_bn(*p["bn_l1"])
    sl2, tl2 = fold_bn(*p["bn_l2"])

    q = {}
    # conv1 / conv2: act-then-bn -> keep (bias, scale, shift), packed (16, 6).
    q["w1"] = conv_mat(p["conv1_w"])                      # (16, 9)
    q["cvec"] = jnp.stack(
        [p["conv1_b"], s1, t1, p["conv2_b"], s2, t2], axis=1).astype(jnp.float32)
    q["w2"] = conv_mat(p["conv2_w"])                      # (16, 144)
    # conv3: bn-then-act -> fold conv bias + BN into weight/shift.
    q["w3"] = conv_mat(p["conv3_w"]) * col(s3)            # (32, 48)
    q["c3"] = col(p["conv3_b"] * s3 + t3)                 # (32, 1)
    # Host-precomputed pooling selection matrices.
    q["sel1"] = sel_mat(W_IN)                             # (383, 192)
    q["sel2"] = sel_mat(W_C2)                             # (189, 95)
    q["sel3"] = sel_mat(W_C3)                             # (92, 46)
    # linears: bn-then-act -> fold BN into (bf16) weights; biases packed f32.
    q["lw1"] = (p["lin1_w"] * sl1[None, :]).astype(jnp.bfloat16).reshape(
        C3, H_C2 * W_P3, D1)                              # (32, 138, 64)
    q["lw2"] = (p["lin2_w"] * sl2[None, :]).astype(jnp.bfloat16)   # (64, 128)
    q["lw3"] = p["lin3_w"].astype(jnp.bfloat16)                    # (128, 88)
    q["lbias"] = jnp.concatenate(
        [p["lin1_b"] * sl1 + tl1, p["lin2_b"] * sl2 + tl2, p["lin3_b"]]
    ).reshape(1, D1 + D2 + D3).astype(jnp.float32)        # (1, 280)
    return q


# ----------------------------------------------------------------------------
# Forward pass (mirrors longNet.forward, eval mode: dropout = identity)
# ----------------------------------------------------------------------------
def longnet_forward(q, x_nchw):
    N = x_nchw.shape[0]
    x = x_nchw.astype(jnp.float32)                        # (N, 1, 5, 384)

    flops_per_sample = 2 * (
        C1 * 9 * H_IN * W_IN                  # conv1 taps
        + C2 * (9 * C1) * H_C2 * W_C2         # conv2
        + C3 * (3 * C2) * H_C2 * W_C3         # conv3
        + (H_IN * C1) * (W_IN - 1) * W_P1     # pool1 selection matmul
        + (H_C2 * C2) * (W_C2 - 1) * W_P2     # pool2
        + (H_C2 * C3) * (W_C3 - 1) * W_P3     # pool3
        + FLAT * D1 + D1 * D2 + D2 * D3)      # MLP
    weight_bytes = sum(int(v.size) * v.dtype.itemsize for v in q.values())
    cost = pl.CostEstimate(
        flops=N * flops_per_sample,
        transcendentals=N * D3,
        bytes_accessed=weight_bytes + N * (H_IN * W_IN + D3) * 4)

    out = pl.pallas_call(
        _longnet_kernel,
        out_shape=jax.ShapeDtypeStruct((N, 1, D3), jnp.float32),
        grid=(N,),
        in_specs=[
            pl.BlockSpec((1, 1, H_IN, W_IN), lambda n: (n, 0, 0, 0)),  # x
            pl.BlockSpec((C1, 9), lambda n: (0, 0)),                   # w1
            pl.BlockSpec((C1, 6), lambda n: (0, 0)),                   # cvec
            pl.BlockSpec((C2, 9 * C1), lambda n: (0, 0)),              # w2
            pl.BlockSpec((C3, 3 * C2), lambda n: (0, 0)),              # w3
            pl.BlockSpec((C3, 1), lambda n: (0, 0)),                   # c3
            pl.BlockSpec((W_IN - 1, W_P1), lambda n: (0, 0)),          # sel1
            pl.BlockSpec((W_C2 - 1, W_P2), lambda n: (0, 0)),          # sel2
            pl.BlockSpec((W_C3 - 1, W_P3), lambda n: (0, 0)),          # sel3
            pl.BlockSpec((C3, H_C2 * W_P3, D1), lambda n: (0, 0, 0)),  # lw1
            pl.BlockSpec((D1, D2), lambda n: (0, 0)),                  # lw2
            pl.BlockSpec((D2, D3), lambda n: (0, 0)),                  # lw3
            pl.BlockSpec((1, D1 + D2 + D3), lambda n: (0, 0)),         # lbias
        ],
        out_specs=pl.BlockSpec((1, 1, D3), lambda n: (n, 0, 0)),
        scratch_shapes=[pltpu.VMEM((C3, H_C2 * W_P3), jnp.float32)],
        compiler_params=pltpu.CompilerParams(
            dimension_semantics=("parallel",)),           # batch across TCs (v7x)
        cost_estimate=cost,
    )(x, q["w1"], q["cvec"], q["w2"], q["w3"], q["c3"],
      q["sel1"], q["sel2"], q["sel3"],
      q["lw1"], q["lw2"], q["lw3"], q["lbias"])
    return out.reshape(N, D3)


if __name__ == "__main__":
    key = jax.random.PRNGKey(0)
    pkey, xkey = jax.random.split(key)
    params = init_params(pkey)
    prepared = prepare_params(params)          # weight re-layout outside jit
    # (N, C=1, H=5, W=384): the only spatial size consistent with linear1's
    # 3*46*32 input features.  Batch kept small.
    x = jax.random.normal(xkey, (2, 1, H_IN, W_IN), jnp.float32)
    fwd = jax.jit(longnet_forward)
    out = jax.block_until_ready(fwd(prepared, x))
    assert out.shape == (2, 88)
    assert bool(jnp.all(jnp.isfinite(out)))
    assert bool(jnp.all((out >= 0.0) & (out <= 1.0)))
    print("KERNEL_OK")
</pallas_src>

<mosaic_0001>
module attributes {stable_mosaic.version = 11 : i64} {
  func.func @_longnet_kernel(%arg0: i32, %arg1: memref<1x1x5x384xf32, #tpu.memory_space<vmem>>, %arg2: memref<16x9xf32, #tpu.memory_space<vmem>>, %arg3: memref<16x6xf32, #tpu.memory_space<vmem>>, %arg4: memref<16x144xf32, #tpu.memory_space<vmem>>, %arg5: memref<32x48xf32, #tpu.memory_space<vmem>>, %arg6: memref<32x1xf32, #tpu.memory_space<vmem>>, %arg7: memref<383x192xf32, #tpu.memory_space<vmem>>, %arg8: memref<189x95xf32, #tpu.memory_space<vmem>>, %arg9: memref<92x46xf32, #tpu.memory_space<vmem>>, %arg10: memref<32x138x64xbf16, #tpu.memory_space<vmem>>, %arg11: memref<64x128xbf16, #tpu.memory_space<vmem>>, %arg12: memref<128x88xbf16, #tpu.memory_space<vmem>>, %arg13: memref<1x280xf32, #tpu.memory_space<vmem>>, %arg14: memref<1x1x88xf32, #tpu.memory_space<vmem>>, %arg15: memref<32x138xf32, #tpu.memory_space<vmem>>) attributes {dimension_semantics = [#tpu.dimension_semantics<parallel>], iteration_bounds = array<i64: 2>, scalar_prefetch = 0 : i64, scratch_operands = 1 : i64, tpu.core_type = #tpu.core_type<tc>, window_params = [{transform_indices = @transform_0, window_bounds = array<i64: 1, 1, 5, 384>}, {pipeline_mode = #tpu.pipeline_mode<synchronous>, transform_indices = @transform_1, window_bounds = array<i64: 16, 9>}, {pipeline_mode = #tpu.pipeline_mode<synchronous>, transform_indices = @transform_2, window_bounds = array<i64: 16, 6>}, {pipeline_mode = #tpu.pipeline_mode<synchronous>, transform_indices = @transform_3, window_bounds = array<i64: 16, 144>}, {pipeline_mode = #tpu.pipeline_mode<synchronous>, transform_indices = @transform_4, window_bounds = array<i64: 32, 48>}, {pipeline_mode = #tpu.pipeline_mode<synchronous>, transform_indices = @transform_5, window_bounds = array<i64: 32, 1>}, {pipeline_mode = #tpu.pipeline_mode<synchronous>, transform_indices = @transform_6, window_bounds = array<i64: 383, 192>}, {pipeline_mode = #tpu.pipeline_mode<synchronous>, transform_indices = @transform_7, window_bounds = array<i64: 189, 95>}, {pipeline_mode = #tpu.pipeline_mode<synchronous>, transform_indices = @transform_8, window_bounds = array<i64: 92, 46>}, {pipeline_mode = #tpu.pipeline_mode<synchronous>, transform_indices = @transform_9, window_bounds = array<i64: 32, 138, 64>}, {pipeline_mode = #tpu.pipeline_mode<synchronous>, transform_indices = @transform_10, window_bounds = array<i64: 64, 128>}, {pipeline_mode = #tpu.pipeline_mode<synchronous>, transform_indices = @transform_11, window_bounds = array<i64: 128, 88>}, {pipeline_mode = #tpu.pipeline_mode<synchronous>, transform_indices = @transform_12, window_bounds = array<i64: 1, 280>}, {transform_indices = @transform_13, window_bounds = array<i64: 1, 1, 88>}]} {
    %c0 = arith.constant 0 : index
    %c0_0 = arith.constant 0 : index
    %0 = vector.load %arg3[%c0, %c0_0] : memref<16x6xf32, #tpu.memory_space<vmem>>, vector<16x6xf32>
    %1 = vector.extract_strided_slice %0 {offsets = [0, 0], sizes = [16, 1], strides = [1, 1]} : vector<16x6xf32> to vector<16x1xf32>
    %2 = vector.extract_strided_slice %0 {offsets = [0, 1], sizes = [16, 1], strides = [1, 1]} : vector<16x6xf32> to vector<16x1xf32>
    %3 = vector.extract_strided_slice %0 {offsets = [0, 2], sizes = [16, 1], strides = [1, 1]} : vector<16x6xf32> to vector<16x1xf32>
    %4 = vector.extract_strided_slice %0 {offsets = [0, 3], sizes = [16, 1], strides = [1, 1]} : vector<16x6xf32> to vector<16x1xf32>
    %5 = vector.extract_strided_slice %0 {offsets = [0, 4], sizes = [16, 1], strides = [1, 1]} : vector<16x6xf32> to vector<16x1xf32>
    %6 = vector.extract_strided_slice %0 {offsets = [0, 5], sizes = [16, 1], strides = [1, 1]} : vector<16x6xf32> to vector<16x1xf32>
    %c0_1 = arith.constant 0 : index
    %c0_2 = arith.constant 0 : index
    %7 = vector.load %arg2[%c0_1, %c0_2] : memref<16x9xf32, #tpu.memory_space<vmem>>, vector<16x9xf32>
    %c0_3 = arith.constant 0 : index
    %c0_4 = arith.constant 0 : index
    %c0_5 = arith.constant 0 : index
    %c0_6 = arith.constant 0 : index
    %8 = vector.load %arg1[%c0_3, %c0_4, %c0_5, %c0_6] : memref<1x1x5x384xf32, #tpu.memory_space<vmem>>, vector<1x1x5x384xf32>
    %9 = vector.shape_cast %8 : vector<1x1x5x384xf32> to vector<5x384xf32>
    %cst = arith.constant 0.000000e+00 : f32
    %10 = vector.broadcast %cst : f32 to vector<1x1xf32>
    %11 = vector.extract_strided_slice %9 {offsets = [0, 0], sizes = [1, 384], strides = [1, 1]} : vector<5x384xf32> to vector<1x384xf32>
    %12 = vector.extract_strided_slice %11 {offsets = [0, 0], sizes = [1, 383], strides = [1, 1]} : vector<1x384xf32> to vector<1x383xf32>
    %13 = tpu.concatenate %10, %12 in 1 : vector<1x1xf32>, vector<1x383xf32> -> vector<1x384xf32>
    %14 = vector.extract_strided_slice %11 {offsets = [0, 1], sizes = [1, 383], strides = [1, 1]} : vector<1x384xf32> to vector<1x383xf32>
    %15 = tpu.concatenate %14, %10 in 1 : vector<1x383xf32>, vector<1x1xf32> -> vector<1x384xf32>
    %16 = vector.extract_strided_slice %7 {offsets = [0, 0], sizes = [16, 1], strides = [1, 1]} : vector<16x9xf32> to vector<16x1xf32>
    %17 = vector.broadcast %16 : vector<16x1xf32> to vector<16x384xf32>
    %18 = vector.broadcast %13 : vector<1x384xf32> to vector<16x384xf32>
    %19 = arith.mulf %17, %18 : vector<16x384xf32>
    %20 = vector.extract_strided_slice %7 {offsets = [0, 1], sizes = [16, 1], strides = [1, 1]} : vector<16x9xf32> to vector<16x1xf32>
    %21 = vector.broadcast %20 : vector<16x1xf32> to vector<16x384xf32>
    %22 = vector.broadcast %11 : vector<1x384xf32> to vector<16x384xf32>
    %23 = arith.mulf %21, %22 : vector<16x384xf32>
    %24 = arith.addf %19, %23 : vector<16x384xf32>
    %25 = vector.extract_strided_slice %7 {offsets = [0, 2], sizes = [16, 1], strides = [1, 1]} : vector<16x9xf32> to vector<16x1xf32>
    %26 = vector.broadcast %25 : vector<16x1xf32> to vector<16x384xf32>
    %27 = vector.broadcast %15 : vector<1x384xf32> to vector<16x384xf32>
    %28 = arith.mulf %26, %27 : vector<16x384xf32>
    %29 = arith.addf %24, %28 : vector<16x384xf32>
    %30 = vector.extract_strided_slice %7 {offsets = [0, 3], sizes = [16, 1], strides = [1, 1]} : vector<16x9xf32> to vector<16x1xf32>
    %31 = vector.broadcast %30 : vector<16x1xf32> to vector<16x384xf32>
    %32 = vector.broadcast %13 : vector<1x384xf32> to vector<16x384xf32>
    %33 = arith.mulf %31, %32 : vector<16x384xf32>
    %34 = vector.extract_strided_slice %7 {offsets = [0, 4], sizes = [16, 1], strides = [1, 1]} : vector<16x9xf32> to vector<16x1xf32>
    %35 = vector.broadcast %34 : vector<16x1xf32> to vector<16x384xf32>
    %36 = vector.broadcast %11 : vector<1x384xf32> to vector<16x384xf32>
    %37 = arith.mulf %35, %36 : vector<16x384xf32>
    %38 = arith.addf %33, %37 : vector<16x384xf32>
    %39 = vector.extract_strided_slice %7 {offsets = [0, 5], sizes = [16, 1], strides = [1, 1]} : vector<16x9xf32> to vector<16x1xf32>
    %40 = vector.broadcast %39 : vector<16x1xf32> to vector<16x384xf32>
    %41 = vector.broadcast %15 : vector<1x384xf32> to vector<16x384xf32>
    %42 = arith.mulf %40, %41 : vector<16x384xf32>
    %43 = arith.addf %38, %42 : vector<16x384xf32>
    %44 = vector.extract_strided_slice %9 {offsets = [1, 0], sizes = [1, 384], strides = [1, 1]} : vector<5x384xf32> to vector<1x384xf32>
    %45 = vector.extract_strided_slice %44 {offsets = [0, 0], sizes = [1, 383], strides = [1, 1]} : vector<1x384xf32> to vector<1x383xf32>
    %46 = tpu.concatenate %10, %45 in 1 : vector<1x1xf32>, vector<1x383xf32> -> vector<1x384xf32>
    %47 = vector.extract_strided_slice %44 {offsets = [0, 1], sizes = [1, 383], strides = [1, 1]} : vector<1x384xf32> to vector<1x383xf32>
    %48 = tpu.concatenate %47, %10 in 1 : vector<1x383xf32>, vector<1x1xf32> -> vector<1x384xf32>
    %49 = vector.extract_strided_slice %7 {offsets = [0, 0], sizes = [16, 1], strides = [1, 1]} : vector<16x9xf32> to vector<16x1xf32>
    %50 = vector.broadcast %49 : vector<16x1xf32> to vector<16x384xf32>
    %51 = vector.broadcast %46 : vector<1x384xf32> to vector<16x384xf32>
    %52 = arith.mulf %50, %51 : vector<16x384xf32>
    %53 = vector.extract_strided_slice %7 {offsets = [0, 1], sizes = [16, 1], strides = [1, 1]} : vector<16x9xf32> to vector<16x1xf32>
    %54 = vector.broadcast %53 : vector<16x1xf32> to vector<16x384xf32>
    %55 = vector.broadcast %44 : vector<1x384xf32> to vector<16x384xf32>
    %56 = arith.mulf %54, %55 : vector<16x384xf32>
    %57 = arith.addf %52, %56 : vector<16x384xf32>
    %58 = vector.extract_strided_slice %7 {offsets = [0, 2], sizes = [16, 1], strides = [1, 1]} : vector<16x9xf32> to vector<16x1xf32>
    %59 = vector.broadcast %58 : vector<16x1xf32> to vector<16x384xf32>
    %60 = vector.broadcast %48 : vector<1x384xf32> to vector<16x384xf32>
    %61 = arith.mulf %59, %60 : vector<16x384xf32>
    %62 = arith.addf %57, %61 : vector<16x384xf32>
    %63 = vector.extract_strided_slice %7 {offsets = [0, 3], sizes = [16, 1], strides = [1, 1]} : vector<16x9xf32> to vector<16x1xf32>
    %64 = vector.broadcast %63 : vector<16x1xf32> to vector<16x384xf32>
    %65 = vector.broadcast %46 : vector<1x384xf32> to vector<16x384xf32>
    %66 = arith.mulf %64, %65 : vector<16x384xf32>
    %67 = vector.extract_strided_slice %7 {offsets = [0, 4], sizes = [16, 1], strides = [1, 1]} : vector<16x9xf32> to vector<16x1xf32>
    %68 = vector.broadcast %67 : vector<16x1xf32> to vector<16x384xf32>
    %69 = vector.broadcast %44 : vector<1x384xf32> to vector<16x384xf32>
    %70 = arith.mulf %68, %69 : vector<16x384xf32>
    %71 = arith.addf %66, %70 : vector<16x384xf32>
    %72 = vector.extract_strided_slice %7 {offsets = [0, 5], sizes = [16, 1], strides = [1, 1]} : vector<16x9xf32> to vector<16x1xf32>
    %73 = vector.broadcast %72 : vector<16x1xf32> to vector<16x384xf32>
    %74 = vector.broadcast %48 : vector<1x384xf32> to vector<16x384xf32>
    %75 = arith.mulf %73, %74 : vector<16x384xf32>
    %76 = arith.addf %71, %75 : vector<16x384xf32>
    %77 = arith.addf %29, %76 : vector<16x384xf32>
    %78 = vector.extract_strided_slice %7 {offsets = [0, 6], sizes = [16, 1], strides = [1, 1]} : vector<16x9xf32> to vector<16x1xf32>
    %79 = vector.broadcast %78 : vector<16x1xf32> to vector<16x384xf32>
    %80 = vector.broadcast %46 : vector<1x384xf32> to vector<16x384xf32>
    %81 = arith.mulf %79, %80 : vector<16x384xf32>
    %82 = vector.extract_strided_slice %7 {offsets = [0, 7], sizes = [16, 1], strides = [1, 1]} : vector<16x9xf32> to vector<16x1xf32>
    %83 = vector.broadcast %82 : vector<16x1xf32> to vector<16x384xf32>
    %84 = vector.broadcast %44 : vector<1x384xf32> to vector<16x384xf32>
    %85 = arith.mulf %83, %84 : vector<16x384xf32>
    %86 = arith.addf %81, %85 : vector<16x384xf32>
    %87 = vector.extract_strided_slice %7 {offsets = [0, 8], sizes = [16, 1], strides = [1, 1]} : vector<16x9xf32> to vector<16x1xf32>
    %88 = vector.broadcast %87 : vector<16x1xf32> to vector<16x384xf32>
    %89 = vector.broadcast %48 : vector<1x384xf32> to vector<16x384xf32>
    %90 = arith.mulf %88, %89 : vector<16x384xf32>
    %91 = arith.addf %86, %90 : vector<16x384xf32>
    %92 = arith.addf %43, %91 : vector<16x384xf32>
    %93 = vector.extract_strided_slice %9 {offsets = [2, 0], sizes = [1, 384], strides = [1, 1]} : vector<5x384xf32> to vector<1x384xf32>
    %94 = vector.extract_strided_slice %93 {offsets = [0, 0], sizes = [1, 383], strides = [1, 1]} : vector<1x384xf32> to vector<1x383xf32>
    %95 = tpu.concatenate %10, %94 in 1 : vector<1x1xf32>, vector<1x383xf32> -> vector<1x384xf32>
    %96 = vector.extract_strided_slice %93 {offsets = [0, 1], sizes = [1, 383], strides = [1, 1]} : vector<1x384xf32> to vector<1x383xf32>
    %97 = tpu.concatenate %96, %10 in 1 : vector<1x383xf32>, vector<1x1xf32> -> vector<1x384xf32>
    %98 = vector.extract_strided_slice %7 {offsets = [0, 0], sizes = [16, 1], strides = [1, 1]} : vector<16x9xf32> to vector<16x1xf32>
    %99 = vector.broadcast %98 : vector<16x1xf32> to vector<16x384xf32>
    %100 = vector.broadcast %95 : vector<1x384xf32> to vector<16x384xf32>
    %101 = arith.mulf %99, %100 : vector<16x384xf32>
    %102 = vector.extract_strided_slice %7 {offsets = [0, 1], sizes = [16, 1], strides = [1, 1]} : vector<16x9xf32> to vector<16x1xf32>
    %103 = vector.broadcast %102 : vector<16x1xf32> to vector<16x384xf32>
    %104 = vector.broadcast %93 : vector<1x384xf32> to vector<16x384xf32>
    %105 = arith.mulf %103, %104 : vector<16x384xf32>
    %106 = arith.addf %101, %105 : vector<16x384xf32>
    %107 = vector.extract_strided_slice %7 {offsets = [0, 2], sizes = [16, 1], strides = [1, 1]} : vector<16x9xf32> to vector<16x1xf32>
    %108 = vector.broadcast %107 : vector<16x1xf32> to vector<16x384xf32>
    %109 = vector.broadcast %97 : vector<1x384xf32> to vector<16x384xf32>
    %110 = arith.mulf %108, %109 : vector<16x384xf32>
    %111 = arith.addf %106, %110 : vector<16x384xf32>
    %112 = vector.extract_strided_slice %7 {offsets = [0, 3], sizes = [16, 1], strides = [1, 1]} : vector<16x9xf32> to vector<16x1xf32>
    %113 = vector.broadcast %112 : vector<16x1xf32> to vector<16x384xf32>
    %114 = vector.broadcast %95 : vector<1x384xf32> to vector<16x384xf32>
    %115 = arith.mulf %113, %114 : vector<16x384xf32>
    %116 = vector.extract_strided_slice %7 {offsets = [0, 4], sizes = [16, 1], strides = [1, 1]} : vector<16x9xf32> to vector<16x1xf32>
    %117 = vector.broadcast %116 : vector<16x1xf32> to vector<16x384xf32>
    %118 = vector.broadcast %93 : vector<1x384xf32> to vector<16x384xf32>
    %119 = arith.mulf %117, %118 : vector<16x384xf32>
    %120 = arith.addf %115, %119 : vector<16x384xf32>
    %121 = vector.extract_strided_slice %7 {offsets = [0, 5], sizes = [16, 1], strides = [1, 1]} : vector<16x9xf32> to vector<16x1xf32>
    %122 = vector.broadcast %121 : vector<16x1xf32> to vector<16x384xf32>
    %123 = vector.broadcast %97 : vector<1x384xf32> to vector<16x384xf32>
    %124 = arith.mulf %122, %123 : vector<16x384xf32>
    %125 = arith.addf %120, %124 : vector<16x384xf32>
    %126 = arith.addf %62, %125 : vector<16x384xf32>
    %127 = vector.extract_strided_slice %7 {offsets = [0, 6], sizes = [16, 1], strides = [1, 1]} : vector<16x9xf32> to vector<16x1xf32>
    %128 = vector.broadcast %127 : vector<16x1xf32> to vector<16x384xf32>
    %129 = vector.broadcast %95 : vector<1x384xf32> to vector<16x384xf32>
    %130 = arith.mulf %128, %129 : vector<16x384xf32>
    %131 = vector.extract_strided_slice %7 {offsets = [0, 7], sizes = [16, 1], strides = [1, 1]} : vector<16x9xf32> to vector<16x1xf32>
    %132 = vector.broadcast %131 : vector<16x1xf32> to vector<16x384xf32>
    %133 = vector.broadcast %93 : vector<1x384xf32> to vector<16x384xf32>
    %134 = arith.mulf %132, %133 : vector<16x384xf32>
    %135 = arith.addf %130, %134 : vector<16x384xf32>
    %136 = vector.extract_strided_slice %7 {offsets = [0, 8], sizes = [16, 1], strides = [1, 1]} : vector<16x9xf32> to vector<16x1xf32>
    %137 = vector.broadcast %136 : vector<16x1xf32> to vector<16x384xf32>
    %138 = vector.broadcast %97 : vector<1x384xf32> to vector<16x384xf32>
    %139 = arith.mulf %137, %138 : vector<16x384xf32>
    %140 = arith.addf %135, %139 : vector<16x384xf32>
    %141 = arith.addf %77, %140 : vector<16x384xf32>
    %142 = vector.extract_strided_slice %9 {offsets = [3, 0], sizes = [1, 384], strides = [1, 1]} : vector<5x384xf32> to vector<1x384xf32>
    %143 = vector.extract_strided_slice %142 {offsets = [0, 0], sizes = [1, 383], strides = [1, 1]} : vector<1x384xf32> to vector<1x383xf32>
    %144 = tpu.concatenate %10, %143 in 1 : vector<1x1xf32>, vector<1x383xf32> -> vector<1x384xf32>
    %145 = vector.extract_strided_slice %142 {offsets = [0, 1], sizes = [1, 383], strides = [1, 1]} : vector<1x384xf32> to vector<1x383xf32>
    %146 = tpu.concatenate %145, %10 in 1 : vector<1x383xf32>, vector<1x1xf32> -> vector<1x384xf32>
    %147 = vector.extract_strided_slice %7 {offsets = [0, 0], sizes = [16, 1], strides = [1, 1]} : vector<16x9xf32> to vector<16x1xf32>
    %148 = vector.broadcast %147 : vector<16x1xf32> to vector<16x384xf32>
    %149 = vector.broadcast %144 : vector<1x384xf32> to vector<16x384xf32>
    %150 = arith.mulf %148, %149 : vector<16x384xf32>
    %151 = vector.extract_strided_slice %7 {offsets = [0, 1], sizes = [16, 1], strides = [1, 1]} : vector<16x9xf32> to vector<16x1xf32>
    %152 = vector.broadcast %151 : vector<16x1xf32> to vector<16x384xf32>
    %153 = vector.broadcast %142 : vector<1x384xf32> to vector<16x384xf32>
    %154 = arith.mulf %152, %153 : vector<16x384xf32>
    %155 = arith.addf %150, %154 : vector<16x384xf32>
    %156 = vector.extract_strided_slice %7 {offsets = [0, 2], sizes = [16, 1], strides = [1, 1]} : vector<16x9xf32> to vector<16x1xf32>
    %157 = vector.broadcast %156 : vector<16x1xf32> to vector<16x384xf32>
    %158 = vector.broadcast %146 : vector<1x384xf32> to vector<16x384xf32>
    %159 = arith.mulf %157, %158 : vector<16x384xf32>
    %160 = arith.addf %155, %159 : vector<16x384xf32>
    %161 = vector.extract_strided_slice %7 {offsets = [0, 3], sizes = [16, 1], strides = [1, 1]} : vector<16x9xf32> to vector<16x1xf32>
    %162 = vector.broadcast %161 : vector<16x1xf32> to vector<16x384xf32>
    %163 = vector.broadcast %144 : vector<1x384xf32> to vector<16x384xf32>
    %164 = arith.mulf %162, %163 : vector<16x384xf32>
    %165 = vector.extract_strided_slice %7 {offsets = [0, 4], sizes = [16, 1], strides = [1, 1]} : vector<16x9xf32> to vector<16x1xf32>
    %166 = vector.broadcast %165 : vector<16x1xf32> to vector<16x384xf32>
    %167 = vector.broadcast %142 : vector<1x384xf32> to vector<16x384xf32>
    %168 = arith.mulf %166, %167 : vector<16x384xf32>
    %169 = arith.addf %164, %168 : vector<16x384xf32>
    %170 = vector.extract_strided_slice %7 {offsets = [0, 5], sizes = [16, 1], strides = [1, 1]} : vector<16x9xf32> to vector<16x1xf32>
    %171 = vector.broadcast %170 : vector<16x1xf32> to vector<16x384xf32>
    %172 = vector.broadcast %146 : vector<1x384xf32> to vector<16x384xf32>
    %173 = arith.mulf %171, %172 : vector<16x384xf32>
    %174 = arith.addf %169, %173 : vector<16x384xf32>
    %175 = arith.addf %111, %174 : vector<16x384xf32>
    %176 = vector.extract_strided_slice %7 {offsets = [0, 6], sizes = [16, 1], strides = [1, 1]} : vector<16x9xf32> to vector<16x1xf32>
    %177 = vector.broadcast %176 : vector<16x1xf32> to vector<16x384xf32>
    %178 = vector.broadcast %144 : vector<1x384xf32> to vector<16x384xf32>
    %179 = arith.mulf %177, %178 : vector<16x384xf32>
    %180 = vector.extract_strided_slice %7 {offsets = [0, 7], sizes = [16, 1], strides = [1, 1]} : vector<16x9xf32> to vector<16x1xf32>
    %181 = vector.broadcast %180 : vector<16x1xf32> to vector<16x384xf32>
    %182 = vector.broadcast %142 : vector<1x384xf32> to vector<16x384xf32>
    %183 = arith.mulf %181, %182 : vector<16x384xf32>
    %184 = arith.addf %179, %183 : vector<16x384xf32>
    %185 = vector.extract_strided_slice %7 {offsets = [0, 8], sizes = [16, 1], strides = [1, 1]} : vector<16x9xf32> to vector<16x1xf32>
    %186 = vector.broadcast %185 : vector<16x1xf32> to vector<16x384xf32>
    %187 = vector.broadcast %146 : vector<1x384xf32> to vector<16x384xf32>
    %188 = arith.mulf %186, %187 : vector<16x384xf32>
    %189 = arith.addf %184, %188 : vector<16x384xf32>
    %190 = arith.addf %126, %189 : vector<16x384xf32>
    %191 = vector.extract_strided_slice %9 {offsets = [4, 0], sizes = [1, 384], strides = [1, 1]} : vector<5x384xf32> to vector<1x384xf32>
    %192 = vector.extract_strided_slice %191 {offsets = [0, 0], sizes = [1, 383], strides = [1, 1]} : vector<1x384xf32> to vector<1x383xf32>
    %193 = tpu.concatenate %10, %192 in 1 : vector<1x1xf32>, vector<1x383xf32> -> vector<1x384xf32>
    %194 = vector.extract_strided_slice %191 {offsets = [0, 1], sizes = [1, 383], strides = [1, 1]} : vector<1x384xf32> to vector<1x383xf32>
    %195 = tpu.concatenate %194, %10 in 1 : vector<1x383xf32>, vector<1x1xf32> -> vector<1x384xf32>
    %196 = vector.extract_strided_slice %7 {offsets = [0, 3], sizes = [16, 1], strides = [1, 1]} : vector<16x9xf32> to vector<16x1xf32>
    %197 = vector.broadcast %196 : vector<16x1xf32> to vector<16x384xf32>
    %198 = vector.broadcast %193 : vector<1x384xf32> to vector<16x384xf32>
    %199 = arith.mulf %197, %198 : vector<16x384xf32>
    %200 = vector.extract_strided_slice %7 {offsets = [0, 4], sizes = [16, 1], strides = [1, 1]} : vector<16x9xf32> to vector<16x1xf32>
    %201 = vector.broadcast %200 : vector<16x1xf32> to vector<16x384xf32>
    %202 = vector.broadcast %191 : vector<1x384xf32> to vector<16x384xf32>
    %203 = arith.mulf %201, %202 : vector<16x384xf32>
    %204 = arith.addf %199, %203 : vector<16x384xf32>
    %205 = vector.extract_strided_slice %7 {offsets = [0, 5], sizes = [16, 1], strides = [1, 1]} : vector<16x9xf32> to vector<16x1xf32>
    %206 = vector.broadcast %205 : vector<16x1xf32> to vector<16x384xf32>
    %207 = vector.broadcast %195 : vector<1x384xf32> to vector<16x384xf32>
    %208 = arith.mulf %206, %207 : vector<16x384xf32>
    %209 = arith.addf %204, %208 : vector<16x384xf32>
    %210 = arith.addf %160, %209 : vector<16x384xf32>
    %211 = vector.extract_strided_slice %7 {offsets = [0, 6], sizes = [16, 1], strides = [1, 1]} : vector<16x9xf32> to vector<16x1xf32>
    %212 = vector.broadcast %211 : vector<16x1xf32> to vector<16x384xf32>
    %213 = vector.broadcast %193 : vector<1x384xf32> to vector<16x384xf32>
    %214 = arith.mulf %212, %213 : vector<16x384xf32>
    %215 = vector.extract_strided_slice %7 {offsets = [0, 7], sizes = [16, 1], strides = [1, 1]} : vector<16x9xf32> to vector<16x1xf32>
    %216 = vector.broadcast %215 : vector<16x1xf32> to vector<16x384xf32>
    %217 = vector.broadcast %191 : vector<1x384xf32> to vector<16x384xf32>
    %218 = arith.mulf %216, %217 : vector<16x384xf32>
    %219 = arith.addf %214, %218 : vector<16x384xf32>
    %220 = vector.extract_strided_slice %7 {offsets = [0, 8], sizes = [16, 1], strides = [1, 1]} : vector<16x9xf32> to vector<16x1xf32>
    %221 = vector.broadcast %220 : vector<16x1xf32> to vector<16x384xf32>
    %222 = vector.broadcast %195 : vector<1x384xf32> to vector<16x384xf32>
    %223 = arith.mulf %221, %222 : vector<16x384xf32>
    %224 = arith.addf %219, %223 : vector<16x384xf32>
    %225 = arith.addf %175, %224 : vector<16x384xf32>
    %226 = vector.broadcast %1 : vector<16x1xf32> to vector<16x384xf32>
    %227 = arith.addf %92, %226 : vector<16x384xf32>
    %cst_7 = arith.constant 0.000000e+00 : f32
    %228 = vector.broadcast %cst_7 : f32 to vector<16x384xf32>
    %229 = arith.cmpf ogt, %227, %228 : vector<16x384xf32>
    %cst_8 = arith.constant 0.00999999977 : f32
    %230 = vector.broadcast %cst_8 : f32 to vector<16x384xf32>
    %231 = arith.mulf %230, %227 : vector<16x384xf32>
    %232 = arith.select %229, %227, %231 : vector<16x384xi1>, vector<16x384xf32>
    %233 = vector.broadcast %2 : vector<16x1xf32> to vector<16x384xf32>
    %234 = arith.mulf %232, %233 : vector<16x384xf32>
    %235 = vector.broadcast %3 : vector<16x1xf32> to vector<16x384xf32>
    %236 = arith.addf %234, %235 : vector<16x384xf32>
    %237 = vector.broadcast %1 : vector<16x1xf32> to vector<16x384xf32>
    %238 = arith.addf %141, %237 : vector<16x384xf32>
    %cst_9 = arith.constant 0.000000e+00 : f32
    %239 = vector.broadcast %cst_9 : f32 to vector<16x384xf32>
    %240 = arith.cmpf ogt, %238, %239 : vector<16x384xf32>
    %cst_10 = arith.constant 0.00999999977 : f32
    %241 = vector.broadcast %cst_10 : f32 to vector<16x384xf32>
    %242 = arith.mulf %241, %238 : vector<16x384xf32>
    %243 = arith.select %240, %238, %242 : vector<16x384xi1>, vector<16x384xf32>
    %244 = vector.broadcast %2 : vector<16x1xf32> to vector<16x384xf32>
    %245 = arith.mulf %243, %244 : vector<16x384xf32>
    %246 = vector.broadcast %3 : vector<16x1xf32> to vector<16x384xf32>
    %247 = arith.addf %245, %246 : vector<16x384xf32>
    %248 = vector.broadcast %1 : vector<16x1xf32> to vector<16x384xf32>
    %249 = arith.addf %190, %248 : vector<16x384xf32>
    %cst_11 = arith.constant 0.000000e+00 : f32
    %250 = vector.broadcast %cst_11 : f32 to vector<16x384xf32>
    %251 = arith.cmpf ogt, %249, %250 : vector<16x384xf32>
    %cst_12 = arith.constant 0.00999999977 : f32
    %252 = vector.broadcast %cst_12 : f32 to vector<16x384xf32>
    %253 = arith.mulf %252, %249 : vector<16x384xf32>
    %254 = arith.select %251, %249, %253 : vector<16x384xi1>, vector<16x384xf32>
    %255 = vector.broadcast %2 : vector<16x1xf32> to vector<16x384xf32>
    %256 = arith.mulf %254, %255 : vector<16x384xf32>
    %257 = vector.broadcast %3 : vector<16x1xf32> to vector<16x384xf32>
    %258 = arith.addf %256, %257 : vector<16x384xf32>
    %259 = vector.broadcast %1 : vector<16x1xf32> to vector<16x384xf32>
    %260 = arith.addf %225, %259 : vector<16x384xf32>
    %cst_13 = arith.constant 0.000000e+00 : f32
    %261 = vector.broadcast %cst_13 : f32 to vector<16x384xf32>
    %262 = arith.cmpf ogt, %260, %261 : vector<16x384xf32>
    %cst_14 = arith.constant 0.00999999977 : f32
    %263 = vector.broadcast %cst_14 : f32 to vector<16x384xf32>
    %264 = arith.mulf %263, %260 : vector<16x384xf32>
    %265 = arith.select %262, %260, %264 : vector<16x384xi1>, vector<16x384xf32>
    %266 = vector.broadcast %2 : vector<16x1xf32> to vector<16x384xf32>
    %267 = arith.mulf %265, %266 : vector<16x384xf32>
    %268 = vector.broadcast %3 : vector<16x1xf32> to vector<16x384xf32>
    %269 = arith.addf %267, %268 : vector<16x384xf32>
    %270 = vector.broadcast %1 : vector<16x1xf32> to vector<16x384xf32>
    %271 = arith.addf %210, %270 : vector<16x384xf32>
    %cst_15 = arith.constant 0.000000e+00 : f32
    %272 = vector.broadcast %cst_15 : f32 to vector<16x384xf32>
    %273 = arith.cmpf ogt, %271, %272 : vector<16x384xf32>
    %cst_16 = arith.constant 0.00999999977 : f32
    %274 = vector.broadcast %cst_16 : f32 to vector<16x384xf32>
    %275 = arith.mulf %274, %271 : vector<16x384xf32>
    %276 = arith.select %273, %271, %275 : vector<16x384xi1>, vector<16x384xf32>
    %277 = vector.broadcast %2 : vector<16x1xf32> to vector<16x384xf32>
    %278 = arith.mulf %276, %277 : vector<16x384xf32>
    %279 = vector.broadcast %3 : vector<16x1xf32> to vector<16x384xf32>
    %280 = arith.addf %278, %279 : vector<16x384xf32>
    %281 = tpu.concatenate %236, %247, %258, %269, %280 in 0 : vector<16x384xf32>, vector<16x384xf32>, vector<16x384xf32>, vector<16x384xf32>, vector<16x384xf32> -> vector<80x384xf32>
    %c0_17 = arith.constant 0 : index
    %c0_18 = arith.constant 0 : index
    %282 = vector.load %arg7[%c0_17, %c0_18] : memref<383x192xf32, #tpu.memory_space<vmem>>, vector<383x192xf32>
    %283 = vector.extract_strided_slice %281 {offsets = [0, 0], sizes = [80, 383], strides = [1, 1]} : vector<80x384xf32> to vector<80x383xf32>
    %284 = vector.extract_strided_slice %281 {offsets = [0, 1], sizes = [80, 383], strides = [1, 1]} : vector<80x384xf32> to vector<80x383xf32>
    %285 = arith.maximumf %283, %284 : vector<80x383xf32>
    %cst_19 = arith.constant dense<0.000000e+00> : vector<80x192xf32>
    %286 = tpu.matmul %285, %282, %cst_19 {dimension_numbers = #tpu.dot_dimension_numbers<[1], [0], [0], [1], [0, 0, 1, 1], [], []>} : vector<80x383xf32>, vector<383x192xf32>, vector<80x192xf32> -> vector<80x192xf32>
    %c0_20 = arith.constant 0 : index
    %c0_21 = arith.constant 0 : index
    %287 = vector.load %arg4[%c0_20, %c0_21] : memref<16x144xf32, #tpu.memory_space<vmem>>, vector<16x144xf32>
    %288 = vector.extract_strided_slice %286 {offsets = [0, 0], sizes = [16, 190], strides = [1, 1]} : vector<80x192xf32> to vector<16x190xf32>
    %289 = vector.extract_strided_slice %286 {offsets = [0, 1], sizes = [16, 190], strides = [1, 1]} : vector<80x192xf32> to vector<16x190xf32>
    %290 = vector.extract_strided_slice %286 {offsets = [0, 2], sizes = [16, 190], strides = [1, 1]} : vector<80x192xf32> to vector<16x190xf32>
    %291 = vector.extract_strided_slice %286 {offsets = [16, 0], sizes = [16, 190], strides = [1, 1]} : vector<80x192xf32> to vector<16x190xf32>
    %292 = vector.extract_strided_slice %286 {offsets = [16, 1], sizes = [16, 190], strides = [1, 1]} : vector<80x192xf32> to vector<16x190xf32>
    %293 = vector.extract_strided_slice %286 {offsets = [16, 2], sizes = [16, 190], strides = [1, 1]} : vector<80x192xf32> to vector<16x190xf32>
    %294 = vector.extract_strided_slice %286 {offsets = [32, 0], sizes = [16, 190], strides = [1, 1]} : vector<80x192xf32> to vector<16x190xf32>
    %295 = vector.extract_strided_slice %286 {offsets = [32, 1], sizes = [16, 190], strides = [1, 1]} : vector<80x192xf32> to vector<16x190xf32>
    %296 = vector.extract_strided_slice %286 {offsets = [32, 2], sizes = [16, 190], strides = [1, 1]} : vector<80x192xf32> to vector<16x190xf32>
    %297 = vector.extract_strided_slice %286 {offsets = [48, 0], sizes = [16, 190], strides = [1, 1]} : vector<80x192xf32> to vector<16x190xf32>
    %298 = vector.extract_strided_slice %286 {offsets = [48, 1], sizes = [16, 190], strides = [1, 1]} : vector<80x192xf32> to vector<16x190xf32>
    %299 = vector.extract_strided_slice %286 {offsets = [48, 2], sizes = [16, 190], strides = [1, 1]} : vector<80x192xf32> to vector<16x190xf32>
    %300 = vector.extract_strided_slice %286 {offsets = [64, 0], sizes = [16, 190], strides = [1, 1]} : vector<80x192xf32> to vector<16x190xf32>
    %301 = vector.extract_strided_slice %286 {offsets = [64, 1], sizes = [16, 190], strides = [1, 1]} : vector<80x192xf32> to vector<16x190xf32>
    %302 = vector.extract_strided_slice %286 {offsets = [64, 2], sizes = [16, 190], strides = [1, 1]} : vector<80x192xf32> to vector<16x190xf32>
    %303 = tpu.concatenate %288, %289, %290, %291, %292, %293, %294, %295, %296 in 0 : vector<16x190xf32>, vector<16x190xf32>, vector<16x190xf32>, vector<16x190xf32>, vector<16x190xf32>, vector<16x190xf32>, vector<16x190xf32>, vector<16x190xf32>, vector<16x190xf32> -> vector<144x190xf32>
    %cst_22 = arith.constant dense<0.000000e+00> : vector<16x190xf32>
    %304 = tpu.matmul %287, %303, %cst_22 {dimension_numbers = #tpu.dot_dimension_numbers<[1], [0], [0], [1], [0, 0, 1, 1], [], []>} : vector<16x144xf32>, vector<144x190xf32>, vector<16x190xf32> -> vector<16x190xf32>
    %305 = vector.broadcast %4 : vector<16x1xf32> to vector<16x190xf32>
    %306 = arith.addf %304, %305 : vector<16x190xf32>
    %cst_23 = arith.constant 0.000000e+00 : f32
    %307 = vector.broadcast %cst_23 : f32 to vector<16x190xf32>
    %308 = arith.cmpf ogt, %306, %307 : vector<16x190xf32>
    %cst_24 = arith.constant 0.00999999977 : f32
    %309 = vector.broadcast %cst_24 : f32 to vector<16x190xf32>
    %310 = arith.mulf %309, %306 : vector<16x190xf32>
    %311 = arith.select %308, %306, %310 : vector<16x190xi1>, vector<16x190xf32>
    %312 = vector.broadcast %5 : vector<16x1xf32> to vector<16x190xf32>
    %313 = arith.mulf %311, %312 : vector<16x190xf32>
    %314 = vector.broadcast %6 : vector<16x1xf32> to vector<16x190xf32>
    %315 = arith.addf %313, %314 : vector<16x190xf32>
    %316 = tpu.concatenate %291, %292, %293, %294, %295, %296, %297, %298, %299 in 0 : vector<16x190xf32>, vector<16x190xf32>, vector<16x190xf32>, vector<16x190xf32>, vector<16x190xf32>, vector<16x190xf32>, vector<16x190xf32>, vector<16x190xf32>, vector<16x190xf32> -> vector<144x190xf32>
    %cst_25 = arith.constant dense<0.000000e+00> : vector<16x190xf32>
    %317 = tpu.matmul %287, %316, %cst_25 {dimension_numbers = #tpu.dot_dimension_numbers<[1], [0], [0], [1], [0, 0, 1, 1], [], []>} : vector<16x144xf32>, vector<144x190xf32>, vector<16x190xf32> -> vector<16x190xf32>
    %318 = vector.broadcast %4 : vector<16x1xf32> to vector<16x190xf32>
    %319 = arith.addf %317, %318 : vector<16x190xf32>
    %cst_26 = arith.constant 0.000000e+00 : f32
    %320 = vector.broadcast %cst_26 : f32 to vector<16x190xf32>
    %321 = arith.cmpf ogt, %319, %320 : vector<16x190xf32>
    %cst_27 = arith.constant 0.00999999977 : f32
    %322 = vector.broadcast %cst_27 : f32 to vector<16x190xf32>
    %323 = arith.mulf %322, %319 : vector<16x190xf32>
    %324 = arith.select %321, %319, %323 : vector<16x190xi1>, vector<16x190xf32>
    %325 = vector.broadcast %5 : vector<16x1xf32> to vector<16x190xf32>
    %326 = arith.mulf %324, %325 : vector<16x190xf32>
    %327 = vector.broadcast %6 : vector<16x1xf32> to vector<16x190xf32>
    %328 = arith.addf %326, %327 : vector<16x190xf32>
    %329 = tpu.concatenate %294, %295, %296, %297, %298, %299, %300, %301, %302 in 0 : vector<16x190xf32>, vector<16x190xf32>, vector<16x190xf32>, vector<16x190xf32>, vector<16x190xf32>, vector<16x190xf32>, vector<16x190xf32>, vector<16x190xf32>, vector<16x190xf32> -> vector<144x190xf32>
    %cst_28 = arith.constant dense<0.000000e+00> : vector<16x190xf32>
    %330 = tpu.matmul %287, %329, %cst_28 {dimension_numbers = #tpu.dot_dimension_numbers<[1], [0], [0], [1], [0, 0, 1, 1], [], []>} : vector<16x144xf32>, vector<144x190xf32>, vector<16x190xf32> -> vector<16x190xf32>
    %331 = vector.broadcast %4 : vector<16x1xf32> to vector<16x190xf32>
    %332 = arith.addf %330, %331 : vector<16x190xf32>
    %cst_29 = arith.constant 0.000000e+00 : f32
    %333 = vector.broadcast %cst_29 : f32 to vector<16x190xf32>
    %334 = arith.cmpf ogt, %332, %333 : vector<16x190xf32>
    %cst_30 = arith.constant 0.00999999977 : f32
    %335 = vector.broadcast %cst_30 : f32 to vector<16x190xf32>
    %336 = arith.mulf %335, %332 : vector<16x190xf32>
    %337 = arith.select %334, %332, %336 : vector<16x190xi1>, vector<16x190xf32>
    %338 = vector.broadcast %5 : vector<16x1xf32> to vector<16x190xf32>
    %339 = arith.mulf %337, %338 : vector<16x190xf32>
    %340 = vector.broadcast %6 : vector<16x1xf32> to vector<16x190xf32>
    %341 = arith.addf %339, %340 : vector<16x190xf32>
    %342 = tpu.concatenate %315, %328, %341 in 0 : vector<16x190xf32>, vector<16x190xf32>, vector<16x190xf32> -> vector<48x190xf32>
    %c0_31 = arith.constant 0 : index
    %c0_32 = arith.constant 0 : index
    %343 = vector.load %arg8[%c0_31, %c0_32] : memref<189x95xf32, #tpu.memory_space<vmem>>, vector<189x95xf32>
    %344 = vector.extract_strided_slice %342 {offsets = [0, 0], sizes = [48, 189], strides = [1, 1]} : vector<48x190xf32> to vector<48x189xf32>
    %345 = vector.extract_strided_slice %342 {offsets = [0, 1], sizes = [48, 189], strides = [1, 1]} : vector<48x190xf32> to vector<48x189xf32>
    %346 = arith.maximumf %344, %345 : vector<48x189xf32>
    %cst_33 = arith.constant dense<0.000000e+00> : vector<48x95xf32>
    %347 = tpu.matmul %346, %343, %cst_33 {dimension_numbers = #tpu.dot_dimension_numbers<[1], [0], [0], [1], [0, 0, 1, 1], [], []>} : vector<48x189xf32>, vector<189x95xf32>, vector<48x95xf32> -> vector<48x95xf32>
    %c0_34 = arith.constant 0 : index
    %c0_35 = arith.constant 0 : index
    %348 = vector.load %arg5[%c0_34, %c0_35] : memref<32x48xf32, #tpu.memory_space<vmem>>, vector<32x48xf32>
    %c0_36 = arith.constant 0 : index
    %c0_37 = arith.constant 0 : index
    %349 = vector.load %arg6[%c0_36, %c0_37] : memref<32x1xf32, #tpu.memory_space<vmem>>, vector<32x1xf32>
    %350 = vector.extract_strided_slice %347 {offsets = [0, 0], sizes = [16, 95], strides = [1, 1]} : vector<48x95xf32> to vector<16x95xf32>
    %351 = vector.extract_strided_slice %350 {offsets = [0, 0], sizes = [16, 93], strides = [1, 1]} : vector<16x95xf32> to vector<16x93xf32>
    %352 = vector.extract_strided_slice %350 {offsets = [0, 1], sizes = [16, 93], strides = [1, 1]} : vector<16x95xf32> to vector<16x93xf32>
    %353 = vector.extract_strided_slice %350 {offsets = [0, 2], sizes = [16, 93], strides = [1, 1]} : vector<16x95xf32> to vector<16x93xf32>
    %354 = tpu.concatenate %351, %352, %353 in 0 : vector<16x93xf32>, vector<16x93xf32>, vector<16x93xf32> -> vector<48x93xf32>
    %cst_38 = arith.constant dense<0.000000e+00> : vector<32x93xf32>
    %355 = tpu.matmul %348, %354, %cst_38 {dimension_numbers = #tpu.dot_dimension_numbers<[1], [0], [0], [1], [0, 0, 1, 1], [], []>} : vector<32x48xf32>, vector<48x93xf32>, vector<32x93xf32> -> vector<32x93xf32>
    %356 = vector.broadcast %349 : vector<32x1xf32> to vector<32x93xf32>
    %357 = arith.addf %355, %356 : vector<32x93xf32>
    %cst_39 = arith.constant 0.000000e+00 : f32
    %358 = vector.broadcast %cst_39 : f32 to vector<32x93xf32>
    %359 = arith.cmpf ogt, %357, %358 : vector<32x93xf32>
    %cst_40 = arith.constant 0.00999999977 : f32
    %360 = vector.broadcast %cst_40 : f32 to vector<32x93xf32>
    %361 = arith.mulf %360, %357 : vector<32x93xf32>
    %362 = arith.select %359, %357, %361 : vector<32x93xi1>, vector<32x93xf32>
    %363 = vector.extract_strided_slice %347 {offsets = [16, 0], sizes = [16, 95], strides = [1, 1]} : vector<48x95xf32> to vector<16x95xf32>
    %364 = vector.extract_strided_slice %363 {offsets = [0, 0], sizes = [16, 93], strides = [1, 1]} : vector<16x95xf32> to vector<16x93xf32>
    %365 = vector.extract_strided_slice %363 {offsets = [0, 1], sizes = [16, 93], strides = [1, 1]} : vector<16x95xf32> to vector<16x93xf32>
    %366 = vector.extract_strided_slice %363 {offsets = [0, 2], sizes = [16, 93], strides = [1, 1]} : vector<16x95xf32> to vector<16x93xf32>
    %367 = tpu.concatenate %364, %365, %366 in 0 : vector<16x93xf32>, vector<16x93xf32>, vector<16x93xf32> -> vector<48x93xf32>
    %cst_41 = arith.constant dense<0.000000e+00> : vector<32x93xf32>
    %368 = tpu.matmul %348, %367, %cst_41 {dimension_numbers = #tpu.dot_dimension_numbers<[1], [0], [0], [1], [0, 0, 1, 1], [], []>} : vector<32x48xf32>, vector<48x93xf32>, vector<32x93xf32> -> vector<32x93xf32>
    %369 = vector.broadcast %349 : vector<32x1xf32> to vector<32x93xf32>
    %370 = arith.addf %368, %369 : vector<32x93xf32>
    %cst_42 = arith.constant 0.000000e+00 : f32
    %371 = vector.broadcast %cst_42 : f32 to vector<32x93xf32>
    %372 = arith.cmpf ogt, %370, %371 : vector<32x93xf32>
    %cst_43 = arith.constant 0.00999999977 : f32
    %373 = vector.broadcast %cst_43 : f32 to vector<32x93xf32>
    %374 = arith.mulf %373, %370 : vector<32x93xf32>
    %375 = arith.select %372, %370, %374 : vector<32x93xi1>, vector<32x93xf32>
    %376 = vector.extract_strided_slice %347 {offsets = [32, 0], sizes = [16, 95], strides = [1, 1]} : vector<48x95xf32> to vector<16x95xf32>
    %377 = vector.extract_strided_slice %376 {offsets = [0, 0], sizes = [16, 93], strides = [1, 1]} : vector<16x95xf32> to vector<16x93xf32>
    %378 = vector.extract_strided_slice %376 {offsets = [0, 1], sizes = [16, 93], strides = [1, 1]} : vector<16x95xf32> to vector<16x93xf32>
    %379 = vector.extract_strided_slice %376 {offsets = [0, 2], sizes = [16, 93], strides = [1, 1]} : vector<16x95xf32> to vector<16x93xf32>
    %380 = tpu.concatenate %377, %378, %379 in 0 : vector<16x93xf32>, vector<16x93xf32>, vector<16x93xf32> -> vector<48x93xf32>
    %cst_44 = arith.constant dense<0.000000e+00> : vector<32x93xf32>
    %381 = tpu.matmul %348, %380, %cst_44 {dimension_numbers = #tpu.dot_dimension_numbers<[1], [0], [0], [1], [0, 0, 1, 1], [], []>} : vector<32x48xf32>, vector<48x93xf32>, vector<32x93xf32> -> vector<32x93xf32>
    %382 = vector.broadcast %349 : vector<32x1xf32> to vector<32x93xf32>
    %383 = arith.addf %381, %382 : vector<32x93xf32>
    %cst_45 = arith.constant 0.000000e+00 : f32
    %384 = vector.broadcast %cst_45 : f32 to vector<32x93xf32>
    %385 = arith.cmpf ogt, %383, %384 : vector<32x93xf32>
    %cst_46 = arith.constant 0.00999999977 : f32
    %386 = vector.broadcast %cst_46 : f32 to vector<32x93xf32>
    %387 = arith.mulf %386, %383 : vector<32x93xf32>
    %388 = arith.select %385, %383, %387 : vector<32x93xi1>, vector<32x93xf32>
    %389 = tpu.concatenate %362, %375, %388 in 0 : vector<32x93xf32>, vector<32x93xf32>, vector<32x93xf32> -> vector<96x93xf32>
    %c0_47 = arith.constant 0 : index
    %c0_48 = arith.constant 0 : index
    %390 = vector.load %arg9[%c0_47, %c0_48] : memref<92x46xf32, #tpu.memory_space<vmem>>, vector<92x46xf32>
    %391 = vector.extract_strided_slice %389 {offsets = [0, 0], sizes = [96, 92], strides = [1, 1]} : vector<96x93xf32> to vector<96x92xf32>
    %392 = vector.extract_strided_slice %389 {offsets = [0, 1], sizes = [96, 92], strides = [1, 1]} : vector<96x93xf32> to vector<96x92xf32>
    %393 = arith.maximumf %391, %392 : vector<96x92xf32>
    %cst_49 = arith.constant dense<0.000000e+00> : vector<96x46xf32>
    %394 = tpu.matmul %393, %390, %cst_49 {dimension_numbers = #tpu.dot_dimension_numbers<[1], [0], [0], [1], [0, 0, 1, 1], [], []>} : vector<96x92xf32>, vector<92x46xf32>, vector<96x46xf32> -> vector<96x46xf32>
    %395 = vector.extract_strided_slice %394 {offsets = [0, 0], sizes = [32, 46], strides = [1, 1]} : vector<96x46xf32> to vector<32x46xf32>
    %c0_50 = arith.constant 0 : index
    %c0_51 = arith.constant 0 : index
    %396 = vector.load %arg15[%c0_50, %c0_51] : memref<32x138xf32, #tpu.memory_space<vmem>>, vector<32x46xf32>
    tpu.vector_store %arg15[%c0_50, %c0_51], %395 {strides = array<i32>} : memref<32x138xf32, #tpu.memory_space<vmem>>, vector<32x46xf32>,
    %397 = vector.extract_strided_slice %394 {offsets = [32, 0], sizes = [32, 46], strides = [1, 1]} : vector<96x46xf32> to vector<32x46xf32>
    %c0_52 = arith.constant 0 : index
    %c46 = arith.constant 46 : index
    %398 = vector.load %arg15[%c0_52, %c46] : memref<32x138xf32, #tpu.memory_space<vmem>>, vector<32x46xf32>
    tpu.vector_store %arg15[%c0_52, %c46], %397 {strides = array<i32>} : memref<32x138xf32, #tpu.memory_space<vmem>>, vector<32x46xf32>,
    %399 = vector.extract_strided_slice %394 {offsets = [64, 0], sizes = [32, 46], strides = [1, 1]} : vector<96x46xf32> to vector<32x46xf32>
    %c0_53 = arith.constant 0 : index
    %c92 = arith.constant 92 : index
    %400 = vector.load %arg15[%c0_53, %c92] : memref<32x138xf32, #tpu.memory_space<vmem>>, vector<32x46xf32>
    tpu.vector_store %arg15[%c0_53, %c92], %399 {strides = array<i32>} : memref<32x138xf32, #tpu.memory_space<vmem>>, vector<32x46xf32>,
    %c0_54 = arith.constant 0 : index
    %c0_55 = arith.constant 0 : index
    %401 = vector.load %arg13[%c0_54, %c0_55] : memref<1x280xf32, #tpu.memory_space<vmem>>, vector<1x280xf32>
    %402 = vector.extract_strided_slice %401 {offsets = [0, 0], sizes = [1, 64], strides = [1, 1]} : vector<1x280xf32> to vector<1x64xf32>
    %c0_56 = arith.constant 0 : index
    %c0_57 = arith.constant 0 : index
    %403 = vector.load %arg15[%c0_56, %c0_57] : memref<32x138xf32, #tpu.memory_space<vmem>>, vector<1x138xf32>
    %404 = arith.truncf %403 : vector<1x138xf32> to vector<1x138xbf16>
    %c0_58 = arith.constant 0 : index
    %c0_59 = arith.constant 0 : index
    %c0_60 = arith.constant 0 : index
    %405 = vector.load %arg10[%c0_58, %c0_59, %c0_60] : memref<32x138x64xbf16, #tpu.memory_space<vmem>>, vector<1x138x64xbf16>
    %406 = vector.shape_cast %405 : vector<1x138x64xbf16> to vector<138x64xbf16>
    %cst_61 = arith.constant dense<0.000000e+00> : vector<1x64xf32>
    %407 = tpu.matmul %404, %406, %cst_61 {dimension_numbers = #tpu.dot_dimension_numbers<[1], [0], [0], [1], [0, 0, 1, 1], [], []>} : vector<1x138xbf16>, vector<138x64xbf16>, vector<1x64xf32> -> vector<1x64xf32>
    %408 = arith.addf %402, %407 : vector<1x64xf32>
    %c1 = arith.constant 1 : index
    %c0_62 = arith.constant 0 : index
    %409 = vector.load %arg15[%c1, %c0_62] : memref<32x138xf32, #tpu.memory_space<vmem>>, vector<1x138xf32>
    %410 = arith.truncf %409 : vector<1x138xf32> to vector<1x138xbf16>
    %c1_63 = arith.constant 1 : index
    %c0_64 = arith.constant 0 : index
    %c0_65 = arith.constant 0 : index
    %411 = vector.load %arg10[%c1_63, %c0_64, %c0_65] : memref<32x138x64xbf16, #tpu.memory_space<vmem>>, vector<1x138x64xbf16>
    %412 = vector.shape_cast %411 : vector<1x138x64xbf16> to vector<138x64xbf16>
    %cst_66 = arith.constant dense<0.000000e+00> : vector<1x64xf32>
    %413 = tpu.matmul %410, %412, %cst_66 {dimension_numbers = #tpu.dot_dimension_numbers<[1], [0], [0], [1], [0, 0, 1, 1], [], []>} : vector<1x138xbf16>, vector<138x64xbf16>, vector<1x64xf32> -> vector<1x64xf32>
    %414 = arith.addf %408, %413 : vector<1x64xf32>
    %c2 = arith.constant 2 : index
    %c0_67 = arith.constant 0 : index
    %415 = vector.load %arg15[%c2, %c0_67] : memref<32x138xf32, #tpu.memory_space<vmem>>, vector<1x138xf32>
    %416 = arith.truncf %415 : vector<1x138xf32> to vector<1x138xbf16>
    %c2_68 = arith.constant 2 : index
    %c0_69 = arith.constant 0 : index
    %c0_70 = arith.constant 0 : index
    %417 = vector.load %arg10[%c2_68, %c0_69, %c0_70] : memref<32x138x64xbf16, #tpu.memory_space<vmem>>, vector<1x138x64xbf16>
    %418 = vector.shape_cast %417 : vector<1x138x64xbf16> to vector<138x64xbf16>
    %cst_71 = arith.constant dense<0.000000e+00> : vector<1x64xf32>
    %419 = tpu.matmul %416, %418, %cst_71 {dimension_numbers = #tpu.dot_dimension_numbers<[1], [0], [0], [1], [0, 0, 1, 1], [], []>} : vector<1x138xbf16>, vector<138x64xbf16>, vector<1x64xf32> -> vector<1x64xf32>
    %420 = arith.addf %414, %419 : vector<1x64xf32>
    %c3 = arith.constant 3 : index
    %c0_72 = arith.constant 0 : index
    %421 = vector.load %arg15[%c3, %c0_72] : memref<32x138xf32, #tpu.memory_space<vmem>>, vector<1x138xf32>
    %422 = arith.truncf %421 : vector<1x138xf32> to vector<1x138xbf16>
    %c3_73 = arith.constant 3 : index
    %c0_74 = arith.constant 0 : index
    %c0_75 = arith.constant 0 : index
    %423 = vector.load %arg10[%c3_73, %c0_74, %c0_75] : memref<32x138x64xbf16, #tpu.memory_space<vmem>>, vector<1x138x64xbf16>
    %424 = vector.shape_cast %423 : vector<1x138x64xbf16> to vector<138x64xbf16>
    %cst_76 = arith.constant dense<0.000000e+00> : vector<1x64xf32>
    %425 = tpu.matmul %422, %424, %cst_76 {dimension_numbers = #tpu.dot_dimension_numbers<[1], [0], [0], [1], [0, 0, 1, 1], [], []>} : vector<1x138xbf16>, vector<138x64xbf16>, vector<1x64xf32> -> vector<1x64xf32>
    %426 = arith.addf %420, %425 : vector<1x64xf32>
    %c4 = arith.constant 4 : index
    %c0_77 = arith.constant 0 : index
    %427 = vector.load %arg15[%c4, %c0_77] : memref<32x138xf32, #tpu.memory_space<vmem>>, vector<1x138xf32>
    %428 = arith.truncf %427 : vector<1x138xf32> to vector<1x138xbf16>
    %c4_78 = arith.constant 4 : index
    %c0_79 = arith.constant 0 : index
    %c0_80 = arith.constant 0 : index
    %429 = vector.load %arg10[%c4_78, %c0_79, %c0_80] : memref<32x138x64xbf16, #tpu.memory_space<vmem>>, vector<1x138x64xbf16>
    %430 = vector.shape_cast %429 : vector<1x138x64xbf16> to vector<138x64xbf16>
    %cst_81 = arith.constant dense<0.000000e+00> : vector<1x64xf32>
    %431 = tpu.matmul %428, %430, %cst_81 {dimension_numbers = #tpu.dot_dimension_numbers<[1], [0], [0], [1], [0, 0, 1, 1], [], []>} : vector<1x138xbf16>, vector<138x64xbf16>, vector<1x64xf32> -> vector<1x64xf32>
    %432 = arith.addf %426, %431 : vector<1x64xf32>
    %c5 = arith.constant 5 : index
    %c0_82 = arith.constant 0 : index
    %433 = vector.load %arg15[%c5, %c0_82] : memref<32x138xf32, #tpu.memory_space<vmem>>, vector<1x138xf32>
    %434 = arith.truncf %433 : vector<1x138xf32> to vector<1x138xbf16>
    %c5_83 = arith.constant 5 : index
    %c0_84 = arith.constant 0 : index
    %c0_85 = arith.constant 0 : index
    %435 = vector.load %arg10[%c5_83, %c0_84, %c0_85] : memref<32x138x64xbf16, #tpu.memory_space<vmem>>, vector<1x138x64xbf16>
    %436 = vector.shape_cast %435 : vector<1x138x64xbf16> to vector<138x64xbf16>
    %cst_86 = arith.constant dense<0.000000e+00> : vector<1x64xf32>
    %437 = tpu.matmul %434, %436, %cst_86 {dimension_numbers = #tpu.dot_dimension_numbers<[1], [0], [0], [1], [0, 0, 1, 1], [], []>} : vector<1x138xbf16>, vector<138x64xbf16>, vector<1x64xf32> -> vector<1x64xf32>
    %438 = arith.addf %432, %437 : vector<1x64xf32>
    %c6 = arith.constant 6 : index
    %c0_87 = arith.constant 0 : index
    %439 = vector.load %arg15[%c6, %c0_87] : memref<32x138xf32, #tpu.memory_space<vmem>>, vector<1x138xf32>
    %440 = arith.truncf %439 : vector<1x138xf32> to vector<1x138xbf16>
    %c6_88 = arith.constant 6 : index
    %c0_89 = arith.constant 0 : index
    %c0_90 = arith.constant 0 : index
    %441 = vector.load %arg10[%c6_88, %c0_89, %c0_90] : memref<32x138x64xbf16, #tpu.memory_space<vmem>>, vector<1x138x64xbf16>
    %442 = vector.shape_cast %441 : vector<1x138x64xbf16> to vector<138x64xbf16>
    %cst_91 = arith.constant dense<0.000000e+00> : vector<1x64xf32>
    %443 = tpu.matmul %440, %442, %cst_91 {dimension_numbers = #tpu.dot_dimension_numbers<[1], [0], [0], [1], [0, 0, 1, 1], [], []>} : vector<1x138xbf16>, vector<138x64xbf16>, vector<1x64xf32> -> vector<1x64xf32>
    %444 = arith.addf %438, %443 : vector<1x64xf32>
    %c7 = arith.constant 7 : index
    %c0_92 = arith.constant 0 : index
    %445 = vector.load %arg15[%c7, %c0_92] : memref<32x138xf32, #tpu.memory_space<vmem>>, vector<1x138xf32>
    %446 = arith.truncf %445 : vector<1x138xf32> to vector<1x138xbf16>
    %c7_93 = arith.constant 7 : index
    %c0_94 = arith.constant 0 : index
    %c0_95 = arith.constant 0 : index
    %447 = vector.load %arg10[%c7_93, %c0_94, %c0_95] : memref<32x138x64xbf16, #tpu.memory_space<vmem>>, vector<1x138x64xbf16>
    %448 = vector.shape_cast %447 : vector<1x138x64xbf16> to vector<138x64xbf16>
    %cst_96 = arith.constant dense<0.000000e+00> : vector<1x64xf32>
    %449 = tpu.matmul %446, %448, %cst_96 {dimension_numbers = #tpu.dot_dimension_numbers<[1], [0], [0], [1], [0, 0, 1, 1], [], []>} : vector<1x138xbf16>, vector<138x64xbf16>, vector<1x64xf32> -> vector<1x64xf32>
    %450 = arith.addf %444, %449 : vector<1x64xf32>
    %c8 = arith.constant 8 : index
    %c0_97 = arith.constant 0 : index
    %451 = vector.load %arg15[%c8, %c0_97] : memref<32x138xf32, #tpu.memory_space<vmem>>, vector<1x138xf32>
    %452 = arith.truncf %451 : vector<1x138xf32> to vector<1x138xbf16>
    %c8_98 = arith.constant 8 : index
    %c0_99 = arith.constant 0 : index
    %c0_100 = arith.constant 0 : index
    %453 = vector.load %arg10[%c8_98, %c0_99, %c0_100] : memref<32x138x64xbf16, #tpu.memory_space<vmem>>, vector<1x138x64xbf16>
    %454 = vector.shape_cast %453 : vector<1x138x64xbf16> to vector<138x64xbf16>
    %cst_101 = arith.constant dense<0.000000e+00> : vector<1x64xf32>
    %455 = tpu.matmul %452, %454, %cst_101 {dimension_numbers = #tpu.dot_dimension_numbers<[1], [0], [0], [1], [0, 0, 1, 1], [], []>} : vector<1x138xbf16>, vector<138x64xbf16>, vector<1x64xf32> -> vector<1x64xf32>
    %456 = arith.addf %450, %455 : vector<1x64xf32>
    %c9 = arith.constant 9 : index
    %c0_102 = arith.constant 0 : index
    %457 = vector.load %arg15[%c9, %c0_102] : memref<32x138xf32, #tpu.memory_space<vmem>>, vector<1x138xf32>
    %458 = arith.truncf %457 : vector<1x138xf32> to vector<1x138xbf16>
    %c9_103 = arith.constant 9 : index
    %c0_104 = arith.constant 0 : index
    %c0_105 = arith.constant 0 : index
    %459 = vector.load %arg10[%c9_103, %c0_104, %c0_105] : memref<32x138x64xbf16, #tpu.memory_space<vmem>>, vector<1x138x64xbf16>
    %460 = vector.shape_cast %459 : vector<1x138x64xbf16> to vector<138x64xbf16>
    %cst_106 = arith.constant dense<0.000000e+00> : vector<1x64xf32>
    %461 = tpu.matmul %458, %460, %cst_106 {dimension_numbers = #tpu.dot_dimension_numbers<[1], [0], [0], [1], [0, 0, 1, 1], [], []>} : vector<1x138xbf16>, vector<138x64xbf16>, vector<1x64xf32> -> vector<1x64xf32>
    %462 = arith.addf %456, %461 : vector<1x64xf32>
    %c10 = arith.constant 10 : index
    %c0_107 = arith.constant 0 : index
    %463 = vector.load %arg15[%c10, %c0_107] : memref<32x138xf32, #tpu.memory_space<vmem>>, vector<1x138xf32>
    %464 = arith.truncf %463 : vector<1x138xf32> to vector<1x138xbf16>
    %c10_108 = arith.constant 10 : index
    %c0_109 = arith.constant 0 : index
    %c0_110 = arith.constant 0 : index
    %465 = vector.load %arg10[%c10_108, %c0_109, %c0_110] : memref<32x138x64xbf16, #tpu.memory_space<vmem>>, vector<1x138x64xbf16>
    %466 = vector.shape_cast %465 : vector<1x138x64xbf16> to vector<138x64xbf16>
    %cst_111 = arith.constant dense<0.000000e+00> : vector<1x64xf32>
    %467 = tpu.matmul %464, %466, %cst_111 {dimension_numbers = #tpu.dot_dimension_numbers<[1], [0], [0], [1], [0, 0, 1, 1], [], []>} : vector<1x138xbf16>, vector<138x64xbf16>, vector<1x64xf32> -> vector<1x64xf32>
    %468 = arith.addf %462, %467 : vector<1x64xf32>
    %c11 = arith.constant 11 : index
    %c0_112 = arith.constant 0 : index
    %469 = vector.load %arg15[%c11, %c0_112] : memref<32x138xf32, #tpu.memory_space<vmem>>, vector<1x138xf32>
    %470 = arith.truncf %469 : vector<1x138xf32> to vector<1x138xbf16>
    %c11_113 = arith.constant 11 : index
    %c0_114 = arith.constant 0 : index
    %c0_115 = arith.constant 0 : index
    %471 = vector.load %arg10[%c11_113, %c0_114, %c0_115] : memref<32x138x64xbf16, #tpu.memory_space<vmem>>, vector<1x138x64xbf16>
    %472 = vector.shape_cast %471 : vector<1x138x64xbf16> to vector<138x64xbf16>
    %cst_116 = arith.constant dense<0.000000e+00> : vector<1x64xf32>
    %473 = tpu.matmul %470, %472, %cst_116 {dimension_numbers = #tpu.dot_dimension_numbers<[1], [0], [0], [1], [0, 0, 1, 1], [], []>} : vector<1x138xbf16>, vector<138x64xbf16>, vector<1x64xf32> -> vector<1x64xf32>
    %474 = arith.addf %468, %473 : vector<1x64xf32>
    %c12 = arith.constant 12 : index
    %c0_117 = arith.constant 0 : index
    %475 = vector.load %arg15[%c12, %c0_117] : memref<32x138xf32, #tpu.memory_space<vmem>>, vector<1x138xf32>
    %476 = arith.truncf %475 : vector<1x138xf32> to vector<1x138xbf16>
    %c12_118 = arith.constant 12 : index
    %c0_119 = arith.constant 0 : index
    %c0_120 = arith.constant 0 : index
    %477 = vector.load %arg10[%c12_118, %c0_119, %c0_120] : memref<32x138x64xbf16, #tpu.memory_space<vmem>>, vector<1x138x64xbf16>
    %478 = vector.shape_cast %477 : vector<1x138x64xbf16> to vector<138x64xbf16>
    %cst_121 = arith.constant dense<0.000000e+00> : vector<1x64xf32>
    %479 = tpu.matmul %476, %478, %cst_121 {dimension_numbers = #tpu.dot_dimension_numbers<[1], [0], [0], [1], [0, 0, 1, 1], [], []>} : vector<1x138xbf16>, vector<138x64xbf16>, vector<1x64xf32> -> vector<1x64xf32>
    %480 = arith.addf %474, %479 : vector<1x64xf32>
    %c13 = arith.constant 13 : index
    %c0_122 = arith.constant 0 : index
    %481 = vector.load %arg15[%c13, %c0_122] : memref<32x138xf32, #tpu.memory_space<vmem>>, vector<1x138xf32>
    %482 = arith.truncf %481 : vector<1x138xf32> to vector<1x138xbf16>
    %c13_123 = arith.constant 13 : index
    %c0_124 = arith.constant 0 : index
    %c0_125 = arith.constant 0 : index
    %483 = vector.load %arg10[%c13_123, %c0_124, %c0_125] : memref<32x138x64xbf16, #tpu.memory_space<vmem>>, vector<1x138x64xbf16>
    %484 = vector.shape_cast %483 : vector<1x138x64xbf16> to vector<138x64xbf16>
    %cst_126 = arith.constant dense<0.000000e+00> : vector<1x64xf32>
    %485 = tpu.matmul %482, %484, %cst_126 {dimension_numbers = #tpu.dot_dimension_numbers<[1], [0], [0], [1], [0, 0, 1, 1], [], []>} : vector<1x138xbf16>, vector<138x64xbf16>, vector<1x64xf32> -> vector<1x64xf32>
    %486 = arith.addf %480, %485 : vector<1x64xf32>
    %c14 = arith.constant 14 : index
    %c0_127 = arith.constant 0 : index
    %487 = vector.load %arg15[%c14, %c0_127] : memref<32x138xf32, #tpu.memory_space<vmem>>, vector<1x138xf32>
    %488 = arith.truncf %487 : vector<1x138xf32> to vector<1x138xbf16>
    %c14_128 = arith.constant 14 : index
    %c0_129 = arith.constant 0 : index
    %c0_130 = arith.constant 0 : index
    %489 = vector.load %arg10[%c14_128, %c0_129, %c0_130] : memref<32x138x64xbf16, #tpu.memory_space<vmem>>, vector<1x138x64xbf16>
    %490 = vector.shape_cast %489 : vector<1x138x64xbf16> to vector<138x64xbf16>
    %cst_131 = arith.constant dense<0.000000e+00> : vector<1x64xf32>
    %491 = tpu.matmul %488, %490, %cst_131 {dimension_numbers = #tpu.dot_dimension_numbers<[1], [0], [0], [1], [0, 0, 1, 1], [], []>} : vector<1x138xbf16>, vector<138x64xbf16>, vector<1x64xf32> -> vector<1x64xf32>
    %492 = arith.addf %486, %491 : vector<1x64xf32>
    %c15 = arith.constant 15 : index
    %c0_132 = arith.constant 0 : index
    %493 = vector.load %arg15[%c15, %c0_132] : memref<32x138xf32, #tpu.memory_space<vmem>>, vector<1x138xf32>
    %494 = arith.truncf %493 : vector<1x138xf32> to vector<1x138xbf16>
    %c15_133 = arith.constant 15 : index
    %c0_134 = arith.constant 0 : index
    %c0_135 = arith.constant 0 : index
    %495 = vector.load %arg10[%c15_133, %c0_134, %c0_135] : memref<32x138x64xbf16, #tpu.memory_space<vmem>>, vector<1x138x64xbf16>
    %496 = vector.shape_cast %495 : vector<1x138x64xbf16> to vector<138x64xbf16>
    %cst_136 = arith.constant dense<0.000000e+00> : vector<1x64xf32>
    %497 = tpu.matmul %494, %496, %cst_136 {dimension_numbers = #tpu.dot_dimension_numbers<[1], [0], [0], [1], [0, 0, 1, 1], [], []>} : vector<1x138xbf16>, vector<138x64xbf16>, vector<1x64xf32> -> vector<1x64xf32>
    %498 = arith.addf %492, %497 : vector<1x64xf32>
    %c16 = arith.constant 16 : index
    %c0_137 = arith.constant 0 : index
    %499 = vector.load %arg15[%c16, %c0_137] : memref<32x138xf32, #tpu.memory_space<vmem>>, vector<1x138xf32>
    %500 = arith.truncf %499 : vector<1x138xf32> to vector<1x138xbf16>
    %c16_138 = arith.constant 16 : index
    %c0_139 = arith.constant 0 : index
    %c0_140 = arith.constant 0 : index
    %501 = vector.load %arg10[%c16_138, %c0_139, %c0_140] : memref<32x138x64xbf16, #tpu.memory_space<vmem>>, vector<1x138x64xbf16>
    %502 = vector.shape_cast %501 : vector<1x138x64xbf16> to vector<138x64xbf16>
    %cst_141 = arith.constant dense<0.000000e+00> : vector<1x64xf32>
    %503 = tpu.matmul %500, %502, %cst_141 {dimension_numbers = #tpu.dot_dimension_numbers<[1], [0], [0], [1], [0, 0, 1, 1], [], []>} : vector<1x138xbf16>, vector<138x64xbf16>, vector<1x64xf32> -> vector<1x64xf32>
    %504 = arith.addf %498, %503 : vector<1x64xf32>
    %c17 = arith.constant 17 : index
    %c0_142 = arith.constant 0 : index
    %505 = vector.load %arg15[%c17, %c0_142] : memref<32x138xf32, #tpu.memory_space<vmem>>, vector<1x138xf32>
    %506 = arith.truncf %505 : vector<1x138xf32> to vector<1x138xbf16>
    %c17_143 = arith.constant 17 : index
    %c0_144 = arith.constant 0 : index
    %c0_145 = arith.constant 0 : index
    %507 = vector.load %arg10[%c17_143, %c0_144, %c0_145] : memref<32x138x64xbf16, #tpu.memory_space<vmem>>, vector<1x138x64xbf16>
    %508 = vector.shape_cast %507 : vector<1x138x64xbf16> to vector<138x64xbf16>
    %cst_146 = arith.constant dense<0.000000e+00> : vector<1x64xf32>
    %509 = tpu.matmul %506, %508, %cst_146 {dimension_numbers = #tpu.dot_dimension_numbers<[1], [0], [0], [1], [0, 0, 1, 1], [], []>} : vector<1x138xbf16>, vector<138x64xbf16>, vector<1x64xf32> -> vector<1x64xf32>
    %510 = arith.addf %504, %509 : vector<1x64xf32>
    %c18 = arith.constant 18 : index
    %c0_147 = arith.constant 0 : index
    %511 = vector.load %arg15[%c18, %c0_147] : memref<32x138xf32, #tpu.memory_space<vmem>>, vector<1x138xf32>
    %512 = arith.truncf %511 : vector<1x138xf32> to vector<1x138xbf16>
    %c18_148 = arith.constant 18 : index
    %c0_149 = arith.constant 0 : index
    %c0_150 = arith.constant 0 : index
    %513 = vector.load %arg10[%c18_148, %c0_149, %c0_150] : memref<32x138x64xbf16, #tpu.memory_space<vmem>>, vector<1x138x64xbf16>
    %514 = vector.shape_cast %513 : vector<1x138x64xbf16> to vector<138x64xbf16>
    %cst_151 = arith.constant dense<0.000000e+00> : vector<1x64xf32>
    %515 = tpu.matmul %512, %514, %cst_151 {dimension_numbers = #tpu.dot_dimension_numbers<[1], [0], [0], [1], [0, 0, 1, 1], [], []>} : vector<1x138xbf16>, vector<138x64xbf16>, vector<1x64xf32> -> vector<1x64xf32>
    %516 = arith.addf %510, %515 : vector<1x64xf32>
    %c19 = arith.constant 19 : index
    %c0_152 = arith.constant 0 : index
    %517 = vector.load %arg15[%c19, %c0_152] : memref<32x138xf32, #tpu.memory_space<vmem>>, vector<1x138xf32>
    %518 = arith.truncf %517 : vector<1x138xf32> to vector<1x138xbf16>
    %c19_153 = arith.constant 19 : index
    %c0_154 = arith.constant 0 : index
    %c0_155 = arith.constant 0 : index
    %519 = vector.load %arg10[%c19_153, %c0_154, %c0_155] : memref<32x138x64xbf16, #tpu.memory_space<vmem>>, vector<1x138x64xbf16>
    %520 = vector.shape_cast %519 : vector<1x138x64xbf16> to vector<138x64xbf16>
    %cst_156 = arith.constant dense<0.000000e+00> : vector<1x64xf32>
    %521 = tpu.matmul %518, %520, %cst_156 {dimension_numbers = #tpu.dot_dimension_numbers<[1], [0], [0], [1], [0, 0, 1, 1], [], []>} : vector<1x138xbf16>, vector<138x64xbf16>, vector<1x64xf32> -> vector<1x64xf32>
    %522 = arith.addf %516, %521 : vector<1x64xf32>
    %c20 = arith.constant 20 : index
    %c0_157 = arith.constant 0 : index
    %523 = vector.load %arg15[%c20, %c0_157] : memref<32x138xf32, #tpu.memory_space<vmem>>, vector<1x138xf32>
    %524 = arith.truncf %523 : vector<1x138xf32> to vector<1x138xbf16>
    %c20_158 = arith.constant 20 : index
    %c0_159 = arith.constant 0 : index
    %c0_160 = arith.constant 0 : index
    %525 = vector.load %arg10[%c20_158, %c0_159, %c0_160] : memref<32x138x64xbf16, #tpu.memory_space<vmem>>, vector<1x138x64xbf16>
    %526 = vector.shape_cast %525 : vector<1x138x64xbf16> to vector<138x64xbf16>
    %cst_161 = arith.constant dense<0.000000e+00> : vector<1x64xf32>
    %527 = tpu.matmul %524, %526, %cst_161 {dimension_numbers = #tpu.dot_dimension_numbers<[1], [0], [0], [1], [0, 0, 1, 1], [], []>} : vector<1x138xbf16>, vector<138x64xbf16>, vector<1x64xf32> -> vector<1x64xf32>
    %528 = arith.addf %522, %527 : vector<1x64xf32>
    %c21 = arith.constant 21 : index
    %c0_162 = arith.constant 0 : index
    %529 = vector.load %arg15[%c21, %c0_162] : memref<32x138xf32, #tpu.memory_space<vmem>>, vector<1x138xf32>
    %530 = arith.truncf %529 : vector<1x138xf32> to vector<1x138xbf16>
    %c21_163 = arith.constant 21 : index
    %c0_164 = arith.constant 0 : index
    %c0_165 = arith.constant 0 : index
    %531 = vector.load %arg10[%c21_163, %c0_164, %c0_165] : memref<32x138x64xbf16, #tpu.memory_space<vmem>>, vector<1x138x64xbf16>
    %532 = vector.shape_cast %531 : vector<1x138x64xbf16> to vector<138x64xbf16>
    %cst_166 = arith.constant dense<0.000000e+00> : vector<1x64xf32>
    %533 = tpu.matmul %530, %532, %cst_166 {dimension_numbers = #tpu.dot_dimension_numbers<[1], [0], [0], [1], [0, 0, 1, 1], [], []>} : vector<1x138xbf16>, vector<138x64xbf16>, vector<1x64xf32> -> vector<1x64xf32>
    %534 = arith.addf %528, %533 : vector<1x64xf32>
    %c22 = arith.constant 22 : index
    %c0_167 = arith.constant 0 : index
    %535 = vector.load %arg15[%c22, %c0_167] : memref<32x138xf32, #tpu.memory_space<vmem>>, vector<1x138xf32>
    %536 = arith.truncf %535 : vector<1x138xf32> to vector<1x138xbf16>
    %c22_168 = arith.constant 22 : index
    %c0_169 = arith.constant 0 : index
    %c0_170 = arith.constant 0 : index
    %537 = vector.load %arg10[%c22_168, %c0_169, %c0_170] : memref<32x138x64xbf16, #tpu.memory_space<vmem>>, vector<1x138x64xbf16>
    %538 = vector.shape_cast %537 : vector<1x138x64xbf16> to vector<138x64xbf16>
    %cst_171 = arith.constant dense<0.000000e+00> : vector<1x64xf32>
    %539 = tpu.matmul %536, %538, %cst_171 {dimension_numbers = #tpu.dot_dimension_numbers<[1], [0], [0], [1], [0, 0, 1, 1], [], []>} : vector<1x138xbf16>, vector<138x64xbf16>, vector<1x64xf32> -> vector<1x64xf32>
    %540 = arith.addf %534, %539 : vector<1x64xf32>
    %c23 = arith.constant 23 : index
    %c0_172 = arith.constant 0 : index
    %541 = vector.load %arg15[%c23, %c0_172] : memref<32x138xf32, #tpu.memory_space<vmem>>, vector<1x138xf32>
    %542 = arith.truncf %541 : vector<1x138xf32> to vector<1x138xbf16>
    %c23_173 = arith.constant 23 : index
    %c0_174 = arith.constant 0 : index
    %c0_175 = arith.constant 0 : index
    %543 = vector.load %arg10[%c23_173, %c0_174, %c0_175] : memref<32x138x64xbf16, #tpu.memory_space<vmem>>, vector<1x138x64xbf16>
    %544 = vector.shape_cast %543 : vector<1x138x64xbf16> to vector<138x64xbf16>
    %cst_176 = arith.constant dense<0.000000e+00> : vector<1x64xf32>
    %545 = tpu.matmul %542, %544, %cst_176 {dimension_numbers = #tpu.dot_dimension_numbers<[1], [0], [0], [1], [0, 0, 1, 1], [], []>} : vector<1x138xbf16>, vector<138x64xbf16>, vector<1x64xf32> -> vector<1x64xf32>
    %546 = arith.addf %540, %545 : vector<1x64xf32>
    %c24 = arith.constant 24 : index
    %c0_177 = arith.constant 0 : index
    %547 = vector.load %arg15[%c24, %c0_177] : memref<32x138xf32, #tpu.memory_space<vmem>>, vector<1x138xf32>
    %548 = arith.truncf %547 : vector<1x138xf32> to vector<1x138xbf16>
    %c24_178 = arith.constant 24 : index
    %c0_179 = arith.constant 0 : index
    %c0_180 = arith.constant 0 : index
    %549 = vector.load %arg10[%c24_178, %c0_179, %c0_180] : memref<32x138x64xbf16, #tpu.memory_space<vmem>>, vector<1x138x64xbf16>
    %550 = vector.shape_cast %549 : vector<1x138x64xbf16> to vector<138x64xbf16>
    %cst_181 = arith.constant dense<0.000000e+00> : vector<1x64xf32>
    %551 = tpu.matmul %548, %550, %cst_181 {dimension_numbers = #tpu.dot_dimension_numbers<[1], [0], [0], [1], [0, 0, 1, 1], [], []>} : vector<1x138xbf16>, vector<138x64xbf16>, vector<1x64xf32> -> vector<1x64xf32>
    %552 = arith.addf %546, %551 : vector<1x64xf32>
    %c25 = arith.constant 25 : index
    %c0_182 = arith.constant 0 : index
    %553 = vector.load %arg15[%c25, %c0_182] : memref<32x138xf32, #tpu.memory_space<vmem>>, vector<1x138xf32>
    %554 = arith.truncf %553 : vector<1x138xf32> to vector<1x138xbf16>
    %c25_183 = arith.constant 25 : index
    %c0_184 = arith.constant 0 : index
    %c0_185 = arith.constant 0 : index
    %555 = vector.load %arg10[%c25_183, %c0_184, %c0_185] : memref<32x138x64xbf16, #tpu.memory_space<vmem>>, vector<1x138x64xbf16>
    %556 = vector.shape_cast %555 : vector<1x138x64xbf16> to vector<138x64xbf16>
    %cst_186 = arith.constant dense<0.000000e+00> : vector<1x64xf32>
    %557 = tpu.matmul %554, %556, %cst_186 {dimension_numbers = #tpu.dot_dimension_numbers<[1], [0], [0], [1], [0, 0, 1, 1], [], []>} : vector<1x138xbf16>, vector<138x64xbf16>, vector<1x64xf32> -> vector<1x64xf32>
    %558 = arith.addf %552, %557 : vector<1x64xf32>
    %c26 = arith.constant 26 : index
    %c0_187 = arith.constant 0 : index
    %559 = vector.load %arg15[%c26, %c0_187] : memref<32x138xf32, #tpu.memory_space<vmem>>, vector<1x138xf32>
    %560 = arith.truncf %559 : vector<1x138xf32> to vector<1x138xbf16>
    %c26_188 = arith.constant 26 : index
    %c0_189 = arith.constant 0 : index
    %c0_190 = arith.constant 0 : index
    %561 = vector.load %arg10[%c26_188, %c0_189, %c0_190] : memref<32x138x64xbf16, #tpu.memory_space<vmem>>, vector<1x138x64xbf16>
    %562 = vector.shape_cast %561 : vector<1x138x64xbf16> to vector<138x64xbf16>
    %cst_191 = arith.constant dense<0.000000e+00> : vector<1x64xf32>
    %563 = tpu.matmul %560, %562, %cst_191 {dimension_numbers = #tpu.dot_dimension_numbers<[1], [0], [0], [1], [0, 0, 1, 1], [], []>} : vector<1x138xbf16>, vector<138x64xbf16>, vector<1x64xf32> -> vector<1x64xf32>
    %564 = arith.addf %558, %563 : vector<1x64xf32>
    %c27 = arith.constant 27 : index
    %c0_192 = arith.constant 0 : index
    %565 = vector.load %arg15[%c27, %c0_192] : memref<32x138xf32, #tpu.memory_space<vmem>>, vector<1x138xf32>
    %566 = arith.truncf %565 : vector<1x138xf32> to vector<1x138xbf16>
    %c27_193 = arith.constant 27 : index
    %c0_194 = arith.constant 0 : index
    %c0_195 = arith.constant 0 : index
    %567 = vector.load %arg10[%c27_193, %c0_194, %c0_195] : memref<32x138x64xbf16, #tpu.memory_space<vmem>>, vector<1x138x64xbf16>
    %568 = vector.shape_cast %567 : vector<1x138x64xbf16> to vector<138x64xbf16>
    %cst_196 = arith.constant dense<0.000000e+00> : vector<1x64xf32>
    %569 = tpu.matmul %566, %568, %cst_196 {dimension_numbers = #tpu.dot_dimension_numbers<[1], [0], [0], [1], [0, 0, 1, 1], [], []>} : vector<1x138xbf16>, vector<138x64xbf16>, vector<1x64xf32> -> vector<1x64xf32>
    %570 = arith.addf %564, %569 : vector<1x64xf32>
    %c28 = arith.constant 28 : index
    %c0_197 = arith.constant 0 : index
    %571 = vector.load %arg15[%c28, %c0_197] : memref<32x138xf32, #tpu.memory_space<vmem>>, vector<1x138xf32>
    %572 = arith.truncf %571 : vector<1x138xf32> to vector<1x138xbf16>
    %c28_198 = arith.constant 28 : index
    %c0_199 = arith.constant 0 : index
    %c0_200 = arith.constant 0 : index
    %573 = vector.load %arg10[%c28_198, %c0_199, %c0_200] : memref<32x138x64xbf16, #tpu.memory_space<vmem>>, vector<1x138x64xbf16>
    %574 = vector.shape_cast %573 : vector<1x138x64xbf16> to vector<138x64xbf16>
    %cst_201 = arith.constant dense<0.000000e+00> : vector<1x64xf32>
    %575 = tpu.matmul %572, %574, %cst_201 {dimension_numbers = #tpu.dot_dimension_numbers<[1], [0], [0], [1], [0, 0, 1, 1], [], []>} : vector<1x138xbf16>, vector<138x64xbf16>, vector<1x64xf32> -> vector<1x64xf32>
    %576 = arith.addf %570, %575 : vector<1x64xf32>
    %c29 = arith.constant 29 : index
    %c0_202 = arith.constant 0 : index
    %577 = vector.load %arg15[%c29, %c0_202] : memref<32x138xf32, #tpu.memory_space<vmem>>, vector<1x138xf32>
    %578 = arith.truncf %577 : vector<1x138xf32> to vector<1x138xbf16>
    %c29_203 = arith.constant 29 : index
    %c0_204 = arith.constant 0 : index
    %c0_205 = arith.constant 0 : index
    %579 = vector.load %arg10[%c29_203, %c0_204, %c0_205] : memref<32x138x64xbf16, #tpu.memory_space<vmem>>, vector<1x138x64xbf16>
    %580 = vector.shape_cast %579 : vector<1x138x64xbf16> to vector<138x64xbf16>
    %cst_206 = arith.constant dense<0.000000e+00> : vector<1x64xf32>
    %581 = tpu.matmul %578, %580, %cst_206 {dimension_numbers = #tpu.dot_dimension_numbers<[1], [0], [0], [1], [0, 0, 1, 1], [], []>} : vector<1x138xbf16>, vector<138x64xbf16>, vector<1x64xf32> -> vector<1x64xf32>
    %582 = arith.addf %576, %581 : vector<1x64xf32>
    %c30 = arith.constant 30 : index
    %c0_207 = arith.constant 0 : index
    %583 = vector.load %arg15[%c30, %c0_207] : memref<32x138xf32, #tpu.memory_space<vmem>>, vector<1x138xf32>
    %584 = arith.truncf %583 : vector<1x138xf32> to vector<1x138xbf16>
    %c30_208 = arith.constant 30 : index
    %c0_209 = arith.constant 0 : index
    %c0_210 = arith.constant 0 : index
    %585 = vector.load %arg10[%c30_208, %c0_209, %c0_210] : memref<32x138x64xbf16, #tpu.memory_space<vmem>>, vector<1x138x64xbf16>
    %586 = vector.shape_cast %585 : vector<1x138x64xbf16> to vector<138x64xbf16>
    %cst_211 = arith.constant dense<0.000000e+00> : vector<1x64xf32>
    %587 = tpu.matmul %584, %586, %cst_211 {dimension_numbers = #tpu.dot_dimension_numbers<[1], [0], [0], [1], [0, 0, 1, 1], [], []>} : vector<1x138xbf16>, vector<138x64xbf16>, vector<1x64xf32> -> vector<1x64xf32>
    %588 = arith.addf %582, %587 : vector<1x64xf32>
    %c31 = arith.constant 31 : index
    %c0_212 = arith.constant 0 : index
    %589 = vector.load %arg15[%c31, %c0_212] : memref<32x138xf32, #tpu.memory_space<vmem>>, vector<1x138xf32>
    %590 = arith.truncf %589 : vector<1x138xf32> to vector<1x138xbf16>
    %c31_213 = arith.constant 31 : index
    %c0_214 = arith.constant 0 : index
    %c0_215 = arith.constant 0 : index
    %591 = vector.load %arg10[%c31_213, %c0_214, %c0_215] : memref<32x138x64xbf16, #tpu.memory_space<vmem>>, vector<1x138x64xbf16>
    %592 = vector.shape_cast %591 : vector<1x138x64xbf16> to vector<138x64xbf16>
    %cst_216 = arith.constant dense<0.000000e+00> : vector<1x64xf32>
    %593 = tpu.matmul %590, %592, %cst_216 {dimension_numbers = #tpu.dot_dimension_numbers<[1], [0], [0], [1], [0, 0, 1, 1], [], []>} : vector<1x138xbf16>, vector<138x64xbf16>, vector<1x64xf32> -> vector<1x64xf32>
    %594 = arith.addf %588, %593 : vector<1x64xf32>
    %cst_217 = arith.constant 0.000000e+00 : f32
    %595 = vector.broadcast %cst_217 : f32 to vector<1x64xf32>
    %596 = arith.cmpf ogt, %594, %595 : vector<1x64xf32>
    %cst_218 = arith.constant 0.00999999977 : f32
    %597 = vector.broadcast %cst_218 : f32 to vector<1x64xf32>
    %598 = arith.mulf %597, %594 : vector<1x64xf32>
    %599 = arith.select %596, %594, %598 : vector<1x64xi1>, vector<1x64xf32>
    %600 = arith.truncf %599 : vector<1x64xf32> to vector<1x64xbf16>
    %c0_219 = arith.constant 0 : index
    %c0_220 = arith.constant 0 : index
    %601 = vector.load %arg11[%c0_219, %c0_220] : memref<64x128xbf16, #tpu.memory_space<vmem>>, vector<64x128xbf16>
    %cst_221 = arith.constant dense<0.000000e+00> : vector<1x128xf32>
    %602 = tpu.matmul %600, %601, %cst_221 {dimension_numbers = #tpu.dot_dimension_numbers<[1], [0], [0], [1], [0, 0, 1, 1], [], []>} : vector<1x64xbf16>, vector<64x128xbf16>, vector<1x128xf32> -> vector<1x128xf32>
    %603 = vector.extract_strided_slice %401 {offsets = [0, 64], sizes = [1, 128], strides = [1, 1]} : vector<1x280xf32> to vector<1x128xf32>
    %604 = arith.addf %602, %603 : vector<1x128xf32>
    %cst_222 = arith.constant 0.000000e+00 : f32
    %605 = vector.broadcast %cst_222 : f32 to vector<1x128xf32>
    %606 = arith.cmpf ogt, %604, %605 : vector<1x128xf32>
    %cst_223 = arith.constant 0.00999999977 : f32
    %607 = vector.broadcast %cst_223 : f32 to vector<1x128xf32>
    %608 = arith.mulf %607, %604 : vector<1x128xf32>
    %609 = arith.select %606, %604, %608 : vector<1x128xi1>, vector<1x128xf32>
    %610 = arith.truncf %609 : vector<1x128xf32> to vector<1x128xbf16>
    %c0_224 = arith.constant 0 : index
    %c0_225 = arith.constant 0 : index
    %611 = vector.load %arg12[%c0_224, %c0_225] : memref<128x88xbf16, #tpu.memory_space<vmem>>, vector<128x88xbf16>
    %cst_226 = arith.constant dense<0.000000e+00> : vector<1x88xf32>
    %612 = tpu.matmul %610, %611, %cst_226 {dimension_numbers = #tpu.dot_dimension_numbers<[1], [0], [0], [1], [0, 0, 1, 1], [], []>} : vector<1x128xbf16>, vector<128x88xbf16>, vector<1x88xf32> -> vector<1x88xf32>
    %613 = vector.extract_strided_slice %401 {offsets = [0, 192], sizes = [1, 88], strides = [1, 1]} : vector<1x280xf32> to vector<1x88xf32>
    %614 = arith.addf %612, %613 : vector<1x88xf32>
    %615 = arith.negf %614 : vector<1x88xf32>
    %616 = math.exp %615 : vector<1x88xf32>
    %cst_227 = arith.constant 1.000000e+00 : f32
    %617 = vector.broadcast %cst_227 : f32 to vector<1x88xf32>
    %618 = arith.addf %617, %616 : vector<1x88xf32>
    %619 = arith.divf %617, %618 : vector<1x88xf32>
    %c0_228 = arith.constant 0 : index
    %c0_229 = arith.constant 0 : index
    %c0_230 = arith.constant 0 : index
    %620 = vector.load %arg14[%c0_228, %c0_229, %c0_230] : memref<1x1x88xf32, #tpu.memory_space<vmem>>, vector<1x1x88xf32>
    %621 = vector.shape_cast %620 : vector<1x1x88xf32> to vector<1x88xf32>
    %622 = vector.shape_cast %619 : vector<1x88xf32> to vector<1x1x88xf32>
    tpu.vector_store %arg14[%c0_228, %c0_229, %c0_230], %622 {strides = array<i32>} : memref<1x1x88xf32, #tpu.memory_space<vmem>>, vector<1x1x88xf32>,
    return
  }
  func.func @transform_0(%arg0: i32) -> (i32, i32, i32, i32) {
    %c0_i32 = arith.constant 0 : i32
    %c0_i32_0 = arith.constant 0 : i32
    %c0_i32_1 = arith.constant 0 : i32
    %c0_i32_2 = arith.constant 0 : i32
    return %arg0, %c0_i32, %c0_i32_0, %c0_i32_1 : i32, i32, i32, i32
  }
  func.func @transform_1(%arg0: i32) -> (i32, i32) {
    %c0_i32 = arith.constant 0 : i32
    %c0_i32_0 = arith.constant 0 : i32
    %c0_i32_1 = arith.constant 0 : i32
    return %c0_i32, %c0_i32_0 : i32, i32
  }
  func.func @transform_2(%arg0: i32) -> (i32, i32) {
    %c0_i32 = arith.constant 0 : i32
    %c0_i32_0 = arith.constant 0 : i32
    %c0_i32_1 = arith.constant 0 : i32
    return %c0_i32, %c0_i32_0 : i32, i32
  }
  func.func @transform_3(%arg0: i32) -> (i32, i32) {
    %c0_i32 = arith.constant 0 : i32
    %c0_i32_0 = arith.constant 0 : i32
    %c0_i32_1 = arith.constant 0 : i32
    return %c0_i32, %c0_i32_0 : i32, i32
  }
  func.func @transform_4(%arg0: i32) -> (i32, i32) {
    %c0_i32 = arith.constant 0 : i32
    %c0_i32_0 = arith.constant 0 : i32
    %c0_i32_1 = arith.constant 0 : i32
    return %c0_i32, %c0_i32_0 : i32, i32
  }
  func.func @transform_5(%arg0: i32) -> (i32, i32) {
    %c0_i32 = arith.constant 0 : i32
    %c0_i32_0 = arith.constant 0 : i32
    %c0_i32_1 = arith.constant 0 : i32
    return %c0_i32, %c0_i32_0 : i32, i32
  }
  func.func @transform_6(%arg0: i32) -> (i32, i32) {
    %c0_i32 = arith.constant 0 : i32
    %c0_i32_0 = arith.constant 0 : i32
    %c0_i32_1 = arith.constant 0 : i32
    return %c0_i32, %c0_i32_0 : i32, i32
  }
  func.func @transform_7(%arg0: i32) -> (i32, i32) {
    %c0_i32 = arith.constant 0 : i32
    %c0_i32_0 = arith.constant 0 : i32
    %c0_i32_1 = arith.constant 0 : i32
    return %c0_i32, %c0_i32_0 : i32, i32
  }
  func.func @transform_8(%arg0: i32) -> (i32, i32) {
    %c0_i32 = arith.constant 0 : i32
    %c0_i32_0 = arith.constant 0 : i32
    %c0_i32_1 = arith.constant 0 : i32
    return %c0_i32, %c0_i32_0 : i32, i32
  }
  func.func @transform_9(%arg0: i32) -> (i32, i32, i32) {
    %c0_i32 = arith.constant 0 : i32
    %c0_i32_0 = arith.constant 0 : i32
    %c0_i32_1 = arith.constant 0 : i32
    %c0_i32_2 = arith.constant 0 : i32
    return %c0_i32, %c0_i32_0, %c0_i32_1 : i32, i32, i32
  }
  func.func @transform_10(%arg0: i32) -> (i32, i32) {
    %c0_i32 = arith.constant 0 : i32
    %c0_i32_0 = arith.constant 0 : i32
    %c0_i32_1 = arith.constant 0 : i32
    return %c0_i32, %c0_i32_0 : i32, i32
  }
  func.func @transform_11(%arg0: i32) -> (i32, i32) {
    %c0_i32 = arith.constant 0 : i32
    %c0_i32_0 = arith.constant 0 : i32
    %c0_i32_1 = arith.constant 0 : i32
    return %c0_i32, %c0_i32_0 : i32, i32
  }
  func.func @transform_12(%arg0: i32) -> (i32, i32) {
    %c0_i32 = arith.constant 0 : i32
    %c0_i32_0 = arith.constant 0 : i32
    %c0_i32_1 = arith.constant 0 : i32
    return %c0_i32, %c0_i32_0 : i32, i32
  }
  func.func @transform_13(%arg0: i32) -> (i32, i32, i32) {
    %c0_i32 = arith.constant 0 : i32
    %c0_i32_0 = arith.constant 0 : i32
    %c0_i32_1 = arith.constant 0 : i32
    return %arg0, %c0_i32, %c0_i32_0 : i32, i32, i32
  }
}

</mosaic_0001>

<bundles_post_ra>
// kernel: longnet_forward.1
= control target key start
LH: loop header
LB: loop body
LE: loop exit
PB: predicated region body
PF: predicated region fallthrough
CT: control target
= control target key end

     0   :  { %s13514_s0 = inlined_call_operand.vmem [shape: f32[2,1,5,384], index: 0, kind: input, shape index: {}]   ;;  %s13515_s1 = inlined_call_operand.vmem [shape: f32[16,9], index: 1, kind: input, shape index: {}]   ;;  %s13516_s2 = inlined_call_operand.vmem [shape: f32[16,6], index: 2, kind: input, shape index: {}]   ;;  %s13517_s3 = inlined_call_operand.vmem [shape: f32[16,144], index: 3, kind: input, shape index: {}]   ;;  %s13518_s4 = inlined_call_operand.vmem [shape: f32[32,48], index: 4, kind: input, shape index: {}]   ;;  %s13519_s5 = inlined_call_operand.vmem [shape: f32[32,1], index: 5, kind: input, shape index: {}]   ;;  %s13520_s6 = inlined_call_operand.vmem [shape: f32[383,192], index: 6, kind: input, shape index: {}]   ;;  %s13521_s7 = inlined_call_operand.vmem [shape: f32[189,95], index: 7, kind: input, shape index: {}]   ;;  %s13522_s8 = inlined_call_operand.vmem [shape: f32[92,46], index: 8, kind: input, shape index: {}]   ;;  %s13523_s9 = inlined_call_operand.vmem [shape: bf16[32,138,64], index: 9, kind: input, shape index: {}]   ;;  %s13524_s10 = inlined_call_operand.vmem [shape: bf16[64,128], index: 10, kind: input, shape index: {}]   ;;  %s13525_s11 = inlined_call_operand.vmem [shape: bf16[128,88], index: 11, kind: input, shape index: {}]   ;;  %s13526_s12 = inlined_call_operand.vmem [shape: f32[1,280], index: 12, kind: input, shape index: {}]   ;;  %s13527_s13 = inlined_call_operand.hbm [shape: f32[2,1,88], index: 13, kind: output, shape index: {}]  }
   0x1   :  { %13608 = sst [smem:[#allocation79_spill]] %s13514_s0 }
   0x2   :  { %13609 = sst [smem:[#allocation80_spill]] %s13515_s1 }
   0x3   :  { %18 = vsyncpa [#allocation4], 0 }
   0x4   :  { %20 = vsyncpa [#allocation4 + $0x1], 0  ;;  %s9655_s25 = smov 0   ;;  %s9657_s26 = smov 0  }
   0x5   :  { %s9659_s27 = smov 0   ;;  %s9661_s28 = smov 0  }
   0x6 LB: > { %s9676_s29 = sadd.s32 4294967295, %s9565_s28   ;;  %s7919_s30 = sadd.s32 4294967294, %s9565_s28   ;;  %s9565_s28 = sphi %s9661_s28, %s13834_s28   ;;  %s9561_s27 = sphi %s9659_s27, %s13833_s27   ;;  %s9557_s26 = sphi %s9657_s26, %s13832_s26   ;;  %s9553_s25 = sphi %s9655_s25, %s13831_s25  }
   0x7   : > { %s9680_s14 = sadd.s32 1, %s9565_s28   ;;  %s311_s15 = sadd.s32 1, %s9561_s27 }
   0x8   : > { %s308_s16 = ssub.s32 %s9565_s28, %s9680_s14  ;;  %p321_p0 = scmp.ne.s32.totalorder %s9561_s27, %s9557_s26 }
   0x9   : > { %p309_p1 = scmp.eq.s32.totalorder %s308_s16, 0  ;;  %p322_p2 = scmp.eq.s32.totalorder %s9676_s29, 1 }
   0xa   : > { %p327_p3 = scmp.ne.s32.totalorder %s9557_s26, %s9553_s25  ;;  %p328_p4 = scmp.eq.s32.totalorder %s7919_s30, 1 }
   0xb   : > { %s9691_s17 = scalar_select %p309_p1, %s9561_s27, %s311_s15  }
   0xc   : > { %p9693_p5 = por %p322_p2, %p321_p0  ;;  %p9697_p6 = por %p328_p4, %p327_p3 }
   0xd   : > { %13610 = sst [smem:[#allocation6_spill]] %s9691_s17  ;;  %p7922_p7 = scmp.ge.s32.totalorder %s9565_s28, 1 }
   0xe   : > { %p390_p8 = scmp.lt.s32.totalorder %s9565_s28, 3 }
  0x10   : > { %p391_p9 = pnand %p7922_p7, %p390_p8 }
  0x12   : > { %394 = sbr.rel (%p391_p9) target bundleno = 3323 (0xcfb), region = 72 }
  0x17   : > { %s13613_s1 = sld [smem:[#allocation80_spill]]  ;;  %p433_p10 = scmp.lt.s32.totalorder %s9676_s29, 1  ;;  %v485_v1 = vlaneseq  ;;  %v9567_v2 = vmov 6   ;;  %v13531_v3 = vmov 4   ;;  %v9569_v5 = vmov 7   ;;  %v440_v31 = vld [vmem:[%s13516_s2 + $0x8] sm:$0xff] }
  0x18   : > { %9123 = vset.pattern.permute.xlu1 %v9567_v2  ;;  %9122 = vset.pattern.permute.xlu0 %v13531_v3  ;;  %s13614_s0 = sld [smem:[#allocation79_spill]]  ;;  %v13530_v6 = vmov 5   ;;  %s9571_s16 = smov 1   ;;  %v9572_v24 = vmov 8   ;;  %v9573_v26 = vmov 3   ;;  %v9575_v30 = vmov 2  }
  0x19   : > { %s434_s22 = scalar_select %p433_p10, %s9676_s29, 1  ;;  %v9713_v4 = vshrl.u32 %v485_v1, 7  ;;  %v13528_v32 = vmov 0   ;;  %v9577_v33 = vmov 1   ;;  %v439_v34 = vld [vmem:[%s13516_s2] sm:$0xff]  ;;  %vm455_vm0 = vcmask 7168  }
  0x1a   : > { %vm468_vm1 = vcmask 1039360   ;;  %s8866_s24 = sshll.u32 %s9676_s29, 4  ;;  %s9584_s20 = smov [#allocation3]  }
  0x1b   : > { %s9065_s23 = smul.u32 24, %s434_s22  ;;  %v9720_v7 = vsub.s32 0, %v9713_v4  ;;  %v9723_v8 = vsub.s32 1, %v9713_v4  ;;  %v9737_v14 = vsub.s32 2, %v9713_v4  ;;  %v9740_v15 = vsub.s32 4, %v9713_v4  ;;  %s13580_s22 = smov 127  }
  0x1c   : > { %v9812_v42 = vsub.s32 3, %v9713_v4  ;;  %s9509_s21 = sshll.u32 %s9584_s20, 4  ;;  %s9510_s21 = int_to_ptr.vmem [resolvable:$false] %s9509_s21 }
  0x1d   : > { %v9706_v0 = vld [vmem:[%s13613_s1] sm:$0xff]  ;;  %13615 = vst [vmem:[#allocation7_spill] sm:$0xff] %v9720_v7  ;;  %13616 = vst [vmem:[#allocation8_spill] sm:$0xff] %v9723_v8  ;;  %v442_v27 = vld [vmem:[%s13613_s1 + $0x8] sm:$0xff]  ;;  %s9580_s1 = smov 46   ;;  %s9511_s29 = scalar_lea.vmem %s9510_s21, 32 }
  0x1e   : > { %739 = vperm.xlu1 %9123, %v9706_v0   ;;  %582 = vperm.xlu0 %9122, %v9706_v0   ;;  %s437_s15 = scalar_lea.vmem %s13614_s0, %s9065_s23  ;;  %13617 = vst [vmem:[#allocation9_spill] sm:$0xff] %v9737_v14  ;;  %s9579_s0 = smov 126  }
  0x1f   : > { %v9726_v9 = vld [vmem:[%s437_s15 + $0x8] sm:$0x1f]  ;;  %v9728_v10 = vld [vmem:[%s437_s15] sm:$0x1f]  ;;  %v9730_v11 = vld [vmem:[%s437_s15 + $0x10] sm:$0x1f] }
  0x20   : > { %v621_v12 = vrot.slane %v9728_v10, 1  ;;  %v623_v13 = vrot.slane %v9730_v11, 1  ;;  %v622_v16 = vrot.slane %v9726_v9, 1  ;;  %v800_v17 = vrot.slane %v9730_v11, 2  ;;  %s431_s23 = sand.u32 1, %s9557_s26  }
  0x21   : > { %v798_v18 = vrot.slane %v9728_v10, 2  ;;  %v953_v19 = vrot.slane %v9730_v11, 3  ;;  %v799_v20 = vrot.slane %v9726_v9, 2  ;;  %v1104_v21 = vrot.slane %v9728_v10, 4  ;;  %s432_s17 = scalar_lea.vmem [#allocation3], %s431_s23 }
  0x22   : > { %9124 = vset.pattern.permute.xlu1 %v9569_v5  ;;  %9125 = vset.pattern.permute.xlu0 %v13530_v6  ;;  %v951_v22 = vrot.slane %v9728_v10, 3  ;;  %v952_v23 = vrot.slane %v9726_v9, 3  ;;  %v9755_v25 = vrot.slane %v9730_v11, %v9740_v15  ;;  %v1106_v28 = vrot.slane %v9730_v11, 4  ;;  %s7864_s30 = sshll.u32 %s432_s17, 4  ;;  %s7865_s30 = int_to_ptr.vmem [resolvable:$true] %s7864_s30 }
  0x23   : > { %753 = vperm.xlu1 %9124, %v9706_v0   ;;  %451 = vrot.lane.b32.xlu0 %v9726_v9, %s9571_s16  ;;  %v1105_v29 = vrot.slane %v9726_v9, 4  ;;  %v9816_v43 = vrot.slane %v9730_v11, %v9720_v7  ;;  %v9820_v44 = vrot.slane %v9728_v10, %v9720_v7  ;;  %v9824_v45 = vrot.slane %v9728_v10, %v9740_v15  ;;  %p9512_p0 = scmp.lt.s32.totalorder %s7865_s30, %s9510_s21 }
  0x24   : > { %v9828_v46 = vrot.slane %v9730_v11, %v9723_v8  ;;  %v9832_v47 = vrot.slane %v9726_v9, %v9720_v7  ;;  %v9836_v48 = vrot.slane %v9728_v10, %v9723_v8  ;;  %v9840_v50 = vrot.slane %v9726_v9, %v9723_v8 }
  0x25   : > { %v9844_v51 = vrot.slane %v9726_v9, %v9740_v15  ;;  %v9848_v52 = vrot.slane %v9730_v11, %v9737_v14  ;;  %v9852_v53 = vrot.slane %v9728_v10, %v9737_v14  ;;  %v9856_v54 = vrot.slane %v9726_v9, %v9737_v14 }
  0x26   : > { %13620 = vst [vmem:[#allocation12_spill] sm:$0xff] %v9828_v46  ;;  %13621 = vst [vmem:[#allocation13_spill] sm:$0xff] %v9836_v48  ;;  %v9860_v55 = vrot.slane %v9730_v11, %v9812_v42  ;;  %v9864_v56 = vrot.slane %v9728_v10, %v9812_v42  ;;  %v9868_v57 = vrot.slane %v9726_v9, %v9812_v42 }
  0x27   : > { %449 = vrot.lane.b32.xlu1 %v9728_v10, %s9571_s16  ;;  %602 = vperm.xlu0 %9125, %v9706_v0   ;;  %13622 = vst [vmem:[#allocation14_spill] sm:$0xff] %v9840_v50  ;;  %13623 = vst [vmem:[#allocation15_spill] sm:$0xff] %v9848_v52 }
  0x28   : > { %9127 = vset.pattern.permute.xlu1 %v9572_v24  ;;  %13624 = vst [vmem:[#allocation16_spill] sm:$0xff] %v9852_v53  ;;  %13625 = vst [vmem:[#allocation17_spill] sm:$0xff] %v9856_v54 }
  0x29   : > { %13626 = vst [vmem:[#allocation18_spill] sm:$0xff] %v9860_v55  ;;  %13627 = vst [vmem:[#allocation19_spill] sm:$0xff] %v9864_v56 }
  0x2a   : > { %13628 = vst [vmem:[#allocation20_spill] sm:$0xff] %v9868_v57 }
  0x2b   : > { %453 = vrot.lane.b32.xlu1 %v9730_v11, %s9571_s16  ;;  %9126 = vset.pattern.permute.xlu0 %v9573_v26 }
  0x2c   : > { %568 = vperm.xlu0 %9126, %v9706_v0  }
  0x2f   : > { %624 = vrot.lane.b32.xlu1 %v621_v12, %s9571_s16 }
  0x30   : > { %628 = vrot.lane.b32.xlu0 %v623_v13, %s9571_s16 }
  0x33   : > { %626 = vrot.lane.b32.xlu1 %v622_v16, %s9571_s16 }
  0x34   : > { %464 = vrot.lane.b32.xlu0 %v9726_v9, %s13580_s22 }
  0x37   : > { %773 = vperm.xlu1 %9127, %v9706_v0  }
  0x38   : > { %572 = vperm.xlu0 %9126, %v442_v27  }
  0x3b   : > { %466 = vrot.lane.b32.xlu1 %v9730_v11, %s13580_s22 }
  0x3c   : > { %9128 = vset.pattern.permute.xlu1 %v13531_v3  ;;  %9130 = vset.pattern.permute.xlu0 %v9569_v5 }
  0x3d   : > { %757 = vperm.xlu0 %9130, %v442_v27  }
  0x3f   : > { %586 = vperm.xlu1 %9128, %v442_v27  }
  0x41   : > { %9134 = vset.pattern.permute.xlu0 %v9575_v30 }
  0x42   : > { %536 = vperm.xlu0 %9134, %v9706_v0  }
  0x43   : > { %9129 = vset.pattern.permute.xlu1 %v9567_v2 }
  0x44   : > { %743 = vperm.xlu1 %9129, %v442_v27  }
  0x46   : > { %805 = vrot.lane.b32.xlu0 %v800_v17, %s9571_s16 }
  0x47   : > { %9137 = vset.pattern.permute.xlu0 %v13528_v32 }
  0x48   : > { %462 = vrot.lane.b32.xlu1 %v9728_v10, %s13580_s22  ;;  %s13725_s22 = smov 127  }
  0x49   : > { %9131 = vset.pattern.permute.xlu1 %v13528_v32 }
  0x4a   : > { %1234 = vperm.xlu0 %9137, %v440_v31  }
  0x4c   : > { %477 = vperm.xlu1 %9131, %v9706_v0  }
  0x4e   : > { %9138 = vset.pattern.permute.xlu0 %v9577_v33 }
  0x4f   : > { %504 = vperm.xlu0 %9138, %v9706_v0  }
  0x50   : > { %9132 = vset.pattern.permute.xlu1 %v13530_v6 }
  0x51   : > { %606 = vperm.xlu1 %9132, %v442_v27  }
  0x53   : > { %508 = vperm.xlu0 %9138, %v442_v27  }
  0x55   : > { %9133 = vset.pattern.permute.xlu1 %v9572_v24 }
  0x56   : > { %777 = vperm.xlu1 %9133, %v442_v27  }
  0x57   : > { %1266 = vperm.xlu0 %9138, %v440_v31  }
  0x5a   : > { %9135 = vset.pattern.permute.xlu1 %v13528_v32 }
  0x5b   : > { %1229 = vperm.xlu1 %9135, %v439_v34   ;;  %958 = vrot.lane.b32.xlu0 %v953_v19, %s9571_s16 }
  0x5c   : > { %9192 = vset.pattern.permute.xlu0 %v9573_v26 }
  0x5f   : > { %482 = vperm.xlu1 %9135, %v442_v27   ;;  %1107 = vrot.lane.b32.xlu0 %v1104_v21, %s9571_s16 }
  0x63   : > { %801 = vrot.lane.b32.xlu1 %v798_v18, %s9571_s16  ;;  %1111 = vrot.lane.b32.xlu0 %v1106_v28, %s9571_s16 }
  0x64   : > { %9136 = vset.pattern.permute.xlu1 %v9575_v30 }
  0x67   : > { %803 = vrot.lane.b32.xlu1 %v799_v20, %s9571_s16 }
  0x6b   : > { %540 = vperm.xlu1 %9136, %v442_v27  }
  0x6f   : > { %9139 = vset.pattern.permute.xlu1 %v9577_v33 }
  0x70   : > { %1262 = vperm.xlu1 %9139, %v439_v34  }
  0x74   : > { %9140 = vset.pattern.permute.xlu1 %v9575_v30 }
  0x75   : > { %1276 = vperm.xlu1 %9140, %v439_v34  }
  0x79   : > { %954 = vrot.lane.b32.xlu1 %v951_v22, %s9571_s16 }
  0x7d   : > { %956 = vrot.lane.b32.xlu1 %v952_v23, %s9571_s16 }
  0x81   : > { %1280 = vperm.xlu1 %9140, %v440_v31  }
  0x85   : > { %1109 = vrot.lane.b32.xlu1 %v1105_v29, %s9571_s16  ;;  %s9505_s16 = scalar_lea.vmem %s7865_s30, 16 }
  0x86   : > { %9191 = vset.pattern.permute.xlu1 %v9573_v26  ;;  %p9506_p11 = scmp.ne.s32.totalorder %s7865_s30, %s9505_s16  ;;  %p9513_p1 = scmp.lt.s32.totalorder %s9511_s29, %s9505_s16 }
  0x88   : > { %p9507_p12 = pnand %p9506_p11, %p9693_p5  ;;  %p9514_p2 = por %p9513_p1, %p9512_p0 }
  0x8a   : > { %p9508_p13 = pneg %p9507_p12 }
  0x8c   : > { %p9515_p3 = pnand %p9514_p2, %p9508_p13 }
  0x99   : > { %v9802_v35 = vpop.permute.xlu1 %739  ;;  %v9804_v36 = vpop.permute.xlu0 %582 }
  0x9a   : > { %13618 = vst [vmem:[#allocation10_spill] sm:$0xff] %v9802_v35  ;;  %v9875_v60 = vmul.f32 %v9824_v45, %v9804_v36  ;;  %v591_v61 = vmul.f32 %v9804_v36, %v9816_v43  ;;  %v589_v62 = vmul.f32 %v9804_v36, %v9820_v44  ;;  %v590_v63 = vmul.f32 %v9804_v36, %v9832_v47 }
  0x9b   : > { %v9885_v0 = vmul.f32 %v9844_v51, %v9804_v36  ;;  %v9889_v1 = vmul.f32 %v9755_v25, %v9804_v36  ;;  %v710_v2 = vmul.f32 %v9828_v46, %v9804_v36  ;;  %v708_v9 = vmul.f32 %v9836_v48, %v9804_v36 }
  0x9c   : > { %13629 = vst [vmem:[#allocation21_spill] sm:$0xff] %v9875_v60  ;;  %v709_v10 = vmul.f32 %v9840_v50, %v9804_v36  ;;  %v9900_v11 = vmul.f32 %v9848_v52, %v9804_v36  ;;  %v9908_v16 = vmul.f32 %v9852_v53, %v9804_v36  ;;  %v9912_v17 = vmul.f32 %v9856_v54, %v9804_v36 }
  0x9d   : > { %v452_v37 = vpop.permute.xlu0 %451  ;;  %13630 = vst [vmem:[#allocation22_spill] sm:$0xff] %v9885_v0  ;;  %13631 = vst [vmem:[#allocation23_spill] sm:$0xff] %v9889_v1 }
  0x9e   : > { %v9806_v38 = vpop.permute.xlu1 %753  ;;  %13632 = vst [vmem:[#allocation24_spill] sm:$0xff] %v9900_v11  ;;  %13633 = vst [vmem:[#allocation25_spill] sm:$0xff] %v9908_v16 }
  0x9f   : > { %13634 = vst [vmem:[#allocation26_spill] sm:$0xff] %v9912_v17  ;;  %v9922_v21 = vmul.f32 %v9824_v45, %v9806_v38  ;;  %v762_v22 = vmul.f32 %v9806_v38, %v9828_v46  ;;  %v760_v24 = vmul.f32 %v9806_v38, %v9836_v48  ;;  %v761_v26 = vmul.f32 %v9806_v38, %v9840_v50 }
  0xa0   : > { %v9935_v27 = vmul.f32 %v9844_v51, %v9806_v38  ;;  %v9941_v30 = vmul.f32 %v9755_v25, %v9806_v38  ;;  %v9945_v31 = vmul.f32 %v9848_v52, %v9806_v38  ;;  %v9949_v33 = vmul.f32 %v9852_v53, %v9806_v38 }
  0xa1   : > { %13636 = vst [vmem:[#allocation28_spill] sm:$0xff] %v9922_v21 }
  0xa2   : > { %v450_v39 = vpop.permute.xlu1 %449  ;;  %v9809_v41 = vpop.permute.xlu0 %602  ;;  %13637 = vst [vmem:[#allocation29_spill] sm:$0xff] %v9935_v27  ;;  %13638 = vst [vmem:[#allocation30_spill] sm:$0xff] %v9941_v30 }
  0xa3   : > { %v461_v40 = vsel %vm455_vm0, 0.0, %v450_v39  ;;  %13619 = vst [vmem:[#allocation11_spill] sm:$0xff] %v9809_v41  ;;  %v456_v4 = vsel %vm455_vm0, %v450_v39, %v452_v37  ;;  %13639 = vst [vmem:[#allocation31_spill] sm:$0xff] %v9945_v31 }
  0xa4   : > { %v9915_v18 = vrot.slane %v461_v40, %v9720_v7  ;;  %v9927_v23 = vrot.slane %v456_v4, %v9720_v7  ;;  %13640 = vst [vmem:[#allocation32_spill] sm:$0xff] %v9949_v33 }
  0xa6   : > { %v454_v49 = vpop.permute.xlu1 %453 }
  0xa7   : > { %v457_v58 = vsel %vm455_vm0, %v452_v37, %v454_v49  ;;  %v9871_v59 = vpop.permute.xlu0 %568 }
  0xa8   : > { %v9903_v12 = vrot.slane %v457_v58, %v9720_v7  ;;  %v575_v29 = vmul.f32 %v9871_v59, %v9915_v18  ;;  %v576_v40 = vmul.f32 %v9871_v59, %v9927_v23 }
  0xaa   : > { %v625_v5 = vpop.permute.xlu1 %624  ;;  %v577_v39 = vmul.f32 %v9871_v59, %v9903_v12  ;;  %v9995_v27 = vadd.f32 %v589_v62, %v575_v29  ;;  %v596_v16 = vadd.f32 %v590_v63, %v576_v40 }
  0xab   : > { %v635_v13 = vsel %vm455_vm0, 0.0, %v625_v5  ;;  %v629_v20 = vpop.permute.xlu0 %628 }
  0xac   : > { %v9918_v19 = vrot.slane %v635_v13, %v9720_v7  ;;  %v597_v0 = vadd.f32 %v591_v61, %v577_v39 }
  0xae   : > { %13635 = vst [vmem:[#allocation27_spill] sm:$0xff] %v9918_v19  ;;  %v627_v28 = vpop.permute.xlu1 %626  ;;  %v702_v49 = vmul.f32 %v9918_v19, %v9871_v59 }
  0xaf   : > { %v630_v34 = vsel %vm455_vm0, %v625_v5, %v627_v28  ;;  %v631_v37 = vsel %vm455_vm0, %v627_v28, %v629_v20  ;;  %v9965_v13 = vpop.permute.xlu0 %464  ;;  %v746_v5 = vmul.f32 %v9802_v35, %v9918_v19  ;;  %v9971_v20 = vmul.f32 %v9856_v54, %v9806_v38 }
  0xb0   : > { %v9960_v58 = vrot.slane %v630_v34, %v9720_v7  ;;  %v9963_v4 = vrot.slane %v631_v37, %v9720_v7  ;;  %v9975_v28 = vmul.f32 %v9860_v55, %v9806_v38  ;;  %v9979_v34 = vmul.f32 %v9864_v56, %v9806_v38 }
  0xb1   : > { %13643 = vst [vmem:[#allocation35_spill] sm:$0xff] %v9971_v20  ;;  %v9983_v37 = vmul.f32 %v9868_v57, %v9806_v38  ;;  %v9999_v38 = vmul.f32 %v9860_v55, %v9804_v36  ;;  %v10013_v62 = vadd.f32 %v708_v9, %v702_v49 }
  0xb2   : > { %13641 = vst [vmem:[#allocation33_spill] sm:$0xff] %v9960_v58  ;;  %13642 = vst [vmem:[#allocation34_spill] sm:$0xff] %v9963_v4  ;;  %v703_v32 = vmul.f32 %v9960_v58, %v9871_v59  ;;  %v9987_v6 = vpop.permute.xlu1 %773  ;;  %v748_v3 = vmul.f32 %v9802_v35, %v9963_v4  ;;  %v747_v17 = vmul.f32 %v9802_v35, %v9960_v58 }
  0xb3   : > { %13644 = vst [vmem:[#allocation36_spill] sm:$0xff] %v9975_v28  ;;  %13645 = vst [vmem:[#allocation37_spill] sm:$0xff] %v9979_v34  ;;  %v704_v30 = vmul.f32 %v9963_v4, %v9871_v59  ;;  %v10007_v34 = vmul.f32 %v9868_v57, %v9804_v36  ;;  %v10009_v1 = vpop.permute.xlu0 %572  ;;  %v10011_v28 = vadd.f32 %v760_v24, %v746_v5 }
  0xb4   : > { %13646 = vst [vmem:[#allocation38_spill] sm:$0xff] %v9983_v37  ;;  %13647 = vst [vmem:[#allocation39_spill] sm:$0xff] %v9987_v6  ;;  %v10003_v37 = vmul.f32 %v9864_v56, %v9804_v36  ;;  %v768_v29 = vadd.f32 %v762_v22, %v748_v3  ;;  %v767_v11 = vadd.f32 %v761_v26, %v747_v17 }
  0xb5   : > { %13648 = vst [vmem:[#allocation40_spill] sm:$0xff] %v9999_v38  ;;  %13650 = vst [vmem:[#allocation42_spill] sm:$0xff] %v10007_v34  ;;  %v10015_v55 = vadd.f32 %v710_v2, %v704_v30  ;;  %v10017_v38 = vadd.f32 %v709_v10, %v703_v32  ;;  %v578_v36 = vmul.f32 %v10009_v1, %v9915_v18 }
  0xb6   : > { %13649 = vst [vmem:[#allocation41_spill] sm:$0xff] %v10003_v37  ;;  %13651 = vst [vmem:[#allocation43_spill] sm:$0xff] %v10009_v1  ;;  %v467_v56 = vpop.permute.xlu1 %466  ;;  %v580_v37 = vmul.f32 %v10009_v1, %v9903_v12  ;;  %v579_v61 = vmul.f32 %v10009_v1, %v9927_v23  ;;  %v10027_v63 = vmul.f32 %v9963_v4, %v10009_v1 }
  0xb7   : > { %v470_v3 = vsel %vm468_vm1, %v9965_v13, %v467_v56  ;;  %v474_v32 = vsel %vm468_vm1, %v467_v56, 0.0  ;;  %v10034_v2 = vmul.f32 %v9918_v19, %v10009_v1  ;;  %v10038_v9 = vmul.f32 %v9960_v58, %v10009_v1 }
  0xb8   : > { %v10041_v10 = vrot.slane %v470_v3, %v9720_v7  ;;  %v10044_v17 = vrot.slane %v474_v32, %v9720_v7  ;;  %v10047_v22 = vrot.slane %v470_v3, %v9723_v8  ;;  %v10050_v24 = vrot.slane %v474_v32, %v9723_v8  ;;  %v10064_v40 = vpop.permute.xlu0 %757 }
  0xb9   : > { %v10053_v56 = vrot.slane %v470_v3, %v9737_v14  ;;  %v10056_v26 = vrot.slane %v474_v32, %v9737_v14  ;;  %v10059_v30 = vrot.slane %v470_v3, %v9812_v42  ;;  %v10062_v39 = vrot.slane %v474_v32, %v9812_v42  ;;  %13658 = vst [vmem:[#allocation50_spill] sm:$0xff] %v10064_v40 }
  0xba   : > { %13652 = vst [vmem:[#allocation44_spill] sm:$0xff] %v10041_v10  ;;  %13653 = vst [vmem:[#allocation45_spill] sm:$0xff] %v10044_v17  ;;  %v610_v49 = vmul.f32 %v9809_v41, %v10041_v10  ;;  %v10069_v5 = vrot.slane %v470_v3, %v9740_v15  ;;  %v10072_v34 = vrot.slane %v474_v32, %v9740_v15  ;;  %v10074_v57 = vpop.permute.xlu1 %586 }
  0xbb   : > { %13654 = vst [vmem:[#allocation46_spill] sm:$0xff] %v10050_v24  ;;  %13655 = vst [vmem:[#allocation47_spill] sm:$0xff] %v10056_v26  ;;  %v10078_v20 = vmul.f32 %v9824_v45, %v10064_v40  ;;  %v782_v3 = vmul.f32 %v9987_v6, %v10050_v24  ;;  %v781_v32 = vmul.f32 %v9987_v6, %v10047_v22 }
  0xbc   : > { %13656 = vst [vmem:[#allocation48_spill] sm:$0xff] %v10059_v30  ;;  %13657 = vst [vmem:[#allocation49_spill] sm:$0xff] %v10062_v39  ;;  %v10082_v30 = vmul.f32 %v9824_v45, %v10074_v57  ;;  %v611_v39 = vmul.f32 %v9809_v41, %v10044_v17  ;;  %v10096_v31 = vmul.f32 %v10069_v5, %v9987_v6 }
  0xbd   : > { %13659 = vst [vmem:[#allocation51_spill] sm:$0xff] %v10072_v34  ;;  %13660 = vst [vmem:[#allocation52_spill] sm:$0xff] %v10074_v57  ;;  %v10092_v34 = vmul.f32 %v10069_v5, %v9809_v41  ;;  %v616_v33 = vadd.f32 %v610_v49, %v596_v16  ;;  %v594_v45 = vmul.f32 %v10074_v57, %v9816_v43  ;;  %v10102_v35 = vpop.permute.xlu0 %536 }
  0xbe   : > { %13661 = vst [vmem:[#allocation53_spill] sm:$0xff] %v10078_v20  ;;  %13662 = vst [vmem:[#allocation54_spill] sm:$0xff] %v10082_v30  ;;  %v617_v20 = vadd.f32 %v611_v39, %v597_v0  ;;  %v788_v21 = vadd.f32 %v782_v3, %v768_v29  ;;  %v787_v30 = vadd.f32 %v781_v32, %v767_v11 }
  0xbf   : > { %13663 = vst [vmem:[#allocation55_spill] sm:$0xff] %v10092_v34  ;;  %13664 = vst [vmem:[#allocation56_spill] sm:$0xff] %v10096_v31  ;;  %v765_v60 = vmul.f32 %v10064_v40, %v9828_v46  ;;  %v10104_v1 = vadd.f32 %v594_v45, %v580_v37  ;;  %v10108_v34 = vmul.f32 %v9844_v51, %v10074_v57  ;;  %v10118_v11 = vpop.permute.xlu1 %743 }
  0xc0   : > { %13665 = vst [vmem:[#allocation57_spill] sm:$0xff] %v10102_v35  ;;  %v10112_v16 = vmul.f32 %v9755_v25, %v10074_v57  ;;  %v10116_v0 = vmul.f32 %v9844_v51, %v10064_v40  ;;  %v10120_v29 = vadd.f32 %v788_v21, %v617_v20  ;;  %v10122_v39 = vadd.f32 %v787_v30, %v616_v33 }
  0xc1   : > { %13666 = vst [vmem:[#allocation58_spill] sm:$0xff] %v10108_v34  ;;  %v10126_v37 = vmul.f32 %v9755_v25, %v10064_v40  ;;  %v592_v49 = vmul.f32 %v10074_v57, %v9820_v44  ;;  %v751_v3 = vmul.f32 %v10118_v11, %v9963_v4  ;;  %v593_v51 = vmul.f32 %v10074_v57, %v9832_v47  ;;  %v10148_v45 = vpop.permute.xlu0 %805 }
  0xc2   : > { %13667 = vst [vmem:[#allocation59_spill] sm:$0xff] %v10112_v16  ;;  %13668 = vst [vmem:[#allocation60_spill] sm:$0xff] %v10116_v0  ;;  %v749_v32 = vmul.f32 %v10118_v11, %v9918_v19  ;;  %v750_v21 = vmul.f32 %v10118_v11, %v9960_v58  ;;  %v763_v25 = vmul.f32 %v10064_v40, %v9836_v48 }
  0xc3   : > { %13669 = vst [vmem:[#allocation61_spill] sm:$0xff] %v10126_v37  ;;  %v10138_v33 = vadd.f32 %v592_v49, %v578_v36  ;;  %v764_v20 = vmul.f32 %v10064_v40, %v9840_v50  ;;  %v10146_v30 = vmul.f32 %v10044_v17, %v10102_v35  ;;  %13670 = vst [vmem:[#allocation62_spill] sm:$0xff] %v10148_v45  ;;  %v463_v49 = vpop.permute.xlu1 %462 }
  0xc4   : > { %v10150_v31 = vadd.f32 %v765_v60, %v751_v3  ;;  %v599_v37 = vadd.f32 %v593_v51, %v579_v61  ;;  %v722_v0 = vmul.f32 %v10050_v24, %v9809_v41  ;;  %v10156_v36 = vmul.f32 %v10056_v26, %v9987_v6 }
  0xc5   : > { %v10158_v16 = vadd.f32 %v763_v25, %v749_v32  ;;  %v10160_v34 = vadd.f32 %v764_v20, %v750_v21  ;;  %v556_v58 = vmul.f32 %v10041_v10, %v10102_v35  ;;  %v721_v60 = vmul.f32 %v10047_v22, %v9809_v41 }
  0xc6   : > { %13671 = vst [vmem:[#allocation63_spill] sm:$0xff] %v10156_v36  ;;  %v469_v61 = vsel %vm468_vm1, %v463_v49, %v9965_v13  ;;  %v10169_v3 = vadd.f32 %v722_v0, %v10015_v55  ;;  %v10173_v51 = vmul.f32 %v10053_v56, %v9987_v6  ;;  %v713_v32 = vmul.f32 %v9828_v46, %v10074_v57  ;;  %v10190_v0 = vpop.permute.xlu0 %1234 }
  0xc7   : > { %v10178_v21 = vrot.slane %v469_v61, %v9720_v7  ;;  %v10181_v25 = vrot.slane %v469_v61, %v9723_v8  ;;  %v10184_v20 = vrot.slane %v469_v61, %v9737_v14  ;;  %v10187_v13 = vrot.slane %v469_v61, %v9812_v42  ;;  %v10202_v42 = vpop.permute.xlu1 %477 }
  0xc8   : > { %13672 = vst [vmem:[#allocation64_spill] sm:$0xff] %v10173_v51  ;;  %v1164_v55 = vrot.slane %v469_v61, %v9740_v15  ;;  %v727_v49 = vadd.f32 %v721_v60, %v10017_v38  ;;  %v719_v19 = vadd.f32 %v713_v32, %v10027_v63  ;;  %v10196_v51 = vmul.f32 %v9848_v52, %v10064_v40 }
  0xc9   : > { %13673 = vst [vmem:[#allocation65_spill] sm:$0xff] %v10178_v21  ;;  %13674 = vst [vmem:[#allocation66_spill] sm:$0xff] %v10187_v13  ;;  %v555_v8 = vmul.f32 %v10178_v21, %v10102_v35  ;;  %v609_v14 = vmul.f32 %v9809_v41, %v10178_v21  ;;  %v780_v15 = vmul.f32 %v9987_v6, %v10181_v25 }
  0xca   : > { %13675 = vst [vmem:[#allocation67_spill] sm:$0xff] %v10196_v51  ;;  %13676 = vst [vmem:[#allocation68_spill] sm:$0xff] %v10202_v42  ;;  %v720_v38 = vmul.f32 %v10181_v25, %v9809_v41  ;;  %v10209_v63 = vmul.f32 %v1164_v55, %v9809_v41  ;;  %v10212_v60 = vmul.f32 %v1164_v55, %v9987_v6 }
  0xcb   : > { %v499_v61 = vmul.f32 %v9903_v12, %v10202_v42  ;;  %v497_v32 = vmul.f32 %v9915_v18, %v10202_v42  ;;  %v615_v52 = vadd.f32 %v609_v14, %v9995_v27  ;;  %v786_v13 = vadd.f32 %v780_v15, %v10011_v28  ;;  %v10235_v27 = vpop.permute.xlu0 %504 }
  0xcc   : > { %13677 = vst [vmem:[#allocation69_spill] sm:$0xff] %v10212_v60  ;;  %v498_v36 = vmul.f32 %v9927_v23, %v10202_v42  ;;  %v726_v51 = vadd.f32 %v720_v38, %v10013_v62  ;;  %v10225_v41 = vmul.f32 %v10184_v20, %v9987_v6  ;;  %v711_v45 = vmul.f32 %v9836_v48, %v10074_v57  ;;  %v10247_v48 = vpop.permute.xlu1 %606 }
  0xcd   : > { %v712_v60 = vmul.f32 %v9840_v50, %v10074_v57  ;;  %v10233_v14 = vmul.f32 %v9852_v53, %v10064_v40  ;;  %v792_v28 = vadd.f32 %v786_v13, %v615_v52  ;;  %v10239_v62 = vmul.f32 %v9856_v54, %v10064_v40  ;;  %13682 = vst [vmem:[#allocation74_spill] sm:$0xff] %v10247_v48 }
  0xce   : > { %13678 = vst [vmem:[#allocation70_spill] sm:$0xff] %v10225_v41  ;;  %v650_v15 = vmul.f32 %v9963_v4, %v10202_v42  ;;  %v10245_v38 = vmul.f32 %v10050_v24, %v10102_v35  ;;  %v525_v53 = vmul.f32 %v9816_v43, %v10235_v27  ;;  %v523_v57 = vmul.f32 %v9820_v44, %v10235_v27 }
  0xcf   : > { %13679 = vst [vmem:[#allocation71_spill] sm:$0xff] %v10233_v14  ;;  %13680 = vst [vmem:[#allocation72_spill] sm:$0xff] %v10239_v62  ;;  %v524_v52 = vmul.f32 %v9832_v47, %v10235_v27  ;;  %v717_v13 = vadd.f32 %v711_v45, %v10034_v2  ;;  %v10257_v54 = vmul.f32 %v1164_v55, %v10247_v48  ;;  %v10269_v2 = vpop.permute.xlu0 %508 }
  0xd0   : > { %13681 = vst [vmem:[#allocation73_spill] sm:$0xff] %v10245_v38  ;;  %v614_v40 = vmul.f32 %v10247_v48, %v10044_v17  ;;  %v10263_v4 = vmul.f32 %v10069_v5, %v10247_v48  ;;  %v612_v35 = vmul.f32 %v10247_v48, %v10178_v21  ;;  %v613_v50 = vmul.f32 %v10247_v48, %v10041_v10 }
  0xd1   : > { %13683 = vst [vmem:[#allocation75_spill] sm:$0xff] %v10257_v54  ;;  %v531_v6 = vadd.f32 %v525_v53, %v499_v61  ;;  %v529_v62 = vadd.f32 %v523_v57, %v497_v32  ;;  %v530_v14 = vadd.f32 %v524_v52, %v498_v36  ;;  %13685 = vst [vmem:[#allocation77_spill] sm:$0xff] %v10269_v2  ;;  %v10277_v10 = vpop.permute.xlu1 %777 }
  0xd2   : > { %13684 = vst [vmem:[#allocation76_spill] sm:$0xff] %v10263_v4  ;;  %v620_v45 = vadd.f32 %v614_v40, %v10104_v1  ;;  %v618_v41 = vadd.f32 %v612_v35, %v10138_v33  ;;  %v725_v17 = vmul.f32 %v10050_v24, %v10247_v48  ;;  %v718_v4 = vadd.f32 %v712_v60, %v10038_v9 }
  0xd3   : > { %v619_v38 = vadd.f32 %v613_v50, %v599_v37  ;;  %v563_v21 = vadd.f32 %v10146_v30, %v531_v6  ;;  %v561_v42 = vadd.f32 %v555_v8, %v529_v62  ;;  %v562_v54 = vadd.f32 %v556_v58, %v530_v14  ;;  %13686 = vst [vmem:[#allocation78_spill] sm:$0xff] %v10277_v10 }
  0xd4   : > { %v10281_v53 = vmul.f32 %v9816_v43, %v10269_v2  ;;  %v10283_v57 = vadd.f32 %v725_v17, %v719_v19  ;;  %v10287_v35 = vmul.f32 %v9820_v44, %v10269_v2  ;;  %v10291_v1 = vmul.f32 %v9832_v47, %v10269_v2  ;;  %v10304_v19 = vpop.permute.xlu0 %1266 }
  0xd5   : > { %v10294_v6 = vmul.f32 %v1164_v55, %v10277_v10  ;;  %v785_v8 = vmul.f32 %v10277_v10, %v10050_v24  ;;  %v10300_v43 = vmul.f32 %v10069_v5, %v10277_v10  ;;  %v783_v50 = vmul.f32 %v10277_v10, %v10181_v25 }
  0xd6   : > { %v784_v44 = vmul.f32 %v10277_v10, %v10047_v22  ;;  %v10309_v47 = vadd.f32 %v10169_v3, %v563_v21  ;;  %v10311_v58 = vadd.f32 %v726_v51, %v561_v42  ;;  %v10313_v9 = vadd.f32 %v727_v49, %v562_v54 }
  0xd7   : > { %v791_v17 = vadd.f32 %v785_v8, %v10150_v31  ;;  %v789_v40 = vadd.f32 %v783_v50, %v10158_v16  ;;  %v10319_v5 = vmul.f32 %v10056_v26, %v10277_v10  ;;  %v723_v37 = vmul.f32 %v10181_v25, %v10247_v48  ;;  %v10334_v16 = vpop.permute.xlu1 %1229 }
  0xd8   : > { %v790_v33 = vadd.f32 %v784_v44, %v10160_v34  ;;  %v724_v30 = vmul.f32 %v10047_v22, %v10247_v48  ;;  %v10328_v54 = vmul.f32 %v10184_v20, %v10277_v10  ;;  %v10332_v31 = vmul.f32 %v10053_v56, %v10277_v10  ;;  %v10340_v21 = vpop.permute.xlu0 %958  ;;  %v13691_v48 = vld [vmem:[#allocation28_spill] sm:$0xff] }
  0xd9   : > { %v797_v36 = vadd.f32 %v791_v17, %v620_v45  ;;  %v795_v3 = vadd.f32 %v789_v40, %v618_v41  ;;  %v10336_v51 = vadd.f32 %v723_v37, %v717_v13  ;;  %v668_v34 = vmul.f32 %v9828_v46, %v10235_v27  ;;  %v1463_v17 = vld [vmem:[%s13520_s6 + $0xf0] sm:$0xff]  ;;  %v1462_v40 = vld [vmem:[%s13520_s6 + $0xe8] sm:$0xff]  ;;  %v1461_v37 = vld [vmem:[%s13520_s6 + $0xe0] sm:$0xff] }
  0xda   : > { %v1239_v55 = vadd.f32 %v10334_v16, %v10120_v29  ;;  %v1237_v49 = vadd.f32 %v10334_v16, %v792_v28  ;;  %v1238_v42 = vadd.f32 %v10334_v16, %v10122_v39  ;;  %v796_v60 = vadd.f32 %v790_v33, %v619_v38  ;;  %v13692_v46 = vld [vmem:[#allocation53_spill] sm:$0xff] }
  0xdb   : > { %v1242_v61 = vadd.f32 %v10190_v0, %v797_v36  ;;  %v1240_v41 = vadd.f32 %v10190_v0, %v795_v3  ;;  %v10349_v32 = vadd.f32 %v724_v30, %v718_v4  ;;  %v10351_v14 = vadd.f32 %v668_v34, %v650_v15  ;;  %v10353_v52 = vpop.permute.xlu1 %482  ;;  %v1464_v15 = vld [vmem:[%s13520_s6 + $0xf8] sm:$0xff] }
  0xdc   : > { %vm1245_vm2 = vcmp.gt.f32.partialorder %v1239_v55, 0.0  ;;  %v1251_v62 = vmul.f32 0.01, %v1239_v55  ;;  %vm1243_vm3 = vcmp.gt.f32.partialorder %v1237_v49, 0.0  ;;  %vm1244_vm4 = vcmp.gt.f32.partialorder %v1238_v42, 0.0  ;;  %v10356_v38 = vpop.permute.xlu0 %1107  ;;  %1736 = vmatprep.subr.mxu0 %v1464_v15  ;;  %v1460_v34 = vld [vmem:[%s13520_s6 + $0xd8] sm:$0xff] }
  0xdd   : > { %v1249_v29 = vmul.f32 0.01, %v1237_v49  ;;  %v1250_v28 = vmul.f32 0.01, %v1238_v42  ;;  %vm1248_vm5 = vcmp.gt.f32.partialorder %v1242_v61, 0.0  ;;  %v1241_v39 = vadd.f32 %v10190_v0, %v796_v60  ;;  %1737 = vmatpush1.msra.mxu0 %v1463_v17 }
  0xde   : > { %v10358_v13 = vsel %vm1245_vm2, %v1239_v55, %v1251_v62  ;;  %v1254_v45 = vmul.f32 0.01, %v1242_v61  ;;  %vm1246_vm6 = vcmp.gt.f32.partialorder %v1240_v41, 0.0  ;;  %v1252_v4 = vmul.f32 0.01, %v1240_v41  ;;  %1738 = vmatprep.subr.mxu0 %v1462_v40 }
  0xdf   : > { %v1118_v8 = vsel %vm455_vm0, 0.0, %v10356_v38  ;;  %v10365_v50 = vsel %vm1243_vm3, %v1237_v49, %v1249_v29  ;;  %v10367_v44 = vsel %vm1244_vm4, %v1238_v42, %v1250_v28  ;;  %vm1247_vm7 = vcmp.gt.f32.partialorder %v1241_v39, 0.0  ;;  %v802_v55 = vpop.permute.xlu1 %801  ;;  %v13687_v29 = vld [vmem:[#allocation43_spill] sm:$0xff]  ;;  %1739 = vmatpush1.msra.mxu0 %v1461_v37 }
  0xe0   : > { %v1122_v33 = vrot.slane %v1118_v8, %v9720_v7  ;;  %v1260_v30 = vsel %vm1248_vm5, %v1242_v61, %v1254_v45  ;;  %v1253_v36 = vmul.f32 0.01, %v1241_v39  ;;  %v1258_v3 = vsel %vm1246_vm6, %v1240_v41, %v1252_v4  ;;  %v1459_v41 = vld [vmem:[%s13520_s6 + $0xd0] sm:$0xff]  ;;  %v13688_v45 = vld [vmem:[#allocation10_spill] sm:$0xff]  ;;  %1740 = vmatprep.subr.mxu0 %v1460_v34 }
  0xe1   : > { %v10384_v49 = vmul.f32 %v10304_v19, %v1260_v30  ;;  %v10387_v42 = vmul.f32 %v10304_v19, %v1258_v3  ;;  %v502_v60 = vmul.f32 %v9903_v12, %v10353_v52  ;;  %v500_v61 = vmul.f32 %v9915_v18, %v10353_v52  ;;  %v1458_v12 = vld [vmem:[%s13520_s6 + $0xc8] sm:$0xff]  ;;  %v1457_v30 = vld [vmem:[%s13520_s6 + $0xc0] sm:$0xff]  ;;  %1741 = vmatpush1.msra.mxu0 %v1459_v41 }
  0xe2   : > { %v1131_v62 = vmul.f32 %v1122_v33, %v9871_v59  ;;  %v1134_v28 = vmul.f32 %v1122_v33, %v13687_v29  ;;  %v1191_v4 = vmul.f32 %v1122_v33, %v13688_v45  ;;  %v1194_v15 = vmul.f32 %v1122_v33, %v10118_v11  ;;  %v13689_v33 = vld [vmem:[#allocation21_spill] sm:$0xff]  ;;  %v13690_v3 = vld [vmem:[#allocation54_spill] sm:$0xff]  ;;  %1742 = vmatprep.subr.mxu0 %v1458_v12  ;;  %v13694_v41 = vld [vmem:[#allocation75_spill] sm:$0xff] }
  0xe3   : > { %v812_v18 = vsel %vm455_vm0, 0.0, %v802_v55  ;;  %v1259_v8 = vsel %vm1247_vm7, %v1241_v39, %v1253_v36  ;;  %v534_v17 = vadd.f32 %v10281_v53, %v502_v60  ;;  %v501_v40 = vmul.f32 %v9927_v23, %v10353_v52  ;;  %v1456_v53 = vld [vmem:[%s13520_s6 + $0xb8] sm:$0xff]  ;;  %v804_v39 = vpop.permute.xlu1 %803  ;;  %1743 = vmatpush1.msra.mxu0 %v1457_v30 }
  0xe4   : > { %v1155_v37 = vadd.f32 %v13689_v33, %v1131_v62  ;;  %v1158_v10 = vadd.f32 %v13690_v3, %v1134_v28  ;;  %v1203_v24 = vadd.f32 %v13691_v48, %v1191_v4  ;;  %v1206_v2 = vadd.f32 %v13692_v46, %v1194_v15  ;;  %v1455_v46 = vld [vmem:[%s13520_s6 + $0xb0] sm:$0xff]  ;;  %1744 = vmatprep.subr.mxu0 %v1456_v53  ;;  %v13703_v12 = vld [vmem:[#allocation62_spill] sm:$0xff] }
  0xe5   : > { %v816_v23 = vrot.slane %v812_v18, %v9720_v7  ;;  %v10420_v36 = vmul.f32 %v10304_v19, %v1259_v8  ;;  %v532_v34 = vadd.f32 %v10287_v35, %v500_v61  ;;  %v533_v60 = vadd.f32 %v10291_v1, %v501_v40  ;;  %v13696_v28 = vld [vmem:[#allocation69_spill] sm:$0xff]  ;;  %v1454_v35 = vld [vmem:[%s13520_s6 + $0xa8] sm:$0xff]  ;;  %1745 = vmatpush1.msra.mxu0 %v1455_v46 }
  0xe6   : > { %v10428_v48 = vadd.f32 %v10209_v63, %v1155_v37  ;;  %v10431_v62 = vadd.f32 %v13694_v41, %v1158_v10  ;;  %v10434_v4 = vadd.f32 %v13696_v28, %v1203_v24  ;;  %v10437_v15 = vadd.f32 %v10294_v6, %v1206_v2  ;;  %v13699_v1 = vld [vmem:[#allocation68_spill] sm:$0xff]  ;;  %v1453_v2 = vld [vmem:[%s13520_s6 + $0xa0] sm:$0xff]  ;;  %v1452_v30 = vld [vmem:[%s13520_s6 + $0x98] sm:$0xff]  ;;  %1746 = vmatprep.subr.mxu0 %v1454_v35 }
  0xe7   : > { %v10443_v61 = vmul.f32 %v816_v23, %v13699_v1  ;;  %v10446_v63 = vmul.f32 %v816_v23, %v10353_v52  ;;  %v10449_v10 = vmul.f32 %v816_v23, %v9871_v59  ;;  %v10452_v24 = vmul.f32 %v816_v23, %v13687_v29  ;;  %v10469_v3 = vpop.permute.xlu1 %540  ;;  %v13707_v46 = vld [vmem:[#allocation32_spill] sm:$0xff]  ;;  %1747 = vmatpush1.msra.mxu0 %v1453_v2  ;;  %v1449_v2 = vld [vmem:[%s13520_s6 + $0x80] sm:$0xff] }
  0xe8   : > { %13693 = vst [vmem:[#allocation43_spill] sm:$0xff] %v10428_v48  ;;  %13695 = vst [vmem:[#allocation10_spill] sm:$0xff] %v10431_v62  ;;  %v807_v6 = vsel %vm455_vm0, %v802_v55, %v804_v39  ;;  %v808_v18 = vsel %vm455_vm0, %v804_v39, %v13703_v12  ;;  %v915_v8 = vmul.f32 %v816_v23, %v13688_v45  ;;  %v13705_v55 = vld [vmem:[#allocation73_spill] sm:$0xff]  ;;  %v13706_v39 = vld [vmem:[#allocation11_spill] sm:$0xff]  ;;  %1748 = vmatprep.subr.mxu0 %v1452_v30 }
  0xe9   : > { %13697 = vst [vmem:[#allocation21_spill] sm:$0xff] %v10434_v4  ;;  %13698 = vst [vmem:[#allocation54_spill] sm:$0xff] %v10437_v15  ;;  %v918_v40 = vmul.f32 %v816_v23, %v10118_v11  ;;  %v820_v33 = vrot.slane %v807_v6, %v9720_v7  ;;  %v10467_v37 = vrot.slane %v808_v18, %v9720_v7  ;;  %v1451_v23 = vld [vmem:[%s13520_s6 + $0x90] sm:$0xff]  ;;  %v1450_v35 = vld [vmem:[%s13520_s6 + $0x88] sm:$0xff] }
  0xea   : > { %13700 = vst [vmem:[#allocation28_spill] sm:$0xff] %v10443_v61  ;;  %13701 = vst [vmem:[#allocation53_spill] sm:$0xff] %v10446_v63  ;;  %v10473_v53 = vadd.f32 %v13705_v55, %v10351_v14  ;;  %v10477_v41 = vmul.f32 %v10056_v26, %v13706_v39  ;;  %v927_v28 = vadd.f32 %v13707_v46, %v915_v8  ;;  %v13708_v6 = vld [vmem:[#allocation45_spill] sm:$0xff]  ;;  %v13710_v14 = vld [vmem:[#allocation44_spill] sm:$0xff]  ;;  %1749 = vmatpush1.msra.mxu0 %v1451_v23 }
  0xeb   : > { %13702 = vst [vmem:[#allocation75_spill] sm:$0xff] %v10452_v24  ;;  %13704 = vst [vmem:[#allocation69_spill] sm:$0xff] %v10469_v3  ;;  %v560_v12 = vmul.f32 %v13708_v6, %v10469_v3  ;;  %v13709_v18 = vld [vmem:[#allocation65_spill] sm:$0xff]  ;;  %v559_v55 = vmul.f32 %v13710_v14, %v10469_v3  ;;  %v10493_v48 = vmul.f32 %v820_v33, %v13699_v1  ;;  %v13714_v14 = vld [vmem:[#allocation70_spill] sm:$0xff]  ;;  %1750 = vmatprep.subr.mxu0 %v1450_v35  ;;  %v10520_v26 = vpop.permute.xlu1 %1262 }
  0xec   : > { %v558_v62 = vmul.f32 %v13709_v18, %v10469_v3  ;;  %v10496_v15 = vmul.f32 %v820_v33, %v10353_v52  ;;  %v10499_v8 = vmul.f32 %v820_v33, %v9871_v59  ;;  %v10502_v46 = vmul.f32 %v820_v33, %v13687_v29  ;;  %v1447_v24 = vld [vmem:[%s13520_s6 + $0x70] sm:$0xff]  ;;  %1751 = vmatpush1.msra.mxu0 %v1449_v2 }
  0xed   : > { %13711 = vst [vmem:[#allocation68_spill] sm:$0xff] %v10493_v48  ;;  %v917_v6 = vmul.f32 %v10467_v37, %v13688_v45  ;;  %v916_v18 = vmul.f32 %v820_v33, %v13688_v45  ;;  %v939_v63 = vadd.f32 %v13714_v14, %v927_v28  ;;  %v566_v4 = vadd.f32 %v560_v12, %v534_v17  ;;  %v13715_v17 = vld [vmem:[#allocation31_spill] sm:$0xff] }
  0xee   : > { %13712 = vst [vmem:[#allocation62_spill] sm:$0xff] %v10496_v15  ;;  %13713 = vst [vmem:[#allocation73_spill] sm:$0xff] %v10502_v46  ;;  %v1448_v15 = vld [vmem:[%s13520_s6 + $0x78] sm:$0xff]  ;;  %v920_v30 = vmul.f32 %v10467_v37, %v10118_v11  ;;  %v564_v48 = vadd.f32 %v558_v62, %v532_v34  ;;  %v565_v61 = vadd.f32 %v559_v55, %v533_v60  ;;  %v13716_v28 = vld [vmem:[#allocation35_spill] sm:$0xff] }
  0xef   : > { %v919_v46 = vmul.f32 %v820_v33, %v10118_v11  ;;  %v929_v23 = vadd.f32 %v13715_v17, %v917_v6  ;;  %v928_v12 = vadd.f32 %v13716_v28, %v916_v18  ;;  %v945_v14 = vadd.f32 %v939_v63, %v10311_v58  ;;  %v1446_v34 = vld [vmem:[%s13520_s6 + $0x68] sm:$0xff]  ;;  %1752 = vmatprep.subr.mxu0 %v1448_v15 }
  0xf0   : > { %v737_v3 = vadd.f32 %v10283_v57, %v566_v4  ;;  %v1271_v60 = vmul.f32 %v10520_v26, %v10358_v13  ;;  %v1269_v62 = vmul.f32 %v10520_v26, %v10365_v50  ;;  %v1270_v33 = vmul.f32 %v10520_v26, %v10367_v44  ;;  %v13717_v55 = vld [vmem:[#allocation67_spill] sm:$0xff]  ;;  %v13719_v63 = vld [vmem:[#allocation64_spill] sm:$0xff]  ;;  %1753 = vmatpush1.msra.mxu0 %v1447_v24  ;;  %v1444_v50 = vld [vmem:[%s13520_s6 + $0x58] sm:$0xff] }
  0xf1   : > { %v932_v35 = vadd.f32 %v13717_v55, %v920_v30  ;;  %v1445_v57 = vld [vmem:[%s13520_s6 + $0x60] sm:$0xff]  ;;  %v940_v2 = vadd.f32 %v13719_v63, %v928_v12  ;;  %v1289_v6 = vadd.f32 %v10334_v16, %v945_v14  ;;  %v735_v13 = vadd.f32 %v10336_v51, %v564_v48  ;;  %v13721_v17 = vld [vmem:[#allocation72_spill] sm:$0xff]  ;;  %1754 = vmatprep.subr.mxu0 %v1446_v34 }
  0xf2   : > { %v13718_v58 = vld [vmem:[#allocation63_spill] sm:$0xff]  ;;  %v736_v15 = vadd.f32 %v10349_v32, %v565_v61  ;;  %v931_v28 = vadd.f32 %v13721_v17, %v919_v46  ;;  %1755 = vmatpush1.msra.mxu0 %v1445_v57  ;;  %v10558_v32 = vpop.permute.xlu1 %1276  ;;  %v881_v12 = vmul.f32 %v10467_v37, %v9871_v59  ;;  %v1436_v17 = vld [vmem:[%s13520_s6 + $0x18] sm:$0xff] }
  0xf3   : > { %v941_v4 = vadd.f32 %v13718_v58, %v929_v23  ;;  %v944_v44 = vadd.f32 %v10319_v5, %v932_v35  ;;  %v13720_v18 = vld [vmem:[#allocation71_spill] sm:$0xff]  ;;  %v1443_v23 = vld [vmem:[%s13520_s6 + $0x50] sm:$0xff]  ;;  %v946_v48 = vadd.f32 %v940_v2, %v10313_v9  ;;  %vm1295_vm8 = vcmp.gt.f32.partialorder %v1289_v6, 0.0  ;;  %1756 = vmatprep.subr.mxu0 %v1444_v50 }
  0xf4   : > { %v930_v30 = vadd.f32 %v13720_v18, %v918_v40  ;;  %v1301_v24 = vmul.f32 0.01, %v1289_v6  ;;  %v1442_v5 = vld [vmem:[%s13520_s6 + $0x48] sm:$0xff]  ;;  %v943_v46 = vadd.f32 %v10332_v31, %v931_v28  ;;  %v10568_v9 = vadd.f32 %v10558_v32, %v1271_v60  ;;  %1757 = vmatpush1.msra.mxu0 %v1443_v23  ;;  %v1440_v31 = vld [vmem:[%s13520_s6 + $0x38] sm:$0xff]  ;;  %v1437_v63 = vld [vmem:[%s13520_s6 + $0x20] sm:$0xff] }
  0xf5   : > { %v947_v51 = vadd.f32 %v941_v4, %v10309_v47  ;;  %v950_v61 = vadd.f32 %v944_v44, %v737_v3  ;;  %v1441_v47 = vld [vmem:[%s13520_s6 + $0x40] sm:$0xff]  ;;  %v10571_v14 = vadd.f32 %v10558_v32, %v1269_v62  ;;  %v10574_v3 = vadd.f32 %v10558_v32, %v1270_v33  ;;  %1758 = vmatprep.subr.mxu0 %v1442_v5  ;;  %v1439_v62 = vld [vmem:[%s13520_s6 + $0x30] sm:$0xff]  ;;  %v1438_v4 = vld [vmem:[%s13520_s6 + $0x28] sm:$0xff] }
  0xf6   : > { %v942_v40 = vadd.f32 %v10328_v54, %v930_v30  ;;  %13722 = vst [vmem:[#allocation11_spill] sm:$0xff] %v10568_v9  ;;  %v1290_v34 = vadd.f32 %v10334_v16, %v946_v48  ;;  %v1307_v55 = vsel %vm1295_vm8, %v1289_v6, %v1301_v24  ;;  %1563 = vrot.lane.b32.xlu0 %v10568_v9, %s13725_s22  ;;  %v955_v2 = vpop.permute.xlu1 %954  ;;  %v1435_v24 = vld [vmem:[%s13520_s6 + $0x10] sm:$0xff] }
  0xf7   : > { %13723 = vst [vmem:[#allocation32_spill] sm:$0xff] %v10571_v14  ;;  %13724 = vst [vmem:[#allocation45_spill] sm:$0xff] %v10574_v3  ;;  %v1291_v54 = vadd.f32 %v10334_v16, %v947_v51  ;;  %v1294_v60 = vadd.f32 %v10190_v0, %v950_v61  ;;  %v9141_v33 = vpack.i.bf16 %v10571_v14, %v10574_v3  ;;  %1759 = vmatpush1.msra.mxu0 %v1441_v47 }
  0xf8   : > { %v948_v35 = vadd.f32 %v942_v40, %v735_v13  ;;  %v1313_v58 = vmul.f32 %v1307_v55, %v10520_v26  ;;  %vm1296_vm10 = vcmp.gt.f32.partialorder %v1290_v34, 0.0  ;;  %v1302_v6 = vmul.f32 0.01, %v1290_v34  ;;  %1760 = vmatprep.subr.mxu0 %v1440_v31  ;;  %v13730_v55 = vld [vmem:[#allocation24_spill] sm:$0xff] }
  0xf9   : > { %vm1297_vm9 = vcmp.gt.f32.partialorder %v1291_v54, 0.0  ;;  %v1303_v57 = vmul.f32 0.01, %v1291_v54  ;;  %vm1300_vm11 = vcmp.gt.f32.partialorder %v1294_v60, 0.0  ;;  %v1306_v13 = vmul.f32 0.01, %v1294_v60  ;;  %9142 = vrot.lane.b32.xlu1 %v9141_v33, %s13725_s22  ;;  %1761 = vmatpush1.msra.mxu0 %v1439_v62 }
  0xfa   : > { %v965_v50 = vsel %vm455_vm0, 0.0, %v955_v2  ;;  %v10600_v18 = vadd.f32 %v1313_v58, %v10558_v32  ;;  %v949_v30 = vadd.f32 %v943_v46, %v736_v15  ;;  %v1308_v51 = vsel %vm1296_vm10, %v1290_v34, %v1302_v6  ;;  %1762 = vmatprep.subr.mxu0 %v1438_v4  ;;  %v1434_v46 = vld [vmem:[%s13520_s6 + $0x8] sm:$0xff]  ;;  %v957_v31 = vpop.permute.xlu1 %956  ;;  %v1496_v58 = vld [vmem:[%s13520_s6 + $0x1f8] sm:$0xff] }
  0xfb   : > { %v1309_v44 = vsel %vm1297_vm9, %v1291_v54, %v1303_v57  ;;  %v10606_v28 = vrot.slane %v965_v50, %v9720_v7  ;;  %v1312_v48 = vsel %vm1300_vm11, %v1294_v60, %v1306_v13  ;;  %v1314_v5 = vmul.f32 %v1308_v51, %v10520_v26  ;;  %1763 = vmatpush1.msra.mxu0 %v1437_v63  ;;  %v13732_v50 = vld [vmem:[#allocation39_spill] sm:$0xff] }
  0xfc   : > { %13726 = vst [vmem:[#allocation65_spill] sm:$0xff] %v10600_v18  ;;  %v1315_v23 = vmul.f32 %v1309_v44, %v10520_v26  ;;  %v1318_v15 = vmul.f32 %v1312_v48, %v10304_v19  ;;  %v1292_v61 = vadd.f32 %v10190_v0, %v948_v35  ;;  %v1293_v40 = vadd.f32 %v10190_v0, %v949_v30  ;;  %v1433_v35 = vld [vmem:[%s13520_s6] sm:$0xff]  ;;  %v13733_v44 = vld [vmem:[#allocation49_spill] sm:$0xff] }
  0xfd   : > { %v10621_v47 = vmul.f32 %v10606_v28, %v9871_v59  ;;  %v10625_v54 = vmul.f32 %v10606_v28, %v13687_v29  ;;  %v893_v60 = vadd.f32 %v13730_v55, %v881_v12  ;;  %1764 = vmatprep.subr.mxu0 %v1436_v17  ;;  %v960_v62 = vsel %vm455_vm0, %v955_v2, %v957_v31  ;;  %v1494_v17 = vld [vmem:[%s13520_s6 + $0x1e8] sm:$0xff] }
  0xfe   : > { %v10628_v34 = vadd.f32 %v1315_v23, %v10558_v32  ;;  %v961_v33 = vsel %vm455_vm0, %v957_v31, %v10340_v21  ;;  %v10638_v57 = vadd.f32 %v1314_v5, %v10558_v32  ;;  %vm1298_vm12 = vcmp.gt.f32.partialorder %v1292_v61, 0.0  ;;  %1765 = vmatpush1.msra.mxu0 %v1435_v24  ;;  %v1495_v21 = vld [vmem:[%s13520_s6 + $0x1f0] sm:$0xff]  ;;  %v10668_v48 = vpop.permute.xlu1 %1280  ;;  %v1493_v5 = vld [vmem:[%s13520_s6 + $0x1e0] sm:$0xff] }
  0xff   : > { %13727 = vst [vmem:[#allocation44_spill] sm:$0xff] %v10621_v47  ;;  %13728 = vst [vmem:[#allocation70_spill] sm:$0xff] %v10625_v54  ;;  %v10644_v12 = vrot.slane %v960_v62, %v9720_v7  ;;  %v10647_v4 = vrot.slane %v961_v33, %v9720_v7  ;;  %vm1299_vm13 = vcmp.gt.f32.partialorder %v1293_v40, 0.0  ;;  %v1304_v63 = vmul.f32 0.01, %v1292_v61  ;;  %1766 = vmatprep.subr.mxu0 %v1434_v46  ;;  %v13740_v33 = vld [vmem:[#allocation36_spill] sm:$0xff] }
 0x100   : > { %13729 = vst [vmem:[#allocation31_spill] sm:$0xff] %v10628_v34  ;;  %13731 = vst [vmem:[#allocation35_spill] sm:$0xff] %v10638_v57  ;;  %v1305_v6 = vmul.f32 0.01, %v1293_v40  ;;  %v905_v13 = vadd.f32 %v10477_v41, %v893_v60  ;;  %v1088_v30 = vmul.f32 %v13733_v44, %v13732_v50  ;;  %1767 = vmatpush1.msra.mxu0 %v1433_v35  ;;  %v1492_v60 = vld [vmem:[%s13520_s6 + $0x1d8] sm:$0xff]  ;;  %v1112_v35 = vpop.permute.xlu0 %1111  ;;  %v13754_v54 = vld [vmem:[#allocation59_spill] sm:$0xff] }
 0x101   : > { %v10662_v23 = vmul.f32 %v10644_v12, %v9871_v59  ;;  %v10666_v51 = vmul.f32 %v10644_v12, %v13687_v29  ;;  %v1310_v41 = vsel %vm1298_vm12, %v1292_v61, %v1304_v63  ;;  %v1070_v24 = vmul.f32 %v10647_v4, %v13688_v45  ;;  %1768 = vmatprep.subr.mxu0 %v1496_v58  ;;  %v13741_v63 = vld [vmem:[#allocation27_spill] sm:$0xff]  ;;  %v13758_v47 = vld [vmem:[#allocation60_spill] sm:$0xff] }
 0x102   : > { %v10678_v46 = vadd.f32 %v10668_v48, %v10384_v49  ;;  %v10682_v31 = vadd.f32 %v10668_v48, %v10387_v42  ;;  %v10686_v55 = vadd.f32 %v10668_v48, %v10420_v36  ;;  %v10689_v61 = vadd.f32 %v1318_v15, %v10668_v48  ;;  %1769 = vmatpush2.msra.mxu0 %v1495_v21 }
 0x103   : > { %13734 = vst [vmem:[#allocation67_spill] sm:$0xff] %v10662_v23  ;;  %13735 = vst [vmem:[#allocation63_spill] sm:$0xff] %v10666_v51  ;;  %v1311_v49 = vsel %vm1299_vm13, %v1293_v40, %v1305_v6  ;;  %v1316_v62 = vmul.f32 %v1310_v41, %v10304_v19  ;;  %v911_v42 = vadd.f32 %v905_v13, %v10473_v53  ;;  %1770 = vmatprep.subr.mxu0 %v1494_v17  ;;  %v13742_v40 = vld [vmem:[#allocation33_spill] sm:$0xff]  ;;  %v1110_v13 = vpop.permute.xlu1 %1109 }
 0x104   : > { %13736 = vst [vmem:[#allocation64_spill] sm:$0xff] %v10678_v46  ;;  %13737 = vst [vmem:[#allocation71_spill] sm:$0xff] %v10682_v31  ;;  %v1082_v58 = vadd.f32 %v13740_v33, %v1070_v24  ;;  %1569 = vrot.lane.b32.xlu0 %v10678_v46, %s13725_s22  ;;  %v9146_v36 = vpack.i.bf16 %v10682_v31, %v10686_v55  ;;  %v1317_v15 = vmul.f32 %v1311_v49, %v10304_v19  ;;  %v1491_v53 = vld [vmem:[%s13520_s6 + $0x1d0] sm:$0xff]  ;;  %v13745_v49 = vld [vmem:[#allocation14_spill] sm:$0xff] }
 0x105   : > { %13738 = vst [vmem:[#allocation72_spill] sm:$0xff] %v10686_v55  ;;  %13739 = vst [vmem:[#allocation24_spill] sm:$0xff] %v10689_v61  ;;  %v648_v21 = vmul.f32 %v13741_v63, %v13699_v1  ;;  %v649_v6 = vmul.f32 %v13742_v40, %v13699_v1  ;;  %v10711_v17 = vadd.f32 %v1316_v62, %v10668_v48  ;;  %v13744_v24 = vld [vmem:[#allocation13_spill] sm:$0xff]  ;;  %1771 = vmatpush2.msra.mxu0 %v1493_v5 }
 0x106   : > { %v1094_v41 = vadd.f32 %v1088_v30, %v1082_v58  ;;  %v666_v33 = vmul.f32 %v13744_v24, %v10235_v27  ;;  %v667_v2 = vmul.f32 %v13745_v49, %v10235_v27  ;;  %v1113_v31 = vsel %vm455_vm0, %v10356_v38, %v1110_v13  ;;  %9147 = vrot.lane.b32.xlu1 %v9146_v36, %s13725_s22  ;;  %v13747_v62 = vld [vmem:[#allocation57_spill] sm:$0xff]  ;;  %v1490_v58 = vld [vmem:[%s13520_s6 + $0x1c8] sm:$0xff] }
 0x107   : > { %13743 = vst [vmem:[#allocation39_spill] sm:$0xff] %v10711_v17  ;;  %v1114_v55 = vsel %vm455_vm0, %v1110_v13, %v1112_v35  ;;  %v10722_v46 = vadd.f32 %v1317_v15, %v10668_v48  ;;  %v690_v30 = vmul.f32 %v10181_v25, %v13747_v62  ;;  %v1126_v14 = vrot.slane %v1113_v31, %v9720_v7  ;;  %v13748_v13 = vld [vmem:[#allocation25_spill] sm:$0xff]  ;;  %v1489_v31 = vld [vmem:[%s13520_s6 + $0x1c0] sm:$0xff] }
 0x108   : > { %v1130_v5 = vrot.slane %v1114_v55, %v9720_v7  ;;  %v1100_v3 = vadd.f32 %v1094_v41, %v911_v42  ;;  %v672_v38 = vadd.f32 %v666_v33, %v648_v21  ;;  %1772 = vmatprep.subr.mxu0 %v1492_v60  ;;  %1575 = vrot.lane.b32.xlu0 %v10628_v34, %s13725_s22  ;;  %v13750_v7 = vld [vmem:[#allocation22_spill] sm:$0xff] }
 0x109   : > { %13746 = vst [vmem:[#allocation49_spill] sm:$0xff] %v10722_v46  ;;  %v9156_v35 = vpack.i.bf16 %v10711_v17, %v10722_v46  ;;  %v673_v36 = vadd.f32 %v667_v2, %v649_v6  ;;  %v691_v15 = vmul.f32 %v10047_v22, %v13747_v62  ;;  %v891_v9 = vadd.f32 %v13748_v13, %v10449_v10  ;;  %v1488_v13 = vld [vmem:[%s13520_s6 + $0x1b8] sm:$0xff] }
 0x10a   : > { %v1132_v55 = vmul.f32 %v1126_v14, %v9871_v59  ;;  %v1133_v60 = vmul.f32 %v1130_v5, %v9871_v59  ;;  %v1135_v42 = vmul.f32 %v1126_v14, %v13687_v29  ;;  %v1136_v21 = vmul.f32 %v1130_v5, %v13687_v29  ;;  %1773 = vmatpush2.msra.mxu0 %v1491_v53  ;;  %v13751_v53 = vld [vmem:[#allocation23_spill] sm:$0xff]  ;;  %v13753_v34 = vld [vmem:[#allocation58_spill] sm:$0xff] }
 0x10b   : > { %v1192_v2 = vmul.f32 %v1126_v14, %v13688_v45  ;;  %v1193_v6 = vmul.f32 %v1130_v5, %v13688_v45  ;;  %v1195_v41 = vmul.f32 %v1126_v14, %v10118_v11  ;;  %v1196_v10 = vmul.f32 %v1130_v5, %v10118_v11  ;;  %1774 = vmatprep.subr.mxu0 %v1490_v58  ;;  %v1487_v5 = vld [vmem:[%s13520_s6 + $0x1b0] sm:$0xff] }
 0x10c   : > { %v13749_v33 = vpack.i.bf16 %v10600_v18, %v10638_v57  ;;  %v1156_v17 = vadd.f32 %v13750_v7, %v1132_v55  ;;  %v10759_v46 = vadd.f32 %v13751_v53, %v1133_v60  ;;  %v1159_v51 = vadd.f32 %v13753_v34, %v1135_v42  ;;  %v13757_v57 = vld [vmem:[#allocation30_spill] sm:$0xff]  ;;  %v13759_v55 = vld [vmem:[#allocation61_spill] sm:$0xff]  ;;  %1581 = vrot.lane.b32.xlu0 %v10689_v61, %s13725_s22  ;;  %v13761_v34 = vld [vmem:[#allocation55_spill] sm:$0xff] }
 0x10d   : > { %v10763_v14 = vadd.f32 %v13754_v54, %v1136_v21  ;;  %v10770_v23 = vadd.f32 %v13757_v57, %v1193_v6  ;;  %v1207_v7 = vadd.f32 %v13758_v47, %v1195_v41  ;;  %v10774_v60 = vadd.f32 %v13759_v55, %v1196_v10  ;;  %v1486_v54 = vld [vmem:[%s13520_s6 + $0x1a8] sm:$0xff]  ;;  %1775 = vmatpush2.msra.mxu0 %v1489_v31  ;;  %v1485_v47 = vld [vmem:[%s13520_s6 + $0x1a0] sm:$0xff] }
 0x10e   : > { %9152 = vrot.lane.b32.xlu1 %v13749_v33, %s13725_s22  ;;  %13752 = vst [vmem:[#allocation36_spill] sm:$0xff] %v10759_v46  ;;  %v13756_v33 = vld [vmem:[#allocation29_spill] sm:$0xff]  ;;  %v10782_v58 = vadd.f32 %v13761_v34, %v1156_v17  ;;  %v13763_v42 = vld [vmem:[#allocation76_spill] sm:$0xff]  ;;  %v1327_v57 = vadd.f32 %v10334_v16, %v1100_v3  ;;  %v697_v17 = vadd.f32 %v691_v15, %v673_v36  ;;  %v13768_v36 = vld [vmem:[#allocation66_spill] sm:$0xff] }
 0x10f   : > { %13755 = vst [vmem:[#allocation27_spill] sm:$0xff] %v10763_v14  ;;  %v1204_v18 = vadd.f32 %v13756_v33, %v1192_v2  ;;  %13760 = vst [vmem:[#allocation33_spill] sm:$0xff] %v10774_v60  ;;  %v10785_v21 = vadd.f32 %v13763_v42, %v1159_v51  ;;  %v696_v2 = vadd.f32 %v690_v30, %v672_v38  ;;  %v13765_v6 = vld [vmem:[#allocation56_spill] sm:$0xff]  ;;  %v13767_v51 = vld [vmem:[#allocation26_spill] sm:$0xff]  ;;  %1776 = vmatprep.subr.mxu0 %v1488_v13 }
 0x110   : > { %13762 = vst [vmem:[#allocation13_spill] sm:$0xff] %v10782_v58  ;;  %v10795_v10 = vadd.f32 %v10300_v43, %v1207_v7  ;;  %v892_v53 = vadd.f32 %v13767_v51, %v10499_v8  ;;  %v1484_v3 = vld [vmem:[%s13520_s6 + $0x198] sm:$0xff]  ;;  %vm1333_vm14 = vcmp.gt.f32.partialorder %v1327_v57, 0.0  ;;  %v1339_v30 = vmul.f32 0.01, %v1327_v57  ;;  %v1483_v43 = vld [vmem:[%s13520_s6 + $0x190] sm:$0xff]  ;;  %1777 = vmatpush2.msra.mxu0 %v1487_v5 }
 0x111   : > { %13764 = vst [vmem:[#allocation14_spill] sm:$0xff] %v10785_v21  ;;  %v10792_v41 = vadd.f32 %v13765_v6, %v1204_v18  ;;  %v897_v38 = vmul.f32 %v10184_v20, %v13706_v39  ;;  %v898_v18 = vmul.f32 %v10053_v56, %v13706_v39  ;;  %v1068_v8 = vmul.f32 %v10606_v28, %v13688_v45  ;;  %v13769_v31 = vld [vmem:[#allocation48_spill] sm:$0xff]  ;;  %v13770_v42 = vld [vmem:[#allocation34_spill] sm:$0xff]  ;;  %v13771_v51 = vld [vmem:[#allocation37_spill] sm:$0xff] }
 0x112   : > { %13766 = vst [vmem:[#allocation57_spill] sm:$0xff] %v10795_v10  ;;  %9157 = vrot.lane.b32.xlu1 %v9156_v35, %s13725_s22  ;;  %v1069_v35 = vmul.f32 %v10644_v12, %v13688_v45  ;;  %v1086_v15 = vmul.f32 %v13768_v36, %v13732_v50  ;;  %v1087_v33 = vmul.f32 %v13769_v31, %v13732_v50  ;;  %v1482_v13 = vld [vmem:[%s13520_s6 + $0x188] sm:$0xff]  ;;  %v13772_v21 = vld [vmem:[#allocation38_spill] sm:$0xff]  ;;  %v13773_v58 = vld [vmem:[#allocation77_spill] sm:$0xff] }
 0x113   : > { %v1345_v7 = vsel %vm1333_vm14, %v1327_v57, %v1339_v30  ;;  %v903_v55 = vadd.f32 %v897_v38, %v891_v9  ;;  %v904_v34 = vadd.f32 %v898_v18, %v892_v53  ;;  %v653_v6 = vmul.f32 %v13770_v42, %v10353_v52  ;;  %1778 = vmatprep.subr.mxu0 %v1486_v54  ;;  %v13774_v10 = vld [vmem:[#allocation12_spill] sm:$0xff]  ;;  %v1481_v57 = vld [vmem:[%s13520_s6 + $0x180] sm:$0xff]  ;;  %v13775_v30 = vld [vmem:[#allocation69_spill] sm:$0xff] }
 0x114   : > { %v1351_v45 = vmul.f32 %v1345_v7, %v10520_v26  ;;  %v1080_v61 = vadd.f32 %v13771_v51, %v1068_v8  ;;  %v1081_v14 = vadd.f32 %v13772_v21, %v1069_v35  ;;  %v671_v5 = vmul.f32 %v13774_v10, %v13773_v58  ;;  %1779 = vmatpush2.msra.mxu0 %v1485_v47  ;;  %v13776_v38 = vld [vmem:[#allocation46_spill] sm:$0xff] }
 0x115   : > { %v909_v9 = vadd.f32 %v903_v55, %v696_v2  ;;  %v910_v53 = vadd.f32 %v904_v34, %v697_v17  ;;  %v695_v18 = vmul.f32 %v13776_v38, %v13775_v30  ;;  %v884_v54 = vmul.f32 %v10467_v37, %v13687_v29  ;;  %1780 = vmatprep.subr.mxu0 %v1484_v3  ;;  %v1480_v21 = vld [vmem:[%s13520_s6 + $0x178] sm:$0xff]  ;;  %v13777_v2 = vld [vmem:[#allocation52_spill] sm:$0xff]  ;;  %v13778_v17 = vld [vmem:[#allocation15_spill] sm:$0xff] }
 0x116   : > { %v10839_v10 = vadd.f32 %v1351_v45, %v10558_v32  ;;  %v1092_v47 = vadd.f32 %v1086_v15, %v1080_v61  ;;  %v1093_v8 = vadd.f32 %v1087_v33, %v1081_v14  ;;  %v677_v35 = vadd.f32 %v671_v5, %v653_v6  ;;  %1781 = vmatpush2.msra.mxu0 %v1483_v43  ;;  %v13779_v55 = vld [vmem:[#allocation74_spill] sm:$0xff]  ;;  %v13780_v34 = vld [vmem:[#allocation47_spill] sm:$0xff]  ;;  %v1479_v6 = vld [vmem:[%s13520_s6 + $0x170] sm:$0xff] }
 0x117   : > { %v890_v7 = vmul.f32 %v13778_v17, %v13777_v2  ;;  %v902_v42 = vmul.f32 %v13780_v34, %v13779_v55  ;;  %v1073_v3 = vmul.f32 %v10647_v4, %v10118_v11  ;;  %v13781_v51 = vld [vmem:[#allocation50_spill] sm:$0xff]  ;;  %1782 = vmatprep.subr.mxu0 %v1482_v13  ;;  %v651_v60 = vmul.f32 %v13741_v63, %v10353_v52 }
 0x118   : > { %v13782_v38 = vld [vmem:[#allocation18_spill] sm:$0xff]  ;;  %1587 = vrot.lane.b32.xlu0 %v10839_v10, %s13725_s22  ;;  %v1098_v61 = vadd.f32 %v1092_v47, %v909_v9  ;;  %v1099_v14 = vadd.f32 %v1093_v8, %v910_v53  ;;  %v701_v15 = vadd.f32 %v695_v18, %v677_v35  ;;  %v652_v13 = vmul.f32 %v13742_v40, %v10353_v52  ;;  %v1478_v9 = vld [vmem:[%s13520_s6 + $0x168] sm:$0xff] }
 0x119   : > { %v1079_v46 = vmul.f32 %v13782_v38, %v13781_v51  ;;  %v13783_v43 = vld [vmem:[#allocation78_spill] sm:$0xff]  ;;  %v896_v45 = vadd.f32 %v890_v7, %v884_v54  ;;  %1783 = vmatpush2.msra.mxu0 %v1481_v57  ;;  %v669_v47 = vmul.f32 %v13744_v24, %v13773_v58  ;;  %v693_v54 = vmul.f32 %v10181_v25, %v13775_v30 }
 0x11a   : > { %v1091_v33 = vmul.f32 %v13733_v44, %v13783_v43  ;;  %v1325_v53 = vadd.f32 %v10334_v16, %v1098_v61  ;;  %v1326_v18 = vadd.f32 %v10334_v16, %v1099_v14  ;;  %1784 = vmatprep.subr.mxu0 %v1480_v21  ;;  %v1477_v63 = vld [vmem:[%s13520_s6 + $0x160] sm:$0xff]  ;;  %v694_v8 = vmul.f32 %v10047_v22, %v13775_v30  ;;  %v1476_v24 = vld [vmem:[%s13520_s6 + $0x158] sm:$0xff]  ;;  %v1474_v61 = vld [vmem:[%s13520_s6 + $0x148] sm:$0xff] }
 0x11b   : > { %v1085_v5 = vadd.f32 %v1079_v46, %v1073_v3  ;;  %v670_v46 = vmul.f32 %v13745_v49, %v13773_v58  ;;  %v908_v40 = vadd.f32 %v902_v42, %v896_v45  ;;  %1785 = vmatpush2.msra.mxu0 %v1479_v6  ;;  %v1475_v49 = vld [vmem:[%s13520_s6 + $0x150] sm:$0xff]  ;;  %v675_v42 = vadd.f32 %v669_v47, %v651_v60  ;;  %v1473_v60 = vld [vmem:[%s13520_s6 + $0x140] sm:$0xff] }
 0x11c   : > { %vm1331_vm15 = vcmp.gt.f32.partialorder %v1325_v53, 0.0  ;;  %vm1332_vm0 = vcmp.gt.f32.partialorder %v1326_v18, 0.0  ;;  %v1337_v21 = vmul.f32 0.01, %v1325_v53  ;;  %v1338_v35 = vmul.f32 0.01, %v1326_v18  ;;  %1786 = vmatprep.subr.mxu0 %v1478_v9 }
 0x11d   : > { %v1097_v57 = vadd.f32 %v1091_v33, %v1085_v5  ;;  %v914_v7 = vadd.f32 %v908_v40, %v701_v15  ;;  %v676_v25 = vadd.f32 %v670_v46, %v652_v13  ;;  %v13784_v3 = vld [vmem:[#allocation16_spill] sm:$0xff]  ;;  %1787 = vmatpush2.msra.mxu0 %v1477_v63  ;;  %v13785_v6 = vld [vmem:[#allocation17_spill] sm:$0xff]  ;;  %v900_v5 = vmul.f32 %v10184_v20, %v13779_v55  ;;  %v13786_v46 = vld [vmem:[#allocation75_spill] sm:$0xff] }
 0x11e   : > { %v888_v22 = vmul.f32 %v13784_v3, %v13777_v2  ;;  %v1343_v14 = vsel %vm1331_vm15, %v1325_v53, %v1337_v21  ;;  %v1344_v33 = vsel %vm1332_vm0, %v1326_v18, %v1338_v35  ;;  %v889_v45 = vmul.f32 %v13785_v6, %v13777_v2  ;;  %1788 = vmatprep.subr.mxu0 %v1476_v24  ;;  %v1472_v53 = vld [vmem:[%s13520_s6 + $0x138] sm:$0xff]  ;;  %v1471_v35 = vld [vmem:[%s13520_s6 + $0x130] sm:$0xff] }
 0x11f   : > { %v1349_v15 = vmul.f32 %v1343_v14, %v10520_v26  ;;  %v1350_v13 = vmul.f32 %v1344_v33, %v10520_v26  ;;  %v1103_v9 = vadd.f32 %v1097_v57, %v914_v7  ;;  %v699_v47 = vadd.f32 %v693_v54, %v675_v42  ;;  %1789 = vmatpush2.msra.mxu0 %v1475_v49  ;;  %v13787_v40 = vld [vmem:[#allocation73_spill] sm:$0xff]  ;;  %v1470_v7 = vld [vmem:[%s13520_s6 + $0x128] sm:$0xff] }
 0x120   : > { %v700_v18 = vadd.f32 %v694_v8, %v676_v25  ;;  %v894_v63 = vadd.f32 %v888_v22, %v13786_v46  ;;  %v895_v24 = vadd.f32 %v889_v45, %v13787_v40  ;;  %v901_v21 = vmul.f32 %v10053_v56, %v13779_v55  ;;  %1790 = vmatprep.subr.mxu0 %v1474_v61  ;;  %v13788_v61 = vld [vmem:[#allocation19_spill] sm:$0xff] }
 0x121   : > { %v10907_v57 = vadd.f32 %v1349_v15, %v10558_v32  ;;  %v10910_v54 = vadd.f32 %v1350_v13, %v10558_v32  ;;  %v1330_v8 = vadd.f32 %v10190_v0, %v1103_v9  ;;  %v1071_v49 = vmul.f32 %v10606_v28, %v10118_v11  ;;  %1791 = vmatpush2.msra.mxu0 %v1473_v60  ;;  %v13789_v60 = vld [vmem:[#allocation20_spill] sm:$0xff] }
 0x122   : > { %v906_v42 = vadd.f32 %v900_v5, %v894_v63  ;;  %v907_v25 = vadd.f32 %v901_v21, %v895_v24  ;;  %v1072_v22 = vmul.f32 %v10644_v12, %v10118_v11  ;;  %v1077_v14 = vmul.f32 %v13788_v61, %v13781_v51  ;;  %1792 = vmatprep.subr.mxu0 %v1472_v53  ;;  %v1469_v5 = vld [vmem:[%s13520_s6 + $0x120] sm:$0xff]  ;;  %v1468_v53 = vld [vmem:[%s13520_s6 + $0x118] sm:$0xff] }
 0x123   : > { %v9161_v33 = vpack.i.bf16 %v10907_v57, %v10910_v54  ;;  %vm1336_vm2 = vcmp.gt.f32.partialorder %v1330_v8, 0.0  ;;  %v1342_v45 = vmul.f32 0.01, %v1330_v8  ;;  %v1078_v15 = vmul.f32 %v13789_v60, %v13781_v51  ;;  %1793 = vmatpush2.msra.mxu0 %v1471_v35 }
 0x124   : > { %v912_v13 = vadd.f32 %v906_v42, %v699_v47  ;;  %v913_v9 = vadd.f32 %v907_v25, %v700_v18  ;;  %v1083_v11 = vadd.f32 %v1077_v14, %v1071_v49  ;;  %v1089_v46 = vmul.f32 %v13768_v36, %v13783_v43  ;;  %1794 = vmatprep.subr.mxu0 %v1470_v7  ;;  %v1467_v18 = vld [vmem:[%s13520_s6 + $0x110] sm:$0xff]  ;;  %v1466_v49 = vld [vmem:[%s13520_s6 + $0x108] sm:$0xff] }
 0x125   : > { %9162 = vrot.lane.b32.xlu1 %v9161_v33, %s13725_s22  ;;  %v1348_v63 = vsel %vm1336_vm2, %v1330_v8, %v1342_v45  ;;  %v1084_v51 = vadd.f32 %v1078_v15, %v1072_v22  ;;  %v1090_v40 = vmul.f32 %v13769_v31, %v13783_v43  ;;  %v827_v47 = vmul.f32 %v10467_v37, %v13699_v1  ;;  %v13790_v22 = vld [vmem:[#allocation51_spill] sm:$0xff] }
 0x126   : > { %v1354_v24 = vmul.f32 %v1348_v63, %v10304_v19  ;;  %v1095_v21 = vadd.f32 %v1089_v46, %v1083_v11  ;;  %v845_v35 = vmul.f32 %v13778_v17, %v10235_v27  ;;  %v869_v8 = vmul.f32 %v13780_v34, %v13747_v62  ;;  %1795 = vmatpush2.msra.mxu0 %v1469_v5  ;;  %v13791_v46 = vld [vmem:[#allocation40_spill] sm:$0xff] }
 0x127   : > { %v1096_v7 = vadd.f32 %v1090_v40, %v1084_v51  ;;  %v1034_v42 = vmul.f32 %v10647_v4, %v9871_v59  ;;  %v1052_v25 = vmul.f32 %v13733_v44, %v13706_v39  ;;  %v1211_v14 = vmul.f32 %v13790_v22, %v13732_v50  ;;  %1796 = vmatprep.subr.mxu0 %v1468_v53  ;;  %v1465_v59 = vld [vmem:[%s13520_s6 + $0x100] sm:$0xff]  ;;  %v13792_v40 = vld [vmem:[#allocation28_spill] sm:$0xff] }
 0x128   : > { %v10957_v33 = vadd.f32 %v1354_v24, %v10668_v48  ;;  %v1101_v45 = vadd.f32 %v1095_v21, %v912_v13  ;;  %v851_v15 = vadd.f32 %v845_v35, %v827_v47  ;;  %v843_v5 = vmul.f32 %v13784_v3, %v10235_v27  ;;  %1797 = vmatpush2.msra.mxu0 %v1467_v18  ;;  %v13793_v21 = vld [vmem:[#allocation68_spill] sm:$0xff] }
 0x129   : > { %v1102_v11 = vadd.f32 %v1096_v7, %v913_v9  ;;  %v1046_v63 = vadd.f32 %v13791_v46, %v1034_v42  ;;  %v1217_v51 = vadd.f32 %v1211_v14, %v10770_v23  ;;  %v844_v50 = vmul.f32 %v13785_v6, %v10235_v27  ;;  %1798 = vmatprep.subr.mxu0 %v1466_v49  ;;  %v13794_v42 = vld [vmem:[#allocation44_spill] sm:$0xff]  ;;  %v13795_v14 = vld [vmem:[#allocation41_spill] sm:$0xff] }
 0x12a   : > { %1593 = vrot.lane.b32.xlu0 %v10957_v33, %s13725_s22  ;;  %v1328_v13 = vadd.f32 %v10190_v0, %v1101_v45  ;;  %v875_v53 = vadd.f32 %v869_v8, %v851_v15  ;;  %v849_v47 = vadd.f32 %v843_v5, %v13792_v40  ;;  %v867_v18 = vmul.f32 %v10184_v20, %v13747_v62  ;;  %v13796_v40 = vld [vmem:[#allocation67_spill] sm:$0xff] }
 0x12b   : > { %v1329_v9 = vadd.f32 %v10190_v0, %v1102_v11  ;;  %v1058_v24 = vadd.f32 %v1052_v25, %v1046_v63  ;;  %v850_v23 = vadd.f32 %v844_v50, %v13793_v21  ;;  %v868_v35 = vmul.f32 %v10053_v56, %v13747_v62  ;;  %1799 = vmatpush2.msra.mxu0 %v1465_v59  ;;  %v13797_v11 = vld [vmem:[#allocation42_spill] sm:$0xff] }
 0x12c   : > { %vm1334_vm3 = vcmp.gt.f32.partialorder %v1328_v13, 0.0  ;;  %v1340_v49 = vmul.f32 0.01, %v1328_v13  ;;  %v873_v7 = vadd.f32 %v867_v18, %v849_v47  ;;  %v1044_v8 = vadd.f32 %v13795_v14, %v13794_v42 }
 0x12d   : > { %vm1335_vm4 = vcmp.gt.f32.partialorder %v1329_v9, 0.0  ;;  %v1341_v45 = vmul.f32 0.01, %v1329_v9  ;;  %v1064_v15 = vadd.f32 %v1058_v24, %v875_v53  ;;  %v874_v5 = vadd.f32 %v868_v35, %v850_v23 }
 0x12e   : > { %v1346_v46 = vsel %vm1334_vm3, %v1328_v13, %v1340_v49  ;;  %v1045_v25 = vadd.f32 %v13797_v11, %v13796_v40  ;;  %v1050_v63 = vmul.f32 %v13768_v36, %v13706_v39  ;;  %v1051_v59 = vmul.f32 %v13769_v31, %v13706_v39 }
 0x12f   : > { %v1347_v50 = vsel %vm1335_vm4, %v1329_v9, %v1341_v45  ;;  %v1352_v47 = vmul.f32 %v1346_v46, %v10304_v19  ;;  %v1223_v18 = vadd.f32 %v1217_v51, %v1064_v15  ;;  %v830_v21 = vmul.f32 %v10467_v37, %v10353_v52  ;;  %v13798_v46 = vld [vmem:[#allocation21_spill] sm:$0xff] }
 0x130   : > { %v1353_v53 = vmul.f32 %v1347_v50, %v10304_v19  ;;  %v1056_v24 = vadd.f32 %v1050_v63, %v1044_v8  ;;  %v1057_v13 = vadd.f32 %v1051_v59, %v1045_v25  ;;  %v848_v23 = vmul.f32 %v13778_v17, %v13773_v58 }
 0x131   : > { %v10993_v35 = vadd.f32 %v1352_v47, %v10668_v48  ;;  %v1363_v49 = vadd.f32 %v10334_v16, %v1223_v18  ;;  %v872_v9 = vmul.f32 %v13780_v34, %v13775_v30  ;;  %v1037_v51 = vmul.f32 %v10647_v4, %v13687_v29 }
 0x132   : > { %v11001_v37 = vadd.f32 %v1353_v53, %v10668_v48  ;;  %v1062_v42 = vadd.f32 %v1056_v24, %v873_v7  ;;  %v1063_v14 = vadd.f32 %v1057_v13, %v874_v5  ;;  %v854_v8 = vadd.f32 %v848_v23, %v830_v21  ;;  %v13799_v21 = vld [vmem:[#allocation33_spill] sm:$0xff] }
 0x133   : > { %vm1369_vm5 = vcmp.gt.f32.partialorder %v1363_v49, 0.0  ;;  %v1375_v45 = vmul.f32 0.01, %v1363_v49  ;;  %v1043_v17 = vmul.f32 %v13782_v38, %v13777_v2  ;;  %v1055_v15 = vmul.f32 %v13733_v44, %v13779_v55  ;;  %v13800_v24 = vld [vmem:[#allocation53_spill] sm:$0xff] }
 0x134   : > { %v9166_v34 = vpack.i.bf16 %v10993_v35, %v11001_v37  ;;  %v1221_v40 = vadd.f32 %v13798_v46, %v1062_v42  ;;  %v1222_v29 = vadd.f32 %v10792_v41, %v1063_v14  ;;  %v878_v11 = vadd.f32 %v872_v9, %v854_v8 }
 0x135   : > { %v1381_v25 = vsel %vm1369_vm5, %v1363_v49, %v1375_v45  ;;  %v1049_v7 = vadd.f32 %v1043_v17, %v1037_v51  ;;  %v1214_v5 = vmul.f32 %v13790_v22, %v13783_v43  ;;  %v846_v63 = vmul.f32 %v13784_v3, %v13773_v58  ;;  %v13801_v51 = vld [vmem:[#allocation62_spill] sm:$0xff] }
 0x136   : > { %9167 = vrot.lane.b32.xlu1 %v9166_v34, %s13725_s22  ;;  %v1387_v59 = vmul.f32 %v1381_v25, %v10520_v26  ;;  %v1361_v50 = vadd.f32 %v10334_v16, %v1221_v40  ;;  %v1362_v47 = vadd.f32 %v10334_v16, %v1222_v29  ;;  %v847_v41 = vmul.f32 %v13785_v6, %v13773_v58  ;;  %v13802_v29 = vld [vmem:[#allocation70_spill] sm:$0xff] }
 0x137   : > { %v1061_v18 = vadd.f32 %v1055_v15, %v1049_v7  ;;  %v1220_v53 = vadd.f32 %v1214_v5, %v13799_v21  ;;  %v852_v13 = vadd.f32 %v846_v63, %v13800_v24  ;;  %v870_v43 = vmul.f32 %v10184_v20, %v13775_v30 }
 0x138   : > { %v11026_v3 = vadd.f32 %v1387_v59, %v10558_v32  ;;  %vm1367_vm6 = vcmp.gt.f32.partialorder %v1361_v50, 0.0  ;;  %vm1368_vm7 = vcmp.gt.f32.partialorder %v1362_v47, 0.0  ;;  %v1373_v23 = vmul.f32 0.01, %v1361_v50 }
 0x139   : > { %v1374_v49 = vmul.f32 0.01, %v1362_v47  ;;  %v1067_v9 = vadd.f32 %v1061_v18, %v878_v11  ;;  %v853_v42 = vadd.f32 %v847_v41, %v13801_v51  ;;  %v871_v6 = vmul.f32 %v10053_v56, %v13775_v30  ;;  %v13803_v11 = vld [vmem:[#allocation63_spill] sm:$0xff] }
 0x13a   : > { %1599 = vrot.lane.b32.xlu0 %v11026_v3, %s13725_s22  ;;  %v1379_v14 = vsel %vm1367_vm6, %v1361_v50, %v1373_v23  ;;  %v876_v8 = vadd.f32 %v870_v43, %v852_v13  ;;  %v1041_v20 = vmul.f32 %v13788_v61, %v13777_v2  ;;  %v1042_v45 = vmul.f32 %v13789_v60, %v13777_v2 }
 0x13b   : > { %v1380_v17 = vsel %vm1368_vm7, %v1362_v47, %v1374_v49  ;;  %v1385_v15 = vmul.f32 %v1379_v14, %v10520_v26  ;;  %v1226_v34 = vadd.f32 %v1220_v53, %v1067_v9  ;;  %v877_v46 = vadd.f32 %v871_v6, %v853_v42  ;;  %v13804_v42 = vld [vmem:[#allocation36_spill] sm:$0xff] }
 0x13c   : > { %v1386_v40 = vmul.f32 %v1380_v17, %v10520_v26  ;;  %v1047_v56 = vadd.f32 %v1041_v20, %v13802_v29  ;;  %v1048_v25 = vadd.f32 %v1042_v45, %v13803_v11  ;;  %v1053_v7 = vmul.f32 %v13768_v36, %v13779_v55 }
 0x13d   : > { %v11044_v5 = vadd.f32 %v1385_v15, %v10558_v32  ;;  %v1366_v63 = vadd.f32 %v10190_v0, %v1226_v34  ;;  %v1054_v2 = vmul.f32 %v13769_v31, %v13779_v55  ;;  %v980_v59 = vmul.f32 %v10647_v4, %v13699_v1  ;;  %v13806_v15 = vld [vmem:[#allocation57_spill] sm:$0xff] }
 0x13e   : > { %v11052_v50 = vadd.f32 %v1386_v40, %v10558_v32  ;;  %v1059_v47 = vadd.f32 %v1053_v7, %v1047_v56  ;;  %v998_v41 = vmul.f32 %v13782_v38, %v10235_v27  ;;  %v1022_v18 = vmul.f32 %v13733_v44, %v13747_v62 }
 0x13f   : > { %vm1372_vm8 = vcmp.gt.f32.partialorder %v1366_v63, 0.0  ;;  %v1378_v21 = vmul.f32 0.01, %v1366_v63  ;;  %v1060_v53 = vadd.f32 %v1054_v2, %v1048_v25  ;;  %v1175_v24 = vmul.f32 %v13790_v22, %v13706_v39  ;;  %v13805_v39 = vld [vmem:[#allocation54_spill] sm:$0xff] }
 0x140   : > { %v9171_v13 = vpack.i.bf16 %v11044_v5, %v11052_v50  ;;  %v1065_v43 = vadd.f32 %v1059_v47, %v876_v8  ;;  %v1004_v23 = vadd.f32 %v998_v41, %v980_v59  ;;  %v978_v49 = vmul.f32 %v10606_v28, %v13699_v1 }
 0x141   : > { %v1384_v9 = vsel %vm1372_vm8, %v1366_v63, %v1378_v21  ;;  %v1066_v51 = vadd.f32 %v1060_v53, %v877_v46  ;;  %v1181_v6 = vadd.f32 %v1175_v24, %v13804_v42  ;;  %v979_v14 = vmul.f32 %v10644_v12, %v13699_v1 }
 0x142   : > { %9172 = vrot.lane.b32.xlu1 %v9171_v13, %s13725_s22  ;;  %v1390_v20 = vmul.f32 %v1384_v9, %v10304_v19  ;;  %v1224_v45 = vadd.f32 %v13805_v39, %v1065_v43  ;;  %v1028_v17 = vadd.f32 %v1022_v18, %v1004_v23  ;;  %v996_v8 = vmul.f32 %v13788_v61, %v10235_v27  ;;  %v13807_v13 = vld [vmem:[#allocation43_spill] sm:$0xff]  ;;  %v13808_v23 = vld [vmem:[#allocation13_spill] sm:$0xff] }
 0x143   : > { %v1225_v34 = vadd.f32 %v13806_v15, %v1066_v51  ;;  %v997_v46 = vmul.f32 %v13789_v60, %v10235_v27  ;;  %v1020_v40 = vmul.f32 %v13768_v36, %v13747_v62  ;;  %v1021_v1 = vmul.f32 %v13769_v31, %v13747_v62  ;;  %v13809_v15 = vld [vmem:[#allocation27_spill] sm:$0xff] }
 0x144   : > { %v11080_v29 = vadd.f32 %v1390_v20, %v10668_v48  ;;  %v1364_v56 = vadd.f32 %v10190_v0, %v1224_v45  ;;  %v1187_v11 = vadd.f32 %v1181_v6, %v1028_v17  ;;  %v1002_v25 = vadd.f32 %v996_v8, %v978_v49 }
 0x145   : > { %v1365_v7 = vadd.f32 %v10190_v0, %v1225_v34  ;;  %v1003_v63 = vadd.f32 %v997_v46, %v979_v14  ;;  %v983_v2 = vmul.f32 %v10647_v4, %v10353_v52  ;;  %v1001_v27 = vmul.f32 %v13782_v38, %v13773_v58 }
 0x146   : > { %1605 = vrot.lane.b32.xlu0 %v11080_v29, %s13725_s22  ;;  %vm1370_vm9 = vcmp.gt.f32.partialorder %v1364_v56, 0.0  ;;  %v1376_v62 = vmul.f32 0.01, %v1364_v56  ;;  %v1399_v59 = vadd.f32 %v10334_v16, %v1187_v11  ;;  %v1026_v47 = vadd.f32 %v1020_v40, %v1002_v25 }
 0x147   : > { %vm1371_vm10 = vcmp.gt.f32.partialorder %v1365_v7, 0.0  ;;  %v1377_v41 = vmul.f32 0.01, %v1365_v7  ;;  %v1027_v18 = vadd.f32 %v1021_v1, %v1003_v63  ;;  %v1007_v21 = vadd.f32 %v1001_v27, %v983_v2  ;;  %v1528_v63 = vld [vmem:[%s13520_s6 + $0x2f8] sm:$0x7f] }
 0x148   : > { %v1382_v53 = vsel %vm1370_vm9, %v1364_v56, %v1376_v62  ;;  %vm1405_vm11 = vcmp.gt.f32.partialorder %v1399_v59, 0.0  ;;  %v1411_v24 = vmul.f32 0.01, %v1399_v59  ;;  %v1185_v4 = vadd.f32 %v13807_v13, %v1026_v47  ;;  %v13810_v13 = vld [vmem:[#allocation10_spill] sm:$0xff] }
 0x149   : > { %v1383_v43 = vsel %vm1371_vm10, %v1365_v7, %v1377_v41  ;;  %v1388_v38 = vmul.f32 %v1382_v53, %v10304_v19  ;;  %v1186_v49 = vadd.f32 %v13808_v23, %v1027_v18  ;;  %v1025_v9 = vmul.f32 %v13733_v44, %v13775_v30  ;;  %v1524_v41 = vld [vmem:[%s13520_s6 + $0x2d8] sm:$0xff]  ;;  %v1523_v53 = vld [vmem:[%s13520_s6 + $0x2d0] sm:$0xff]  ;;  %v1522_v23 = vld [vmem:[%s13520_s6 + $0x2c8] sm:$0xff] }
 0x14a   : > { %v1389_v51 = vmul.f32 %v1383_v43, %v10304_v19  ;;  %v1417_v42 = vsel %vm1405_vm11, %v1399_v59, %v1411_v24  ;;  %v1397_v6 = vadd.f32 %v10334_v16, %v1185_v4  ;;  %v1178_v14 = vmul.f32 %v13790_v22, %v13779_v55  ;;  %v13811_v43 = vld [vmem:[#allocation14_spill] sm:$0xff] }
 0x14b   : > { %v11101_v20 = vadd.f32 %v1388_v38, %v10668_v48  ;;  %v1423_v39 = vmul.f32 %v1417_v42, %v10520_v26  ;;  %v1398_v45 = vadd.f32 %v10334_v16, %v1186_v49  ;;  %v1031_v17 = vadd.f32 %v1025_v9, %v1007_v21  ;;  %v1521_v49 = vld [vmem:[%s13520_s6 + $0x2c0] sm:$0xff] }
 0x14c   : > { %v11106_v8 = vadd.f32 %v1389_v51, %v10668_v48  ;;  %vm1403_vm12 = vcmp.gt.f32.partialorder %v1397_v6, 0.0  ;;  %v1409_v44 = vmul.f32 0.01, %v1397_v6  ;;  %v1184_v34 = vadd.f32 %v1178_v14, %v13809_v15  ;;  %v1519_v14 = vld [vmem:[%s13520_s6 + $0x2b0] sm:$0xff] }
 0x14d   : > { %v11110_v46 = vadd.f32 %v1423_v39, %v10558_v32  ;;  %vm1404_vm13 = vcmp.gt.f32.partialorder %v1398_v45, 0.0  ;;  %v1410_v55 = vmul.f32 0.01, %v1398_v45  ;;  %v981_v22 = vmul.f32 %v10606_v28, %v10353_v52  ;;  %v1518_v39 = vld [vmem:[%s13520_s6 + $0x2a8] sm:$0xff] }
 0x14e   : > { %v9176_v40 = vpack.i.bf16 %v11101_v20, %v11106_v8  ;;  %v1415_v16 = vsel %vm1403_vm12, %v1397_v6, %v1409_v44  ;;  %v1190_v1 = vadd.f32 %v1184_v34, %v1031_v17  ;;  %v982_v56 = vmul.f32 %v10644_v12, %v10353_v52  ;;  %v1520_v6 = vld [vmem:[%s13520_s6 + $0x2b8] sm:$0xff]  ;;  %v1517_v17 = vld [vmem:[%s13520_s6 + $0x2a0] sm:$0xff] }
 0x14f   : > { %1611 = vrot.lane.b32.xlu0 %v11110_v46, %s13725_s22  ;;  %v1416_v11 = vsel %vm1404_vm13, %v1398_v45, %v1410_v55  ;;  %v1421_v25 = vmul.f32 %v1415_v16, %v10520_v26  ;;  %v999_v7 = vmul.f32 %v13788_v61, %v13773_v58  ;;  %v1000_v28 = vmul.f32 %v13789_v60, %v13773_v58  ;;  %v1527_v58 = vld [vmem:[%s13520_s6 + $0x2f0] sm:$0x7f]  ;;  %v1516_v34 = vld [vmem:[%s13520_s6 + $0x298] sm:$0xff]  ;;  %v1514_v16 = vld [vmem:[%s13520_s6 + $0x288] sm:$0xff] }
 0x150   : > { %9177 = vrot.lane.b32.xlu1 %v9176_v40, %s13725_s22  ;;  %v1422_v52 = vmul.f32 %v1416_v11, %v10520_v26  ;;  %v1402_v12 = vadd.f32 %v10190_v0, %v1190_v1  ;;  %v1023_v2 = vmul.f32 %v13768_v36, %v13775_v30  ;;  %v1024_v27 = vmul.f32 %v13769_v31, %v13775_v30  ;;  %v1526_v26 = vld [vmem:[%s13520_s6 + $0x2e8] sm:$0xff]  ;;  %v1525_v31 = vld [vmem:[%s13520_s6 + $0x2e0] sm:$0xff]  ;;  %v1515_v40 = vld [vmem:[%s13520_s6 + $0x290] sm:$0xff] }
 0x151   : > { %v11139_v61 = vadd.f32 %v1421_v25, %v10558_v32  ;;  %v1005_v60 = vadd.f32 %v999_v7, %v981_v22  ;;  %v1006_v62 = vadd.f32 %v1000_v28, %v982_v56  ;;  %vm1729_vm14 = vcmask 1046528   ;;  %v1512_v11 = vld [vmem:[%s13520_s6 + $0x278] sm:$0xff]  ;;  %v1511_v7 = vld [vmem:[%s13520_s6 + $0x270] sm:$0xff]  ;;  %v1509_v28 = vld [vmem:[%s13520_s6 + $0x260] sm:$0xff] }
 0x152   : > { %v11145_v59 = vadd.f32 %v1422_v52, %v10558_v32  ;;  %vm1408_vm15 = vcmp.gt.f32.partialorder %v1402_v12, 0.0  ;;  %v1414_v36 = vmul.f32 0.01, %v1402_v12  ;;  %7924 = vmatprep.subr.msk.mxu1 %vm1729_vm14, %v1528_v63  ;;  %v9578_v18 = vmov 0.0   ;;  %v1508_v63 = vld [vmem:[%s13520_s6 + $0x258] sm:$0xff]  ;;  %v1507_v52 = vld [vmem:[%s13520_s6 + $0x250] sm:$0xff] }
 0x153   : > { %v1029_v30 = vadd.f32 %v1023_v2, %v1005_v60  ;;  %v1030_v47 = vadd.f32 %v1024_v27, %v1006_v62  ;;  %7925 = vmatpush1.msk.msra.mxu1 %vm1729_vm14, %v1527_v58  ;;  %1925 = vmatprep.mubr.f32.mxu1 %v9578_v18  ;;  %v1505_v2 = vld [vmem:[%s13520_s6 + $0x240] sm:$0xff]  ;;  %v1504_v27 = vld [vmem:[%s13520_s6 + $0x238] sm:$0xff]  ;;  %v1503_v58 = vld [vmem:[%s13520_s6 + $0x230] sm:$0xff]  ;;  %vm2095_vm3 = vcmask 130048   ;;  %vm2016_vm4 = vcmask 1031168  }
 0x154   : > { %v9181_v32 = vpack.i.bf16 %v11139_v61, %v11145_v59  ;;  %v1420_v21 = vsel %vm1408_vm15, %v1402_v12, %v1414_v36  ;;  %1863 = vmatprep.subr.mxu1 %v1526_v26  ;;  %v1506_v12 = vld [vmem:[%s13520_s6 + $0x248] sm:$0xff]  ;;  %v1501_v62 = vld [vmem:[%s13520_s6 + $0x220] sm:$0xff]  ;;  %v1500_v26 = vld [vmem:[%s13520_s6 + $0x218] sm:$0xff]  ;;  %vm2582_vm5 = vcmask 1044480  }
 0x155   : > { %v1426_v24 = vmul.f32 %v1420_v21, %v10304_v19  ;;  %v1188_v4 = vadd.f32 %v13810_v13, %v1029_v30  ;;  %v1189_v38 = vadd.f32 %v13811_v43, %v1030_v47  ;;  %1864 = vmatpush1.msra.mxu1 %v1525_v31  ;;  %v1502_v60 = vld [vmem:[%s13520_s6 + $0x228] sm:$0xff]  ;;  %v1499_v36 = vld [vmem:[%s13520_s6 + $0x210] sm:$0xff] }
 0x156   : > { %9182 = vrot.lane.b32.xlu1 %v9181_v32, %s13725_s22  ;;  %1865 = vmatprep.subr.mxu1 %v1524_v41  ;;  %v1498_v30 = vld [vmem:[%s13520_s6 + $0x208] sm:$0xff]  ;;  %v1497_v32 = vld [vmem:[%s13520_s6 + $0x200] sm:$0xff]  ;;  %v13813_v43 = vld [vmem:[#allocation45_spill] sm:$0xff] }
 0x157   : > { %v11170_v9 = vadd.f32 %v1426_v24, %v10668_v48  ;;  %v1400_v51 = vadd.f32 %v10190_v0, %v1188_v4  ;;  %v1401_v42 = vadd.f32 %v10190_v0, %v1189_v38  ;;  %1866 = vmatpush1.msra.mxu1 %v1523_v53  ;;  %v13812_v47 = vld [vmem:[#allocation11_spill] sm:$0xff] }
 0x158   : > { %1867 = vmatprep.subr.mxu1 %v1522_v23  ;;  %v13814_v23 = vld [vmem:[#allocation32_spill] sm:$0xff] }
 0x159   : > { %1617 = vrot.lane.b32.xlu0 %v11170_v9, %s13725_s22  ;;  %vm1406_vm0 = vcmp.gt.f32.partialorder %v1400_v51, 0.0  ;;  %vm1407_vm2 = vcmp.gt.f32.partialorder %v1401_v42, 0.0  ;;  %v1412_v0 = vmul.f32 0.01, %v1400_v51  ;;  %v1413_v45 = vmul.f32 0.01, %v1401_v42  ;;  %1868 = vmatpush1.msra.mxu1 %v1521_v49 }
 0x15a   : > { %1869 = vmatprep.subr.mxu1 %v1520_v6 }
 0x15b   : > { %v1418_v44 = vsel %vm1406_vm0, %v1400_v51, %v1412_v0  ;;  %v1419_v15 = vsel %vm1407_vm2, %v1401_v42, %v1413_v45  ;;  %1870 = vmatpush1.msra.mxu1 %v1519_v14  ;;  %v13815_v42 = vld [vmem:[#allocation64_spill] sm:$0xff] }
 0x15c   : > { %v1424_v55 = vmul.f32 %v1418_v44, %v10304_v19  ;;  %v1425_v22 = vmul.f32 %v1419_v15, %v10304_v19  ;;  %1871 = vmatprep.subr.mxu1 %v1518_v39  ;;  %v1513_v19 = vld [vmem:[%s13520_s6 + $0x280] sm:$0xff] }
 0x15d   : > { %1872 = vmatpush1.msra.mxu1 %v1517_v17  ;;  %v13816_v17 = vld [vmem:[#allocation31_spill] sm:$0xff] }
 0x15e   : > { %v11200_v1 = vadd.f32 %v1424_v55, %v10668_v48  ;;  %v11203_v56 = vadd.f32 %v1425_v22, %v10668_v48  ;;  %1873 = vmatprep.subr.mxu1 %v1516_v34  ;;  %v1510_v48 = vld [vmem:[%s13520_s6 + $0x268] sm:$0xff] }
 0x15f   : > { %1874 = vmatpush1.msra.mxu1 %v1515_v40  ;;  %v13817_v22 = vld [vmem:[#allocation72_spill] sm:$0xff] }
 0x160   : > { %v9186_v25 = vpack.i.bf16 %v11200_v1, %v11203_v56  ;;  %1875 = vmatprep.subr.mxu1 %v1514_v16  ;;  %v13818_v16 = vld [vmem:[#allocation71_spill] sm:$0xff] }
 0x161   : > { %1876 = vmatpush1.msra.mxu1 %v1513_v19 }
 0x162   : > { %9187 = vrot.lane.b32.xlu1 %v9186_v25, %s13725_s22  ;;  %1877 = vmatprep.subr.mxu1 %v1512_v11 }
 0x163   : > { %1878 = vmatpush1.msra.mxu1 %v1511_v7 }
 0x164   : > { %1879 = vmatprep.subr.mxu1 %v1510_v48  ;;  %v13819_v48 = vld [vmem:[#allocation24_spill] sm:$0xff] }
 0x165   : > { %1880 = vmatpush1.msra.mxu1 %v1509_v28 }
 0x166   : > { %1881 = vmatprep.subr.mxu1 %v1508_v63 }
 0x167   : > { %1882 = vmatpush1.msra.mxu1 %v1507_v52 }
 0x168   : > { %1883 = vmatprep.subr.mxu1 %v1506_v12  ;;  %v1564_v31 = vpop.permute.xlu0 %1563 }
 0x169   : > { %1884 = vmatpush1.msra.mxu1 %v1505_v2  ;;  %v1671_v41 = vmax.f32 %v13812_v47, %v1564_v31  ;;  %v13820_v2 = vld [vmem:[#allocation35_spill] sm:$0xff] }
 0x16a   : > { %1885 = vmatprep.subr.mxu1 %v1504_v27 }
 0x16b   : > { %1886 = vmatpush1.msra.mxu1 %v1503_v58  ;;  %v9143_v21 = vpop.permute.xlu1 %9142  ;;  %v13821_v58 = vld [vmem:[#allocation65_spill] sm:$0xff] }
 0x16c   : > { %1887 = vmatprep.subr.mxu1 %v1502_v60  ;;  %v9145_v53 = vunpack.i.h.bf16 %v9143_v21  ;;  %v9144_v24 = vunpack.i.l.bf16 %v9143_v21 }
 0x16d   : > { %1888 = vmatpush1.msra.mxu1 %v1501_v62 }
 0x16e   : > { %1889 = vmatprep.subr.mxu1 %v1500_v26  ;;  %v1620_v13 = vsel %vm468_vm1, %v9144_v24, %v1564_v31  ;;  %v1619_v4 = vsel %vm468_vm1, %v9145_v53, %v9144_v24 }
 0x16f   : > { %1890 = vmatpush1.msra.mxu1 %v1499_v36  ;;  %v1670_v38 = vmax.f32 %v13813_v43, %v1620_v13  ;;  %v1669_v49 = vmax.f32 %v13814_v23, %v1619_v4 }
 0x170   : > { %1891 = vmatprep.subr.mxu1 %v1498_v30  ;;  %v13822_v30 = vld [vmem:[#allocation49_spill] sm:$0xff] }
 0x171   : > { %1892 = vmatpush1.msra.mxu1 %v1497_v32  ;;  %1800 = vmatprep.mubr.f32.mxu0 %v1670_v38 }
 0x172   : > { %7926 = vmatmul.mubr.msk.f32.vlgmr.msra.gmra.mxu1 %vm468_vm1, %v1671_v41  ;;  %1801 = vmatmul.mubr.f32.vlgmr.msra.gmra.mxu0 %v1669_v49  ;;  %v13823_v41 = vld [vmem:[#allocation39_spill] sm:$0xff] }
 0x173   : > { %1931 = vmatprep.mubr.f32.mxu1 %v9578_v18 }
 0x176   : > { %v1570_v51 = vpop.permute.xlu0 %1569 }
 0x177   : > { %v1674_v6 = vmax.f32 %v13815_v42, %v1570_v51 }
 0x178   : > { %v9148_v14 = vpop.permute.xlu1 %9147 }
 0x179   : > { %v9150_v39 = vunpack.i.h.bf16 %v9148_v14  ;;  %v9149_v0 = vunpack.i.l.bf16 %v9148_v14  ;;  %7927 = vmatmul.mubr.msk.f32.gmra.mxu1 %vm468_vm1, %v1674_v6 }
 0x17a   : > { %v1576_v45 = vpop.permute.xlu0 %1575  ;;  %1937 = vmatprep.mubr.f32.mxu1 %v9578_v18 }
 0x17b   : > { %v1677_v44 = vmax.f32 %v13816_v17, %v1576_v45  ;;  %v1622_v15 = vsel %vm468_vm1, %v9149_v0, %v1570_v51  ;;  %v1621_v34 = vsel %vm468_vm1, %v9150_v39, %v9149_v0 }
 0x17c   : > { %v1673_v40 = vmax.f32 %v13817_v22, %v1622_v15  ;;  %v1672_v19 = vmax.f32 %v13818_v16, %v1621_v34 }
 0x17d   : > { %7928 = vmatmul.mubr.msk.f32.gmra.mxu1 %vm468_vm1, %v1677_v44 }
 0x17e   : > { %v1582_v7 = vpop.permute.xlu0 %1581  ;;  %1806 = vmatprep.mubr.f32.mxu0 %v1673_v40  ;;  %1943 = vmatprep.mubr.f32.mxu1 %v9578_v18 }
 0x17f   : > { %v1680_v28 = vmax.f32 %v13819_v48, %v1582_v7  ;;  %1807 = vmatmul.mubr.f32.gmra.mxu0 %v1672_v19 }
 0x180   : > { %v9153_v55 = vpop.permute.xlu1 %9152 }
 0x181   : > { %v9155_v11 = vunpack.i.h.bf16 %v9153_v55  ;;  %v9154_v25 = vunpack.i.l.bf16 %v9153_v55  ;;  %7929 = vmatmul.mubr.msk.f32.gmra.mxu1 %vm468_vm1, %v1680_v28 }
 0x182   : > { %1949 = vmatprep.mubr.f32.mxu1 %v9578_v18 }
 0x183   : > { %v1624_v63 = vsel %vm468_vm1, %v9154_v25, %v1576_v45  ;;  %v1623_v52 = vsel %vm468_vm1, %v9155_v11, %v9154_v25 }
 0x184   : > { %v9158_v12 = vpop.permute.xlu1 %9157  ;;  %v1676_v27 = vmax.f32 %v13820_v2, %v1624_v63  ;;  %v1675_v60 = vmax.f32 %v13821_v58, %v1623_v52 }
 0x185   : > { %v9160_v62 = vunpack.i.h.bf16 %v9158_v12  ;;  %v9159_v26 = vunpack.i.l.bf16 %v9158_v12 }
 0x186   : > { %1812 = vmatprep.mubr.f32.mxu0 %v1676_v27 }
 0x187   : > { %1813 = vmatmul.mubr.f32.gmra.mxu0 %v1675_v60  ;;  %v1626_v36 = vsel %vm468_vm1, %v9159_v26, %v1582_v7  ;;  %v1625_v31 = vsel %vm468_vm1, %v9160_v62, %v9159_v26 }
 0x188   : > { %v1679_v47 = vmax.f32 %v13822_v30, %v1626_v36  ;;  %v1678_v32 = vmax.f32 %v13823_v41, %v1625_v31 }
 0x18a   : > { %1818 = vmatprep.mubr.f32.mxu0 %v1679_v47  ;;  %v1588_v21 = vpop.permute.xlu0 %1587 }
 0x18b   : > { %1819 = vmatmul.mubr.f32.gmra.mxu0 %v1678_v32  ;;  %v1683_v53 = vmax.f32 %v10839_v10, %v1588_v21 }
 0x18d   : > { %7930 = vmatmul.mubr.msk.f32.gmra.mxu1 %vm468_vm1, %v1683_v53 }
 0x18e   : > { %1955 = vmatprep.mubr.f32.mxu1 %v9578_v18 }
 0x197   : > { %v9163_v24 = vpop.permute.xlu1 %9162 }
 0x198   : > { %v9165_v13 = vunpack.i.h.bf16 %v9163_v24  ;;  %v9164_v4 = vunpack.i.l.bf16 %v9163_v24 }
 0x19a   : > { %v1628_v43 = vsel %vm468_vm1, %v9164_v4, %v1588_v21  ;;  %v1627_v38 = vsel %vm468_vm1, %v9165_v13, %v9164_v4 }
 0x19b   : > { %v1682_v23 = vmax.f32 %v10910_v54, %v1628_v43  ;;  %v1681_v49 = vmax.f32 %v10907_v57, %v1627_v38 }
 0x19c   : > { %v1594_v51 = vpop.permute.xlu0 %1593 }
 0x19d   : > { %v1686_v42 = vmax.f32 %v10957_v33, %v1594_v51  ;;  %1824 = vmatprep.mubr.f32.mxu0 %v1682_v23 }
 0x19e   : > { %1825 = vmatmul.mubr.f32.gmra.mxu0 %v1681_v49 }
 0x19f   : > { %7931 = vmatmul.mubr.msk.f32.gmra.mxu1 %vm468_vm1, %v1686_v42 }
 0x1a0   : > { %1961 = vmatprep.mubr.f32.mxu1 %v9578_v18 }
 0x1a8   : > { %v9168_v10 = vpop.permute.xlu1 %9167 }
 0x1a9   : > { %v9170_v6 = vunpack.i.h.bf16 %v9168_v10  ;;  %v9169_v14 = vunpack.i.l.bf16 %v9168_v10 }
 0x1ab   : > { %v1630_v39 = vsel %vm468_vm1, %v9169_v14, %v1594_v51  ;;  %v1629_v0 = vsel %vm468_vm1, %v9170_v6, %v9169_v14 }
 0x1ac   : > { %v1600_v45 = vpop.permute.xlu0 %1599  ;;  %v1685_v54 = vmax.f32 %v11001_v37, %v1630_v39  ;;  %v1684_v57 = vmax.f32 %v10993_v35, %v1629_v0 }
 0x1ad   : > { %v1689_v33 = vmax.f32 %v11026_v3, %v1600_v45 }
 0x1ae   : > { %1830 = vmatprep.mubr.f32.mxu0 %v1685_v54 }
 0x1af   : > { %7932 = vmatmul.mubr.msk.f32.gmra.mxu1 %vm468_vm1, %v1689_v33  ;;  %1831 = vmatmul.mubr.f32.gmra.mxu0 %v1684_v57 }
 0x1b0   : > { %1967 = vmatprep.mubr.f32.mxu1 %v9578_v18 }
 0x1b4   : > { %v9173_v17 = vpop.permute.xlu1 %9172 }
 0x1b5   : > { %v9175_v44 = vunpack.i.h.bf16 %v9173_v17  ;;  %v9174_v15 = vunpack.i.l.bf16 %v9173_v17 }
 0x1b7   : > { %v1632_v34 = vsel %vm468_vm1, %v9174_v15, %v1600_v45  ;;  %v1631_v55 = vsel %vm468_vm1, %v9175_v44, %v9174_v15 }
 0x1b8   : > { %v1606_v22 = vpop.permute.xlu0 %1605  ;;  %v1688_v37 = vmax.f32 %v11052_v50, %v1632_v34  ;;  %v1687_v35 = vmax.f32 %v11044_v5, %v1631_v55 }
 0x1b9   : > { %v1692_v3 = vmax.f32 %v11080_v29, %v1606_v22 }
 0x1ba   : > { %1836 = vmatprep.mubr.f32.mxu0 %v1688_v37 }
 0x1bb   : > { %7933 = vmatmul.mubr.msk.f32.gmra.mxu1 %vm468_vm1, %v1692_v3  ;;  %1837 = vmatmul.mubr.f32.gmra.mxu0 %v1687_v35 }
 0x1bc   : > { %1973 = vmatprep.mubr.f32.mxu1 %v9578_v18 }
 0x1c1   : > { %v1612_v40 = vpop.permute.xlu0 %1611 }
 0x1c2   : > { %v9178_v16 = vpop.permute.xlu1 %9177  ;;  %v1695_v19 = vmax.f32 %v11110_v46, %v1612_v40 }
 0x1c3   : > { %v9180_v11 = vunpack.i.h.bf16 %v9178_v16  ;;  %v9179_v25 = vunpack.i.l.bf16 %v9178_v16 }
 0x1c4   : > { %7934 = vmatmul.mubr.msk.f32.gmra.mxu1 %vm468_vm1, %v1695_v19 }
 0x1c5   : > { %v1634_v50 = vsel %vm468_vm1, %v9179_v25, %v1606_v22  ;;  %v1633_v5 = vsel %vm468_vm1, %v9180_v11, %v9179_v25  ;;  %1979 = vmatprep.mubr.f32.mxu1 %v9578_v18 }
 0x1c6   : > { %v1691_v29 = vmax.f32 %v11106_v8, %v1634_v50  ;;  %v1690_v7 = vmax.f32 %v11101_v20, %v1633_v5 }
 0x1c8   : > { %v9183_v48 = vpop.permute.xlu1 %9182  ;;  %1842 = vmatprep.mubr.f32.mxu0 %v1691_v29 }
 0x1c9   : > { %v9185_v28 = vunpack.i.h.bf16 %v9183_v48  ;;  %v9184_v63 = vunpack.i.l.bf16 %v9183_v48  ;;  %1843 = vmatmul.mubr.f32.gmra.mxu0 %v1690_v7 }
 0x1cb   : > { %v1618_v46 = vpop.permute.xlu0 %1617  ;;  %v1636_v52 = vsel %vm468_vm1, %v9184_v63, %v1612_v40  ;;  %v1635_v12 = vsel %vm468_vm1, %v9185_v28, %v9184_v63  ;;  %v11413_v28 = vld [vmem:[%s13517_s3 + $0x8] sm:$0xff] }
 0x1cc   : > { %v1698_v2 = vmax.f32 %v11170_v9, %v1618_v46  ;;  %v1694_v27 = vmax.f32 %v11145_v59, %v1636_v52  ;;  %v1693_v58 = vmax.f32 %v11139_v61, %v1635_v12 }
 0x1ce   : > { %7935 = vmatmul.mubr.msk.f32.gmra.mxu1 %vm468_vm1, %v1698_v2  ;;  %1848 = vmatprep.mubr.f32.mxu0 %v1694_v27 }
 0x1cf   : > { %1849 = vmatmul.mubr.f32.gmra.mxu0 %v1693_v58  ;;  %7936 = vmatprep.mubr.msk.f32.mxu1 %vm2095_vm3, %v11413_v28 }
 0x1d4   : > { %v9188_v20 = vpop.permute.xlu1 %9187 }
 0x1d5   : > { %v9190_v8 = vunpack.i.h.bf16 %v9188_v20  ;;  %v9189_v60 = vunpack.i.l.bf16 %v9188_v20 }
 0x1d7   : > { %v1638_v62 = vsel %vm468_vm1, %v9189_v60, %v1618_v46  ;;  %v1637_v26 = vsel %vm468_vm1, %v9190_v8, %v9189_v60 }
 0x1d8   : > { %v1697_v36 = vmax.f32 %v11203_v56, %v1638_v62  ;;  %v1696_v31 = vmax.f32 %v11200_v1, %v1637_v26 }
 0x1da   : > { %1854 = vmatprep.mubr.f32.mxu0 %v1697_v36  ;;  %v9502_v36 = vld [vmem:[%s13516_s2] sm:$0xff] }
 0x1db   : > { %1855 = vmatmul.mubr.f32.gmra.mxu0 %v1696_v31  ;;  %v9503_v31 = vld [vmem:[%s13516_s2 + $0x8] sm:$0xff] }
 0x1dc   : > { %7938 = vmatprep.mubr.msk.f32.mxu0 %vm2095_vm3, %v11413_v28 }
 0x232   : > { %v1927_v59 = vpop.f32.mrf.mxu1  ;;  %v1802_v61 = vpop.f32.mrf.mxu0 }
 0x233   : > { %v11374_v22 = vadd.f32 %v1927_v59, %v1802_v61  ;;  %v13824_v59 = vmov 4   ;;  %v13826_v61 = vmov 0  }
 0x234   : > { %v1929_v9 = vpop.f32.mrf.mxu1  ;;  %v1804_v47 = vpop.f32.mrf.mxu0 }
 0x235   : > { %v11378_v37 = vadd.f32 %v1929_v9, %v1804_v47  ;;  %v13825_v9 = vmov 5  }
 0x239   : > { %v1933_v30 = vpop.f32.mrf.mxu1 }
 0x23b   : > { %v1935_v41 = vpop.f32.mrf.mxu1 }
 0x23d   : > { %v1939_v21 = vpop.f32.mrf.mxu1 }
 0x23f   : > { %v1808_v32 = vpop.f32.mrf.mxu0  ;;  %v1941_v4 = vpop.f32.mrf.mxu1 }
 0x240   : > { %v11366_v34 = vadd.f32 %v1933_v30, %v1808_v32 }
 0x241   : > { %v1810_v53 = vpop.f32.mrf.mxu0  ;;  %v1945_v56 = vpop.f32.mrf.mxu1 }
 0x242   : > { %v11370_v55 = vadd.f32 %v1935_v41, %v1810_v53 }
 0x243   : > { %v1947_v51 = vpop.f32.mrf.mxu1 }
 0x247   : > { %v1814_v24 = vpop.f32.mrf.mxu0 }
 0x248   : > { %v11328_v13 = vadd.f32 %v1939_v21, %v1814_v24 }
 0x249   : > { %v1816_v43 = vpop.f32.mrf.mxu0 }
 0x24a   : > { %v11330_v38 = vadd.f32 %v1941_v4, %v1816_v43  ;;  %2041 = vrot.lane.b32.xlu1 %v11328_v13, %s9579_s0 }
 0x24b   : > { %v1820_v1 = vpop.f32.mrf.mxu0 }
 0x24c   : > { %2043 = vrot.lane.b32.xlu0 %v11330_v38, %s9579_s0  ;;  %v11338_v49 = vadd.f32 %v1945_v56, %v1820_v1 }
 0x24d   : > { %v1822_v23 = vpop.f32.mrf.mxu0  ;;  %v1951_v10 = vpop.f32.mrf.mxu1 }
 0x24e   : > { %2027 = vrot.lane.b32.xlu1 %v11328_v13, %s13725_s22  ;;  %v11342_v42 = vadd.f32 %v1947_v51, %v1822_v23 }
 0x24f   : > { %v1953_v39 = vpop.f32.mrf.mxu1 }
 0x250   : > { %2029 = vrot.lane.b32.xlu0 %v11330_v38, %s13725_s22 }
 0x252   : > { %2045 = vrot.lane.b32.xlu1 %v11338_v49, %s9579_s0 }
 0x254   : > { %2047 = vrot.lane.b32.xlu0 %v11342_v42, %s9579_s0 }
 0x256   : > { %2031 = vrot.lane.b32.xlu1 %v11338_v49, %s13725_s22 }
 0x258   : > { %2033 = vrot.lane.b32.xlu0 %v11342_v42, %s13725_s22 }
 0x25e   : > { %v1826_v6 = vpop.f32.mrf.mxu0 }
 0x25f   : > { %v11352_v14 = vadd.f32 %v1951_v10, %v1826_v6  ;;  %v1957_v54 = vpop.f32.mrf.mxu1 }
 0x260   : > { %v1828_v0 = vpop.f32.mrf.mxu0 }
 0x261   : > { %v11354_v45 = vadd.f32 %v1953_v39, %v1828_v0  ;;  %2059 = vrot.lane.b32.xlu1 %v11352_v14, %s13725_s22  ;;  %v1959_v17 = vpop.f32.mrf.mxu1 }
 0x263   : > { %2061 = vrot.lane.b32.xlu0 %v11354_v45, %s13725_s22 }
 0x26f   : > { %v1832_v57 = vpop.f32.mrf.mxu0  ;;  %v1963_v35 = vpop.f32.mrf.mxu1 }
 0x270   : > { %v11360_v33 = vadd.f32 %v1957_v54, %v1832_v57 }
 0x271   : > { %v1834_v44 = vpop.f32.mrf.mxu0  ;;  %v1965_v40 = vpop.f32.mrf.mxu1 }
 0x272   : > { %v11362_v15 = vadd.f32 %v1959_v17, %v1834_v44  ;;  %2063 = vrot.lane.b32.xlu1 %v11360_v33, %s13725_s22 }
 0x274   : > { %2065 = vrot.lane.b32.xlu0 %v11362_v15, %s13725_s22 }
 0x276   : > { %2012 = vrot.lane.b32.xlu1 %v11366_v34, %s9579_s0 }
 0x278   : > { %2014 = vrot.lane.b32.xlu0 %v11370_v55, %s9579_s0 }
 0x27a   : > { %2008 = vrot.lane.b32.xlu1 %v11374_v22, %s9579_s0 }
 0x27b   : > { %v1838_v3 = vpop.f32.mrf.mxu0  ;;  %v1969_v25 = vpop.f32.mrf.mxu1 }
 0x27c   : > { %2010 = vrot.lane.b32.xlu0 %v11378_v37, %s9579_s0  ;;  %v11390_v19 = vadd.f32 %v1963_v35, %v1838_v3 }
 0x27d   : > { %v1840_v16 = vpop.f32.mrf.mxu0  ;;  %v1971_v29 = vpop.f32.mrf.mxu1 }
 0x27e   : > { %1998 = vrot.lane.b32.xlu1 %v11366_v34, %s13725_s22  ;;  %v11394_v11 = vadd.f32 %v1965_v40, %v1840_v16 }
 0x280   : > { %2000 = vrot.lane.b32.xlu0 %v11370_v55, %s13725_s22 }
 0x282   : > { %1994 = vrot.lane.b32.xlu1 %v11374_v22, %s13725_s22 }
 0x284   : > { %1996 = vrot.lane.b32.xlu0 %v11378_v37, %s13725_s22  ;;  %v1975_v63 = vpop.f32.mrf.mxu1 }
 0x286   : > { %2219 = vrot.lane.b32.xlu1 %v11390_v19, %s13725_s22  ;;  %v1977_v52 = vpop.f32.mrf.mxu1 }
 0x288   : > { %2221 = vrot.lane.b32.xlu0 %v11394_v11, %s13725_s22 }
 0x289   : > { %v1844_v50 = vpop.f32.mrf.mxu0 }
 0x28a   : > { %v11400_v5 = vadd.f32 %v1969_v25, %v1844_v50 }
 0x28b   : > { %v1846_v7 = vpop.f32.mrf.mxu0 }
 0x28c   : > { %v11402_v48 = vadd.f32 %v1971_v29, %v1846_v7  ;;  %2223 = vrot.lane.b32.xlu1 %v11400_v5, %s13725_s22 }
 0x28e   : > { %2225 = vrot.lane.b32.xlu0 %v11402_v48, %s13725_s22  ;;  %v1981_v2 = vpop.f32.mrf.mxu1 }
 0x28f   : > { %v1850_v46 = vpop.f32.mrf.mxu0 }
 0x290   : > { %2077 = vrot.lane.b32.xlu1 %v11360_v33, %s9579_s0  ;;  %v1983_v20 = vpop.f32.mrf.mxu1  ;;  %v11431_v62 = vadd.f32 %v1975_v63, %v1850_v46 }
 0x291   : > { %v1852_v12 = vpop.f32.mrf.mxu0 }
 0x292   : > { %2079 = vrot.lane.b32.xlu0 %v11362_v15, %s9579_s0  ;;  %v11435_v26 = vadd.f32 %v1977_v52, %v1852_v12 }
 0x294   : > { %2073 = vrot.lane.b32.xlu1 %v11352_v14, %s9579_s0 }
 0x296   : > { %2075 = vrot.lane.b32.xlu0 %v11354_v45, %s9579_s0 }
 0x29b   : > { %v1856_v27 = vpop.f32.mrf.mxu0 }
 0x29c   : > { %v11425_v58 = vadd.f32 %v1981_v2, %v1856_v27 }
 0x29d   : > { %v1858_v8 = vpop.f32.mrf.mxu0 }
 0x29e   : > { %v11427_v60 = vadd.f32 %v1983_v20, %v1858_v8  ;;  %2352 = vrot.lane.b32.xlu1 %v11425_v58, %s13725_s22 }
 0x2a0   : > { %2354 = vrot.lane.b32.xlu0 %v11427_v60, %s13725_s22 }
 0x2a2   : > { %2348 = vrot.lane.b32.xlu1 %v11431_v62, %s13725_s22 }
 0x2a4   : > { %2350 = vrot.lane.b32.xlu0 %v11435_v26, %s13725_s22 }
 0x2a6   : > { %2237 = vrot.lane.b32.xlu1 %v11400_v5, %s9579_s0 }
 0x2a8   : > { %2239 = vrot.lane.b32.xlu0 %v11402_v48, %s9579_s0 }
 0x2aa   : > { %2233 = vrot.lane.b32.xlu1 %v11390_v19, %s9579_s0 }
 0x2ac   : > { %2235 = vrot.lane.b32.xlu0 %v11394_v11, %s9579_s0 }
 0x2ae   : > { %2366 = vrot.lane.b32.xlu1 %v11425_v58, %s9579_s0 }
 0x2b0   : > { %2368 = vrot.lane.b32.xlu0 %v11427_v60, %s9579_s0 }
 0x2b2   : > { %2362 = vrot.lane.b32.xlu1 %v11431_v62, %s9579_s0 }
 0x2b4   : > { %2364 = vrot.lane.b32.xlu0 %v11435_v26, %s9579_s0 }
 0x2b6   : > { %2088 = vperm.xlu1 %9191, %v9502_v36  }
 0x2b8   : > { %2092 = vperm.xlu0 %9192, %v9503_v31  }
 0x2ba   : > { %9193 = vset.pattern.permute.xlu1 %v13824_v59 }
 0x2bb   : > { %2192 = vperm.xlu1 %9193, %v9502_v36  }
 0x2bc   : > { %9195 = vset.pattern.permute.xlu0 %v13824_v59  ;;  %v2042_v30 = vpop.permute.xlu1 %2041  ;;  %v11576_v59 = vld [vmem:[%s13517_s3 + $0x18] sm:$0xff] }
 0x2bd   : > { %2196 = vperm.xlu0 %9195, %v9503_v31  }
 0x2be   : > { %v11467_v47 = vpop.permute.xlu0 %2043 }
 0x2bf   : > { %9194 = vset.pattern.permute.xlu1 %v13825_v9  ;;  %v11505_v44 = vsel %vm2016_vm4, %v2042_v30, %v11467_v47  ;;  %v11588_v9 = vld [vmem:[%s13517_s3 + $0x10] sm:$0xff] }
 0x2c0   : > { %2204 = vperm.xlu1 %9194, %v9502_v36   ;;  %v2028_v41 = vpop.permute.xlu1 %2027 }
 0x2c1   : > { %9197 = vset.pattern.permute.xlu0 %v13826_v61 }
 0x2c2   : > { %v11470_v32 = vpop.permute.xlu0 %2029 }
 0x2c3   : > { %v11517_v16 = vsel %vm468_vm1, %v2028_v41, %v11470_v32 }
 0x2c4   : > { %2208 = vperm.xlu1 %9194, %v9503_v31   ;;  %v2046_v21 = vpop.permute.xlu1 %2045 }
 0x2c6   : > { %v11472_v53 = vpop.permute.xlu0 %2047 }
 0x2c7   : > { %v11499_v57 = vsel %vm2016_vm4, %v2046_v21, %v11472_v53 }
 0x2c8   : > { %9196 = vset.pattern.permute.xlu1 %v13826_v61  ;;  %v2032_v24 = vpop.permute.xlu1 %2031 }
 0x2ca   : > { %v11474_v4 = vpop.permute.xlu0 %2033 }
 0x2cb   : > { %v11511_v3 = vsel %vm468_vm1, %v2032_v24, %v11474_v4 }
 0x2d3   : > { %v2060_v43 = vpop.permute.xlu1 %2059 }
 0x2d5   : > { %v11476_v1 = vpop.permute.xlu0 %2061 }
 0x2d6   : > { %v11489_v6 = vsel %vm468_vm1, %v2060_v43, %v11476_v1 }
 0x2e4   : > { %v2064_v56 = vpop.permute.xlu1 %2063 }
 0x2e6   : > { %v11478_v23 = vpop.permute.xlu0 %2065 }
 0x2e7   : > { %2102 = vmatprep.subr.mxu1 %v11478_v23  ;;  %v11483_v51 = vsel %vm468_vm1, %v2064_v56, %v11478_v23 }
 0x2e8   : > { %v2013_v10 = vpop.permute.xlu1 %2012  ;;  %2103 = vmatpush1.msra.mxu1 %v11483_v51 }
 0x2e9   : > { %2104 = vmatprep.subr.mxu1 %v11476_v1 }
 0x2ea   : > { %2105 = vmatpush1.msra.mxu1 %v11489_v6  ;;  %v2015_v39 = vpop.permute.xlu0 %2014 }
 0x2eb   : > { %2106 = vmatprep.subr.mxu1 %v11362_v15  ;;  %v2018_v7 = vsel %vm2016_vm4, %v2013_v10, %v2015_v39 }
 0x2ec   : > { %v2009_v0 = vpop.permute.xlu1 %2008  ;;  %2107 = vmatpush1.msra.mxu1 %v11360_v33 }
 0x2ed   : > { %2108 = vmatprep.subr.mxu1 %v11354_v45 }
 0x2ee   : > { %2109 = vmatpush1.msra.mxu1 %v11352_v14  ;;  %v2011_v54 = vpop.permute.xlu0 %2010 }
 0x2ef   : > { %2110 = vmatprep.subr.mxu1 %v11472_v53  ;;  %v2017_v63 = vsel %vm2016_vm4, %v2009_v0, %v2011_v54  ;;  %v2473_v0 = vld [vmem:[%s13521_s7] sm:$0xff] }
 0x2f0   : > { %v1999_v17 = vpop.permute.xlu1 %1998  ;;  %2111 = vmatpush1.msra.mxu1 %v11499_v57 }
 0x2f1   : > { %2112 = vmatprep.subr.mxu1 %v11467_v47 }
 0x2f2   : > { %2113 = vmatpush1.msra.mxu1 %v11505_v44  ;;  %v2001_v35 = vpop.permute.xlu0 %2000 }
 0x2f3   : > { %2114 = vmatprep.subr.mxu1 %v11474_v4  ;;  %v2003_v52 = vsel %vm468_vm1, %v1999_v17, %v2001_v35  ;;  %v2494_v17 = vld [vmem:[%s13521_s7 + $0xa8] sm:$0xff] }
 0x2f4   : > { %v1995_v40 = vpop.permute.xlu1 %1994  ;;  %2115 = vmatpush1.msra.mxu1 %v11511_v3 }
 0x2f5   : > { %2116 = vmatprep.subr.mxu1 %v11470_v32 }
 0x2f6   : > { %2117 = vmatpush1.msra.mxu1 %v11517_v16  ;;  %v1997_v25 = vpop.permute.xlu0 %1996 }
 0x2f7   : > { %2118 = vmatprep.subr.mxu1 %v11342_v42  ;;  %v2002_v2 = vsel %vm468_vm1, %v1995_v40, %v1997_v25 }
 0x2f8   : > { %2119 = vmatpush1.msra.mxu1 %v11338_v49  ;;  %v2220_v50 = vpop.permute.xlu1 %2219 }
 0x2f9   : > { %2120 = vmatprep.subr.mxu1 %v11330_v38 }
 0x2fa   : > { %2121 = vmatpush1.msra.mxu1 %v11328_v13  ;;  %v11524_v29 = vpop.permute.xlu0 %2221 }
 0x2fb   : > { %2122 = vmatprep.subr.mxu1 %v2015_v39  ;;  %v11541_v8 = vsel %vm468_vm1, %v2220_v50, %v11524_v29  ;;  %v2474_v39 = vld [vmem:[%s13521_s7 + $0x8] sm:$0xff] }
 0x2fc   : > { %2123 = vmatpush1.msra.mxu1 %v2018_v7  ;;  %v2490_v50 = vld [vmem:[%s13521_s7 + $0x88] sm:$0xff] }
 0x2fd   : > { %2124 = vmatprep.subr.mxu1 %v2011_v54  ;;  %v2496_v54 = vld [vmem:[%s13521_s7 + $0xb8] sm:$0x1f] }
 0x2fe   : > { %v2224_v46 = vpop.permute.xlu1 %2223  ;;  %2125 = vmatpush1.msra.mxu1 %v2017_v63 }
 0x2ff   : > { %2126 = vmatprep.subr.mxu1 %v2001_v35  ;;  %v2492_v35 = vld [vmem:[%s13521_s7 + $0x98] sm:$0xff] }
 0x300   : > { %v11529_v12 = vpop.permute.xlu0 %2225  ;;  %2127 = vmatpush1.msra.mxu1 %v2003_v52 }
 0x301   : > { %2247 = vmatprep.subr.mxu0 %v11529_v12  ;;  %v11535_v27 = vsel %vm468_vm1, %v2224_v46, %v11529_v12  ;;  %2128 = vmatprep.subr.mxu1 %v1997_v25 }
 0x302   : > { %v2078_v20 = vpop.permute.xlu1 %2077  ;;  %2248 = vmatpush1.msra.mxu0 %v11535_v27  ;;  %2129 = vmatpush1.msra.mxu1 %v2002_v2 }
 0x303   : > { %2249 = vmatprep.subr.mxu0 %v11524_v29  ;;  %2130 = vmatprep.subr.mxu1 %v11370_v55 }
 0x304   : > { %2250 = vmatpush1.msra.mxu0 %v11541_v8  ;;  %v11545_v36 = vpop.permute.xlu0 %2079  ;;  %2131 = vmatpush1.msra.mxu1 %v11366_v34 }
 0x305   : > { %2251 = vmatprep.subr.mxu0 %v11402_v48  ;;  %2132 = vmatprep.subr.mxu1 %v11378_v37  ;;  %v11556_v55 = vsel %vm2016_vm4, %v2078_v20, %v11545_v36  ;;  %v11565_v37 = vld [vmem:[%s13517_s3] sm:$0xff] }
 0x306   : > { %2252 = vmatpush1.msra.mxu0 %v11400_v5  ;;  %2133 = vmatpush1.msra.mxu1 %v11374_v22  ;;  %v2074_v31 = vpop.permute.xlu1 %2073 }
 0x307   : > { %2253 = vmatprep.subr.mxu0 %v11394_v11  ;;  %2162 = vmatprep.subr.mxu1 %v11545_v36 }
 0x308   : > { %2254 = vmatpush1.msra.mxu0 %v11390_v19  ;;  %v11559_v34 = vpop.permute.xlu0 %2075  ;;  %2163 = vmatpush2.msra.mxu1 %v11556_v55 }
 0x309   : > { %2255 = vmatprep.subr.mxu0 %v11545_v36  ;;  %2164 = vmatprep.subr.mxu1 %v11559_v34  ;;  %v11571_v22 = vsel %vm2016_vm4, %v2074_v31, %v11559_v34 }
 0x30a   : > { %2256 = vmatpush1.msra.mxu0 %v11556_v55  ;;  %2165 = vmatpush2.msra.mxu1 %v11571_v22 }
 0x30b   : > { %2257 = vmatprep.subr.mxu0 %v11559_v34  ;;  %2167 = vmatmul.mubr.f32.vlgmr.msra.gmra.mxu1 %v11565_v37 }
 0x30c   : > { %2258 = vmatpush1.msra.mxu0 %v11571_v22  ;;  %7937 = vmatprep.mubr.msk.f32.mxu1 %vm2095_vm3, %v11576_v59 }
 0x30d   : > { %2259 = vmatprep.subr.mxu0 %v11478_v23 }
 0x30e   : > { %2260 = vmatpush1.msra.mxu0 %v11483_v51 }
 0x30f   : > { %2261 = vmatprep.subr.mxu0 %v11476_v1  ;;  %2173 = vmatmul.mubr.f32.gmra.mxu1 %v11588_v9 }
 0x310   : > { %v2353_v30 = vpop.permute.xlu1 %2352  ;;  %2262 = vmatpush1.msra.mxu0 %v11489_v6  ;;  %7940 = vmatprep.mubr.msk.f32.mxu1 %vm2095_vm3, %v11413_v28 }
 0x311   : > { %2263 = vmatprep.subr.mxu0 %v11362_v15 }
 0x312   : > { %v2355_v41 = vpop.permute.xlu0 %2354  ;;  %2264 = vmatpush1.msra.mxu0 %v11360_v33 }
 0x313   : > { %v2357_v21 = vsel %vm468_vm1, %v2353_v30, %v2355_v41  ;;  %2376 = vmatprep.subr.mxu1 %v2355_v41  ;;  %2265 = vmatprep.subr.mxu0 %v11354_v45 }
 0x314   : > { %v2349_v24 = vpop.permute.xlu1 %2348  ;;  %2377 = vmatpush1.msra.mxu1 %v2357_v21  ;;  %2266 = vmatpush1.msra.mxu0 %v11352_v14 }
 0x315   : > { %2267 = vmatprep.subr.mxu0 %v11472_v53 }
 0x316   : > { %v2351_v43 = vpop.permute.xlu0 %2350  ;;  %2268 = vmatpush1.msra.mxu0 %v11499_v57  ;;  %v2495_v57 = vld [vmem:[%s13521_s7 + $0xb0] sm:$0xff] }
 0x317   : > { %v2356_v28 = vsel %vm468_vm1, %v2349_v24, %v2351_v43  ;;  %2378 = vmatprep.subr.mxu1 %v2351_v43  ;;  %2269 = vmatprep.subr.mxu0 %v11467_v47 }
 0x318   : > { %v2238_v56 = vpop.permute.xlu1 %2237  ;;  %2379 = vmatpush1.msra.mxu1 %v2356_v28  ;;  %2270 = vmatpush1.msra.mxu0 %v11505_v44  ;;  %v2493_v44 = vld [vmem:[%s13521_s7 + $0xa0] sm:$0xff] }
 0x319   : > { %2380 = vmatprep.subr.mxu1 %v11427_v60  ;;  %2271 = vmatprep.subr.mxu0 %v11474_v4  ;;  %v2479_v4 = vld [vmem:[%s13521_s7 + $0x30] sm:$0xff] }
 0x31a   : > { %2381 = vmatpush1.msra.mxu1 %v11425_v58  ;;  %v2240_v10 = vpop.permute.xlu0 %2239  ;;  %2272 = vmatpush1.msra.mxu0 %v11511_v3  ;;  %v2491_v3 = vld [vmem:[%s13521_s7 + $0x90] sm:$0xff] }
 0x31b   : > { %2382 = vmatprep.subr.mxu1 %v11435_v26  ;;  %2273 = vmatprep.subr.mxu0 %v11470_v32  ;;  %v2242_v47 = vsel %vm2016_vm4, %v2238_v56, %v2240_v10  ;;  %v2481_v26 = vld [vmem:[%s13521_s7 + $0x40] sm:$0xff]  ;;  %v2480_v32 = vld [vmem:[%s13521_s7 + $0x38] sm:$0xff] }
 0x31c   : > { %2383 = vmatpush1.msra.mxu1 %v11431_v62  ;;  %2274 = vmatpush1.msra.mxu0 %v11517_v16  ;;  %v2234_v60 = vpop.permute.xlu1 %2233  ;;  %v2482_v62 = vld [vmem:[%s13521_s7 + $0x48] sm:$0xff] }
 0x31d   : > { %2384 = vmatprep.subr.mxu1 %v2240_v10  ;;  %2275 = vmatprep.subr.mxu0 %v11342_v42 }
 0x31e   : > { %2385 = vmatpush1.msra.mxu1 %v2242_v47  ;;  %v2236_v53 = vpop.permute.xlu0 %2235  ;;  %2276 = vmatpush1.msra.mxu0 %v11338_v49 }
 0x31f   : > { %2386 = vmatprep.subr.mxu1 %v2236_v53  ;;  %v2241_v58 = vsel %vm2016_vm4, %v2234_v60, %v2236_v53  ;;  %2277 = vmatprep.subr.mxu0 %v11330_v38 }
 0x320   : > { %2387 = vmatpush1.msra.mxu1 %v2241_v58  ;;  %2278 = vmatpush1.msra.mxu0 %v11328_v13  ;;  %v2367_v38 = vpop.permute.xlu1 %2366 }
 0x321   : > { %2388 = vmatprep.subr.mxu1 %v11529_v12  ;;  %2307 = vmatprep.subr.mxu0 %v2240_v10 }
 0x322   : > { %2389 = vmatpush1.msra.mxu1 %v11535_v27  ;;  %2308 = vmatpush2.msra.mxu0 %v2242_v47  ;;  %v2369_v13 = vpop.permute.xlu0 %2368 }
 0x323   : > { %2390 = vmatprep.subr.mxu1 %v11524_v29  ;;  %2309 = vmatprep.subr.mxu0 %v2236_v53  ;;  %v2371_v42 = vsel %vm2016_vm4, %v2367_v38, %v2369_v13  ;;  %v2489_v29 = vld [vmem:[%s13521_s7 + $0x80] sm:$0xff] }
 0x324   : > { %2391 = vmatpush1.msra.mxu1 %v11541_v8  ;;  %2310 = vmatpush2.msra.mxu0 %v2241_v58 }
 0x325   : > { %2392 = vmatprep.subr.mxu1 %v11402_v48  ;;  %2312 = vmatmul.mubr.f32.vlgmr.msra.gmra.mxu0 %v11565_v37  ;;  %v2483_v48 = vld [vmem:[%s13521_s7 + $0x50] sm:$0xff] }
 0x326   : > { %2393 = vmatpush1.msra.mxu1 %v11400_v5  ;;  %7939 = vmatprep.mubr.msk.f32.mxu0 %vm2095_vm3, %v11576_v59  ;;  %v2365_v49 = vpop.permute.xlu0 %2364  ;;  %v2484_v5 = vld [vmem:[%s13521_s7 + $0x58] sm:$0xff] }
 0x327   : > { %2394 = vmatprep.subr.mxu1 %v11394_v11  ;;  %2586 = vmatprep.subr.mxu0 %v9578_v18 }
 0x328   : > { %2395 = vmatpush1.msra.mxu1 %v11390_v19  ;;  %v2363_v19 = vpop.permute.xlu1 %2362 }
 0x329   : > { %2396 = vmatprep.subr.mxu1 %v11545_v36  ;;  %2318 = vmatmul.mubr.f32.gmra.mxu0 %v11588_v9  ;;  %v2370_v11 = vsel %vm2016_vm4, %v2363_v19, %v2365_v49  ;;  %vm2723_vm4 = vcmask 392192  }
 0x32a   : > { %2397 = vmatpush1.msra.mxu1 %v11556_v55 }
 0x32b   : > { %2398 = vmatprep.subr.mxu1 %v11559_v34 }
 0x32c   : > { %2399 = vmatpush1.msra.mxu1 %v11571_v22 }
 0x32d   : > { %2400 = vmatprep.subr.mxu1 %v11478_v23  ;;  %v2477_v23 = vld [vmem:[%s13521_s7 + $0x20] sm:$0xff] }
 0x32e   : > { %2401 = vmatpush1.msra.mxu1 %v11483_v51  ;;  %v2476_v51 = vld [vmem:[%s13521_s7 + $0x18] sm:$0xff] }
 0x32f   : > { %2402 = vmatprep.subr.mxu1 %v11476_v1  ;;  %v2478_v1 = vld [vmem:[%s13521_s7 + $0x28] sm:$0xff] }
 0x330   : > { %2403 = vmatpush1.msra.mxu1 %v11489_v6  ;;  %v2475_v6 = vld [vmem:[%s13521_s7 + $0x10] sm:$0xff] }
 0x331   : > { %2404 = vmatprep.subr.mxu1 %v11362_v15  ;;  %v2485_v15 = vld [vmem:[%s13521_s7 + $0x60] sm:$0xff]  ;;  %v11741_v40 = vpop.permute.xlu1 %2088 }
 0x332   : > { %2405 = vmatpush1.msra.mxu1 %v11360_v33  ;;  %v2486_v33 = vld [vmem:[%s13521_s7 + $0x68] sm:$0xff] }
 0x333   : > { %2406 = vmatprep.subr.mxu1 %v11354_v45  ;;  %v2487_v45 = vld [vmem:[%s13521_s7 + $0x70] sm:$0xff]  ;;  %v11752_v63 = vpop.permute.xlu0 %2092 }
 0x334   : > { %2407 = vmatpush1.msra.mxu1 %v11352_v14  ;;  %v2488_v14 = vld [vmem:[%s13521_s7 + $0x78] sm:$0xff] }
 0x335   : > { %2436 = vmatprep.subr.mxu1 %v2369_v13  ;;  %2587 = vmatpush1.msra.mxu0 %v2488_v14 }
 0x336   : > { %2437 = vmatpush2.msra.mxu1 %v2371_v42  ;;  %2588 = vmatprep.subr.mxu0 %v9578_v18  ;;  %v11743_v16 = vpop.permute.xlu1 %2192 }
 0x337   : > { %2438 = vmatprep.subr.mxu1 %v2365_v49  ;;  %2589 = vmatpush1.msra.mxu0 %v2487_v45 }
 0x338   : > { %2439 = vmatpush2.msra.mxu1 %v2370_v11  ;;  %2590 = vmatprep.subr.mxu0 %v9578_v18  ;;  %v11762_v22 = vpop.permute.xlu0 %2196 }
 0x339   : > { %2441 = vmatmul.mubr.f32.vlgmr.msra.gmra.mxu1 %v11565_v37  ;;  %2591 = vmatpush1.msra.mxu0 %v2486_v33 }
 0x33a   : > { %7941 = vmatprep.mubr.msk.f32.mxu1 %vm2095_vm3, %v11576_v59  ;;  %2592 = vmatprep.subr.mxu0 %v9578_v18  ;;  %vm2563_vm3 = vcmask 498688  }
 0x33b   : > { %2593 = vmatpush1.msra.mxu0 %v2485_v15  ;;  %v11756_v12 = vpop.permute.xlu1 %2204 }
 0x33c   : > { %2594 = vmatprep.subr.mxu0 %v9578_v18 }
 0x33d   : > { %2447 = vmatmul.mubr.f32.gmra.mxu1 %v11588_v9  ;;  %2595 = vmatpush1.msra.mxu0 %v2484_v5 }
 0x33e   : > { %2596 = vmatprep.subr.mxu0 %v9578_v18 }
 0x33f   : > { %2597 = vmatpush1.msra.mxu0 %v2483_v48  ;;  %v11768_v41 = vpop.permute.xlu1 %2208 }
 0x340   : > { %2598 = vmatprep.subr.mxu0 %v9578_v18 }
 0x341   : > { %2599 = vmatpush1.msra.mxu0 %v2482_v62 }
 0x342   : > { %2600 = vmatprep.subr.mxu0 %v9578_v18 }
 0x343   : > { %2601 = vmatpush1.msra.mxu0 %v2481_v26 }
 0x344   : > { %2602 = vmatprep.subr.mxu0 %v9578_v18 }
 0x345   : > { %2603 = vmatpush1.msra.mxu0 %v2480_v32 }
 0x346   : > { %2604 = vmatprep.subr.mxu0 %v9578_v18 }
 0x347   : > { %2605 = vmatpush1.msra.mxu0 %v2479_v4 }
 0x348   : > { %2606 = vmatprep.subr.mxu0 %v9578_v18 }
 0x349   : > { %2607 = vmatpush1.msra.mxu0 %v2478_v1 }
 0x34a   : > { %2608 = vmatprep.subr.mxu0 %v9578_v18 }
 0x34b   : > { %2609 = vmatpush1.msra.mxu0 %v2477_v23 }
 0x34c   : > { %2610 = vmatprep.subr.mxu0 %v9578_v18 }
 0x34d   : > { %2611 = vmatpush1.msra.mxu0 %v2476_v51 }
 0x34e   : > { %2612 = vmatprep.subr.mxu0 %v9578_v18 }
 0x34f   : > { %2613 = vmatpush1.msra.mxu0 %v2475_v6 }
 0x350   : > { %2614 = vmatprep.subr.mxu0 %v9578_v18 }
 0x351   : > { %2615 = vmatpush1.msra.mxu0 %v2474_v39 }
 0x352   : > { %2616 = vmatprep.subr.mxu0 %v9578_v18 }
 0x353   : > { %2617 = vmatpush1.msra.mxu0 %v2473_v0 }
 0x354   : > { %2634 = vmatprep.subr.mxu0 %v9578_v18 }
 0x355   : > { %7942 = vmatpush2.msk.msra.mxu0 %vm2582_vm5, %v2496_v54 }
 0x356   : > { %2636 = vmatprep.subr.mxu0 %v9578_v18 }
 0x357   : > { %2637 = vmatpush2.msra.mxu0 %v2495_v57 }
 0x358   : > { %2638 = vmatprep.subr.mxu0 %v9578_v18 }
 0x359   : > { %2639 = vmatpush2.msra.mxu0 %v2494_v17 }
 0x35a   : > { %2640 = vmatprep.subr.mxu0 %v9578_v18 }
 0x35b   : > { %2641 = vmatpush2.msra.mxu0 %v2493_v44 }
 0x35c   : > { %2642 = vmatprep.subr.mxu0 %v9578_v18 }
 0x35d   : > { %2643 = vmatpush2.msra.mxu0 %v2492_v35 }
 0x35e   : > { %2644 = vmatprep.subr.mxu0 %v9578_v18 }
 0x35f   : > { %2645 = vmatpush2.msra.mxu0 %v2491_v3 }
 0x360   : > { %2646 = vmatprep.subr.mxu0 %v9578_v18 }
 0x361   : > { %2647 = vmatpush2.msra.mxu0 %v2490_v50 }
 0x362   : > { %2648 = vmatprep.subr.mxu0 %v9578_v18 }
 0x363   : > { %2649 = vmatpush2.msra.mxu0 %v2489_v29 }
 0x364   : > { %3437 = vmatprep.subr.bf16.mxu0 %v13826_v61 }
 0x3cb   : > { %v2168_v25 = vpop.f32.mrf.mxu1 }
 0x3cc   : > { %v2169_v7 = vadd.f32 %v2168_v25, %v11741_v40 }
 0x3cd   : > { %v2170_v46 = vpop.f32.mrf.mxu1 }
 0x3ce   : > { %v2171_v52 = vadd.f32 %v2170_v46, %v11741_v40  ;;  %vm2179_vm6 = vcmp.gt.f32.partialorder %v2169_v7, 0.0  ;;  %v2183_v2 = vmul.f32 0.01, %v2169_v7 }
 0x3cf   : > { %v2174_v27 = vpop.f32.mrf.mxu1 }
 0x3d0   : > { %vm2180_vm7 = vcmp.gt.f32.partialorder %v2171_v52, 0.0  ;;  %v2184_v20 = vmul.f32 0.01, %v2171_v52  ;;  %v2175_v8 = vadd.f32 %v2174_v27, %v11752_v63  ;;  %v2187_v36 = vsel %vm2179_vm6, %v2169_v7, %v2183_v2 }
 0x3d1   : > { %v2176_v55 = vpop.f32.mrf.mxu1  ;;  %v2199_v31 = vmul.f32 %v11743_v16, %v2187_v36 }
 0x3d2   : > { %v2188_v34 = vsel %vm2180_vm7, %v2171_v52, %v2184_v20  ;;  %v2177_v37 = vadd.f32 %v2176_v55, %v11752_v63  ;;  %vm2181_vm8 = vcmp.gt.f32.partialorder %v2175_v8, 0.0  ;;  %v2185_v59 = vmul.f32 0.01, %v2175_v8 }
 0x3d3   : > { %v11765_v9 = vadd.f32 %v11756_v12, %v2199_v31  ;;  %v2200_v30 = vmul.f32 %v11743_v16, %v2188_v34 }
 0x3d4   : > { %vm2182_vm9 = vcmp.gt.f32.partialorder %v2177_v37, 0.0  ;;  %v2186_v21 = vmul.f32 0.01, %v2177_v37  ;;  %v2189_v24 = vsel %vm2181_vm8, %v2175_v8, %v2185_v59 }
 0x3d5   : > { %2509 = vrot.lane.b32.xlu1 %v11765_v9, %s13725_s22  ;;  %v11773_v43 = vadd.f32 %v11756_v12, %v2200_v30  ;;  %v2201_v28 = vmul.f32 %v11762_v22, %v2189_v24 }
 0x3d6   : > { %v2190_v56 = vsel %vm2182_vm9, %v2177_v37, %v2186_v21 }
 0x3d7   : > { %2511 = vrot.lane.b32.xlu0 %v11773_v43, %s13725_s22  ;;  %v2202_v10 = vmul.f32 %v11762_v22, %v2190_v56  ;;  %v11780_v47 = vadd.f32 %v11768_v41, %v2201_v28 }
 0x3d9   : > { %v11783_v60 = vadd.f32 %v11768_v41, %v2202_v10  ;;  %2513 = vrot.lane.b32.xlu1 %v11780_v47, %s13725_s22 }
 0x3db   : > { %2515 = vrot.lane.b32.xlu0 %v11783_v60, %s13725_s22 }
 0x3e5   : > { %v2313_v53 = vpop.f32.mrf.mxu0 }
 0x3e6   : > { %v2314_v58 = vadd.f32 %v2313_v53, %v11741_v40 }
 0x3e7   : > { %v2315_v13 = vpop.f32.mrf.mxu0 }
 0x3e8   : > { %vm2324_vm10 = vcmp.gt.f32.partialorder %v2314_v58, 0.0  ;;  %v2328_v38 = vmul.f32 0.01, %v2314_v58  ;;  %v2316_v49 = vadd.f32 %v2315_v13, %v11741_v40 }
 0x3e9   : > { %v2319_v42 = vpop.f32.mrf.mxu0 }
 0x3ea   : > { %v2332_v19 = vsel %vm2324_vm10, %v2314_v58, %v2328_v38  ;;  %vm2325_vm11 = vcmp.gt.f32.partialorder %v2316_v49, 0.0  ;;  %v2329_v11 = vmul.f32 0.01, %v2316_v49  ;;  %v2320_v14 = vadd.f32 %v2319_v42, %v11752_v63 }
 0x3eb   : > { %v2336_v45 = vmul.f32 %v2332_v19, %v11743_v16  ;;  %v2321_v33 = vpop.f32.mrf.mxu0 }
 0x3ec   : > { %v2333_v15 = vsel %vm2325_vm11, %v2316_v49, %v2329_v11  ;;  %vm2326_vm12 = vcmp.gt.f32.partialorder %v2320_v14, 0.0  ;;  %v2330_v5 = vmul.f32 0.01, %v2320_v14  ;;  %v2322_v48 = vadd.f32 %v2321_v33, %v11752_v63 }
 0x3ed   : > { %v2337_v62 = vmul.f32 %v2333_v15, %v11743_v16  ;;  %v11796_v26 = vadd.f32 %v2336_v45, %v11756_v12 }
 0x3ee   : > { %v2334_v32 = vsel %vm2326_vm12, %v2320_v14, %v2330_v5  ;;  %vm2327_vm13 = vcmp.gt.f32.partialorder %v2322_v48, 0.0  ;;  %v2331_v4 = vmul.f32 0.01, %v2322_v48 }
 0x3ef   : > { %v2338_v1 = vmul.f32 %v2334_v32, %v11762_v22  ;;  %2517 = vrot.lane.b32.xlu1 %v11796_v26, %s13725_s22  ;;  %v2341_v23 = vadd.f32 %v2337_v62, %v11756_v12 }
 0x3f0   : > { %v2335_v51 = vsel %vm2327_vm13, %v2322_v48, %v2331_v4 }
 0x3f1   : > { %v2339_v6 = vmul.f32 %v2335_v51, %v11762_v22  ;;  %2519 = vrot.lane.b32.xlu0 %v2341_v23, %s13725_s22  ;;  %v11805_v39 = vadd.f32 %v2338_v1, %v11768_v41  ;;  %v11849_v1 = vld [vmem:[%s13518_s4] sm:$0xff] }
 0x3f2   : > { %8949 = vmatprep.mubr.msk.f32.mxu1 %vm2723_vm4, %v11849_v1 }
 0x3f3   : > { %2521 = vrot.lane.b32.xlu1 %v11805_v39, %s13725_s22  ;;  %v2343_v0 = vadd.f32 %v2339_v6, %v11768_v41 }
 0x3f5   : > { %2523 = vrot.lane.b32.xlu0 %v2343_v0, %s13725_s22 }
 0x3f9   : > { %v2442_v54 = vpop.f32.mrf.mxu1 }
 0x3fa   : > { %v2443_v57 = vadd.f32 %v2442_v54, %v11741_v40 }
 0x3fb   : > { %v2444_v17 = vpop.f32.mrf.mxu1 }
 0x3fc   : > { %vm2453_vm14 = vcmp.gt.f32.partialorder %v2443_v57, 0.0  ;;  %v2457_v44 = vmul.f32 0.01, %v2443_v57  ;;  %v2445_v35 = vadd.f32 %v2444_v17, %v11741_v40 }
 0x3fd   : > { %v2448_v3 = vpop.f32.mrf.mxu1 }
 0x3fe   : > { %v2461_v25 = vsel %vm2453_vm14, %v2443_v57, %v2457_v44  ;;  %vm2454_vm15 = vcmp.gt.f32.partialorder %v2445_v35, 0.0  ;;  %v2458_v50 = vmul.f32 0.01, %v2445_v35  ;;  %v2449_v29 = vadd.f32 %v2448_v3, %v11752_v63  ;;  %v2686_v3 = vld [vmem:[%s13519_s5 + $0x8] sm:$0xff] }
 0x3ff   : > { %v2465_v7 = vmul.f32 %v2461_v25, %v11743_v16  ;;  %v2450_v46 = vpop.f32.mrf.mxu1  ;;  %v2685_v25 = vld [vmem:[%s13519_s5] sm:$0xff] }
 0x400   : > { %v2462_v52 = vsel %vm2454_vm15, %v2445_v35, %v2458_v50  ;;  %vm2455_vm0 = vcmp.gt.f32.partialorder %v2449_v29, 0.0  ;;  %v2459_v2 = vmul.f32 0.01, %v2449_v29  ;;  %v2451_v27 = vadd.f32 %v2450_v46, %v11752_v63  ;;  %v2687_v50 = vld [vmem:[%s13519_s5 + $0x10] sm:$0xff] }
 0x401   : > { %v2466_v20 = vmul.f32 %v2462_v52, %v11743_v16  ;;  %v2469_v8 = vadd.f32 %v2465_v7, %v11756_v12 }
 0x402   : > { %v2463_v36 = vsel %vm2455_vm0, %v2449_v29, %v2459_v2  ;;  %vm2456_vm2 = vcmp.gt.f32.partialorder %v2451_v27, 0.0  ;;  %v2460_v40 = vmul.f32 0.01, %v2451_v27  ;;  %v2688_v29 = vld [vmem:[%s13519_s5 + $0x18] sm:$0xff]  ;;  %vm3127_vm0 = vcmask 752640  }
 0x403   : > { %v2467_v55 = vmul.f32 %v2463_v36, %v11762_v22  ;;  %2525 = vrot.lane.b32.xlu1 %v2469_v8, %s13725_s22  ;;  %v2470_v31 = vadd.f32 %v2466_v20, %v11756_v12  ;;  %v2683_v20 = vld [vmem:[%s13518_s4 + $0x10] sm:$0xff] }
 0x404   : > { %v2464_v34 = vsel %vm2456_vm2, %v2451_v27, %v2460_v40  ;;  %v2682_v27 = vld [vmem:[%s13518_s4 + $0x8] sm:$0xff]  ;;  %vm3293_vm2 = vcmask 375808  }
 0x405   : > { %v2468_v37 = vmul.f32 %v2464_v34, %v11762_v22  ;;  %2527 = vrot.lane.b32.xlu0 %v2470_v31, %s13725_s22  ;;  %v2471_v63 = vadd.f32 %v2467_v55, %v11768_v41 }
 0x407   : > { %2529 = vrot.lane.b32.xlu1 %v2471_v63, %s13725_s22  ;;  %v2472_v16 = vadd.f32 %v2468_v37, %v11768_v41 }
 0x409   : > { %2531 = vrot.lane.b32.xlu0 %v2472_v16, %s13725_s22 }
 0x447   : > { %v2510_v59 = vpop.permute.xlu1 %2509 }
 0x449   : > { %v2512_v30 = vpop.permute.xlu0 %2511 }
 0x44a   : > { %v2533_v21 = vsel %vm468_vm1, %v2510_v59, %v2512_v30  ;;  %v2552_v12 = vmax.f32 %v11773_v43, %v2512_v30  ;;  %v3066_v59 = vld [vmem:[%s13522_s8 + $0x58] sm:$0xf]  ;;  %v3065_v30 = vld [vmem:[%s13522_s8 + $0x50] sm:$0xff] }
 0x44b   : > { %v2551_v24 = vmax.f32 %v11765_v9, %v2533_v21  ;;  %v2514_v22 = vpop.permute.xlu1 %2513  ;;  %v3064_v21 = vld [vmem:[%s13522_s8 + $0x48] sm:$0xff] }
 0x44c   : > { %7943 = vmatprep.mubr.msk.f32.mxu0 %vm2563_vm3, %v2552_v12  ;;  %v3063_v12 = vld [vmem:[%s13522_s8 + $0x40] sm:$0xff] }
 0x44d   : > { %2651 = vmatmul.mubr.f32.vlgmr.msra.gmra.mxu0 %v2551_v24  ;;  %v2516_v28 = vpop.permute.xlu0 %2515  ;;  %v3062_v24 = vld [vmem:[%s13522_s8 + $0x38] sm:$0xff] }
 0x44e   : > { %v2534_v56 = vsel %vm468_vm1, %v2514_v22, %v2516_v28  ;;  %v2554_v41 = vmax.f32 %v11783_v60, %v2516_v28  ;;  %v3061_v22 = vld [vmem:[%s13522_s8 + $0x30] sm:$0xff]  ;;  %v3060_v28 = vld [vmem:[%s13522_s8 + $0x28] sm:$0xff] }
 0x44f   : > { %v2553_v10 = vmax.f32 %v11780_v47, %v2534_v56  ;;  %v3059_v56 = vld [vmem:[%s13522_s8 + $0x20] sm:$0xff] }
 0x450   : > { %7944 = vmatprep.mubr.msk.f32.mxu0 %vm2563_vm3, %v2554_v41  ;;  %v3058_v41 = vld [vmem:[%s13522_s8 + $0x18] sm:$0xff] }
 0x451   : > { %2656 = vmatmul.mubr.f32.gmra.mxu0 %v2553_v10  ;;  %v3057_v10 = vld [vmem:[%s13522_s8 + $0x10] sm:$0xff] }
 0x461   : > { %v2518_v53 = vpop.permute.xlu1 %2517 }
 0x463   : > { %v2520_v58 = vpop.permute.xlu0 %2519 }
 0x464   : > { %v2535_v43 = vsel %vm468_vm1, %v2518_v53, %v2520_v58  ;;  %v2556_v13 = vmax.f32 %v2341_v23, %v2520_v58  ;;  %v3056_v58 = vld [vmem:[%s13522_s8 + $0x8] sm:$0xff] }
 0x465   : > { %v2555_v9 = vmax.f32 %v11796_v26, %v2535_v43  ;;  %v2522_v38 = vpop.permute.xlu1 %2521  ;;  %v3055_v43 = vld [vmem:[%s13522_s8] sm:$0xff] }
 0x466   : > { %7945 = vmatprep.mubr.msk.f32.mxu0 %vm2563_vm3, %v2556_v13 }
 0x467   : > { %2661 = vmatmul.mubr.f32.gmra.mxu0 %v2555_v9  ;;  %v2524_v49 = vpop.permute.xlu0 %2523 }
 0x468   : > { %v2536_v42 = vsel %vm468_vm1, %v2522_v38, %v2524_v49  ;;  %v2558_v60 = vmax.f32 %v2343_v0, %v2524_v49 }
 0x469   : > { %v2557_v47 = vmax.f32 %v11805_v39, %v2536_v42 }
 0x46a   : > { %7946 = vmatprep.mubr.msk.f32.mxu0 %vm2563_vm3, %v2558_v60 }
 0x46b   : > { %2666 = vmatmul.mubr.f32.gmra.mxu0 %v2557_v47 }
 0x475   : > { %v2526_v19 = vpop.permute.xlu1 %2525 }
 0x477   : > { %v2528_v11 = vpop.permute.xlu0 %2527 }
 0x478   : > { %v2537_v14 = vsel %vm468_vm1, %v2526_v19, %v2528_v11  ;;  %v2560_v45 = vmax.f32 %v2470_v31, %v2528_v11 }
 0x479   : > { %v2559_v33 = vmax.f32 %v2469_v8, %v2537_v14  ;;  %v2530_v15 = vpop.permute.xlu1 %2529  ;;  %v2684_v8 = vld [vmem:[%s13518_s4 + $0x18] sm:$0xff] }
 0x47a   : > { %7947 = vmatprep.mubr.msk.f32.mxu0 %vm2563_vm3, %v2560_v45 }
 0x47b   : > { %2671 = vmatmul.mubr.f32.gmra.mxu0 %v2559_v33  ;;  %v2532_v5 = vpop.permute.xlu0 %2531 }
 0x47c   : > { %v2538_v48 = vsel %vm468_vm1, %v2530_v15, %v2532_v5  ;;  %v2562_v62 = vmax.f32 %v2472_v16, %v2532_v5  ;;  %vm3164_vm1 = vcmask 1043456  }
 0x47d   : > { %v2561_v26 = vmax.f32 %v2471_v63, %v2538_v48 }
 0x47e   : > { %7948 = vmatprep.mubr.msk.f32.mxu0 %vm2563_vm3, %v2562_v62 }
 0x47f   : > { %2676 = vmatmul.mubr.f32.gmra.mxu0 %v2561_v26 }
 0x50d   : > { %v2652_v32 = vpop.f32.mrf.mxu0 }
 0x50e   : > { %2697 = vrot.lane.b32.xlu0 %v2652_v32, %s9579_s0 }
 0x50f   : > { %v2654_v4 = vpop.f32.mrf.mxu0 }
 0x511   : > { %v2657_v23 = vpop.f32.mrf.mxu0 }
 0x512   : > { %2691 = vrot.lane.b32.xlu0 %v2652_v32, %s13725_s22  ;;  %2699 = vrot.lane.b32.xlu1 %v2657_v23, %s9579_s0 }
 0x513   : > { %v2659_v51 = vpop.f32.mrf.mxu0 }
 0x516   : > { %2693 = vrot.lane.b32.xlu1 %v2657_v23, %s13725_s22 }
 0x527   : > { %v2662_v6 = vpop.f32.mrf.mxu0 }
 0x528   : > { %2841 = vrot.lane.b32.xlu0 %v2662_v6, %s9579_s0 }
 0x529   : > { %v2664_v39 = vpop.f32.mrf.mxu0 }
 0x52b   : > { %v2667_v0 = vpop.f32.mrf.mxu0 }
 0x52c   : > { %2835 = vrot.lane.b32.xlu0 %v2662_v6, %s13725_s22  ;;  %2843 = vrot.lane.b32.xlu1 %v2667_v0, %s9579_s0 }
 0x52d   : > { %v2669_v54 = vpop.f32.mrf.mxu0 }
 0x530   : > { %2837 = vrot.lane.b32.xlu1 %v2667_v0, %s13725_s22 }
 0x53b   : > { %v11860_v57 = vpop.f32.mrf.mxu0 }
 0x53c   : > { %2952 = vrot.lane.b32.xlu0 %v11860_v57, %s9579_s0 }
 0x53d   : > { %v2674_v17 = vpop.f32.mrf.mxu0 }
 0x53f   : > { %v11864_v44 = vpop.f32.mrf.mxu0 }
 0x540   : > { %2946 = vrot.lane.b32.xlu0 %v11860_v57, %s13725_s22  ;;  %2954 = vrot.lane.b32.xlu1 %v11864_v44, %s9579_s0  ;;  %s9581_s0 = smov 92  }
 0x541   : > { %v2679_v35 = vpop.f32.mrf.mxu0 }
 0x544   : > { %2948 = vrot.lane.b32.xlu1 %v11864_v44, %s13725_s22  ;;  %2710 = vperm.xlu0 %9197, %v2686_v3  }
 0x548   : > { %2705 = vperm.xlu1 %9196, %v2685_v25  }
 0x54c   : > { %2715 = vperm.xlu1 %9196, %v2687_v50  }
 0x550   : > { %2720 = vperm.xlu1 %9196, %v2688_v29  }
 0x580   : > { %v2698_v7 = vpop.permute.xlu0 %2697 }
 0x584   : > { %v2700_v46 = vpop.permute.xlu1 %2699  ;;  %v2692_v2 = vpop.permute.xlu0 %2691 }
 0x585   : > { %8937 = vmatprep.subr.mxu1 %v2700_v46 }
 0x586   : > { %8938 = vmatpush3.msra.mxu1 %v2700_v46 }
 0x587   : > { %8939 = vmatprep.subr.mxu1 %v2698_v7 }
 0x588   : > { %v2694_v52 = vpop.permute.xlu1 %2693  ;;  %8940 = vmatpush3.msra.mxu1 %v2698_v7 }
 0x589   : > { %8941 = vmatprep.subr.mxu1 %v2694_v52 }
 0x58a   : > { %8942 = vmatpush3.msra.mxu1 %v2694_v52 }
 0x58b   : > { %8943 = vmatprep.subr.mxu1 %v2692_v2 }
 0x58c   : > { %8944 = vmatpush3.msra.mxu1 %v2692_v2 }
 0x58d   : > { %8945 = vmatprep.subr.mxu1 %v2657_v23 }
 0x58e   : > { %8946 = vmatpush3.msra.mxu1 %v2657_v23 }
 0x58f   : > { %8947 = vmatprep.subr.mxu1 %v2652_v32 }
 0x590   : > { %8948 = vmatpush3.msra.mxu1 %v2652_v32 }
 0x591   : > { %8950 = vmatmul.mubr.msk.f32.vlgmr.msra.gmra.mxu1 %vm2723_vm4, %v2682_v27 }
 0x592   : > { %8952 = vmatprep.mubr.msk.f32.mxu1 %vm2723_vm4, %v2683_v20 }
 0x595   : > { %8953 = vmatmul.mubr.msk.f32.gmra.mxu1 %vm2723_vm4, %v2684_v8 }
 0x596   : > { %8967 = vmatprep.mubr.msk.f32.mxu1 %vm2723_vm4, %v11849_v1 }
 0x59a   : > { %v2842_v36 = vpop.permute.xlu0 %2841 }
 0x59e   : > { %v2844_v40 = vpop.permute.xlu1 %2843  ;;  %v2836_v31 = vpop.permute.xlu0 %2835 }
 0x59f   : > { %8955 = vmatprep.subr.mxu1 %v2844_v40 }
 0x5a0   : > { %8956 = vmatpush3.msra.mxu1 %v2844_v40 }
 0x5a1   : > { %8957 = vmatprep.subr.mxu1 %v2842_v36 }
 0x5a2   : > { %v2838_v55 = vpop.permute.xlu1 %2837  ;;  %8958 = vmatpush3.msra.mxu1 %v2842_v36 }
 0x5a3   : > { %8959 = vmatprep.subr.mxu1 %v2838_v55 }
 0x5a4   : > { %8960 = vmatpush3.msra.mxu1 %v2838_v55 }
 0x5a5   : > { %8961 = vmatprep.subr.mxu1 %v2836_v31 }
 0x5a6   : > { %8962 = vmatpush3.msra.mxu1 %v2836_v31 }
 0x5a7   : > { %8963 = vmatprep.subr.mxu1 %v2667_v0 }
 0x5a8   : > { %8964 = vmatpush3.msra.mxu1 %v2667_v0 }
 0x5a9   : > { %8965 = vmatprep.subr.mxu1 %v2662_v6 }
 0x5aa   : > { %8966 = vmatpush3.msra.mxu1 %v2662_v6 }
 0x5ab   : > { %8968 = vmatmul.mubr.msk.f32.vlgmr.msra.gmra.mxu1 %vm2723_vm4, %v2682_v27 }
 0x5ac   : > { %8970 = vmatprep.mubr.msk.f32.mxu1 %vm2723_vm4, %v2683_v20 }
 0x5ae   : > { %v2953_v34 = vpop.permute.xlu0 %2952 }
 0x5af   : > { %8971 = vmatmul.mubr.msk.f32.gmra.mxu1 %vm2723_vm4, %v2684_v8 }
 0x5b0   : > { %8985 = vmatprep.mubr.msk.f32.mxu1 %vm2723_vm4, %v11849_v1 }
 0x5b2   : > { %v2955_v37 = vpop.permute.xlu1 %2954  ;;  %v2947_v16 = vpop.permute.xlu0 %2946 }
 0x5b3   : > { %8973 = vmatprep.subr.mxu1 %v2955_v37 }
 0x5b4   : > { %8974 = vmatpush3.msra.mxu1 %v2955_v37 }
 0x5b5   : > { %8975 = vmatprep.subr.mxu1 %v2953_v34 }
 0x5b6   : > { %v2949_v63 = vpop.permute.xlu1 %2948  ;;  %8976 = vmatpush3.msra.mxu1 %v2953_v34 }
 0x5b7   : > { %8977 = vmatprep.subr.mxu1 %v2949_v63 }
 0x5b8   : > { %8978 = vmatpush3.msra.mxu1 %v2949_v63 }
 0x5b9   : > { %8979 = vmatprep.subr.mxu1 %v2947_v16 }
 0x5ba   : > { %8980 = vmatpush3.msra.mxu1 %v2947_v16 }
 0x5bb   : > { %8981 = vmatprep.subr.mxu1 %v11864_v44 }
 0x5bc   : > { %8982 = vmatpush3.msra.mxu1 %v11864_v44 }
 0x5bd   : > { %8983 = vmatprep.subr.mxu1 %v11860_v57 }
 0x5be   : > { %8984 = vmatpush3.msra.mxu1 %v11860_v57 }
 0x5bf   : > { %8986 = vmatmul.mubr.msk.f32.vlgmr.msra.gmra.mxu1 %vm2723_vm4, %v2682_v27  ;;  %8991 = vmatprep.subr.msk.mxu1 %vm3164_vm1, %v3066_v59  ;;  %v2711_v9 = vpop.permute.xlu0 %2710 }
 0x5c0   : > { %8988 = vmatprep.mubr.msk.f32.mxu1 %vm2723_vm4, %v2683_v20  ;;  %8992 = vmatpush3.msk.msra.mxu1 %vm3164_vm1, %v3066_v59  ;;  %vm3314_vm1 = vcmask 753008  }
 0x5c1   : > { %8993 = vmatprep.subr.mxu1 %v3065_v30 }
 0x5c2   : > { %8994 = vmatpush3.msra.mxu1 %v3065_v30 }
 0x5c3   : > { %8989 = vmatmul.mubr.msk.f32.gmra.mxu1 %vm2723_vm4, %v2684_v8  ;;  %8995 = vmatprep.subr.mxu1 %v3064_v21  ;;  %v11940_v53 = vpop.permute.xlu1 %2705 }
 0x5c4   : > { %8996 = vmatpush3.msra.mxu1 %v3064_v21 }
 0x5c5   : > { %8997 = vmatprep.subr.mxu1 %v3063_v12 }
 0x5c6   : > { %8998 = vmatpush3.msra.mxu1 %v3063_v12 }
 0x5c7   : > { %8999 = vmatprep.subr.mxu1 %v3062_v24  ;;  %v11948_v13 = vpop.permute.xlu1 %2715 }
 0x5c8   : > { %9000 = vmatpush3.msra.mxu1 %v3062_v24 }
 0x5c9   : > { %9001 = vmatprep.subr.mxu1 %v3061_v22 }
 0x5ca   : > { %9002 = vmatpush3.msra.mxu1 %v3061_v22 }
 0x5cb   : > { %9003 = vmatprep.subr.mxu1 %v3060_v28  ;;  %v11951_v60 = vpop.permute.xlu1 %2720 }
 0x5cc   : > { %9004 = vmatpush3.msra.mxu1 %v3060_v28 }
 0x5cd   : > { %9005 = vmatprep.subr.mxu1 %v3059_v56 }
 0x5ce   : > { %9006 = vmatpush3.msra.mxu1 %v3059_v56 }
 0x5cf   : > { %9007 = vmatprep.subr.mxu1 %v3058_v41 }
 0x5d0   : > { %9008 = vmatpush3.msra.mxu1 %v3058_v41 }
 0x5d1   : > { %9009 = vmatprep.subr.mxu1 %v3057_v10 }
 0x5d2   : > { %9010 = vmatpush3.msra.mxu1 %v3057_v10 }
 0x5d3   : > { %9011 = vmatprep.subr.mxu1 %v3056_v58 }
 0x5d4   : > { %9012 = vmatpush3.msra.mxu1 %v3056_v58 }
 0x5d5   : > { %9013 = vmatprep.subr.mxu1 %v3055_v43 }
 0x5d6   : > { %9014 = vmatpush3.msra.mxu1 %v3055_v43 }
 0x5d7   : > { %3571 = vmatprep.subr.bf16.mxu1 %v13826_v61 }
 0x651   : > { %v8951_v38 = vpop.f32.mrf.mxu1 }
 0x652   : > { %v2808_v49 = vadd.f32 %v8951_v38, %v2711_v9  ;;  %v9198_v38 = vld [vmem:[%s13523_s9 + $0x38] sm:$0xff]  }
 0x653   : > { %v2802_v42 = vpop.f32.mrf.mxu1  ;;  %3438 = vmatpush1.bf16.msra.mxu0 %v9198_v38 }
 0x654   : > { %v2803_v47 = vadd.f32 %v2802_v42, %v11940_v53  ;;  %vm2822_vm6 = vcmp.gt.f32.partialorder %v2808_v49, 0.0  ;;  %v2826_v19 = vmul.f32 0.01, %v2808_v49  ;;  %v9200_v42 = vld [vmem:[%s13523_s9 + $0x30] sm:$0xff]   ;;  %3439 = vmatprep.subr.bf16.mxu0 %v13826_v61 }
 0x655   : > { %v8954_v11 = vpop.f32.mrf.mxu1 }
 0x656   : > { %vm2821_vm7 = vcmp.gt.f32.partialorder %v2803_v47, 0.0  ;;  %v2825_v14 = vmul.f32 0.01, %v2803_v47  ;;  %v2818_v45 = vadd.f32 %v8954_v11, %v11951_v60  ;;  %v2830_v33 = vsel %vm2822_vm6, %v2808_v49, %v2826_v19  ;;  %v9199_v49 = vld [vmem:[%s13523_s9 + $0x80] sm:$0xff]   ;;  %v9202_v19 = vld [vmem:[%s13523_s9 + $0x28] sm:$0xff]   ;;  %v9203_v11 = vld [vmem:[%s13523_s9 + $0x70] sm:$0xff]  }
 0x657   : > { %v2812_v15 = vpop.f32.mrf.mxu1  ;;  %3081 = vrot.lane.b32.xlu1 %v2830_v33, %s13725_s22  ;;  %3440 = vmatpush1.bf16.msra.mxu0 %v9200_v42  ;;  %vm3335_vm6 = vcmask 1048288   ;;  %v9216_v42 = vld [vmem:[%s13523_s9 + $0xc8] sm:$0xff]  }
 0x658   : > { %vm2824_vm8 = vcmp.gt.f32.partialorder %v2818_v45, 0.0  ;;  %v2828_v5 = vmul.f32 0.01, %v2818_v45  ;;  %v2813_v48 = vadd.f32 %v2812_v15, %v11948_v13  ;;  %v2829_v62 = vsel %vm2821_vm7, %v2803_v47, %v2825_v14  ;;  %v9201_v47 = vld [vmem:[%s13523_s9 + $0x78] sm:$0xff]   ;;  %3441 = vmatprep.subr.bf16.mxu0 %v13826_v61 }
 0x659   : > { %3079 = vrot.lane.b32.xlu0 %v2829_v62, %s13725_s22  ;;  %vm3337_vm7 = vcmask 80896  }
 0x65a   : > { %vm2823_vm9 = vcmp.gt.f32.partialorder %v2813_v48, 0.0  ;;  %v2827_v26 = vmul.f32 0.01, %v2813_v48  ;;  %v2832_v32 = vsel %vm2824_vm8, %v2818_v45, %v2828_v5 }
 0x65b   : > { %3085 = vrot.lane.b32.xlu1 %v2832_v32, %s13725_s22  ;;  %3442 = vmatpush1.bf16.msra.mxu0 %v9202_v19 }
 0x65c   : > { %v2831_v4 = vsel %vm2823_vm9, %v2813_v48, %v2827_v26  ;;  %3443 = vmatprep.subr.bf16.mxu0 %v13826_v61  ;;  %v9205_v26 = vld [vmem:[%s13523_s9 + $0x68] sm:$0xff]   ;;  %vm7681_vm9 = vcmask 523264  }
 0x65d   : > { %3083 = vrot.lane.b32.xlu0 %v2831_v4, %s13725_s22 }
 0x66b   : > { %v8969_v1 = vpop.f32.mrf.mxu1 }
 0x66c   : > { %v2919_v23 = vadd.f32 %v8969_v1, %v2711_v9 }
 0x66d   : > { %v2913_v51 = vpop.f32.mrf.mxu1 }
 0x66e   : > { %vm2933_vm10 = vcmp.gt.f32.partialorder %v2919_v23, 0.0  ;;  %v2937_v6 = vmul.f32 0.01, %v2919_v23  ;;  %v2914_v39 = vadd.f32 %v2913_v51, %v11940_v53  ;;  %v9209_v51 = vld [vmem:[%s13523_s9 + $0x58] sm:$0xff]  }
 0x66f   : > { %v8972_v0 = vpop.f32.mrf.mxu1 }
 0x670   : > { %vm2932_vm11 = vcmp.gt.f32.partialorder %v2914_v39, 0.0  ;;  %v2936_v54 = vmul.f32 0.01, %v2914_v39  ;;  %v2929_v57 = vadd.f32 %v8972_v0, %v11951_v60  ;;  %v2941_v17 = vsel %vm2933_vm10, %v2919_v23, %v2937_v6  ;;  %v9208_v23 = vld [vmem:[%s13523_s9 + $0x10] sm:$0xff]  }
 0x671   : > { %v2923_v44 = vpop.f32.mrf.mxu1  ;;  %3089 = vrot.lane.b32.xlu1 %v2941_v17, %s13725_s22 }
 0x672   : > { %vm2935_vm12 = vcmp.gt.f32.partialorder %v2929_v57, 0.0  ;;  %v2939_v35 = vmul.f32 0.01, %v2929_v57  ;;  %v2924_v3 = vadd.f32 %v2923_v44, %v11948_v13  ;;  %v2940_v25 = vsel %vm2932_vm11, %v2914_v39, %v2936_v54 }
 0x673   : > { %3087 = vrot.lane.b32.xlu0 %v2940_v25, %s13725_s22  ;;  %vm7849_vm11 = vcmask 712704  }
 0x674   : > { %vm2934_vm13 = vcmp.gt.f32.partialorder %v2924_v3, 0.0  ;;  %v2938_v50 = vmul.f32 0.01, %v2924_v3  ;;  %v2943_v29 = vsel %vm2935_vm12, %v2929_v57, %v2939_v35  ;;  %v9210_v57 = vld [vmem:[%s13523_s9 + $0x8] sm:$0xff]   ;;  %v9212_v35 = vld [vmem:[%s13523_s9] sm:$0xff]  }
 0x675   : > { %3093 = vrot.lane.b32.xlu1 %v2943_v29, %s13725_s22 }
 0x676   : > { %v2942_v7 = vsel %vm2934_vm13, %v2924_v3, %v2938_v50  ;;  %v9213_v3 = vld [vmem:[%s13523_s9 + $0x48] sm:$0xff]   ;;  %v9214_v50 = vld [vmem:[%s13523_s9 + $0x40] sm:$0x1f]  }
 0x677   : > { %3091 = vrot.lane.b32.xlu0 %v2942_v7, %s13725_s22 }
 0x67f   : > { %v8987_v46 = vpop.f32.mrf.mxu1 }
 0x680   : > { %v3030_v52 = vadd.f32 %v8987_v46, %v2711_v9  ;;  %v3435_v46 = vsel %vm2582_vm5, %v9214_v50, 0  ;;  %v9234_v50 = vld [vmem:[%s13523_s9 + $0x158] sm:$0xff]  }
 0x681   : > { %v3024_v2 = vpop.f32.mrf.mxu1 }
 0x682   : > { %vm3044_vm14 = vcmp.gt.f32.partialorder %v3030_v52, 0.0  ;;  %v3048_v27 = vmul.f32 0.01, %v3030_v52  ;;  %v3025_v20 = vadd.f32 %v3024_v2, %v11940_v53 }
 0x683   : > { %v8990_v14 = vpop.f32.mrf.mxu1 }
 0x684   : > { %vm3043_vm15 = vcmp.gt.f32.partialorder %v3025_v20, 0.0  ;;  %v3047_v8 = vmul.f32 0.01, %v3025_v20  ;;  %v3052_v36 = vsel %vm3044_vm14, %v3030_v52, %v3048_v27 }
 0x685   : > { %3097 = vrot.lane.b32.xlu1 %v3052_v36, %s13725_s22  ;;  %v3034_v45 = vpop.f32.mrf.mxu1 }
 0x686   : > { %v3051_v40 = vsel %vm3043_vm15, %v3025_v20, %v3047_v8  ;;  %v3035_v1 = vadd.f32 %v3034_v45, %v11948_v13  ;;  %v9219_v45 = vld [vmem:[%s13523_s9 + $0x108] sm:$0xff]  }
 0x687   : > { %3095 = vrot.lane.b32.xlu0 %v3051_v40, %s13725_s22 }
 0x688   : > { %v3049_v39 = vmul.f32 0.01, %v3035_v1  ;;  %vm3045_vm3 = vcmp.gt.f32.partialorder %v3035_v1, 0.0 }
 0x68a   : > { %v3053_v13 = vsel %vm3045_vm3, %v3035_v1, %v3049_v39  ;;  %v9228_v1 = vld [vmem:[%s13523_s9 + $0x98] sm:$0xff]   ;;  %v9232_v39 = vld [vmem:[%s13523_s9 + $0xd0] sm:$0x1f]  }
 0x6c9   : > { %v3082_v55 = vpop.permute.xlu1 %3081 }
 0x6ca   : > { %v3116_v37 = vmax.f32 %v2830_v33, %v3082_v55 }
 0x6cb   : > { %v3080_v31 = vpop.permute.xlu0 %3079 }
 0x6cc   : > { %v3115_v34 = vmax.f32 %v2829_v62, %v3080_v31  ;;  %v9204_v62 = vld [vmem:[%s13523_s9 + $0x20] sm:$0xff]  }
 0x6cd   : > { %v3086_v63 = vpop.permute.xlu1 %3085  ;;  %3444 = vmatpush1.bf16.msra.mxu0 %v9204_v62  ;;  %v9224_v62 = vld [vmem:[%s13523_s9 + $0xa8] sm:$0xff]  }
 0x6ce   : > { %9015 = vmatprep.mubr.msk.f32.mxu1 %vm3127_vm0, %v3115_v34  ;;  %v3118_v30 = vmax.f32 %v2832_v32, %v3086_v63  ;;  %3445 = vmatprep.subr.bf16.mxu0 %v13826_v61  ;;  %v9206_v32 = vld [vmem:[%s13523_s9 + $0x18] sm:$0xff]  }
 0x6cf   : > { %9016 = vmatmul.mubr.msk.f32.vlgmr.msra.gmra.mxu1 %vm3127_vm0, %v3116_v37  ;;  %v3084_v16 = vpop.permute.xlu0 %3083 }
 0x6d0   : > { %v3117_v59 = vmax.f32 %v2831_v4, %v3084_v16  ;;  %3572 = vmatpush1.bf16.msra.mxu1 %v9199_v49  ;;  %v9207_v4 = vld [vmem:[%s13523_s9 + $0x60] sm:$0xff]  }
 0x6d1   : > { %3573 = vmatprep.subr.bf16.mxu1 %v13826_v61  ;;  %3446 = vmatpush1.bf16.msra.mxu0 %v9206_v32  ;;  %v9226_v32 = vld [vmem:[%s13523_s9 + $0xa0] sm:$0xff]  }
 0x6d2   : > { %9018 = vmatprep.mubr.msk.f32.mxu1 %vm3127_vm0, %v3117_v59  ;;  %3447 = vmatprep.subr.bf16.mxu0 %v13826_v61 }
 0x6d3   : > { %9019 = vmatmul.mubr.msk.f32.gmra.mxu1 %vm3127_vm0, %v3118_v30 }
 0x6d4   : > { %3574 = vmatpush1.bf16.msra.mxu1 %v9201_v47  ;;  %v9217_v47 = vld [vmem:[%s13523_s9 + $0x110] sm:$0xff]  }
 0x6d5   : > { %3575 = vmatprep.subr.bf16.mxu1 %v13826_v61  ;;  %3448 = vmatpush1.bf16.msra.mxu0 %v9208_v23  ;;  %v9229_v23 = vld [vmem:[%s13523_s9 + $0xe0] sm:$0xff]  }
 0x6d6   : > { %3449 = vmatprep.subr.bf16.mxu0 %v13826_v61 }
 0x6d8   : > { %3576 = vmatpush1.bf16.msra.mxu1 %v9203_v11 }
 0x6d9   : > { %3577 = vmatprep.subr.bf16.mxu1 %v13826_v61  ;;  %3450 = vmatpush1.bf16.msra.mxu0 %v9210_v57  ;;  %v3703_v57 = vsel %vm2582_vm5, %v9232_v39, 0  ;;  %v9268_v39 = vld [vmem:[%s13523_s9 + $0x1f0] sm:$0x1f]  }
 0x6da   : > { %3451 = vmatprep.subr.bf16.mxu0 %v13826_v61 }
 0x6dc   : > { %3578 = vmatpush1.bf16.msra.mxu1 %v9205_v26  ;;  %v9225_v26 = vld [vmem:[%s13523_s9 + $0xf0] sm:$0xff]  }
 0x6dd   : > { %3579 = vmatprep.subr.bf16.mxu1 %v13826_v61  ;;  %3452 = vmatpush1.bf16.msra.mxu0 %v9212_v35 }
 0x6de   : > { %3467 = vmatprep.subr.bf16.mxu0 %v13826_v61 }
 0x6e0   : > { %3580 = vmatpush1.bf16.msra.mxu1 %v9207_v4  ;;  %v9227_v4 = vld [vmem:[%s13523_s9 + $0xe8] sm:$0xff]  }
 0x6e1   : > { %3581 = vmatprep.subr.bf16.mxu1 %v13826_v61  ;;  %3468 = vmatpush2.bf16.msra.mxu0 %v3435_v46  ;;  %v9235_v46 = vld [vmem:[%s13523_s9 + $0x1a0] sm:$0xff]  }
 0x6e2   : > { %3705 = vmatprep.subr.bf16.mxu0 %v13826_v61 }
 0x6e3   : > { %v3090_v21 = vpop.permute.xlu1 %3089 }
 0x6e4   : > { %v3120_v22 = vmax.f32 %v2941_v17, %v3090_v21  ;;  %3582 = vmatpush1.bf16.msra.mxu1 %v9209_v51  ;;  %v9211_v17 = vld [vmem:[%s13523_s9 + $0x50] sm:$0xff]   ;;  %v13827_v21 = vld [vmem:[#allocation7_spill] sm:$0xff] }
 0x6e5   : > { %v3088_v12 = vpop.permute.xlu0 %3087  ;;  %3583 = vmatprep.subr.bf16.mxu1 %v13826_v61  ;;  %v9230_v51 = vld [vmem:[%s13523_s9 + $0x90] sm:$0xff]  }
 0x6e6   : > { %v3119_v24 = vmax.f32 %v2940_v25, %v3088_v12  ;;  %v3040_v25 = vadd.f32 %v8990_v14, %v11951_v60  ;;  %v9218_v14 = vld [vmem:[%s13523_s9 + $0xc0] sm:$0xff]  }
 0x6e7   : > { %v3094_v28 = vpop.permute.xlu1 %3093 }
 0x6e8   : > { %9021 = vmatprep.mubr.msk.f32.mxu1 %vm3127_vm0, %v3119_v24  ;;  %v3122_v10 = vmax.f32 %v2943_v29, %v3094_v28  ;;  %3584 = vmatpush1.bf16.msra.mxu1 %v9211_v17  ;;  %v9215_v29 = vld [vmem:[%s13523_s9 + $0x88] sm:$0x1f]   ;;  %v3050_v2 = vmul.f32 0.01, %v3040_v25  ;;  %vm3046_vm4 = vcmp.gt.f32.partialorder %v3040_v25, 0.0 }
 0x6e9   : > { %9022 = vmatmul.mubr.msk.f32.gmra.mxu1 %vm3127_vm0, %v3120_v22  ;;  %v3092_v56 = vpop.permute.xlu0 %3091  ;;  %3585 = vmatprep.subr.bf16.mxu1 %v13826_v61  ;;  %v3569_v52 = vsel %vm2582_vm5, %v9215_v29, 0  ;;  %v13828_v24 = vld [vmem:[#allocation8_spill] sm:$0xff] }
 0x6ea   : > { %v3121_v41 = vmax.f32 %v2942_v7, %v3092_v56  ;;  %v3054_v60 = vsel %vm3046_vm4, %v3040_v25, %v3050_v2 }
 0x6ec   : > { %9024 = vmatprep.mubr.msk.f32.mxu1 %vm3127_vm0, %v3121_v41  ;;  %3586 = vmatpush1.bf16.msra.mxu1 %v9213_v3 }
 0x6ed   : > { %9025 = vmatmul.mubr.msk.f32.gmra.mxu1 %vm3127_vm0, %v3122_v10  ;;  %3601 = vmatprep.subr.bf16.mxu1 %v13826_v61 }
 0x6f0   : > { %3602 = vmatpush2.bf16.msra.mxu1 %v3569_v52 }
 0x6f1   : > { %3839 = vmatprep.subr.bf16.mxu1 %v13826_v61 }
 0x6f7   : > { %v3098_v53 = vpop.permute.xlu1 %3097 }
 0x6f8   : > { %v3124_v9 = vmax.f32 %v3052_v36, %v3098_v53 }
 0x6f9   : > { %v3096_v58 = vpop.permute.xlu0 %3095 }
 0x6fa   : > { %v3123_v43 = vmax.f32 %v3051_v40, %v3096_v58 }
 0x6fc   : > { %9027 = vmatprep.mubr.msk.f32.mxu1 %vm3127_vm0, %v3123_v43 }
 0x6fd   : > { %9028 = vmatmul.mubr.msk.f32.gmra.mxu1 %vm3127_vm0, %v3124_v9 }
 0x78f   : > { %v9017_v33 = vpop.f32.mrf.mxu1 }
 0x790   : > { %3295 = vst.msk [vmem:[#allocation2 + $0x10] sm:$0xff] %vm3293_vm2, %v9017_v33  ;;  %v9220_v33 = vld [vmem:[%s13523_s9 + $0xb8] sm:$0xff]  }
 0x791   : > { %v3234_v15 = vpop.f32.mrf.mxu1 }
 0x792   : > { %3294 = vst.msk [vmem:[#allocation2] sm:$0xff] %vm3293_vm2, %v3234_v15  ;;  %v9221_v15 = vld [vmem:[%s13523_s9 + $0x100] sm:$0xff]  }
 0x793   : > { %v9020_v5 = vpop.f32.mrf.mxu1 }
 0x794   : > { %3297 = vst.msk [vmem:[#allocation2 + $0x30] sm:$0xff] %vm3293_vm2, %v9020_v5  ;;  %v9222_v5 = vld [vmem:[%s13523_s9 + $0xb0] sm:$0xff]  }
 0x795   : > { %v3244_v48 = vpop.f32.mrf.mxu1 }
 0x796   : > { %3296 = vst.msk [vmem:[#allocation2 + $0x20] sm:$0xff] %vm3293_vm2, %v3244_v48  ;;  %v9223_v48 = vld [vmem:[%s13523_s9 + $0xf8] sm:$0xff]  }
 0x7a9   : > { %v9023_v6 = vpop.f32.mrf.mxu1 }
 0x7ab   : > { %v3254_v0 = vpop.f32.mrf.mxu1 }
 0x7ac   : > { %3302 = vrot.lane.b32.xlu0 %v3254_v0, %s9580_s1  ;;  %v9233_v0 = vld [vmem:[%s13523_s9 + $0x118] sm:$0x1f]  }
 0x7ad   : > { %v9026_v54 = vpop.f32.mrf.mxu1  ;;  %v3837_v17 = vsel %vm2582_vm5, %v9233_v0, 0  ;;  %v9269_v0 = vld [vmem:[%s13523_s9 + $0x238] sm:$0x1f]  }
 0x7af   : > { %v3264_v44 = vpop.f32.mrf.mxu1 }
 0x7b0   : > { %3099 = vrot.lane.b32.xlu0 %v3053_v13, %s13725_s22 }
 0x7b4   : > { %3304 = vrot.lane.b32.xlu0 %v9023_v6, %s9580_s1  ;;  %v9231_v6 = vld [vmem:[%s13523_s9 + $0xd8] sm:$0xff]  }
 0x7b8   : > { %3306 = vrot.lane.b32.xlu0 %v3264_v44, %s9580_s1 }
 0x7bc   : > { %3308 = vrot.lane.b32.xlu0 %v9026_v54, %s9580_s1  ;;  %s13479_s1 = scalar_lea.hbm %s13527_s13, %s8866_s24 }
 0x7bd   : > { %v9029_v7 = vpop.f32.mrf.mxu1 }
 0x7bf   : > { %v3274_v27 = vpop.f32.mrf.mxu1 }
 0x7c0   : > { %3323 = vrot.lane.b32.xlu1 %v3274_v27, %s9581_s0  ;;  %v9236_v27 = vld [vmem:[%s13523_s9 + $0x150] sm:$0xff]  }
 0x7c4   : > { %3101 = vrot.lane.b32.xlu1 %v3054_v60, %s13725_s22 }
 0x7c8   : > { %3325 = vrot.lane.b32.xlu1 %v9029_v7, %s9581_s0 }
 0x81e   : > { %v3303_v20 = vpop.permute.xlu0 %3302 }
 0x81f   : > { %3315 = vst.msk [vmem:[#allocation2] sm:$0xff] %vm3314_vm1, %v3303_v20  ;;  %v9238_v20 = vld [vmem:[%s13523_s9 + $0x148] sm:$0xff]  }
 0x822   : > { %v3100_v8 = vpop.permute.xlu0 %3099 }
 0x823   : > { %v3125_v36 = vmax.f32 %v3053_v13, %v3100_v8  ;;  %v9239_v8 = vld [vmem:[%s13523_s9 + $0x190] sm:$0xff]  }
 0x825   : > { %9030 = vmatprep.mubr.msk.f32.mxu1 %vm3127_vm0, %v3125_v36  ;;  %v9240_v36 = vld [vmem:[%s13523_s9 + $0x140] sm:$0xff]  }
 0x826   : > { %v3305_v40 = vpop.permute.xlu0 %3304 }
 0x827   : > { %3316 = vst.msk [vmem:[#allocation2 + $0x10] sm:$0xff] %vm3314_vm1, %v3305_v40  ;;  %v9241_v40 = vld [vmem:[%s13523_s9 + $0x188] sm:$0xff]  }
 0x82a   : > { %v3307_v55 = vpop.permute.xlu0 %3306 }
 0x82b   : > { %3317 = vst.msk [vmem:[#allocation2 + $0x20] sm:$0xff] %vm3314_vm1, %v3307_v55  ;;  %v9242_v55 = vld [vmem:[%s13523_s9 + $0x138] sm:$0xff]  }
 0x82e   : > { %v3309_v31 = vpop.permute.xlu0 %3308 }
 0x82f   : > { %3318 = vst.msk [vmem:[#allocation2 + $0x30] sm:$0xff] %vm3314_vm1, %v3309_v31  ;;  %v9243_v31 = vld [vmem:[%s13523_s9 + $0x180] sm:$0xff]  }
 0x832   : > { %v3324_v34 = vpop.permute.xlu1 %3323 }
 0x833   : > { %3336 = vst.msk [vmem:[#allocation2] sm:$0xff] %vm3335_vm6, %v3324_v34 }
 0x834   : > { %3338 = vst.msk [vmem:[#allocation2 + $0x8] sm:$0xff] %vm3337_vm7, %v3324_v34  ;;  %v9244_v34 = vld [vmem:[%s13523_s9 + $0x130] sm:$0xff]  }
 0x836   : > { %v3102_v37 = vpop.permute.xlu1 %3101 }
 0x837   : > { %v3126_v63 = vmax.f32 %v3054_v60, %v3102_v37  ;;  %v9237_v60 = vld [vmem:[%s13523_s9 + $0x198] sm:$0xff]  }
 0x838   : > { %v9245_v37 = vld [vmem:[%s13523_s9 + $0x178] sm:$0xff]  }
 0x839   : > { %9031 = vmatmul.mubr.msk.f32.gmra.mxu1 %vm3127_vm0, %v3126_v63  ;;  %v9246_v63 = vld [vmem:[%s13523_s9 + $0x128] sm:$0xff]  }
 0x83a   : > { %v3326_v16 = vpop.permute.xlu1 %3325 }
 0x83b   : > { %v3346_v59 = vld [vmem:[#allocation2] ss:$8 sm:$0x3]  ;;  %v3479_v30 = vld [vmem:[#allocation2 + $0x1] ss:$8 sm:$0x3] }
 0x83c   : > { %3339 = vst.msk [vmem:[#allocation2 + $0x10] sm:$0xff] %vm3335_vm6, %v3326_v16  ;;  %v3351_v12 = vrot.slane %v3346_v59, %v13827_v21  ;;  %v3355_v22 = vrot.slane %v3346_v59, %v13828_v24  ;;  %v3484_v28 = vrot.slane %v3479_v30, %v13827_v21  ;;  %v3488_v56 = vrot.slane %v3479_v30, %v13828_v24  ;;  %v12070_v41 = vld [vmem:[#allocation2 + $0x2] ss:$8 sm:$0x3] }
 0x83d   : > { %3340 = vst.msk [vmem:[#allocation2 + $0x18] sm:$0xff] %vm3337_vm7, %v3326_v16  ;;  %v12072_v10 = vld [vmem:[#allocation2 + $0x3] ss:$8 sm:$0x3]  ;;  %v3622_v53 = vrot.slane %v12070_v41, %v13828_v24  ;;  %v3618_v44 = vrot.slane %v12070_v41, %v13827_v21  ;;  %v9247_v16 = vld [vmem:[%s13523_s9 + $0x170] sm:$0xff]  }
 0x83e   : > { %v3756_v58 = vrot.slane %v12072_v10, %v13828_v24  ;;  %v3358_v43 = vpack.c.bf16 %v3351_v12, %v3351_v12  ;;  %v3359_v9 = vpack.c.bf16 %v3355_v22, %v3355_v22  ;;  %v3491_v38 = vpack.c.bf16 %v3484_v28, %v3484_v28  ;;  %v12150_v13 = vld [vmem:[#allocation2 + $0x4] ss:$8 sm:$0x3]  ;;  %v12152_v54 = vld [vmem:[#allocation2 + $0x5] ss:$8 sm:$0x3] }
 0x83f   : > { %v3492_v49 = vpack.c.bf16 %v3488_v56, %v3488_v56  ;;  %v3626_v19 = vpack.c.bf16 %v3622_v53, %v3622_v53  ;;  %v3752_v35 = vrot.slane %v12072_v10, %v13827_v21  ;;  %v3890_v3 = vrot.slane %v12150_v13, %v13828_v24  ;;  %v9248_v59 = vld [vmem:[%s13523_s9 + $0x120] sm:$0xff]   ;;  %v9249_v30 = vld [vmem:[%s13523_s9 + $0x168] sm:$0xff]  }
 0x840   : > { %7983 = vmatprep.mubr.msk.bf16.mxu0 %vm3337_vm7, %v3359_v9  ;;  %v3760_v11 = vpack.c.bf16 %v3756_v58, %v3756_v58  ;;  %v4024_v25 = vrot.slane %v12152_v54, %v13828_v24  ;;  %v3625_v29 = vpack.c.bf16 %v3618_v44, %v3618_v44  ;;  %v9250_v12 = vld [vmem:[%s13523_s9 + $0x160] sm:$0x1f]   ;;  %v9251_v22 = vld [vmem:[%s13523_s9 + $0x1a8] sm:$0x1f]   ;;  %v3886_v41 = vrot.slane %v12150_v13, %v13827_v21 }
 0x841   : > { %8011 = vmatprep.mubr.msk.bf16.mxu1 %vm3337_vm7, %v3492_v49  ;;  %3470 = vmatmul.mubr.bf16.vlgmr.msra.gmra.mxu0 %v3358_v43  ;;  %v3759_v7 = vpack.c.bf16 %v3752_v35, %v3752_v35  ;;  %v3894_v52 = vpack.c.bf16 %v3890_v3, %v3890_v3  ;;  %v12238_v28 = vld [vmem:[#allocation2 + $0x6] ss:$8 sm:$0x3]  ;;  %v3971_v56 = vsel %vm2582_vm5, %v9250_v12, 0  ;;  %v4105_v53 = vsel %vm2582_vm5, %v9251_v22, 0 }
 0x842   : > { %3604 = vmatmul.mubr.bf16.vlgmr.msra.gmra.mxu1 %v3491_v38  ;;  %3706 = vmatpush1.bf16.msra.mxu0 %v9216_v42  ;;  %v4028_v2 = vpack.c.bf16 %v4024_v25, %v4024_v25  ;;  %v12244_v10 = vld [vmem:[#allocation2 + $0x7] ss:$8 sm:$0x3]  ;;  %v4020_v58 = vrot.slane %v12152_v54, %v13827_v21  ;;  %v4158_v43 = vrot.slane %v12238_v28, %v13828_v24  ;;  %v9253_v42 = vld [vmem:[%s13523_s9 + $0x230] sm:$0xff]   ;;  %v4239_v54 = vsel %vm2582_vm5, %v9268_v39, 0  ;;  %v9270_v25 = vld [vmem:[%s13523_s9 + $0x278] sm:$0xff]  }
 0x843   : > { %3840 = vmatpush1.bf16.msra.mxu1 %v9217_v47  ;;  %8039 = vmatprep.mubr.msk.bf16.mxu0 %vm3337_vm7, %v3626_v19  ;;  %v9252_v9 = vld [vmem:[%s13523_s9 + $0x1e8] sm:$0xff]   ;;  %v4292_v38 = vrot.slane %v12244_v10, %v13828_v24  ;;  %v3893_v49 = vpack.c.bf16 %v3886_v41, %v3886_v41  ;;  %v4373_v44 = vsel %vm2582_vm5, %v9269_v0, 0  ;;  %v4288_v35 = vrot.slane %v12244_v10, %v13827_v21  ;;  %v9286_v12 = vld [vmem:[%s13523_s9 + $0x280] sm:$0x1f]   ;;  %v9304_v39 = vld [vmem:[%s13523_s9 + $0x310] sm:$0x1f]  }
 0x844   : > { %8067 = vmatprep.mubr.msk.bf16.mxu1 %vm3337_vm7, %v3760_v11  ;;  %3707 = vmatprep.subr.bf16.mxu0 %v13826_v61  ;;  %v4027_v47 = vpack.c.bf16 %v4020_v58, %v4020_v58  ;;  %v4162_v19 = vpack.c.bf16 %v4158_v43, %v4158_v43  ;;  %v12326_v13 = vld [vmem:[#allocation2 + $0x10] ss:$8 sm:$0x3]  ;;  %v9287_v22 = vld [vmem:[%s13523_s9 + $0x2c8] sm:$0x1f]  }
 0x845   : > { %3841 = vmatprep.subr.bf16.mxu1 %v13826_v61  ;;  %v4296_v11 = vpack.c.bf16 %v4292_v38, %v4292_v38  ;;  %v4426_v3 = vrot.slane %v12326_v13, %v13828_v24  ;;  %v4422_v41 = vrot.slane %v12326_v13, %v13827_v21  ;;  %v12420_v10 = vld [vmem:[#allocation2 + $0x13] ss:$8 sm:$0x3]  ;;  %v12502_v13 = vld [vmem:[#allocation2 + $0x14] ss:$8 sm:$0x3] }
 0x846   : > { %3708 = vmatpush1.bf16.msra.mxu0 %v9218_v14  ;;  %v9254_v14 = vld [vmem:[%s13523_s9 + $0x1e0] sm:$0xff]   ;;  %v4828_v38 = vrot.slane %v12420_v10, %v13828_v24  ;;  %v9305_v0 = vld [vmem:[%s13523_s9 + $0x358] sm:$0x1f]  }
 0x847   : > { %3842 = vmatpush1.bf16.msra.mxu1 %v9219_v45  ;;  %3709 = vmatprep.subr.bf16.mxu0 %v13826_v61  ;;  %v9255_v45 = vld [vmem:[%s13523_s9 + $0x228] sm:$0xff]  }
 0x848   : > { %3843 = vmatprep.subr.bf16.mxu1 %v13826_v61 }
 0x84a   : > { %3710 = vmatpush1.bf16.msra.mxu0 %v9220_v33  ;;  %v9256_v33 = vld [vmem:[%s13523_s9 + $0x1d8] sm:$0xff]  }
 0x84b   : > { %3844 = vmatpush1.bf16.msra.mxu1 %v9221_v15  ;;  %3711 = vmatprep.subr.bf16.mxu0 %v13826_v61  ;;  %v9257_v15 = vld [vmem:[%s13523_s9 + $0x220] sm:$0xff]  }
 0x84c   : > { %3845 = vmatprep.subr.bf16.mxu1 %v13826_v61 }
 0x84e   : > { %3712 = vmatpush1.bf16.msra.mxu0 %v9222_v5  ;;  %v9258_v5 = vld [vmem:[%s13523_s9 + $0x1d0] sm:$0xff]  }
 0x84f   : > { %3846 = vmatpush1.bf16.msra.mxu1 %v9223_v48  ;;  %3713 = vmatprep.subr.bf16.mxu0 %v13826_v61  ;;  %v9259_v48 = vld [vmem:[%s13523_s9 + $0x218] sm:$0xff]  }
 0x850   : > { %3847 = vmatprep.subr.bf16.mxu1 %v13826_v61 }
 0x852   : > { %3714 = vmatpush1.bf16.msra.mxu0 %v9224_v62  ;;  %v9260_v62 = vld [vmem:[%s13523_s9 + $0x1c8] sm:$0xff]  }
 0x853   : > { %3848 = vmatpush1.bf16.msra.mxu1 %v9225_v26  ;;  %3715 = vmatprep.subr.bf16.mxu0 %v13826_v61  ;;  %v9261_v26 = vld [vmem:[%s13523_s9 + $0x210] sm:$0xff]  }
 0x854   : > { %3849 = vmatprep.subr.bf16.mxu1 %v13826_v61 }
 0x856   : > { %3716 = vmatpush1.bf16.msra.mxu0 %v9226_v32  ;;  %v9262_v32 = vld [vmem:[%s13523_s9 + $0x1c0] sm:$0xff]  }
 0x857   : > { %3850 = vmatpush1.bf16.msra.mxu1 %v9227_v4  ;;  %3717 = vmatprep.subr.bf16.mxu0 %v13826_v61  ;;  %v9263_v4 = vld [vmem:[%s13523_s9 + $0x208] sm:$0xff]  }
 0x858   : > { %3851 = vmatprep.subr.bf16.mxu1 %v13826_v61 }
 0x85a   : > { %3718 = vmatpush1.bf16.msra.mxu0 %v9228_v1  ;;  %v9264_v1 = vld [vmem:[%s13523_s9 + $0x1b8] sm:$0xff]  }
 0x85b   : > { %3852 = vmatpush1.bf16.msra.mxu1 %v9229_v23  ;;  %3719 = vmatprep.subr.bf16.mxu0 %v13826_v61  ;;  %v9265_v23 = vld [vmem:[%s13523_s9 + $0x200] sm:$0xff]  }
 0x85c   : > { %3853 = vmatprep.subr.bf16.mxu1 %v13826_v61 }
 0x85e   : > { %3720 = vmatpush1.bf16.msra.mxu0 %v9230_v51  ;;  %v9266_v51 = vld [vmem:[%s13523_s9 + $0x1b0] sm:$0xff]  }
 0x85f   : > { %3854 = vmatpush1.bf16.msra.mxu1 %v9231_v6  ;;  %3735 = vmatprep.subr.bf16.mxu0 %v13826_v61  ;;  %v9267_v6 = vld [vmem:[%s13523_s9 + $0x1f8] sm:$0xff]  }
 0x860   : > { %3869 = vmatprep.subr.bf16.mxu1 %v13826_v61 }
 0x862   : > { %3736 = vmatpush2.bf16.msra.mxu0 %v3703_v57  ;;  %v4154_v57 = vrot.slane %v12238_v28, %v13827_v21  ;;  %v12414_v28 = vld [vmem:[#allocation2 + $0x12] ss:$8 sm:$0x3] }
 0x863   : > { %3870 = vmatpush2.bf16.msra.mxu1 %v3837_v17  ;;  %3973 = vmatprep.subr.bf16.mxu0 %v13826_v61  ;;  %v12332_v17 = vld [vmem:[#allocation2 + $0x11] ss:$8 sm:$0x3]  ;;  %v4694_v43 = vrot.slane %v12414_v28, %v13828_v24 }
 0x864   : > { %4107 = vmatprep.subr.bf16.mxu1 %v13826_v61  ;;  %v4556_v58 = vrot.slane %v12332_v17, %v13827_v21 }
 0x865   : > { %3738 = vmatmul.mubr.bf16.vlgmr.msra.gmra.mxu0 %v3625_v29  ;;  %v4161_v29 = vpack.c.bf16 %v4154_v57, %v4154_v57  ;;  %v4690_v57 = vrot.slane %v12414_v28, %v13827_v21 }
 0x866   : > { %3872 = vmatmul.mubr.bf16.vlgmr.msra.gmra.mxu1 %v3759_v7  ;;  %3974 = vmatpush1.bf16.msra.mxu0 %v9234_v50  ;;  %v4560_v50 = vrot.slane %v12332_v17, %v13828_v24  ;;  %v9271_v7 = vld [vmem:[%s13523_s9 + $0x2c0] sm:$0xff]   ;;  %v12508_v17 = vld [vmem:[#allocation2 + $0x15] ss:$8 sm:$0x3] }
 0x867   : > { %8095 = vmatprep.mubr.msk.bf16.mxu0 %vm3337_vm7, %v3894_v52  ;;  %4108 = vmatpush1.bf16.msra.mxu1 %v9235_v46  ;;  %v4295_v46 = vpack.c.bf16 %v4288_v35, %v4288_v35  ;;  %v4430_v52 = vpack.c.bf16 %v4426_v3, %v4426_v3  ;;  %v4824_v35 = vrot.slane %v12420_v10, %v13827_v21  ;;  %v9316_v10 = vld [vmem:[%s13523_s9 + $0x370] sm:$0xff]  }
 0x868   : > { %8123 = vmatprep.mubr.msk.bf16.mxu1 %vm3337_vm7, %v4028_v2  ;;  %3975 = vmatprep.subr.bf16.mxu0 %v13826_v61  ;;  %v4564_v2 = vpack.c.bf16 %v4560_v50, %v4560_v50  ;;  %v4962_v3 = vrot.slane %v12502_v13, %v13828_v24  ;;  %v5096_v50 = vrot.slane %v12508_v17, %v13828_v24 }
 0x869   : > { %4109 = vmatprep.subr.bf16.mxu1 %v13826_v61 }
 0x86a   : > { %3976 = vmatpush1.bf16.msra.mxu0 %v9236_v27  ;;  %v9272_v27 = vld [vmem:[%s13523_s9 + $0x270] sm:$0xff]  }
 0x86b   : > { %4110 = vmatpush1.bf16.msra.mxu1 %v9237_v60  ;;  %3977 = vmatprep.subr.bf16.mxu0 %v13826_v61  ;;  %v9273_v60 = vld [vmem:[%s13523_s9 + $0x2b8] sm:$0xff]  }
 0x86c   : > { %4111 = vmatprep.subr.bf16.mxu1 %v13826_v61 }
 0x86e   : > { %3978 = vmatpush1.bf16.msra.mxu0 %v9238_v20  ;;  %v9274_v20 = vld [vmem:[%s13523_s9 + $0x268] sm:$0xff]  }
 0x86f   : > { %4112 = vmatpush1.bf16.msra.mxu1 %v9239_v8  ;;  %3979 = vmatprep.subr.bf16.mxu0 %v13826_v61  ;;  %v9275_v8 = vld [vmem:[%s13523_s9 + $0x2b0] sm:$0xff]  }
 0x870   : > { %4113 = vmatprep.subr.bf16.mxu1 %v13826_v61 }
 0x872   : > { %3980 = vmatpush1.bf16.msra.mxu0 %v9240_v36  ;;  %v9276_v36 = vld [vmem:[%s13523_s9 + $0x260] sm:$0xff]  }
 0x873   : > { %4114 = vmatpush1.bf16.msra.mxu1 %v9241_v40  ;;  %3981 = vmatprep.subr.bf16.mxu0 %v13826_v61  ;;  %v9277_v40 = vld [vmem:[%s13523_s9 + $0x2a8] sm:$0xff]  }
 0x874   : > { %4115 = vmatprep.subr.bf16.mxu1 %v13826_v61 }
 0x876   : > { %3982 = vmatpush1.bf16.msra.mxu0 %v9242_v55  ;;  %v9278_v55 = vld [vmem:[%s13523_s9 + $0x258] sm:$0xff]  }
 0x877   : > { %4116 = vmatpush1.bf16.msra.mxu1 %v9243_v31  ;;  %3983 = vmatprep.subr.bf16.mxu0 %v13826_v61  ;;  %v9279_v31 = vld [vmem:[%s13523_s9 + $0x2a0] sm:$0xff]  }
 0x878   : > { %4117 = vmatprep.subr.bf16.mxu1 %v13826_v61 }
 0x87a   : > { %3984 = vmatpush1.bf16.msra.mxu0 %v9244_v34  ;;  %v9280_v34 = vld [vmem:[%s13523_s9 + $0x250] sm:$0xff]  }
 0x87b   : > { %4118 = vmatpush1.bf16.msra.mxu1 %v9245_v37  ;;  %3985 = vmatprep.subr.bf16.mxu0 %v13826_v61  ;;  %v9281_v37 = vld [vmem:[%s13523_s9 + $0x298] sm:$0xff]  }
 0x87c   : > { %4119 = vmatprep.subr.bf16.mxu1 %v13826_v61 }
 0x87e   : > { %3986 = vmatpush1.bf16.msra.mxu0 %v9246_v63  ;;  %v9282_v63 = vld [vmem:[%s13523_s9 + $0x248] sm:$0xff]  }
 0x87f   : > { %4120 = vmatpush1.bf16.msra.mxu1 %v9247_v16  ;;  %3987 = vmatprep.subr.bf16.mxu0 %v13826_v61  ;;  %v9283_v16 = vld [vmem:[%s13523_s9 + $0x290] sm:$0xff]  }
 0x880   : > { %4121 = vmatprep.subr.bf16.mxu1 %v13826_v61 }
 0x882   : > { %3988 = vmatpush1.bf16.msra.mxu0 %v9248_v59  ;;  %v9284_v59 = vld [vmem:[%s13523_s9 + $0x240] sm:$0xff]  }
 0x883   : > { %4122 = vmatpush1.bf16.msra.mxu1 %v9249_v30  ;;  %4003 = vmatprep.subr.bf16.mxu0 %v13826_v61  ;;  %v9285_v30 = vld [vmem:[%s13523_s9 + $0x288] sm:$0xff]  }
 0x884   : > { %4137 = vmatprep.subr.bf16.mxu1 %v13826_v61 }
 0x886   : > { %4004 = vmatpush2.bf16.msra.mxu0 %v3971_v56  ;;  %v4507_v56 = vsel %vm2582_vm5, %v9286_v12, 0 }
 0x887   : > { %4138 = vmatpush2.bf16.msra.mxu1 %v4105_v53  ;;  %4241 = vmatprep.subr.bf16.mxu0 %v13826_v61  ;;  %v4641_v53 = vsel %vm2582_vm5, %v9287_v22, 0  ;;  %v9315_v22 = vld [vmem:[%s13523_s9 + $0x3c0] sm:$0xff]  }
 0x888   : > { %4375 = vmatprep.subr.bf16.mxu1 %v13826_v61 }
 0x889   : > { %4006 = vmatmul.mubr.bf16.vlgmr.msra.gmra.mxu0 %v3893_v49  ;;  %v4429_v49 = vpack.c.bf16 %v4422_v41, %v4422_v41 }
 0x88a   : > { %4140 = vmatmul.mubr.bf16.vlgmr.msra.gmra.mxu1 %v4027_v47  ;;  %4242 = vmatpush1.bf16.msra.mxu0 %v9252_v9  ;;  %v9288_v9 = vld [vmem:[%s13523_s9 + $0x308] sm:$0xff]   ;;  %v4563_v47 = vpack.c.bf16 %v4556_v58, %v4556_v58 }
 0x88b   : > { %8151 = vmatprep.mubr.msk.bf16.mxu0 %vm3337_vm7, %v4162_v19  ;;  %4376 = vmatpush1.bf16.msra.mxu1 %v9253_v42  ;;  %v9289_v42 = vld [vmem:[%s13523_s9 + $0x350] sm:$0xff]   ;;  %v4698_v19 = vpack.c.bf16 %v4694_v43, %v4694_v43  ;;  %v9317_v43 = vld [vmem:[%s13523_s9 + $0x3b8] sm:$0xff]  }
 0x88c   : > { %8179 = vmatprep.mubr.msk.bf16.mxu1 %vm3337_vm7, %v4296_v11  ;;  %4243 = vmatprep.subr.bf16.mxu0 %v13826_v61  ;;  %v4832_v11 = vpack.c.bf16 %v4828_v38, %v4828_v38  ;;  %v9319_v38 = vld [vmem:[%s13523_s9 + $0x3b0] sm:$0xff]  }
 0x88d   : > { %4377 = vmatprep.subr.bf16.mxu1 %v13826_v61 }
 0x88e   : > { %4244 = vmatpush1.bf16.msra.mxu0 %v9254_v14  ;;  %v9290_v14 = vld [vmem:[%s13523_s9 + $0x300] sm:$0xff]  }
 0x88f   : > { %4378 = vmatpush1.bf16.msra.mxu1 %v9255_v45  ;;  %4245 = vmatprep.subr.bf16.mxu0 %v13826_v61  ;;  %v9291_v45 = vld [vmem:[%s13523_s9 + $0x348] sm:$0xff]  }
 0x890   : > { %4379 = vmatprep.subr.bf16.mxu1 %v13826_v61 }
 0x892   : > { %4246 = vmatpush1.bf16.msra.mxu0 %v9256_v33  ;;  %v9292_v33 = vld [vmem:[%s13523_s9 + $0x2f8] sm:$0xff]  }
 0x893   : > { %4380 = vmatpush1.bf16.msra.mxu1 %v9257_v15  ;;  %4247 = vmatprep.subr.bf16.mxu0 %v13826_v61  ;;  %v9293_v15 = vld [vmem:[%s13523_s9 + $0x340] sm:$0xff]  }
 0x894   : > { %4381 = vmatprep.subr.bf16.mxu1 %v13826_v61 }
 0x896   : > { %4248 = vmatpush1.bf16.msra.mxu0 %v9258_v5  ;;  %v9294_v5 = vld [vmem:[%s13523_s9 + $0x2f0] sm:$0xff]  }
 0x897   : > { %4382 = vmatpush1.bf16.msra.mxu1 %v9259_v48  ;;  %4249 = vmatprep.subr.bf16.mxu0 %v13826_v61  ;;  %v9295_v48 = vld [vmem:[%s13523_s9 + $0x338] sm:$0xff]  }
 0x898   : > { %4383 = vmatprep.subr.bf16.mxu1 %v13826_v61 }
 0x89a   : > { %4250 = vmatpush1.bf16.msra.mxu0 %v9260_v62  ;;  %v9296_v62 = vld [vmem:[%s13523_s9 + $0x2e8] sm:$0xff]  }
 0x89b   : > { %4384 = vmatpush1.bf16.msra.mxu1 %v9261_v26  ;;  %4251 = vmatprep.subr.bf16.mxu0 %v13826_v61  ;;  %v9297_v26 = vld [vmem:[%s13523_s9 + $0x330] sm:$0xff]  }
 0x89c   : > { %4385 = vmatprep.subr.bf16.mxu1 %v13826_v61 }
 0x89e   : > { %4252 = vmatpush1.bf16.msra.mxu0 %v9262_v32  ;;  %v9298_v32 = vld [vmem:[%s13523_s9 + $0x2e0] sm:$0xff]  }
 0x89f   : > { %4386 = vmatpush1.bf16.msra.mxu1 %v9263_v4  ;;  %4253 = vmatprep.subr.bf16.mxu0 %v13826_v61  ;;  %v9299_v4 = vld [vmem:[%s13523_s9 + $0x328] sm:$0xff]  }
 0x8a0   : > { %4387 = vmatprep.subr.bf16.mxu1 %v13826_v61 }
 0x8a2   : > { %4254 = vmatpush1.bf16.msra.mxu0 %v9264_v1  ;;  %v9300_v1 = vld [vmem:[%s13523_s9 + $0x2d8] sm:$0xff]  }
 0x8a3   : > { %4388 = vmatpush1.bf16.msra.mxu1 %v9265_v23  ;;  %4255 = vmatprep.subr.bf16.mxu0 %v13826_v61  ;;  %v9301_v23 = vld [vmem:[%s13523_s9 + $0x320] sm:$0xff]  }
 0x8a4   : > { %4389 = vmatprep.subr.bf16.mxu1 %v13826_v61 }
 0x8a6   : > { %4256 = vmatpush1.bf16.msra.mxu0 %v9266_v51  ;;  %v9302_v51 = vld [vmem:[%s13523_s9 + $0x2d0] sm:$0xff]  }
 0x8a7   : > { %4390 = vmatpush1.bf16.msra.mxu1 %v9267_v6  ;;  %4271 = vmatprep.subr.bf16.mxu0 %v13826_v61  ;;  %v9303_v6 = vld [vmem:[%s13523_s9 + $0x318] sm:$0xff]  }
 0x8a8   : > { %4405 = vmatprep.subr.bf16.mxu1 %v13826_v61 }
 0x8aa   : > { %4272 = vmatpush2.bf16.msra.mxu0 %v4239_v54  ;;  %v4775_v54 = vsel %vm2582_vm5, %v9304_v39, 0  ;;  %v9327_v39 = vld [vmem:[%s13523_s9 + $0x468] sm:$0xff]  }
 0x8ab   : > { %4406 = vmatpush2.bf16.msra.mxu1 %v4373_v44  ;;  %4509 = vmatprep.subr.bf16.mxu0 %v13826_v61  ;;  %v4909_v44 = vsel %vm2582_vm5, %v9305_v0, 0  ;;  %v9328_v0 = vld [vmem:[%s13523_s9 + $0x418] sm:$0xff]  }
 0x8ac   : > { %4643 = vmatprep.subr.bf16.mxu1 %v13826_v61 }
 0x8ad   : > { %4274 = vmatmul.mubr.bf16.vlgmr.msra.gmra.mxu0 %v4161_v29  ;;  %v4697_v29 = vpack.c.bf16 %v4690_v57, %v4690_v57  ;;  %v9331_v57 = vld [vmem:[%s13523_s9 + $0x458] sm:$0xff]  }
 0x8ae   : > { %4408 = vmatmul.mubr.bf16.vlgmr.msra.gmra.mxu1 %v4295_v46  ;;  %4510 = vmatpush1.bf16.msra.mxu0 %v9270_v25  ;;  %v9306_v25 = vld [vmem:[%s13523_s9 + $0x398] sm:$0xff]   ;;  %v4831_v46 = vpack.c.bf16 %v4824_v35, %v4824_v35 }
 0x8af   : > { %8207 = vmatprep.mubr.msk.bf16.mxu0 %vm3337_vm7, %v4430_v52  ;;  %4644 = vmatpush1.bf16.msra.mxu1 %v9271_v7  ;;  %v9307_v7 = vld [vmem:[%s13523_s9 + $0x3e0] sm:$0xff]   ;;  %v4966_v52 = vpack.c.bf16 %v4962_v3, %v4962_v3  ;;  %v9332_v3 = vld [vmem:[%s13523_s9 + $0x408] sm:$0xff]  }
 0x8b0   : > { %8235 = vmatprep.mubr.msk.bf16.mxu1 %vm3337_vm7, %v4564_v2  ;;  %4511 = vmatprep.subr.bf16.mxu0 %v13826_v61  ;;  %v5100_v2 = vpack.c.bf16 %v5096_v50, %v5096_v50 }
 0x8b1   : > { %4645 = vmatprep.subr.bf16.mxu1 %v13826_v61 }
 0x8b2   : > { %4512 = vmatpush1.bf16.msra.mxu0 %v9272_v27  ;;  %v9308_v27 = vld [vmem:[%s13523_s9 + $0x390] sm:$0xff]  }
 0x8b3   : > { %4646 = vmatpush1.bf16.msra.mxu1 %v9273_v60  ;;  %4513 = vmatprep.subr.bf16.mxu0 %v13826_v61  ;;  %v9309_v60 = vld [vmem:[%s13523_s9 + $0x3d8] sm:$0xff]  }
 0x8b4   : > { %4647 = vmatprep.subr.bf16.mxu1 %v13826_v61 }
 0x8b6   : > { %4514 = vmatpush1.bf16.msra.mxu0 %v9274_v20 }
 0x8b7   : > { %4648 = vmatpush1.bf16.msra.mxu1 %v9275_v8  ;;  %4515 = vmatprep.subr.bf16.mxu0 %v13826_v61  ;;  %v9310_v8 = vld [vmem:[%s13523_s9 + $0x388] sm:$0xff]  }
 0x8b8   : > { %4649 = vmatprep.subr.bf16.mxu1 %v13826_v61 }
 0x8ba   : > { %4516 = vmatpush1.bf16.msra.mxu0 %v9276_v36  ;;  %v9311_v36 = vld [vmem:[%s13523_s9 + $0x3d0] sm:$0xff]  }
 0x8bb   : > { %4650 = vmatpush1.bf16.msra.mxu1 %v9277_v40  ;;  %4517 = vmatprep.subr.bf16.mxu0 %v13826_v61 }
 0x8bc   : > { %4651 = vmatprep.subr.bf16.mxu1 %v13826_v61 }
 0x8be   : > { %4518 = vmatpush1.bf16.msra.mxu0 %v9278_v55  ;;  %v9312_v55 = vld [vmem:[%s13523_s9 + $0x380] sm:$0xff]  }
 0x8bf   : > { %4652 = vmatpush1.bf16.msra.mxu1 %v9279_v31  ;;  %4519 = vmatprep.subr.bf16.mxu0 %v13826_v61  ;;  %v3345_v31 = vld [vmem:[%s13526_s12] sm:$0x7] }
 0x8c0   : > { %4653 = vmatprep.subr.bf16.mxu1 %v13826_v61 }
 0x8c2   : > { %4520 = vmatpush1.bf16.msra.mxu0 %v9280_v34  ;;  %v9313_v34 = vld [vmem:[%s13523_s9 + $0x3c8] sm:$0xff]  }
 0x8c3   : > { %4654 = vmatpush1.bf16.msra.mxu1 %v9281_v37  ;;  %4521 = vmatprep.subr.bf16.mxu0 %v13826_v61 }
 0x8c4   : > { %4655 = vmatprep.subr.bf16.mxu1 %v13826_v61 }
 0x8c6   : > { %4522 = vmatpush1.bf16.msra.mxu0 %v9282_v63 }
 0x8c7   : > { %4656 = vmatpush1.bf16.msra.mxu1 %v9283_v16  ;;  %4523 = vmatprep.subr.bf16.mxu0 %v13826_v61 }
 0x8c8   : > { %4657 = vmatprep.subr.bf16.mxu1 %v13826_v61 }
 0x8ca   : > { %4524 = vmatpush1.bf16.msra.mxu0 %v9284_v59  ;;  %v9314_v59 = vld [vmem:[%s13523_s9 + $0x378] sm:$0xff]  }
 0x8cb   : > { %4658 = vmatpush1.bf16.msra.mxu1 %v9285_v30  ;;  %4539 = vmatprep.subr.bf16.mxu0 %v13826_v61 }
 0x8cc   : > { %4673 = vmatprep.subr.bf16.mxu1 %v13826_v61 }
 0x8ce   : > { %4540 = vmatpush2.bf16.msra.mxu0 %v4507_v56 }
 0x8cf   : > { %4674 = vmatpush2.bf16.msra.mxu1 %v4641_v53  ;;  %4777 = vmatprep.subr.bf16.mxu0 %v13826_v61 }
 0x8d0   : > { %4911 = vmatprep.subr.bf16.mxu1 %v13826_v61 }
 0x8d1   : > { %4542 = vmatmul.mubr.bf16.vlgmr.msra.gmra.mxu0 %v4429_v49  ;;  %v9320_v49 = vld [vmem:[%s13523_s9 + $0x360] sm:$0xff]  }
 0x8d2   : > { %4676 = vmatmul.mubr.bf16.vlgmr.msra.gmra.mxu1 %v4563_v47  ;;  %4778 = vmatpush1.bf16.msra.mxu0 %v9288_v9  ;;  %v9318_v9 = vld [vmem:[%s13523_s9 + $0x368] sm:$0xff]   ;;  %v9322_v47 = vld [vmem:[%s13523_s9 + $0x3a0] sm:$0x1f]  }
 0x8d3   : > { %8263 = vmatprep.mubr.msk.bf16.mxu0 %vm3337_vm7, %v4698_v19  ;;  %4912 = vmatpush1.bf16.msra.mxu1 %v9289_v42  ;;  %v9321_v42 = vld [vmem:[%s13523_s9 + $0x3a8] sm:$0xff]  }
 0x8d4   : > { %8291 = vmatprep.mubr.msk.bf16.mxu1 %vm3337_vm7, %v4832_v11  ;;  %4779 = vmatprep.subr.bf16.mxu0 %v13826_v61  ;;  %v9323_v19 = vld [vmem:[%s13523_s9 + $0x3e8] sm:$0x1f]   ;;  %v12597_v11 = vld [vmem:[#allocation2 + $0x16] ss:$8 sm:$0x3] }
 0x8d5   : > { %4913 = vmatprep.subr.bf16.mxu1 %v13826_v61 }
 0x8d6   : > { %4780 = vmatpush1.bf16.msra.mxu0 %v9290_v14  ;;  %v5043_v14 = vsel %vm2582_vm5, %v9322_v47, 0 }
 0x8d7   : > { %4914 = vmatpush1.bf16.msra.mxu1 %v9291_v45  ;;  %4781 = vmatprep.subr.bf16.mxu0 %v13826_v61  ;;  %v4958_v45 = vrot.slane %v12502_v13, %v13827_v21  ;;  %v9329_v13 = vld [vmem:[%s13523_s9 + $0x460] sm:$0xff]  }
 0x8d8   : > { %4915 = vmatprep.subr.bf16.mxu1 %v13826_v61 }
 0x8da   : > { %4782 = vmatpush1.bf16.msra.mxu0 %v9292_v33  ;;  %v12603_v33 = vld [vmem:[#allocation2 + $0x17] ss:$8 sm:$0x3] }
 0x8db   : > { %4916 = vmatpush1.bf16.msra.mxu1 %v9293_v15  ;;  %4783 = vmatprep.subr.bf16.mxu0 %v13826_v61  ;;  %v5177_v15 = vsel %vm2582_vm5, %v9323_v19, 0  ;;  %v9351_v19 = vld [vmem:[%s13523_s9 + $0x4e0] sm:$0xff]  }
 0x8dc   : > { %4917 = vmatprep.subr.bf16.mxu1 %v13826_v61 }
 0x8de   : > { %4784 = vmatpush1.bf16.msra.mxu0 %v9294_v5  ;;  %v5092_v5 = vrot.slane %v12508_v17, %v13827_v21 }
 0x8df   : > { %4918 = vmatpush1.bf16.msra.mxu1 %v9295_v48  ;;  %4785 = vmatprep.subr.bf16.mxu0 %v13826_v61  ;;  %v5230_v48 = vrot.slane %v12597_v11, %v13828_v24 }
 0x8e0   : > { %4919 = vmatprep.subr.bf16.mxu1 %v13826_v61 }
 0x8e2   : > { %4786 = vmatpush1.bf16.msra.mxu0 %v9296_v62  ;;  %v9324_v62 = vld [vmem:[%s13523_s9 + $0x428] sm:$0xff]  }
 0x8e3   : > { %4920 = vmatpush1.bf16.msra.mxu1 %v9297_v26  ;;  %4787 = vmatprep.subr.bf16.mxu0 %v13826_v61  ;;  %v5364_v26 = vrot.slane %v12603_v33, %v13828_v24 }
 0x8e4   : > { %4921 = vmatprep.subr.bf16.mxu1 %v13826_v61 }
 0x8e6   : > { %4788 = vmatpush1.bf16.msra.mxu0 %v9298_v32  ;;  %v4965_v32 = vpack.c.bf16 %v4958_v45, %v4958_v45 }
 0x8e7   : > { %4922 = vmatpush1.bf16.msra.mxu1 %v9299_v4  ;;  %4789 = vmatprep.subr.bf16.mxu0 %v13826_v61  ;;  %v9325_v4 = vld [vmem:[%s13523_s9 + $0x470] sm:$0xff]  }
 0x8e8   : > { %4923 = vmatprep.subr.bf16.mxu1 %v13826_v61 }
 0x8ea   : > { %4790 = vmatpush1.bf16.msra.mxu0 %v9300_v1  ;;  %v5099_v1 = vpack.c.bf16 %v5092_v5, %v5092_v5 }
 0x8eb   : > { %4924 = vmatpush1.bf16.msra.mxu1 %v9301_v23  ;;  %4791 = vmatprep.subr.bf16.mxu0 %v13826_v61  ;;  %v5234_v23 = vpack.c.bf16 %v5230_v48, %v5230_v48  ;;  %v9353_v48 = vld [vmem:[%s13523_s9 + $0x4d8] sm:$0xff]  }
 0x8ec   : > { %4925 = vmatprep.subr.bf16.mxu1 %v13826_v61 }
 0x8ee   : > { %4792 = vmatpush1.bf16.msra.mxu0 %v9302_v51  ;;  %v5368_v51 = vpack.c.bf16 %v5364_v26, %v5364_v26  ;;  %v9354_v26 = vld [vmem:[%s13523_s9 + $0x488] sm:$0xff]  }
 0x8ef   : > { %4926 = vmatpush1.bf16.msra.mxu1 %v9303_v6  ;;  %4807 = vmatprep.subr.bf16.mxu0 %v13826_v61  ;;  %v9326_v6 = vld [vmem:[%s13523_s9 + $0x420] sm:$0xff]  }
 0x8f0   : > { %4941 = vmatprep.subr.bf16.mxu1 %v13826_v61 }
 0x8f2   : > { %4808 = vmatpush2.bf16.msra.mxu0 %v4775_v54  ;;  %v9330_v54 = vld [vmem:[%s13523_s9 + $0x410] sm:$0xff]  }
 0x8f3   : > { %4942 = vmatpush2.bf16.msra.mxu1 %v4909_v44  ;;  %5045 = vmatprep.subr.bf16.mxu0 %v13826_v61 }
 0x8f4   : > { %5179 = vmatprep.subr.bf16.mxu1 %v13826_v61 }
 0x8f5   : > { %4810 = vmatmul.mubr.bf16.vlgmr.msra.gmra.mxu0 %v4697_v29  ;;  %v9333_v29 = vld [vmem:[%s13523_s9 + $0x450] sm:$0xff]  }
 0x8f6   : > { %4944 = vmatmul.mubr.bf16.vlgmr.msra.gmra.mxu1 %v4831_v46  ;;  %5046 = vmatpush1.bf16.msra.mxu0 %v9306_v25 }
 0x8f7   : > { %8319 = vmatprep.mubr.msk.bf16.mxu0 %vm3337_vm7, %v4966_v52  ;;  %5180 = vmatpush1.bf16.msra.mxu1 %v9307_v7 }
 0x8f8   : > { %8347 = vmatprep.mubr.msk.bf16.mxu1 %vm3337_vm7, %v5100_v2  ;;  %5047 = vmatprep.subr.bf16.mxu0 %v13826_v61  ;;  %v9334_v2 = vld [vmem:[%s13523_s9 + $0x400] sm:$0xff]  }
 0x8f9   : > { %5181 = vmatprep.subr.bf16.mxu1 %v13826_v61  ;;  %v9032_v20 = vpop.f32.mrf.mxu1 }
 0x8fa   : > { %5048 = vmatpush1.bf16.msra.mxu0 %v9308_v27 }
 0x8fb   : > { %5182 = vmatpush1.bf16.msra.mxu1 %v9309_v60  ;;  %5049 = vmatprep.subr.bf16.mxu0 %v13826_v61  ;;  %v3284_v40 = vpop.f32.mrf.mxu1 }
 0x8fc   : > { %5183 = vmatprep.subr.bf16.mxu1 %v13826_v61  ;;  %3327 = vrot.lane.b32.xlu1 %v3284_v40, %s9581_s0  ;;  %v9338_v40 = vld [vmem:[%s13523_s9 + $0x3f0] sm:$0xff]  }
 0x8fe   : > { %5050 = vmatpush1.bf16.msra.mxu0 %v9310_v8  ;;  %v9336_v8 = vld [vmem:[%s13523_s9 + $0x3f8] sm:$0xff]  }
 0x8ff   : > { %5184 = vmatpush1.bf16.msra.mxu1 %v9311_v36  ;;  %5051 = vmatprep.subr.bf16.mxu0 %v13826_v61  ;;  %v9337_v36 = vld [vmem:[%s13523_s9 + $0x440] sm:$0xff]  }
 0x900   : > { %5185 = vmatprep.subr.bf16.mxu1 %v13826_v61  ;;  %3329 = vrot.lane.b32.xlu1 %v9032_v20, %s9581_s0  ;;  %v9335_v20 = vld [vmem:[%s13523_s9 + $0x448] sm:$0xff]   ;;  %s9583_s0 = smov 64  }
 0x901   : > { %v3471_v37 = vpop.f32.mrf.mxu0 }
 0x902   : > { %v3605_v63 = vpop.f32.mrf.mxu1  ;;  %v3477_v16 = vadd.f32 %v3471_v37, %v3345_v31  ;;  %5052 = vmatpush1.bf16.msra.mxu0 %v9312_v55  ;;  %v9339_v55 = vld [vmem:[%s13523_s9 + $0x438] sm:$0xff]   ;;  %v9340_v31 = vld [vmem:[%s13523_s9 + $0x430] sm:$0x1f]  }
 0x903   : > { %5186 = vmatpush1.bf16.msra.mxu1 %v9313_v34  ;;  %v3473_v30 = vpop.f32.mrf.mxu0  ;;  %5053 = vmatprep.subr.bf16.mxu0 %v13826_v61  ;;  %v9341_v34 = vld [vmem:[%s13523_s9 + $0x478] sm:$0x1f]   ;;  %v5311_v37 = vsel %vm2582_vm5, %v9340_v31, 0 }
 0x904   : > { %v3607_v12 = vpop.f32.mrf.mxu1  ;;  %v12564_v28 = vadd.f32 %v3605_v63, %v3477_v16  ;;  %5187 = vmatprep.subr.bf16.mxu1 %v13826_v61  ;;  %v5226_v63 = vrot.slane %v12597_v11, %v13827_v21  ;;  %v5445_v16 = vsel %vm2582_vm5, %v9341_v34, 0  ;;  %v9342_v30 = vld [vmem:[%s13523_s9 + $0x4b8] sm:$0xff]  }
 0x905   : > { %v3474_v56 = vpop.f32.mrf.mxu0 }
 0x906   : > { %v3608_v41 = vpop.f32.mrf.mxu1  ;;  %5054 = vmatpush1.bf16.msra.mxu0 %v9314_v59  ;;  %v5360_v59 = vrot.slane %v12603_v33, %v13827_v21  ;;  %v5233_v12 = vpack.c.bf16 %v5226_v63, %v5226_v63  ;;  %v9344_v56 = vld [vmem:[%s13523_s9 + $0x4b0] sm:$0xff]  }
 0x907   : > { %5188 = vmatpush1.bf16.msra.mxu1 %v9315_v22  ;;  %v3475_v53 = vpop.f32.mrf.mxu0  ;;  %5055 = vmatprep.subr.bf16.mxu0 %v13826_v61  ;;  %v9343_v22 = vld [vmem:[%s13523_s9 + $0x500] sm:$0xff]   ;;  %v9345_v41 = vld [vmem:[%s13523_s9 + $0x4f8] sm:$0xff]  }
 0x908   : > { %v3609_v58 = vpop.f32.mrf.mxu1  ;;  %5189 = vmatprep.subr.bf16.mxu1 %v13826_v61  ;;  %v9347_v53 = vld [vmem:[%s13523_s9 + $0x4f0] sm:$0xff]  }
 0x909   : > { %v9348_v58 = vld [vmem:[%s13523_s9 + $0x4a0] sm:$0xff]  }
 0x90a   : > { %5056 = vmatpush1.bf16.msra.mxu0 %v9316_v10  ;;  %v9346_v10 = vld [vmem:[%s13523_s9 + $0x4a8] sm:$0xff]  }
 0x90b   : > { %5190 = vmatpush1.bf16.msra.mxu1 %v9317_v43  ;;  %5057 = vmatprep.subr.bf16.mxu0 %v13826_v61  ;;  %v9349_v43 = vld [vmem:[%s13523_s9 + $0x4e8] sm:$0xff]  }
 0x90c   : > { %5191 = vmatprep.subr.bf16.mxu1 %v13826_v61 }
 0x90e   : > { %5058 = vmatpush1.bf16.msra.mxu0 %v9318_v9 }
 0x90f   : > { %5192 = vmatpush1.bf16.msra.mxu1 %v9319_v38  ;;  %5059 = vmatprep.subr.bf16.mxu0 %v13826_v61 }
 0x910   : > { %5193 = vmatprep.subr.bf16.mxu1 %v13826_v61 }
 0x912   : > { %5060 = vmatpush1.bf16.msra.mxu0 %v9320_v49 }
 0x913   : > { %5194 = vmatpush1.bf16.msra.mxu1 %v9321_v42  ;;  %5075 = vmatprep.subr.bf16.mxu0 %v13826_v61  ;;  %v9350_v42 = vld [vmem:[%s13523_s9 + $0x498] sm:$0xff]  }
 0x914   : > { %5209 = vmatprep.subr.bf16.mxu1 %v13826_v61 }
 0x916   : > { %5076 = vmatpush2.bf16.msra.mxu0 %v5043_v14 }
 0x917   : > { %5210 = vmatpush2.bf16.msra.mxu1 %v5177_v15  ;;  %5313 = vmatprep.subr.bf16.mxu0 %v13826_v61  ;;  %v9352_v15 = vld [vmem:[%s13523_s9 + $0x490] sm:$0xff]  }
 0x918   : > { %5447 = vmatprep.subr.bf16.mxu1 %v13826_v61 }
 0x919   : > { %5078 = vmatmul.mubr.bf16.vlgmr.msra.gmra.mxu0 %v4965_v32  ;;  %v9355_v32 = vld [vmem:[%s13523_s9 + $0x4d0] sm:$0xff]  }
 0x91a   : > { %5212 = vmatmul.mubr.bf16.vlgmr.msra.gmra.mxu1 %v5099_v1  ;;  %5314 = vmatpush1.bf16.msra.mxu0 %v9324_v62  ;;  %v9357_v1 = vld [vmem:[%s13523_s9 + $0x4c8] sm:$0xff]  }
 0x91b   : > { %8375 = vmatprep.mubr.msk.bf16.mxu0 %vm3337_vm7, %v5234_v23  ;;  %5448 = vmatpush1.bf16.msra.mxu1 %v9325_v4  ;;  %v9356_v4 = vld [vmem:[%s13523_s9 + $0x480] sm:$0xff]  }
 0x91c   : > { %8403 = vmatprep.mubr.msk.bf16.mxu1 %vm3337_vm7, %v5368_v51  ;;  %5315 = vmatprep.subr.bf16.mxu0 %v13826_v61  ;;  %v9358_v23 = vld [vmem:[%s13523_s9 + $0x4c0] sm:$0x1f]   ;;  %v9359_v51 = vld [vmem:[%s13523_s9 + $0x508] sm:$0x1f]  }
 0x91d   : > { %5449 = vmatprep.subr.bf16.mxu1 %v13826_v61 }
 0x91e   : > { %5316 = vmatpush1.bf16.msra.mxu0 %v9326_v6  ;;  %v5579_v6 = vsel %vm2582_vm5, %v9358_v23, 0 }
 0x91f   : > { %5450 = vmatpush1.bf16.msra.mxu1 %v9327_v39  ;;  %5317 = vmatprep.subr.bf16.mxu0 %v13826_v61  ;;  %v5713_v39 = vsel %vm2582_vm5, %v9359_v51, 0 }
 0x920   : > { %5451 = vmatprep.subr.bf16.mxu1 %v13826_v61 }
 0x922   : > { %5318 = vmatpush1.bf16.msra.mxu0 %v9328_v0 }
 0x923   : > { %5452 = vmatpush1.bf16.msra.mxu1 %v9329_v13  ;;  %5319 = vmatprep.subr.bf16.mxu0 %v13826_v61 }
 0x924   : > { %5453 = vmatprep.subr.bf16.mxu1 %v13826_v61 }
 0x925   : > { %v3739_v17 = vpop.f32.mrf.mxu0 }
 0x926   : > { %v3873_v44 = vpop.f32.mrf.mxu1  ;;  %v3745_v35 = vadd.f32 %v3739_v17, %v12564_v28  ;;  %5320 = vmatpush1.bf16.msra.mxu0 %v9330_v54  ;;  %v5367_v28 = vpack.c.bf16 %v5360_v59, %v5360_v59  ;;  %v9361_v59 = vld [vmem:[%s13523_s9 + $0x590] sm:$0xff]  }
 0x927   : > { %5454 = vmatpush1.bf16.msra.mxu1 %v9331_v57  ;;  %v3741_v25 = vpop.f32.mrf.mxu0  ;;  %5321 = vmatprep.subr.bf16.mxu0 %v13826_v61 }
 0x928   : > { %v3875_v50 = vpop.f32.mrf.mxu1  ;;  %v12655_v7 = vadd.f32 %v3873_v44, %v3745_v35  ;;  %5455 = vmatprep.subr.bf16.mxu1 %v13826_v61 }
 0x929   : > { %v3742_v46 = vpop.f32.mrf.mxu0 }
 0x92a   : > { %v3876_v52 = vpop.f32.mrf.mxu1  ;;  %5322 = vmatpush1.bf16.msra.mxu0 %v9332_v3 }
 0x92b   : > { %5456 = vmatpush1.bf16.msra.mxu1 %v9333_v29  ;;  %v3743_v27 = vpop.f32.mrf.mxu0  ;;  %5323 = vmatprep.subr.bf16.mxu0 %v13826_v61 }
 0x92c   : > { %v3877_v60 = vpop.f32.mrf.mxu1  ;;  %5457 = vmatprep.subr.bf16.mxu1 %v13826_v61 }
 0x92e   : > { %5324 = vmatpush1.bf16.msra.mxu0 %v9334_v2 }
 0x92f   : > { %5458 = vmatpush1.bf16.msra.mxu1 %v9335_v20  ;;  %5325 = vmatprep.subr.bf16.mxu0 %v13826_v61 }
 0x930   : > { %5459 = vmatprep.subr.bf16.mxu1 %v13826_v61 }
 0x932   : > { %5326 = vmatpush1.bf16.msra.mxu0 %v9336_v8 }
 0x933   : > { %5460 = vmatpush1.bf16.msra.mxu1 %v9337_v36  ;;  %5327 = vmatprep.subr.bf16.mxu0 %v13826_v61 }
 0x934   : > { %5461 = vmatprep.subr.bf16.mxu1 %v13826_v61 }
 0x936   : > { %5328 = vmatpush1.bf16.msra.mxu0 %v9338_v40 }
 0x937   : > { %5462 = vmatpush1.bf16.msra.mxu1 %v9339_v55  ;;  %5343 = vmatprep.subr.bf16.mxu0 %v13826_v61 }
 0x938   : > { %5477 = vmatprep.subr.bf16.mxu1 %v13826_v61 }
 0x93a   : > { %5344 = vmatpush2.bf16.msra.mxu0 %v5311_v37 }
 0x93b   : > { %5478 = vmatpush2.bf16.msra.mxu1 %v5445_v16  ;;  %5581 = vmatprep.subr.bf16.mxu0 %v13826_v61  ;;  %v9360_v16 = vld [vmem:[%s13523_s9 + $0x548] sm:$0xff]  }
 0x93c   : > { %5715 = vmatprep.subr.bf16.mxu1 %v13826_v61 }
 0x93d   : > { %5346 = vmatmul.mubr.bf16.vlgmr.msra.gmra.mxu0 %v5233_v12 }
 0x93e   : > { %5480 = vmatmul.mubr.bf16.vlgmr.msra.gmra.mxu1 %v5367_v28  ;;  %5582 = vmatpush1.bf16.msra.mxu0 %v9342_v30  ;;  %v9363_v28 = vld [vmem:[%s13523_s9 + $0x588] sm:$0xff]  }
 0x93f   : > { %5716 = vmatpush1.bf16.msra.mxu1 %v9343_v22  ;;  %5583 = vmatprep.subr.bf16.mxu0 %v13826_v61  ;;  %v9362_v22 = vld [vmem:[%s13523_s9 + $0x540] sm:$0xff]  }
 0x940   : > { %5717 = vmatprep.subr.bf16.mxu1 %v13826_v61 }
 0x942   : > { %5584 = vmatpush1.bf16.msra.mxu0 %v9344_v56  ;;  %v9364_v56 = vld [vmem:[%s13523_s9 + $0x538] sm:$0xff]  }
 0x943   : > { %5718 = vmatpush1.bf16.msra.mxu1 %v9345_v41  ;;  %5585 = vmatprep.subr.bf16.mxu0 %v13826_v61  ;;  %v9365_v41 = vld [vmem:[%s13523_s9 + $0x580] sm:$0xff]  }
 0x944   : > { %5719 = vmatprep.subr.bf16.mxu1 %v13826_v61 }
 0x946   : > { %5586 = vmatpush1.bf16.msra.mxu0 %v9346_v10  ;;  %v9366_v10 = vld [vmem:[%s13523_s9 + $0x530] sm:$0xff]  }
 0x947   : > { %5720 = vmatpush1.bf16.msra.mxu1 %v9347_v53  ;;  %5587 = vmatprep.subr.bf16.mxu0 %v13826_v61  ;;  %v9367_v53 = vld [vmem:[%s13523_s9 + $0x578] sm:$0xff]  }
 0x948   : > { %5721 = vmatprep.subr.bf16.mxu1 %v13826_v61 }
 0x949   : > { %v4007_v9 = vpop.f32.mrf.mxu0 }
 0x94a   : > { %v4013_v38 = vadd.f32 %v4007_v9, %v12655_v7  ;;  %v4141_v49 = vpop.f32.mrf.mxu1  ;;  %5588 = vmatpush1.bf16.msra.mxu0 %v9348_v58  ;;  %v9368_v58 = vld [vmem:[%s13523_s9 + $0x528] sm:$0xff]   ;;  %v9370_v9 = vld [vmem:[%s13523_s9 + $0x520] sm:$0xff]  }
 0x94b   : > { %v4009_v47 = vpop.f32.mrf.mxu0  ;;  %5722 = vmatpush1.bf16.msra.mxu1 %v9349_v43  ;;  %5589 = vmatprep.subr.bf16.mxu0 %v13826_v61  ;;  %v9369_v43 = vld [vmem:[%s13523_s9 + $0x570] sm:$0xff]  }
 0x94c   : > { %v4147_v11 = vadd.f32 %v4141_v49, %v4013_v38  ;;  %v4143_v14 = vpop.f32.mrf.mxu1  ;;  %5723 = vmatprep.subr.bf16.mxu1 %v13826_v61  ;;  %v9371_v38 = vld [vmem:[%s13523_s9 + $0x568] sm:$0xff]  }
 0x94d   : > { %v4010_v45 = vpop.f32.mrf.mxu0 }
 0x94e   : > { %v4144_v33 = vpop.f32.mrf.mxu1  ;;  %5590 = vmatpush1.bf16.msra.mxu0 %v9350_v42 }
 0x94f   : > { %v4011_v5 = vpop.f32.mrf.mxu0  ;;  %5724 = vmatpush1.bf16.msra.mxu1 %v9351_v19  ;;  %5591 = vmatprep.subr.bf16.mxu0 %v13826_v61  ;;  %v9372_v19 = vld [vmem:[%s13523_s9 + $0x518] sm:$0xff]  }
 0x950   : > { %v4145_v62 = vpop.f32.mrf.mxu1  ;;  %5725 = vmatprep.subr.bf16.mxu1 %v13826_v61 }
 0x951   : > { %v9375_v62 = vld [vmem:[%s13523_s9 + $0x558] sm:$0xff]  }
 0x952   : > { %5592 = vmatpush1.bf16.msra.mxu0 %v9352_v15 }
 0x953   : > { %5726 = vmatpush1.bf16.msra.mxu1 %v9353_v48  ;;  %5593 = vmatprep.subr.bf16.mxu0 %v13826_v61  ;;  %v9374_v48 = vld [vmem:[%s13523_s9 + $0x510] sm:$0xff]  }
 0x954   : > { %5727 = vmatprep.subr.bf16.mxu1 %v13826_v61 }
 0x956   : > { %5594 = vmatpush1.bf16.msra.mxu0 %v9354_v26 }
 0x957   : > { %5728 = vmatpush1.bf16.msra.mxu1 %v9355_v32  ;;  %5595 = vmatprep.subr.bf16.mxu0 %v13826_v61  ;;  %v9376_v32 = vld [vmem:[%s13523_s9 + $0x550] sm:$0x1f]  }
 0x958   : > { %5729 = vmatprep.subr.bf16.mxu1 %v13826_v61 }
 0x95a   : > { %5596 = vmatpush1.bf16.msra.mxu0 %v9356_v4  ;;  %v9377_v4 = vld [vmem:[%s13523_s9 + $0x598] sm:$0x1f]  }
 0x95b   : > { %5730 = vmatpush1.bf16.msra.mxu1 %v9357_v1  ;;  %5611 = vmatprep.subr.bf16.mxu0 %v13826_v61 }
 0x95c   : > { %5745 = vmatprep.subr.bf16.mxu1 %v13826_v61 }
 0x95e   : > { %5612 = vmatpush2.bf16.msra.mxu0 %v5579_v6  ;;  %v5847_v6 = vsel %vm2582_vm5, %v9376_v32, 0  ;;  %v9401_v32 = vld [vmem:[%s13523_s9 + $0x6a0] sm:$0xff]  }
 0x95f   : > { %5746 = vmatpush2.bf16.msra.mxu1 %v5713_v39  ;;  %5849 = vmatprep.subr.bf16.mxu0 %v13826_v61  ;;  %v5981_v39 = vsel %vm2582_vm5, %v9377_v4, 0  ;;  %v9402_v4 = vld [vmem:[%s13523_s9 + $0x650] sm:$0xff]  }
 0x960   : > { %5983 = vmatprep.subr.bf16.mxu1 %v13826_v61 }
 0x96d   : > { %v4275_v0 = vpop.f32.mrf.mxu0 }
 0x96e   : > { %v4281_v13 = vadd.f32 %v4275_v0, %v4147_v11  ;;  %v4409_v54 = vpop.f32.mrf.mxu1  ;;  %v3328_v17 = vpop.permute.xlu1 %3327  ;;  %v9373_v11 = vld [vmem:[%s13523_s9 + $0x560] sm:$0xff]  }
 0x96f   : > { %v4277_v57 = vpop.f32.mrf.mxu0  ;;  %3341 = vst.msk [vmem:[#allocation2 + $0x20] sm:$0xff] %vm3335_vm6, %v3328_v17 }
 0x970   : > { %v12773_v44 = vadd.f32 %v4409_v54, %v4281_v13  ;;  %v4411_v35 = vpop.f32.mrf.mxu1  ;;  %3342 = vst.msk [vmem:[#allocation2 + $0x28] sm:$0xff] %vm3337_vm7, %v3328_v17  ;;  %v9378_v17 = vld [vmem:[%s13523_s9 + $0x5d8] sm:$0xff]  }
 0x971   : > { %v4278_v3 = vpop.f32.mrf.mxu0 }
 0x972   : > { %v4412_v25 = vpop.f32.mrf.mxu1  ;;  %v3330_v29 = vpop.permute.xlu1 %3329  ;;  %v9379_v3 = vld [vmem:[%s13523_s9 + $0x620] sm:$0xff]  }
 0x973   : > { %v4279_v50 = vpop.f32.mrf.mxu0  ;;  %3343 = vst.msk [vmem:[#allocation2 + $0x30] sm:$0xff] %vm3335_vm6, %v3330_v29 }
 0x974   : > { %v4413_v7 = vpop.f32.mrf.mxu1  ;;  %3344 = vst.msk [vmem:[#allocation2 + $0x38] sm:$0xff] %vm3337_vm7, %v3330_v29  ;;  %v9380_v29 = vld [vmem:[%s13523_s9 + $0x5d0] sm:$0xff]  }
 0x975   : > { %v9381_v7 = vld [vmem:[%s13523_s9 + $0x618] sm:$0xff]  }
 0x977   : > { %v5489_v46 = vld [vmem:[#allocation2 + $0x20] ss:$8 sm:$0x3]  ;;  %v5623_v52 = vld [vmem:[#allocation2 + $0x21] ss:$8 sm:$0x3] }
 0x978   : > { %v5498_v2 = vrot.slane %v5489_v46, %v13828_v24  ;;  %v5632_v27 = vrot.slane %v5623_v52, %v13828_v24  ;;  %v5494_v60 = vrot.slane %v5489_v46, %v13827_v21  ;;  %v5628_v20 = vrot.slane %v5623_v52, %v13827_v21  ;;  %v12783_v8 = vld [vmem:[#allocation2 + $0x22] ss:$8 sm:$0x3]  ;;  %v12785_v36 = vld [vmem:[#allocation2 + $0x23] ss:$8 sm:$0x3] }
 0x979   : > { %v5766_v40 = vrot.slane %v12783_v8, %v13828_v24  ;;  %v5900_v55 = vrot.slane %v12785_v36, %v13828_v24  ;;  %v12866_v23 = vld [vmem:[#allocation2 + $0x24] ss:$8 sm:$0x3]  ;;  %v12868_v51 = vld [vmem:[#allocation2 + $0x25] ss:$8 sm:$0x3]  ;;  %v5762_v0 = vrot.slane %v12783_v8, %v13827_v21  ;;  %v5896_v13 = vrot.slane %v12785_v36, %v13827_v21 }
 0x97a   : > { %v5502_v31 = vpack.c.bf16 %v5498_v2, %v5498_v2  ;;  %v5636_v34 = vpack.c.bf16 %v5632_v27, %v5632_v27  ;;  %v5501_v37 = vpack.c.bf16 %v5494_v60, %v5494_v60  ;;  %v5635_v63 = vpack.c.bf16 %v5628_v20, %v5628_v20  ;;  %v9382_v46 = vld [vmem:[%s13523_s9 + $0x5c8] sm:$0xff]   ;;  %v9383_v52 = vld [vmem:[%s13523_s9 + $0x610] sm:$0xff]   ;;  %v9384_v2 = vld [vmem:[%s13523_s9 + $0x5c0] sm:$0xff]  }
 0x97b   : > { %v5770_v30 = vpack.c.bf16 %v5766_v40, %v5766_v40  ;;  %v5904_v12 = vpack.c.bf16 %v5900_v55, %v5900_v55  ;;  %v6034_v54 = vrot.slane %v12866_v23, %v13828_v24  ;;  %v6168_v57 = vrot.slane %v12868_v51, %v13828_v24  ;;  %v9385_v27 = vld [vmem:[%s13523_s9 + $0x608] sm:$0xff]   ;;  %v9386_v60 = vld [vmem:[%s13523_s9 + $0x5b8] sm:$0xff]   ;;  %v9387_v20 = vld [vmem:[%s13523_s9 + $0x600] sm:$0xff]  }
 0x97c   : > { %8431 = vmatprep.mubr.msk.bf16.mxu0 %vm3337_vm7, %v5502_v31  ;;  %8459 = vmatprep.mubr.msk.bf16.mxu1 %vm3337_vm7, %v5636_v34  ;;  %v5903_v35 = vpack.c.bf16 %v5896_v13, %v5896_v13  ;;  %v9388_v8 = vld [vmem:[%s13523_s9 + $0x5b0] sm:$0xff]   ;;  %v9389_v36 = vld [vmem:[%s13523_s9 + $0x5f8] sm:$0xff]   ;;  %v9390_v34 = vld [vmem:[%s13523_s9 + $0x5a8] sm:$0xff]  }
 0x97d   : > { %5614 = vmatmul.mubr.bf16.vlgmr.msra.gmra.mxu0 %v5501_v37  ;;  %5748 = vmatmul.mubr.bf16.vlgmr.msra.gmra.mxu1 %v5635_v63  ;;  %v6038_v25 = vpack.c.bf16 %v6034_v54, %v6034_v54  ;;  %v6172_v50 = vpack.c.bf16 %v6168_v57, %v6168_v57  ;;  %v9391_v63 = vld [vmem:[%s13523_s9 + $0x5f0] sm:$0xff]   ;;  %v9408_v57 = vld [vmem:[%s13523_s9 + $0x638] sm:$0xff]  }
 0x97e   : > { %5850 = vmatpush1.bf16.msra.mxu0 %v9360_v16  ;;  %5984 = vmatpush1.bf16.msra.mxu1 %v9361_v59 }
 0x97f   : > { %8487 = vmatprep.mubr.msk.bf16.mxu0 %vm3337_vm7, %v5770_v30  ;;  %8515 = vmatprep.mubr.msk.bf16.mxu1 %vm3337_vm7, %v5904_v12 }
 0x980   : > { %5851 = vmatprep.subr.bf16.mxu0 %v13826_v61  ;;  %5985 = vmatprep.subr.bf16.mxu1 %v13826_v61 }
 0x982   : > { %5852 = vmatpush1.bf16.msra.mxu0 %v9362_v22  ;;  %5986 = vmatpush1.bf16.msra.mxu1 %v9363_v28  ;;  %v9392_v22 = vld [vmem:[%s13523_s9 + $0x5a0] sm:$0xff]  }
 0x983   : > { %5853 = vmatprep.subr.bf16.mxu0 %v13826_v61  ;;  %5987 = vmatprep.subr.bf16.mxu1 %v13826_v61 }
 0x986   : > { %5854 = vmatpush1.bf16.msra.mxu0 %v9364_v56  ;;  %5988 = vmatpush1.bf16.msra.mxu1 %v9365_v41  ;;  %v9393_v56 = vld [vmem:[%s13523_s9 + $0x5e8] sm:$0xff]   ;;  %v9394_v41 = vld [vmem:[%s13523_s9 + $0x5e0] sm:$0x1f]  }
 0x987   : > { %5855 = vmatprep.subr.bf16.mxu0 %v13826_v61  ;;  %5989 = vmatprep.subr.bf16.mxu1 %v13826_v61 }
 0x98a   : > { %5856 = vmatpush1.bf16.msra.mxu0 %v9366_v10  ;;  %5990 = vmatpush1.bf16.msra.mxu1 %v9367_v53  ;;  %v9395_v53 = vld [vmem:[%s13523_s9 + $0x628] sm:$0x1f]  }
 0x98b   : > { %5857 = vmatprep.subr.bf16.mxu0 %v13826_v61  ;;  %5991 = vmatprep.subr.bf16.mxu1 %v13826_v61 }
 0x98e   : > { %5858 = vmatpush1.bf16.msra.mxu0 %v9368_v58  ;;  %5992 = vmatpush1.bf16.msra.mxu1 %v9369_v43  ;;  %v12957_v58 = vld [vmem:[#allocation2 + $0x26] ss:$8 sm:$0x3]  ;;  %v6115_v43 = vsel %vm2582_vm5, %v9394_v41, 0  ;;  %v9419_v41 = vld [vmem:[%s13523_s9 + $0x730] sm:$0xff]  }
 0x98f   : > { %5859 = vmatprep.subr.bf16.mxu0 %v13826_v61  ;;  %5993 = vmatprep.subr.bf16.mxu1 %v13826_v61 }
 0x991   : > { %v4543_v49 = vpop.f32.mrf.mxu0 }
 0x992   : > { %v4549_v42 = vadd.f32 %v4543_v49, %v12773_v44  ;;  %v4677_v47 = vpop.f32.mrf.mxu1  ;;  %5860 = vmatpush1.bf16.msra.mxu0 %v9370_v9  ;;  %5994 = vmatpush1.bf16.msra.mxu1 %v9371_v38  ;;  %v5769_v44 = vpack.c.bf16 %v5762_v0, %v5762_v0  ;;  %v6030_v9 = vrot.slane %v12866_v23, %v13827_v21  ;;  %v12963_v38 = vld [vmem:[#allocation2 + $0x27] ss:$8 sm:$0x3]  ;;  %v6249_v49 = vsel %vm2582_vm5, %v9395_v53, 0 }
 0x993   : > { %v4545_v14 = vpop.f32.mrf.mxu0  ;;  %5861 = vmatprep.subr.bf16.mxu0 %v13826_v61  ;;  %5995 = vmatprep.subr.bf16.mxu1 %v13826_v61  ;;  %v9404_v23 = vld [vmem:[%s13523_s9 + $0x648] sm:$0xff]  }
 0x994   : > { %v12850_v45 = vadd.f32 %v4677_v47, %v4549_v42  ;;  %v4679_v33 = vpop.f32.mrf.mxu1  ;;  %v6164_v42 = vrot.slane %v12868_v51, %v13827_v21  ;;  %v6302_v47 = vrot.slane %v12957_v58, %v13828_v24  ;;  %v6037_v14 = vpack.c.bf16 %v6030_v9, %v6030_v9  ;;  %v9405_v51 = vld [vmem:[%s13523_s9 + $0x690] sm:$0xff]   ;;  %v9421_v53 = vld [vmem:[%s13523_s9 + $0x728] sm:$0xff]  }
 0x995   : > { %v4546_v15 = vpop.f32.mrf.mxu0  ;;  %v9424_v9 = vld [vmem:[%s13523_s9 + $0x6d0] sm:$0xff]  }
 0x996   : > { %v4680_v5 = vpop.f32.mrf.mxu1  ;;  %5862 = vmatpush1.bf16.msra.mxu0 %v9372_v19  ;;  %5996 = vmatpush1.bf16.msra.mxu1 %v9373_v11  ;;  %v9396_v19 = vld [vmem:[%s13523_s9 + $0x668] sm:$0xff]   ;;  %v6436_v11 = vrot.slane %v12963_v38, %v13828_v24  ;;  %v6171_v33 = vpack.c.bf16 %v6164_v42, %v6164_v42  ;;  %v6306_v15 = vpack.c.bf16 %v6302_v47, %v6302_v47 }
 0x997   : > { %v4547_v26 = vpop.f32.mrf.mxu0  ;;  %5863 = vmatprep.subr.bf16.mxu0 %v13826_v61  ;;  %5997 = vmatprep.subr.bf16.mxu1 %v13826_v61 }
 0x998   : > { %v4681_v1 = vpop.f32.mrf.mxu1  ;;  %v6440_v5 = vpack.c.bf16 %v6436_v11, %v6436_v11  ;;  %v9400_v26 = vld [vmem:[%s13523_s9 + $0x658] sm:$0xff]  }
 0x999   : > { %v9403_v1 = vld [vmem:[%s13523_s9 + $0x698] sm:$0xff]  }
 0x99a   : > { %5864 = vmatpush1.bf16.msra.mxu0 %v9374_v48  ;;  %5998 = vmatpush1.bf16.msra.mxu1 %v9375_v62  ;;  %v9398_v48 = vld [vmem:[%s13523_s9 + $0x660] sm:$0xff]   ;;  %v9399_v62 = vld [vmem:[%s13523_s9 + $0x6a8] sm:$0xff]  }
 0x99b   : > { %5879 = vmatprep.subr.bf16.mxu0 %v13826_v61  ;;  %6013 = vmatprep.subr.bf16.mxu1 %v13826_v61 }
 0x99e   : > { %5880 = vmatpush2.bf16.msra.mxu0 %v5847_v6  ;;  %6014 = vmatpush2.bf16.msra.mxu1 %v5981_v39  ;;  %v9406_v6 = vld [vmem:[%s13523_s9 + $0x640] sm:$0xff]   ;;  %v9407_v39 = vld [vmem:[%s13523_s9 + $0x688] sm:$0xff]  }
 0x99f   : > { %6117 = vmatprep.subr.bf16.mxu0 %v13826_v61  ;;  %6251 = vmatprep.subr.bf16.mxu1 %v13826_v61 }
 0x9a1   : > { %5882 = vmatmul.mubr.bf16.vlgmr.msra.gmra.mxu0 %v5769_v44  ;;  %6016 = vmatmul.mubr.bf16.vlgmr.msra.gmra.mxu1 %v5903_v35  ;;  %v9409_v44 = vld [vmem:[%s13523_s9 + $0x680] sm:$0xff]  }
 0x9a2   : > { %6118 = vmatpush1.bf16.msra.mxu0 %v9378_v17  ;;  %8543 = vmatprep.mubr.msk.bf16.mxu0 %vm3337_vm7, %v6038_v25 }
 0x9a3   : > { %6252 = vmatpush1.bf16.msra.mxu1 %v9379_v3  ;;  %8571 = vmatprep.mubr.msk.bf16.mxu1 %vm3337_vm7, %v6172_v50 }
 0x9a4   : > { %6119 = vmatprep.subr.bf16.mxu0 %v13826_v61  ;;  %6253 = vmatprep.subr.bf16.mxu1 %v13826_v61 }
 0x9a6   : > { %6120 = vmatpush1.bf16.msra.mxu0 %v9380_v29  ;;  %v9410_v29 = vld [vmem:[%s13523_s9 + $0x630] sm:$0xff]  }
 0x9a7   : > { %6254 = vmatpush1.bf16.msra.mxu1 %v9381_v7  ;;  %6121 = vmatprep.subr.bf16.mxu0 %v13826_v61 }
 0x9a8   : > { %6255 = vmatprep.subr.bf16.mxu1 %v13826_v61 }
 0x9aa   : > { %6122 = vmatpush1.bf16.msra.mxu0 %v9382_v46  ;;  %v9411_v46 = vld [vmem:[%s13523_s9 + $0x678] sm:$0xff]  }
 0x9ab   : > { %6256 = vmatpush1.bf16.msra.mxu1 %v9383_v52  ;;  %6123 = vmatprep.subr.bf16.mxu0 %v13826_v61  ;;  %v9412_v52 = vld [vmem:[%s13523_s9 + $0x670] sm:$0x1f]  }
 0x9ac   : > { %6257 = vmatprep.subr.bf16.mxu1 %v13826_v61 }
 0x9ae   : > { %6124 = vmatpush1.bf16.msra.mxu0 %v9384_v2 }
 0x9af   : > { %6258 = vmatpush1.bf16.msra.mxu1 %v9385_v27  ;;  %6125 = vmatprep.subr.bf16.mxu0 %v13826_v61  ;;  %v9413_v27 = vld [vmem:[%s13523_s9 + $0x6b8] sm:$0x1f]  }
 0x9b0   : > { %6259 = vmatprep.subr.bf16.mxu1 %v13826_v61 }
 0x9b2   : > { %6126 = vmatpush1.bf16.msra.mxu0 %v9386_v60  ;;  %v13048_v60 = vld [vmem:[#allocation2 + $0x30] ss:$8 sm:$0x3] }
 0x9b3   : > { %6260 = vmatpush1.bf16.msra.mxu1 %v9387_v20  ;;  %6127 = vmatprep.subr.bf16.mxu0 %v13826_v61  ;;  %v6383_v20 = vsel %vm2582_vm5, %v9412_v52, 0  ;;  %v9437_v52 = vld [vmem:[%s13523_s9 + $0x7c0] sm:$0xff]  }
 0x9b4   : > { %6261 = vmatprep.subr.bf16.mxu1 %v13826_v61 }
 0x9b5   : > { %v4811_v40 = vpop.f32.mrf.mxu0 }
 0x9b6   : > { %v4817_v55 = vadd.f32 %v4811_v40, %v12850_v45  ;;  %v4945_v31 = vpop.f32.mrf.mxu1  ;;  %6128 = vmatpush1.bf16.msra.mxu0 %v9388_v8  ;;  %v9397_v45 = vld [vmem:[%s13523_s9 + $0x6b0] sm:$0xff]   ;;  %v6298_v8 = vrot.slane %v12957_v58, %v13827_v21  ;;  %v6517_v40 = vsel %vm2582_vm5, %v9413_v27, 0  ;;  %v9422_v58 = vld [vmem:[%s13523_s9 + $0x6d8] sm:$0xff]  }
 0x9b7   : > { %6262 = vmatpush1.bf16.msra.mxu1 %v9389_v36  ;;  %v4813_v37 = vpop.f32.mrf.mxu0  ;;  %6129 = vmatprep.subr.bf16.mxu0 %v13826_v61  ;;  %v13054_v36 = vld [vmem:[#allocation2 + $0x31] ss:$8 sm:$0x3] }
 0x9b8   : > { %v12940_v16 = vadd.f32 %v4945_v31, %v4817_v55  ;;  %v4947_v59 = vpop.f32.mrf.mxu1  ;;  %6263 = vmatprep.subr.bf16.mxu1 %v13826_v61  ;;  %v6432_v55 = vrot.slane %v12963_v38, %v13827_v21  ;;  %v6570_v31 = vrot.slane %v13048_v60, %v13828_v24  ;;  %v6704_v37 = vrot.slane %v13054_v36, %v13828_v24  ;;  %v9425_v38 = vld [vmem:[%s13523_s9 + $0x718] sm:$0xff]  }
 0x9b9   : > { %v4814_v30 = vpop.f32.mrf.mxu0  ;;  %v9439_v27 = vld [vmem:[%s13523_s9 + $0x7b8] sm:$0xff]  }
 0x9ba   : > { %v4948_v12 = vpop.f32.mrf.mxu1  ;;  %6130 = vmatpush1.bf16.msra.mxu0 %v9390_v34  ;;  %v9414_v34 = vld [vmem:[%s13523_s9 + $0x6f8] sm:$0xff]   ;;  %v6439_v59 = vpack.c.bf16 %v6432_v55, %v6432_v55  ;;  %v6574_v30 = vpack.c.bf16 %v6570_v31, %v6570_v31  ;;  %v9445_v55 = vld [vmem:[%s13523_s9 + $0x7a0] sm:$0xff]   ;;  %v9446_v31 = vld [vmem:[%s13523_s9 + $0x750] sm:$0xff]  }
 0x9bb   : > { %6264 = vmatpush1.bf16.msra.mxu1 %v9391_v63  ;;  %v4815_v28 = vpop.f32.mrf.mxu0  ;;  %6131 = vmatprep.subr.bf16.mxu0 %v13826_v61  ;;  %v6305_v63 = vpack.c.bf16 %v6298_v8, %v6298_v8  ;;  %v6708_v12 = vpack.c.bf16 %v6704_v37, %v6704_v37  ;;  %v9442_v8 = vld [vmem:[%s13523_s9 + $0x760] sm:$0xff]   ;;  %v9448_v37 = vld [vmem:[%s13523_s9 + $0x790] sm:$0x1f]  }
 0x9bc   : > { %v4949_v10 = vpop.f32.mrf.mxu1  ;;  %6265 = vmatprep.subr.bf16.mxu1 %v13826_v61  ;;  %v9417_v28 = vld [vmem:[%s13523_s9 + $0x738] sm:$0xff]  }
 0x9bd   : > { %v9420_v10 = vld [vmem:[%s13523_s9 + $0x6e0] sm:$0xff]  }
 0x9be   : > { %6132 = vmatpush1.bf16.msra.mxu0 %v9392_v22  ;;  %v9416_v22 = vld [vmem:[%s13523_s9 + $0x6f0] sm:$0xff]  }
 0x9bf   : > { %6266 = vmatpush1.bf16.msra.mxu1 %v9393_v56  ;;  %6147 = vmatprep.subr.bf16.mxu0 %v13826_v61  ;;  %v9418_v56 = vld [vmem:[%s13523_s9 + $0x6e8] sm:$0xff]  }
 0x9c0   : > { %6281 = vmatprep.subr.bf16.mxu1 %v13826_v61 }
 0x9c2   : > { %6148 = vmatpush2.bf16.msra.mxu0 %v6115_v43  ;;  %v9423_v43 = vld [vmem:[%s13523_s9 + $0x720] sm:$0xff]  }
 0x9c3   : > { %6282 = vmatpush2.bf16.msra.mxu1 %v6249_v49  ;;  %6385 = vmatprep.subr.bf16.mxu0 %v13826_v61 }
 0x9c4   : > { %6519 = vmatprep.subr.bf16.mxu1 %v13826_v61 }
 0x9c5   : > { %6150 = vmatmul.mubr.bf16.vlgmr.msra.gmra.mxu0 %v6037_v14  ;;  %v9427_v14 = vld [vmem:[%s13523_s9 + $0x710] sm:$0xff]  }
 0x9c6   : > { %6284 = vmatmul.mubr.bf16.vlgmr.msra.gmra.mxu1 %v6171_v33  ;;  %6386 = vmatpush1.bf16.msra.mxu0 %v9396_v19  ;;  %v9426_v19 = vld [vmem:[%s13523_s9 + $0x6c8] sm:$0xff]  }
 0x9c7   : > { %8599 = vmatprep.mubr.msk.bf16.mxu0 %vm3337_vm7, %v6306_v15  ;;  %6520 = vmatpush1.bf16.msra.mxu1 %v9397_v45 }
 0x9c8   : > { %8627 = vmatprep.mubr.msk.bf16.mxu1 %vm3337_vm7, %v6440_v5  ;;  %6387 = vmatprep.subr.bf16.mxu0 %v13826_v61 }
 0x9c9   : > { %6521 = vmatprep.subr.bf16.mxu1 %v13826_v61 }
 0x9ca   : > { %6388 = vmatpush1.bf16.msra.mxu0 %v9398_v48  ;;  %v9428_v48 = vld [vmem:[%s13523_s9 + $0x6c0] sm:$0xff]  }
 0x9cb   : > { %6522 = vmatpush1.bf16.msra.mxu1 %v9399_v62  ;;  %6389 = vmatprep.subr.bf16.mxu0 %v13826_v61 }
 0x9cc   : > { %6523 = vmatprep.subr.bf16.mxu1 %v13826_v61 }
 0x9ce   : > { %6390 = vmatpush1.bf16.msra.mxu0 %v9400_v26  ;;  %v9429_v26 = vld [vmem:[%s13523_s9 + $0x708] sm:$0xff]  }
 0x9cf   : > { %6524 = vmatpush1.bf16.msra.mxu1 %v9401_v32  ;;  %6391 = vmatprep.subr.bf16.mxu0 %v13826_v61  ;;  %v9430_v32 = vld [vmem:[%s13523_s9 + $0x700] sm:$0x1f]  }
 0x9d0   : > { %6525 = vmatprep.subr.bf16.mxu1 %v13826_v61 }
 0x9d2   : > { %6392 = vmatpush1.bf16.msra.mxu0 %v9402_v4 }
 0x9d3   : > { %6526 = vmatpush1.bf16.msra.mxu1 %v9403_v1  ;;  %6393 = vmatprep.subr.bf16.mxu0 %v13826_v61  ;;  %v9431_v1 = vld [vmem:[%s13523_s9 + $0x748] sm:$0x1f]  }
 0x9d4   : > { %6527 = vmatprep.subr.bf16.mxu1 %v13826_v61 }
 0x9d6   : > { %6394 = vmatpush1.bf16.msra.mxu0 %v9404_v23  ;;  %v13139_v23 = vld [vmem:[#allocation2 + $0x32] ss:$8 sm:$0x3] }
 0x9d7   : > { %6528 = vmatpush1.bf16.msra.mxu1 %v9405_v51  ;;  %6395 = vmatprep.subr.bf16.mxu0 %v13826_v61  ;;  %v6651_v51 = vsel %vm2582_vm5, %v9430_v32, 0  ;;  %v9459_v32 = vld [vmem:[%s13523_s9 + $0x840] sm:$0xff]  }
 0x9d8   : > { %6529 = vmatprep.subr.bf16.mxu1 %v13826_v61 }
 0x9d9   : > { %v5079_v0 = vpop.f32.mrf.mxu0 }
 0x9da   : > { %v5085_v13 = vadd.f32 %v5079_v0, %v12940_v16  ;;  %v5213_v54 = vpop.f32.mrf.mxu1  ;;  %6396 = vmatpush1.bf16.msra.mxu0 %v9406_v6  ;;  %v9415_v16 = vld [vmem:[%s13523_s9 + $0x740] sm:$0xff]   ;;  %v6566_v6 = vrot.slane %v13048_v60, %v13827_v21  ;;  %v6785_v0 = vsel %vm2582_vm5, %v9431_v1, 0  ;;  %v9440_v60 = vld [vmem:[%s13523_s9 + $0x768] sm:$0xff]  }
 0x9db   : > { %6530 = vmatpush1.bf16.msra.mxu1 %v9407_v39  ;;  %v5081_v17 = vpop.f32.mrf.mxu0  ;;  %6397 = vmatprep.subr.bf16.mxu0 %v13826_v61  ;;  %v13145_v39 = vld [vmem:[#allocation2 + $0x33] ss:$8 sm:$0x3] }
 0x9dc   : > { %v13031_v35 = vadd.f32 %v5213_v54, %v5085_v13  ;;  %v5215_v3 = vpop.f32.mrf.mxu1  ;;  %6531 = vmatprep.subr.bf16.mxu1 %v13826_v61  ;;  %v6700_v13 = vrot.slane %v13054_v36, %v13827_v21  ;;  %v6838_v54 = vrot.slane %v13139_v23, %v13828_v24  ;;  %v6972_v17 = vrot.slane %v13145_v39, %v13828_v24  ;;  %v9443_v36 = vld [vmem:[%s13523_s9 + $0x7a8] sm:$0xff]  }
 0x9dd   : > { %v5082_v25 = vpop.f32.mrf.mxu0 }
 0x9de   : > { %v5216_v50 = vpop.f32.mrf.mxu1  ;;  %6398 = vmatpush1.bf16.msra.mxu0 %v9408_v57  ;;  %v9432_v57 = vld [vmem:[%s13523_s9 + $0x788] sm:$0xff]   ;;  %v6707_v3 = vpack.c.bf16 %v6700_v13, %v6700_v13  ;;  %v6842_v25 = vpack.c.bf16 %v6838_v54, %v6838_v54  ;;  %v9463_v13 = vld [vmem:[%s13523_s9 + $0x830] sm:$0xff]   ;;  %v9464_v54 = vld [vmem:[%s13523_s9 + $0x7e0] sm:$0xff]  }
 0x9df   : > { %6532 = vmatpush1.bf16.msra.mxu1 %v9409_v44  ;;  %v5083_v7 = vpop.f32.mrf.mxu0  ;;  %6399 = vmatprep.subr.bf16.mxu0 %v13826_v61  ;;  %v6573_v44 = vpack.c.bf16 %v6566_v6, %v6566_v6  ;;  %v6976_v50 = vpack.c.bf16 %v6972_v17, %v6972_v17  ;;  %v9466_v17 = vld [vmem:[%s13523_s9 + $0x820] sm:$0x1f]  }
 0x9e0   : > { %v5217_v2 = vpop.f32.mrf.mxu1  ;;  %6533 = vmatprep.subr.bf16.mxu1 %v13826_v61  ;;  %v9435_v7 = vld [vmem:[%s13523_s9 + $0x7c8] sm:$0xff]  }
 0x9e1   : > { %v9438_v2 = vld [vmem:[%s13523_s9 + $0x770] sm:$0xff]  }
 0x9e2   : > { %6400 = vmatpush1.bf16.msra.mxu0 %v9410_v29  ;;  %v9434_v29 = vld [vmem:[%s13523_s9 + $0x780] sm:$0xff]  }
 0x9e3   : > { %6534 = vmatpush1.bf16.msra.mxu1 %v9411_v46  ;;  %6415 = vmatprep.subr.bf16.mxu0 %v13826_v61  ;;  %v9436_v46 = vld [vmem:[%s13523_s9 + $0x778] sm:$0xff]  }
 0x9e4   : > { %6549 = vmatprep.subr.bf16.mxu1 %v13826_v61 }
 0x9e6   : > { %6416 = vmatpush2.bf16.msra.mxu0 %v6383_v20  ;;  %v9441_v20 = vld [vmem:[%s13523_s9 + $0x7b0] sm:$0xff]  }
 0x9e7   : > { %6550 = vmatpush2.bf16.msra.mxu1 %v6517_v40  ;;  %6653 = vmatprep.subr.bf16.mxu0 %v13826_v61  ;;  %v9444_v40 = vld [vmem:[%s13523_s9 + $0x758] sm:$0xff]  }
 0x9e8   : > { %6787 = vmatprep.subr.bf16.mxu1 %v13826_v61 }
 0x9e9   : > { %6418 = vmatmul.mubr.bf16.vlgmr.msra.gmra.mxu0 %v6305_v63  ;;  %v9449_v63 = vld [vmem:[%s13523_s9 + $0x7d8] sm:$0x1f]  }
 0x9ea   : > { %6552 = vmatmul.mubr.bf16.vlgmr.msra.gmra.mxu1 %v6439_v59  ;;  %6654 = vmatpush1.bf16.msra.mxu0 %v9414_v34  ;;  %v9447_v34 = vld [vmem:[%s13523_s9 + $0x798] sm:$0xff]   ;;  %v6919_v59 = vsel %vm2582_vm5, %v9448_v37, 0  ;;  %v9474_v37 = vld [vmem:[%s13523_s9 + $0x890] sm:$0xff]  }
 0x9eb   : > { %8655 = vmatprep.mubr.msk.bf16.mxu0 %vm3337_vm7, %v6574_v30  ;;  %6788 = vmatpush1.bf16.msra.mxu1 %v9415_v16  ;;  %v13227_v16 = vld [vmem:[#allocation2 + $0x34] ss:$8 sm:$0x3]  ;;  %v6834_v30 = vrot.slane %v13139_v23, %v13827_v21 }
 0x9ec   : > { %8683 = vmatprep.mubr.msk.bf16.mxu1 %vm3337_vm7, %v6708_v12  ;;  %6655 = vmatprep.subr.bf16.mxu0 %v13826_v61  ;;  %v13233_v12 = vld [vmem:[#allocation2 + $0x35] ss:$8 sm:$0x3] }
 0x9ed   : > { %6789 = vmatprep.subr.bf16.mxu1 %v13826_v61  ;;  %v9460_v23 = vld [vmem:[%s13523_s9 + $0x7f0] sm:$0xff]  }
 0x9ee   : > { %6656 = vmatpush1.bf16.msra.mxu0 %v9416_v22  ;;  %v7053_v22 = vsel %vm2582_vm5, %v9449_v63, 0  ;;  %v9475_v63 = vld [vmem:[%s13523_s9 + $0x8d8] sm:$0xff]  }
 0x9ef   : > { %6790 = vmatpush1.bf16.msra.mxu1 %v9417_v28  ;;  %6657 = vmatprep.subr.bf16.mxu0 %v13826_v61  ;;  %v6968_v28 = vrot.slane %v13145_v39, %v13827_v21  ;;  %v9461_v39 = vld [vmem:[%s13523_s9 + $0x838] sm:$0xff]  }
 0x9f0   : > { %6791 = vmatprep.subr.bf16.mxu1 %v13826_v61 }
 0x9f2   : > { %6658 = vmatpush1.bf16.msra.mxu0 %v9418_v56  ;;  %v7106_v56 = vrot.slane %v13227_v16, %v13828_v24 }
 0x9f3   : > { %6792 = vmatpush1.bf16.msra.mxu1 %v9419_v41  ;;  %6659 = vmatprep.subr.bf16.mxu0 %v13826_v61  ;;  %v9450_v41 = vld [vmem:[%s13523_s9 + $0x818] sm:$0xff]  }
 0x9f4   : > { %6793 = vmatprep.subr.bf16.mxu1 %v13826_v61 }
 0x9f6   : > { %6660 = vmatpush1.bf16.msra.mxu0 %v9420_v10  ;;  %v7240_v10 = vrot.slane %v13233_v12, %v13828_v24 }
 0x9f7   : > { %6794 = vmatpush1.bf16.msra.mxu1 %v9421_v53  ;;  %6661 = vmatprep.subr.bf16.mxu0 %v13826_v61  ;;  %v6841_v53 = vpack.c.bf16 %v6834_v30, %v6834_v30 }
 0x9f8   : > { %6795 = vmatprep.subr.bf16.mxu1 %v13826_v61 }
 0x9fa   : > { %6662 = vmatpush1.bf16.msra.mxu0 %v9422_v58  ;;  %v9451_v58 = vld [vmem:[%s13523_s9 + $0x860] sm:$0xff]  }
 0x9fb   : > { %6796 = vmatpush1.bf16.msra.mxu1 %v9423_v43  ;;  %6663 = vmatprep.subr.bf16.mxu0 %v13826_v61  ;;  %v6975_v43 = vpack.c.bf16 %v6968_v28, %v6968_v28 }
 0x9fc   : > { %6797 = vmatprep.subr.bf16.mxu1 %v13826_v61 }
 0x9fd   : > { %v5347_v49 = vpop.f32.mrf.mxu0 }
 0x9fe   : > { %v5353_v42 = vadd.f32 %v5347_v49, %v13031_v35  ;;  %v5481_v47 = vpop.f32.mrf.mxu1  ;;  %6664 = vmatpush1.bf16.msra.mxu0 %v9424_v9  ;;  %v9433_v35 = vld [vmem:[%s13523_s9 + $0x7d0] sm:$0xff]   ;;  %v7110_v9 = vpack.c.bf16 %v7106_v56, %v7106_v56 }
 0x9ff   : > { %6798 = vmatpush1.bf16.msra.mxu1 %v9425_v38  ;;  %v5349_v11 = vpop.f32.mrf.mxu0  ;;  %6665 = vmatprep.subr.bf16.mxu0 %v13826_v61  ;;  %v7244_v38 = vpack.c.bf16 %v7240_v10, %v7240_v10  ;;  %v9452_v49 = vld [vmem:[%s13523_s9 + $0x810] sm:$0xff]  }
 0xa00   : > { %v13122_v45 = vadd.f32 %v5481_v47, %v5353_v42  ;;  %v5483_v33 = vpop.f32.mrf.mxu1  ;;  %6799 = vmatprep.subr.bf16.mxu1 %v13826_v61  ;;  %v9453_v42 = vld [vmem:[%s13523_s9 + $0x858] sm:$0xff]   ;;  %v9454_v47 = vld [vmem:[%s13523_s9 + $0x808] sm:$0xff]   ;;  %v9456_v11 = vld [vmem:[%s13523_s9 + $0x800] sm:$0xff]  }
 0xa01   : > { %v5350_v15 = vpop.f32.mrf.mxu0  ;;  %v9477_v56 = vld [vmem:[%s13523_s9 + $0x8d0] sm:$0xff]  }
 0xa02   : > { %v5484_v5 = vpop.f32.mrf.mxu1  ;;  %6666 = vmatpush1.bf16.msra.mxu0 %v9426_v19  ;;  %v9455_v19 = vld [vmem:[%s13523_s9 + $0x850] sm:$0xff]  }
 0xa03   : > { %6800 = vmatpush1.bf16.msra.mxu1 %v9427_v14  ;;  %v5351_v62 = vpop.f32.mrf.mxu0  ;;  %6667 = vmatprep.subr.bf16.mxu0 %v13826_v61  ;;  %v9457_v14 = vld [vmem:[%s13523_s9 + $0x848] sm:$0xff]  }
 0xa04   : > { %v5485_v4 = vpop.f32.mrf.mxu1  ;;  %6801 = vmatprep.subr.bf16.mxu1 %v13826_v61 }
 0xa06   : > { %6668 = vmatpush1.bf16.msra.mxu0 %v9428_v48  ;;  %v9458_v48 = vld [vmem:[%s13523_s9 + $0x7f8] sm:$0xff]  }
 0xa07   : > { %6802 = vmatpush1.bf16.msra.mxu1 %v9429_v26  ;;  %6683 = vmatprep.subr.bf16.mxu0 %v13826_v61 }
 0xa08   : > { %6817 = vmatprep.subr.bf16.mxu1 %v13826_v61 }
 0xa0a   : > { %6684 = vmatpush2.bf16.msra.mxu0 %v6651_v51 }
 0xa0b   : > { %6818 = vmatpush2.bf16.msra.mxu1 %v6785_v0  ;;  %6921 = vmatprep.subr.bf16.mxu0 %v13826_v61  ;;  %v9462_v0 = vld [vmem:[%s13523_s9 + $0x7e8] sm:$0xff]  }
 0xa0c   : > { %7055 = vmatprep.subr.bf16.mxu1 %v13826_v61 }
 0xa0d   : > { %6686 = vmatmul.mubr.bf16.vlgmr.msra.gmra.mxu0 %v6573_v44  ;;  %v9467_v44 = vld [vmem:[%s13523_s9 + $0x868] sm:$0x1f]  }
 0xa0e   : > { %6820 = vmatmul.mubr.bf16.vlgmr.msra.gmra.mxu1 %v6707_v3  ;;  %6922 = vmatpush1.bf16.msra.mxu0 %v9432_v57  ;;  %v9465_v57 = vld [vmem:[%s13523_s9 + $0x828] sm:$0xff]   ;;  %v7187_v3 = vsel %vm2582_vm5, %v9466_v17, 0 }
 0xa0f   : > { %8711 = vmatprep.mubr.msk.bf16.mxu0 %vm3337_vm7, %v6842_v25  ;;  %7056 = vmatpush1.bf16.msra.mxu1 %v9433_v35  ;;  %v13318_v35 = vld [vmem:[#allocation2 + $0x36] ss:$8 sm:$0x3]  ;;  %v7102_v25 = vrot.slane %v13227_v16, %v13827_v21 }
 0xa10   : > { %8739 = vmatprep.mubr.msk.bf16.mxu1 %vm3337_vm7, %v6976_v50  ;;  %6923 = vmatprep.subr.bf16.mxu0 %v13826_v61  ;;  %v13324_v50 = vld [vmem:[#allocation2 + $0x37] ss:$8 sm:$0x3] }
 0xa11   : > { %7057 = vmatprep.subr.bf16.mxu1 %v13826_v61 }
 0xa12   : > { %6924 = vmatpush1.bf16.msra.mxu0 %v9434_v29  ;;  %v7321_v29 = vsel %vm2582_vm5, %v9467_v44, 0 }
 0xa13   : > { %7058 = vmatpush1.bf16.msra.mxu1 %v9435_v7  ;;  %6925 = vmatprep.subr.bf16.mxu0 %v13826_v61  ;;  %v7236_v7 = vrot.slane %v13233_v12, %v13827_v21  ;;  %v9476_v12 = vld [vmem:[%s13523_s9 + $0x888] sm:$0xff]  }
 0xa14   : > { %7059 = vmatprep.subr.bf16.mxu1 %v13826_v61 }
 0xa16   : > { %6926 = vmatpush1.bf16.msra.mxu0 %v9436_v46  ;;  %v7374_v46 = vrot.slane %v13318_v35, %v13828_v24 }
 0xa17   : > { %7060 = vmatpush1.bf16.msra.mxu1 %v9437_v52  ;;  %6927 = vmatprep.subr.bf16.mxu0 %v13826_v61  ;;  %v9468_v52 = vld [vmem:[%s13523_s9 + $0x8a8] sm:$0xff]  }
 0xa18   : > { %7061 = vmatprep.subr.bf16.mxu1 %v13826_v61 }
 0xa1a   : > { %6928 = vmatpush1.bf16.msra.mxu0 %v9438_v2  ;;  %v7508_v2 = vrot.slane %v13324_v50, %v13828_v24 }
 0xa1b   : > { %7062 = vmatpush1.bf16.msra.mxu1 %v9439_v27  ;;  %6929 = vmatprep.subr.bf16.mxu0 %v13826_v61  ;;  %v7109_v27 = vpack.c.bf16 %v7102_v25, %v7102_v25 }
 0xa1c   : > { %7063 = vmatprep.subr.bf16.mxu1 %v13826_v61 }
 0xa1e   : > { %6930 = vmatpush1.bf16.msra.mxu0 %v9440_v60  ;;  %v9469_v60 = vld [vmem:[%s13523_s9 + $0x8f0] sm:$0xff]  }
 0xa1f   : > { %7064 = vmatpush1.bf16.msra.mxu1 %v9441_v20  ;;  %6931 = vmatprep.subr.bf16.mxu0 %v13826_v61  ;;  %v7243_v20 = vpack.c.bf16 %v7236_v7, %v7236_v7 }
 0xa20   : > { %7065 = vmatprep.subr.bf16.mxu1 %v13826_v61 }
 0xa22   : > { %6932 = vmatpush1.bf16.msra.mxu0 %v9442_v8  ;;  %v7378_v8 = vpack.c.bf16 %v7374_v46, %v7374_v46 }
 0xa23   : > { %7066 = vmatpush1.bf16.msra.mxu1 %v9443_v36  ;;  %6933 = vmatprep.subr.bf16.mxu0 %v13826_v61  ;;  %v7512_v36 = vpack.c.bf16 %v7508_v2, %v7508_v2  ;;  %v9489_v2 = vld [vmem:[%s13524_s10] sm:$0xff]  }
 0xa24   : > { %7067 = vmatprep.subr.bf16.mxu1 %v13826_v61 }
 0xa26   : > { %6934 = vmatpush1.bf16.msra.mxu0 %v9444_v40  ;;  %v9470_v40 = vld [vmem:[%s13523_s9 + $0x8a0] sm:$0xff]  }
 0xa27   : > { %7068 = vmatpush1.bf16.msra.mxu1 %v9445_v55  ;;  %6935 = vmatprep.subr.bf16.mxu0 %v13826_v61  ;;  %v9471_v55 = vld [vmem:[%s13523_s9 + $0x8e8] sm:$0xff]  }
 0xa28   : > { %7069 = vmatprep.subr.bf16.mxu1 %v13826_v61 }
 0xa2a   : > { %6936 = vmatpush1.bf16.msra.mxu0 %v9446_v31  ;;  %v9472_v31 = vld [vmem:[%s13523_s9 + $0x898] sm:$0xff]  }
 0xa2b   : > { %7070 = vmatpush1.bf16.msra.mxu1 %v9447_v34  ;;  %6951 = vmatprep.subr.bf16.mxu0 %v13826_v61  ;;  %v9473_v34 = vld [vmem:[%s13523_s9 + $0x8e0] sm:$0xff]  }
 0xa2c   : > { %7085 = vmatprep.subr.bf16.mxu1 %v13826_v61 }
 0xa2e   : > { %6952 = vmatpush2.bf16.msra.mxu0 %v6919_v59 }
 0xa2f   : > { %7086 = vmatpush2.bf16.msra.mxu1 %v7053_v22  ;;  %7189 = vmatprep.subr.bf16.mxu0 %v13826_v61 }
 0xa30   : > { %7323 = vmatprep.subr.bf16.mxu1 %v13826_v61 }
 0xa31   : > { %6954 = vmatmul.mubr.bf16.vlgmr.msra.gmra.mxu0 %v6841_v53 }
 0xa32   : > { %7088 = vmatmul.mubr.bf16.vlgmr.msra.gmra.mxu1 %v6975_v43  ;;  %7190 = vmatpush1.bf16.msra.mxu0 %v9450_v41 }
 0xa33   : > { %8767 = vmatprep.mubr.msk.bf16.mxu0 %vm3337_vm7, %v7110_v9  ;;  %7324 = vmatpush1.bf16.msra.mxu1 %v9451_v58  ;;  %v9478_v58 = vld [vmem:[%s13523_s9 + $0x880] sm:$0xff]  }
 0xa34   : > { %8795 = vmatprep.mubr.msk.bf16.mxu1 %vm3337_vm7, %v7244_v38  ;;  %7191 = vmatprep.subr.bf16.mxu0 %v13826_v61  ;;  %v9479_v38 = vld [vmem:[%s13523_s9 + $0x8c8] sm:$0xff]  }
 0xa35   : > { %7325 = vmatprep.subr.bf16.mxu1 %v13826_v61 }
 0xa36   : > { %7192 = vmatpush1.bf16.msra.mxu0 %v9452_v49  ;;  %v9480_v49 = vld [vmem:[%s13523_s9 + $0x878] sm:$0xff]  }
 0xa37   : > { %7326 = vmatpush1.bf16.msra.mxu1 %v9453_v42  ;;  %7193 = vmatprep.subr.bf16.mxu0 %v13826_v61  ;;  %v9481_v42 = vld [vmem:[%s13523_s9 + $0x8c0] sm:$0xff]  }
 0xa38   : > { %7327 = vmatprep.subr.bf16.mxu1 %v13826_v61 }
 0xa3a   : > { %7194 = vmatpush1.bf16.msra.mxu0 %v9454_v47  ;;  %v9482_v47 = vld [vmem:[%s13523_s9 + $0x870] sm:$0xff]  }
 0xa3b   : > { %7328 = vmatpush1.bf16.msra.mxu1 %v9455_v19  ;;  %7195 = vmatprep.subr.bf16.mxu0 %v13826_v61  ;;  %v9483_v19 = vld [vmem:[%s13523_s9 + $0x8b8] sm:$0xff]  }
 0xa3c   : > { %7329 = vmatprep.subr.bf16.mxu1 %v13826_v61 }
 0xa3d   : > { %v5615_v33 = vpop.f32.mrf.mxu0  ;;  %v5749_v15 = vpop.f32.mrf.mxu1 }
 0xa3e   : > { %v5621_v5 = vadd.f32 %v5615_v33, %v13122_v45  ;;  %7196 = vmatpush1.bf16.msra.mxu0 %v9456_v11  ;;  %v9484_v11 = vld [vmem:[%s13523_s9 + $0x8b0] sm:$0x1f]  }
 0xa3f   : > { %7330 = vmatpush1.bf16.msra.mxu1 %v9457_v14  ;;  %v5617_v62 = vpop.f32.mrf.mxu0  ;;  %v5751_v26 = vpop.f32.mrf.mxu1  ;;  %7197 = vmatprep.subr.bf16.mxu0 %v13826_v61  ;;  %v9485_v14 = vld [vmem:[%s13523_s9 + $0x8f8] sm:$0x1f]   ;;  %v7455_v33 = vsel %vm2582_vm5, %v9484_v11, 0 }
 0xa40   : > { %v13285_v4 = vadd.f32 %v5749_v15, %v5621_v5  ;;  %7331 = vmatprep.subr.bf16.mxu1 %v13826_v61  ;;  %v7370_v15 = vrot.slane %v13318_v35, %v13827_v21  ;;  %v7504_v5 = vrot.slane %v13324_v50, %v13827_v21 }
 0xa41   : > { %v5618_v1 = vpop.f32.mrf.mxu0  ;;  %v5752_v45 = vpop.f32.mrf.mxu1 }
 0xa42   : > { %7198 = vmatpush1.bf16.msra.mxu0 %v9458_v48  ;;  %v7589_v48 = vsel %vm2582_vm5, %v9485_v14, 0  ;;  %v7377_v62 = vpack.c.bf16 %v7370_v15, %v7370_v15  ;;  %v7511_v26 = vpack.c.bf16 %v7504_v5, %v7504_v5  ;;  %vm9582_vm5 = vmmov 0  }
 0xa43   : > { %7332 = vmatpush1.bf16.msra.mxu1 %v9459_v32  ;;  %v5619_v51 = vpop.f32.mrf.mxu0  ;;  %v5753_v6 = vpop.f32.mrf.mxu1  ;;  %7199 = vmatprep.subr.bf16.mxu0 %v13826_v61 }
 0xa44   : > { %7333 = vmatprep.subr.bf16.mxu1 %v13826_v61 }
 0xa46   : > { %7200 = vmatpush1.bf16.msra.mxu0 %v9460_v23 }
 0xa47   : > { %7334 = vmatpush1.bf16.msra.mxu1 %v9461_v39  ;;  %7201 = vmatprep.subr.bf16.mxu0 %v13826_v61 }
 0xa48   : > { %7335 = vmatprep.subr.bf16.mxu1 %v13826_v61 }
 0xa4a   : > { %7202 = vmatpush1.bf16.msra.mxu0 %v9462_v0 }
 0xa4b   : > { %7336 = vmatpush1.bf16.msra.mxu1 %v9463_v13  ;;  %7203 = vmatprep.subr.bf16.mxu0 %v13826_v61  ;;  %v9486_v13 = vld [vmem:[%s13524_s10 + $0x18] sm:$0xff]  }
 0xa4c   : > { %7337 = vmatprep.subr.bf16.mxu1 %v13826_v61 }
 0xa4e   : > { %7204 = vmatpush1.bf16.msra.mxu0 %v9464_v54  ;;  %v9487_v54 = vld [vmem:[%s13524_s10 + $0x10] sm:$0xff]  }
 0xa4f   : > { %7338 = vmatpush1.bf16.msra.mxu1 %v9465_v57  ;;  %7219 = vmatprep.subr.bf16.mxu0 %v13826_v61 }
 0xa50   : > { %7353 = vmatprep.subr.bf16.mxu1 %v13826_v61 }
 0xa52   : > { %7220 = vmatpush2.bf16.msra.mxu0 %v7187_v3 }
 0xa53   : > { %7354 = vmatpush2.bf16.msra.mxu1 %v7321_v29  ;;  %7457 = vmatprep.subr.bf16.mxu0 %v13826_v61 }
 0xa54   : > { %7591 = vmatprep.subr.bf16.mxu1 %v13826_v61 }
 0xa55   : > { %7222 = vmatmul.mubr.bf16.vlgmr.msra.gmra.mxu0 %v7109_v27  ;;  %v9504_v27 = vld [vmem:[%s13526_s12] sm:$0x7] }
 0xa56   : > { %7356 = vmatmul.mubr.bf16.vlgmr.msra.gmra.mxu1 %v7243_v20  ;;  %7458 = vmatpush1.bf16.msra.mxu0 %v9468_v52  ;;  %v9488_v52 = vld [vmem:[%s13524_s10 + $0x8] sm:$0xff]   ;;  %v7676_v20 = vrot.slane %v9504_v27, %v13828_v24 }
 0xa57   : > { %8823 = vmatprep.mubr.msk.bf16.mxu0 %vm3337_vm7, %v7378_v8  ;;  %7592 = vmatpush1.bf16.msra.mxu1 %v9469_v60  ;;  %v7672_v60 = vrot.slane %v9504_v27, %v13827_v21  ;;  %v9490_v8 = vld [vmem:[%s13525_s11 + $0x38] sm:$0xff]   ;;  %v9492_v21 = vld [vmem:[%s13525_s11 + $0x28] sm:$0xff]  }
 0xa58   : > { %8851 = vmatprep.mubr.msk.bf16.mxu1 %vm3337_vm7, %v7512_v36  ;;  %7459 = vmatprep.subr.bf16.mxu0 %v13826_v61  ;;  %v13829_v36 = vld [vmem:[#allocation9_spill] sm:$0xff] }
 0xa59   : > { %7593 = vmatprep.subr.bf16.mxu1 %v13826_v61  ;;  %7677 = vrot.lane.b32.xlu0 %v7672_v60, %s9583_s0 }
 0xa5a   : > { %7460 = vmatpush1.bf16.msra.mxu0 %v9470_v40  ;;  %7679 = vrot.lane.b32.xlu1 %v7676_v20, %s9583_s0  ;;  %v7798_v40 = vrot.slane %v9504_v27, %v13829_v36 }
 0xa5b   : > { %7594 = vmatpush1.bf16.msra.mxu1 %v9471_v55  ;;  %7461 = vmatprep.subr.bf16.mxu0 %v13826_v61  ;;  %v9491_v55 = vld [vmem:[%s13525_s11 + $0x30] sm:$0xff]  }
 0xa5c   : > { %7595 = vmatprep.subr.bf16.mxu1 %v13826_v61 }
 0xa5d   : > { %7799 = vrot.lane.b32.xlu0 %v7798_v40, %s9583_s0  ;;  %s7852_s0 = scalar_lea.sflag [#allocation4], %s431_s23 }
 0xa5e   : > { %7462 = vmatpush1.bf16.msra.mxu0 %v9472_v31 }
 0xa5f   : > { %7596 = vmatpush1.bf16.msra.mxu1 %v9473_v34  ;;  %7463 = vmatprep.subr.bf16.mxu0 %v13826_v61 }
 0xa60   : > { %7597 = vmatprep.subr.bf16.mxu1 %v13826_v61 }
 0xa61   : > { %v5883_v16 = vpop.f32.mrf.mxu0  ;;  %v6017_v59 = vpop.f32.mrf.mxu1 }
 0xa62   : > { %v5889_v30 = vadd.f32 %v5883_v16, %v13285_v4  ;;  %7464 = vmatpush1.bf16.msra.mxu0 %v9474_v37  ;;  %v9493_v37 = vld [vmem:[%s13525_s11 + $0x20] sm:$0xff]  }
 0xa63   : > { %7598 = vmatpush1.bf16.msra.mxu1 %v9475_v63  ;;  %v5885_v22 = vpop.f32.mrf.mxu0  ;;  %v6019_v28 = vpop.f32.mrf.mxu1  ;;  %7465 = vmatprep.subr.bf16.mxu0 %v13826_v61 }
 0xa64   : > { %v6023_v41 = vadd.f32 %v6017_v59, %v5889_v30  ;;  %7599 = vmatprep.subr.bf16.mxu1 %v13826_v61  ;;  %v9494_v22 = vld [vmem:[%s13525_s11 + $0x18] sm:$0xff]  }
 0xa65   : > { %v5886_v10 = vpop.f32.mrf.mxu0  ;;  %v6020_v53 = vpop.f32.mrf.mxu1 }
 0xa66   : > { %7466 = vmatpush1.bf16.msra.mxu0 %v9476_v12 }
 0xa67   : > { %7600 = vmatpush1.bf16.msra.mxu1 %v9477_v56  ;;  %v5887_v43 = vpop.f32.mrf.mxu0  ;;  %v6021_v9 = vpop.f32.mrf.mxu1  ;;  %7467 = vmatprep.subr.bf16.mxu0 %v13826_v61 }
 0xa68   : > { %7601 = vmatprep.subr.bf16.mxu1 %v13826_v61 }
 0xa6a   : > { %7468 = vmatpush1.bf16.msra.mxu0 %v9478_v58 }
 0xa6b   : > { %7602 = vmatpush1.bf16.msra.mxu1 %v9479_v38  ;;  %7469 = vmatprep.subr.bf16.mxu0 %v13826_v61 }
 0xa6c   : > { %7603 = vmatprep.subr.bf16.mxu1 %v13826_v61 }
 0xa6e   : > { %7470 = vmatpush1.bf16.msra.mxu0 %v9480_v49 }
 0xa6f   : > { %7604 = vmatpush1.bf16.msra.mxu1 %v9481_v42  ;;  %7471 = vmatprep.subr.bf16.mxu0 %v13826_v61 }
 0xa70   : > { %7605 = vmatprep.subr.bf16.mxu1 %v13826_v61 }
 0xa72   : > { %7472 = vmatpush1.bf16.msra.mxu0 %v9482_v47 }
 0xa73   : > { %7606 = vmatpush1.bf16.msra.mxu1 %v9483_v19  ;;  %7487 = vmatprep.subr.bf16.mxu0 %v13826_v61 }
 0xa74   : > { %7621 = vmatprep.subr.bf16.mxu1 %v13826_v61 }
 0xa76   : > { %7488 = vmatpush2.bf16.msra.mxu0 %v7455_v33 }
 0xa77   : > { %7622 = vmatpush2.bf16.msra.mxu1 %v7589_v48  ;;  %9045 = vmatprep.subr.bf16.mxu0 %v9578_v18 }
 0xa78   : > { %9033 = vmatprep.subr.bf16.mxu1 %v9578_v18 }
 0xa79   : > { %7490 = vmatmul.mubr.bf16.vlgmr.msra.gmra.mxu0 %v7377_v62 }
 0xa7a   : > { %7624 = vmatmul.mubr.bf16.vlgmr.msra.gmra.mxu1 %v7511_v26  ;;  %9061 = vmatprep.mubr.msk.bf16.mxu0 %vm9582_vm5, %v9578_v18 }
 0xa7b   : > { %9034 = vmatpush3.bf16.msra.mxu1 %v9486_v13  ;;  %9041 = vmatprep.mubr.msk.bf16.mxu1 %vm9582_vm5, %v9578_v18 }
 0xa7c   : > { %9035 = vmatprep.subr.bf16.mxu1 %v9578_v18  ;;  %9046 = vmatpush3.bf16.msra.mxu0 %v9490_v8 }
 0xa7d   : > { %9047 = vmatprep.subr.bf16.mxu0 %v9578_v18 }
 0xa7f   : > { %9036 = vmatpush3.bf16.msra.mxu1 %v9487_v54 }
 0xa80   : > { %9037 = vmatprep.subr.bf16.mxu1 %v9578_v18  ;;  %9048 = vmatpush3.bf16.msra.mxu0 %v9491_v55 }
 0xa81   : > { %9049 = vmatprep.subr.bf16.mxu0 %v9578_v18 }
 0xa83   : > { %9038 = vmatpush3.bf16.msra.mxu1 %v9488_v52 }
 0xa84   : > { %9039 = vmatprep.subr.bf16.mxu1 %v9578_v18  ;;  %9050 = vmatpush3.bf16.msra.mxu0 %v9492_v21 }
 0xa85   : > { %v6151_v32 = vpop.f32.mrf.mxu0  ;;  %9051 = vmatprep.subr.bf16.mxu0 %v9578_v18 }
 0xa86   : > { %v6157_v4 = vadd.f32 %v6151_v32, %v6023_v41  ;;  %v6285_v1 = vpop.f32.mrf.mxu1  ;;  %v9495_v41 = vld [vmem:[%s13525_s11 + $0x10] sm:$0xff]  }
 0xa87   : > { %v6153_v45 = vpop.f32.mrf.mxu0  ;;  %9040 = vmatpush3.bf16.msra.mxu1 %v9489_v2 }
 0xa88   : > { %v6291_v23 = vadd.f32 %v6285_v1, %v6157_v4  ;;  %v6287_v51 = vpop.f32.mrf.mxu1  ;;  %9052 = vmatpush3.bf16.msra.mxu0 %v9493_v37 }
 0xa89   : > { %v6154_v6 = vpop.f32.mrf.mxu0  ;;  %9053 = vmatprep.subr.bf16.mxu0 %v9578_v18 }
 0xa8a   : > { %v6288_v61 = vpop.f32.mrf.mxu1 }
 0xa8b   : > { %v6155_v39 = vpop.f32.mrf.mxu0 }
 0xa8c   : > { %v6289_v0 = vpop.f32.mrf.mxu1  ;;  %9054 = vmatpush3.bf16.msra.mxu0 %v9494_v22 }
 0xa8d   : > { %9055 = vmatprep.subr.bf16.mxu0 %v9578_v18 }
 0xa90   : > { %9056 = vmatpush3.bf16.msra.mxu0 %v9495_v41 }
 0xa91   : > { %9057 = vmatprep.subr.bf16.mxu0 %v9578_v18 }
 0xaa9   : > { %v6419_v57 = vpop.f32.mrf.mxu0 }
 0xaaa   : > { %v6425_v17 = vadd.f32 %v6419_v57, %v6291_v23  ;;  %v6553_v44 = vpop.f32.mrf.mxu1 }
 0xaab   : > { %v6421_v35 = vpop.f32.mrf.mxu0 }
 0xaac   : > { %v6559_v3 = vadd.f32 %v6553_v44, %v6425_v17  ;;  %v6555_v25 = vpop.f32.mrf.mxu1  ;;  %v9496_v35 = vld [vmem:[%s13525_s11 + $0x8] sm:$0xff]  }
 0xaad   : > { %v6422_v50 = vpop.f32.mrf.mxu0  ;;  %9058 = vmatpush3.bf16.msra.mxu0 %v9496_v35 }
 0xaae   : > { %v6556_v29 = vpop.f32.mrf.mxu1  ;;  %9059 = vmatprep.subr.bf16.mxu0 %v9578_v18 }
 0xaaf   : > { %v6423_v7 = vpop.f32.mrf.mxu0 }
 0xab0   : > { %v6557_v46 = vpop.f32.mrf.mxu1 }
 0xacb   : > { %v7678_v50 = vpop.permute.xlu0 %7677 }
 0xacc   : > { %v7680_v25 = vpop.permute.xlu1 %7679 }
 0xacd   : > { %v6687_v24 = vpop.f32.mrf.mxu0  ;;  %v7682_v29 = vsel %vm7681_vm9, %v7678_v50, %v7680_v25 }
 0xace   : > { %v6693_v31 = vadd.f32 %v6687_v24, %v6559_v3  ;;  %v6821_v34 = vpop.f32.mrf.mxu1  ;;  %v9497_v3 = vld [vmem:[%s13525_s11] sm:$0xff]  }
 0xacf   : > { %v6689_v63 = vpop.f32.mrf.mxu0  ;;  %9060 = vmatpush3.bf16.msra.mxu0 %v9497_v3  ;;  %v7800_v36 = vpop.permute.xlu0 %7799 }
 0xad0   : > { %v6827_v16 = vadd.f32 %v6821_v34, %v6693_v31  ;;  %v6823_v59 = vpop.f32.mrf.mxu1  ;;  %v7801_v18 = vsel %vm7681_vm9, %v7680_v25, %v7800_v36 }
 0xad1   : > { %v6690_v30 = vpop.f32.mrf.mxu0 }
 0xad2   : > { %v6824_v12 = vpop.f32.mrf.mxu1 }
 0xad3   : > { %v6691_v28 = vpop.f32.mrf.mxu0 }
 0xad4   : > { %v6825_v56 = vpop.f32.mrf.mxu1 }
 0xaf1   : > { %v6955_v10 = vpop.f32.mrf.mxu0 }
 0xaf2   : > { %v6961_v53 = vadd.f32 %v6955_v10, %v6827_v16  ;;  %v7089_v58 = vpop.f32.mrf.mxu1 }
 0xaf3   : > { %v6957_v43 = vpop.f32.mrf.mxu0 }
 0xaf4   : > { %v7095_v9 = vadd.f32 %v7089_v58, %v6961_v53  ;;  %v7091_v38 = vpop.f32.mrf.mxu1 }
 0xaf5   : > { %v6958_v49 = vpop.f32.mrf.mxu0 }
 0xaf6   : > { %v7092_v42 = vpop.f32.mrf.mxu1 }
 0xaf7   : > { %v6959_v47 = vpop.f32.mrf.mxu0 }
 0xaf8   : > { %v7093_v19 = vpop.f32.mrf.mxu1 }
 0xb15   : > { %v7223_v11 = vpop.f32.mrf.mxu0 }
 0xb16   : > { %v7357_v14 = vpop.f32.mrf.mxu1  ;;  %v7229_v32 = vadd.f32 %v7223_v11, %v7095_v9 }
 0xb17   : > { %v7225_v33 = vpop.f32.mrf.mxu0 }
 0xb18   : > { %v7359_v15 = vpop.f32.mrf.mxu1  ;;  %v7363_v4 = vadd.f32 %v7357_v14, %v7229_v32 }
 0xb19   : > { %v7226_v5 = vpop.f32.mrf.mxu0 }
 0xb1a   : > { %v7360_v48 = vpop.f32.mrf.mxu1 }
 0xb1b   : > { %v7227_v62 = vpop.f32.mrf.mxu0 }
 0xb1c   : > { %v7361_v26 = vpop.f32.mrf.mxu1 }
 0xb39   : > { %v7491_v1 = vpop.f32.mrf.mxu0 }
 0xb3a   : > { %v7497_v45 = vadd.f32 %v7491_v1, %v7363_v4  ;;  %v7625_v23 = vpop.f32.mrf.mxu1 }
 0xb3b   : > { %v7493_v51 = vpop.f32.mrf.mxu0 }
 0xb3c   : > { %v7631_v6 = vadd.f32 %v7625_v23, %v7497_v45  ;;  %v7627_v61 = vpop.f32.mrf.mxu1 }
 0xb3d   : > { %v7494_v39 = vpop.f32.mrf.mxu0 }
 0xb3e   : > { %vm7632_vm8 = vcmp.gt.f32.partialorder %v7631_v6, 0.0  ;;  %v7633_v0 = vmul.f32 0.01, %v7631_v6  ;;  %v7628_v13 = vpop.f32.mrf.mxu1 }
 0xb3f   : > { %v7495_v54 = vpop.f32.mrf.mxu0 }
 0xb40   : > { %v7634_v57 = vsel %vm7632_vm8, %v7631_v6, %v7633_v0  ;;  %v7629_v17 = vpop.f32.mrf.mxu1 }
 0xb41   : > { %v7635_v44 = vpack.c.bf16 %v7634_v57, %v7634_v57 }
 0xb43   : > { %9042 = vmatmul.mubr.msk.bf16.vlgmr.msra.gmra.mxu1 %vm7681_vm9, %v7635_v44 }
 0xc03   : > { %v7721_v7 = vpop.f32.mrf.mxu1 }
 0xc04   : > { %v7722_v46 = vadd.f32 %v7721_v7, %v7682_v29 }
 0xc05   : > { %v9043_v52 = vpop.f32.mrf.mxu1 }
 0xc06   : > { %vm7727_vm10 = vcmp.gt.f32.partialorder %v7722_v46, 0.0  ;;  %v7728_v2 = vmul.f32 0.01, %v7722_v46 }
 0xc07   : > { %v7724_v27 = vpop.f32.mrf.mxu1 }
 0xc08   : > { %v7729_v60 = vsel %vm7727_vm10, %v7722_v46, %v7728_v2 }
 0xc09   : > { %v7730_v20 = vpack.c.bf16 %v7729_v60, %v7729_v60  ;;  %v9044_v8 = vpop.f32.mrf.mxu1 }
 0xc0b   : > { %9062 = vmatmul.mubr.bf16.vlgmr.msra.gmra.mxu0 %v7730_v20 }
 0xccb   : > { %v7837_v40 = vpop.f32.mrf.mxu0 }
 0xccc   : > { %v7838_v55 = vadd.f32 %v7837_v40, %v7801_v18 }
 0xccd   : > { %v9063_v21 = vpop.f32.mrf.mxu0 }
 0xcce   : > { %v8865_v24 = vmul.f32 -1.442695, %v7838_v55 }
 0xccf   : > { %v7840_v31 = vpop.f32.mrf.mxu0 }
 0xcd0   : > { %9498 = vpow2.f32 %v8865_v24 }
 0xcd1   : > { %v9064_v34 = vpop.f32.mrf.mxu0 }
 0xcdd   : > { %v9499_v37 = vpop.eup %9498 }
 0xcde   : > { %v7846_v63 = vadd.f32 1.0, %v9499_v37 }
 0xce0   : > { %9500 = vrcp.f32 %v7846_v63 }
 0xced   : > { %v9501_v16 = vpop.eup %9500 }
 0xcee   : > { %7850 = vst.msk [vmem:[%s432_s17] sm:$0x1] %vm7849_vm11, %v9501_v16 }
 0xcef   : > { %9518 = shalt.err (!%p9515_p3)
}
 0xcf0   : > { %s9519_s24 = scalar_lea.hbm %s13479_s1, 16  ;;  %s9523_s15 = scalar_lea.hbm %s13527_s13, 32 }
 0xcf1   : > { %p9520_p4 = scmp.ne.s32.totalorder %s13479_s1, %s9519_s24  ;;  %p9524_p9 = scmp.lt.s32.totalorder %s13479_s1, %s13527_s13 }
 0xcf2   : > { %p9525_p10 = scmp.lt.s32.totalorder %s9523_s15, %s9519_s24 }
 0xcf3   : > { %p9521_p7 = pnand %p9520_p4, %p9693_p5 }
 0xcf4   : > { %p9526_p11 = por %p9525_p10, %p9524_p9 }
 0xcf5   : > { %p9522_p8 = pneg %p9521_p7 }
 0xcf7   : > { %p9527_p12 = pnand %p9526_p11, %p9522_p8 }
 0xcf9   : > { %9530 = shalt.err (!%p9527_p12)
}
 0xcfa   : > { %9066 = dma.vmem_to_hbm [thread:$0]  (%p9693_p5), %s7865_s30, 16, %s13479_s1, %s7852_s0  }
 0xcfb PF: > { %p9072_p13 = scmp.ge.s32.totalorder %s9565_s28, 2  ;;  %s7876_s16 = sand.u32 1, %s9553_s25  }
 0xcfc   : > { %s7877_s21 = scalar_lea.sflag [#allocation4], %s7876_s16 }
 0xcfd   : > { %p9069_p0 = pnand %p9072_p13, %p9697_p6 }
 0xcff   : > { %p9070_p1 = pneg %p9069_p0 }
 0xd01   : > { %9548 = dma.done.wait (%p9070_p1), %s7877_s21, 16  }
 0xd02   : > { %9550 = vsyncadd (%p9070_p1), %s7877_s21, 4294967280  ;;  %s13830_s29 = sld [smem:[#allocation6_spill]]  ;;  %p23_p2 = scmp.ge.s32.totalorder %s9680_s14, 4  }
 0xd03   : > { %s13831_s25 = smov %s9557_s26  ;;  %s13832_s26 = smov %s9561_s27 }
 0xd04   : > { %s13834_s28 = smov %s9680_s14  ;;  %25 = sbr.rel (!%p23_p2) target bundleno = 6 (0x6), region = 169 }
 0xd08   : > { %s13833_s27 = smov %s13830_s29 }
 0xd09   :  { %7881 = vsyncpa [#allocation4], 1 }
 0xd0a   :  { %7883 = vsyncpa [#allocation4 + $0x1], 1 }

</bundles_post_ra>
